<compile_context>
chip_gen: v5e
topology: v5e:2x2
jax: 0.10.0
libtpu: 0.0.40
codegen_flags: <defaults>
</compile_context>

<pallas_src>
import functools

import numpy as np
import jax
import jax.numpy as jnp
from jax import lax
from jax.experimental import pallas as pl
from jax.experimental.pallas import tpu as pltpu

# --- scaled-down module constants (original: 512/256 channels, priors=128,
#     seq=2048, num_classes from config).  Structure (4 skip + 4 pyramid levels)
#     matches the PyTorch module.
LAYER_NUM = 4
SKIP_DS_LAYER = 4
PRIORS = 32                      # original 128
NUM_CLASSES = 8                  # original config['dataset']['num_classes']
IN_CH = 128                      # original 512
HALF_CH = 64                     # original 256
SEQ_LEN = PRIORS * (2 ** SKIP_DS_LAYER)   # 512 (original 2048)

L_TILE = 128                     # L tile for the big skip convs (16 vregs of f32 acc)
HEAD_W = 128                     # lane-dense head output width (loc=2 + conf=NC, zero-padded)


def _vmem_limit_bytes():
    # Derive the scoped VMEM limit from the actual chip (64 MiB phys on v7x,
    # 128 MiB on v5e/v6e) instead of a hard-coded constant.
    try:
        cap = int(pltpu.get_tpu_info().vmem_capacity_bytes)
        return max(16 << 20, min(cap // 2, 64 << 20))
    except Exception:
        return 32 << 20


_VMEM_LIMIT = _vmem_limit_bytes()


# ---------------------------------------------------------------------------
# Kernel 1: generic multi-branch (pre-sliced taps) conv + bias + ReLU.
#   refs = (x_0 .. x_{nb-1}, w_0 .. w_{nb-1}, bias, out)
#   x_i block (1, T, C_i) bf16, w_i block (C_i, Cout) bf16, bias (1, Cout) f32.
# ---------------------------------------------------------------------------
def _fused_conv_kernel(*refs, nb, activation):
    x_refs = refs[:nb]
    w_refs = refs[nb:2 * nb]
    b_ref = refs[2 * nb]
    o_ref = refs[2 * nb + 1]

    acc = jnp.dot(x_refs[0][0], w_refs[0][...], preferred_element_type=jnp.float32)
    for i in range(1, nb):
        acc = acc + jnp.dot(x_refs[i][0], w_refs[i][...],
                            preferred_element_type=jnp.float32)
    y = acc + b_ref[...]                                   # f32 epilogue
    if activation == "relu":
        y = jnp.maximum(y, 0.0)
    o_ref[0] = y.astype(o_ref.dtype)


def fused_conv(branches, bias, *, activation="relu", out_dtype=jnp.bfloat16):
    """branches: list of (x (B, L, C_i) bf16, w (C_i, Cout) bf16); L-tiled grid."""
    B, L, _ = branches[0][0].shape
    Cout = branches[0][1].shape[1]
    nb = len(branches)

    if L > L_TILE:
        assert L % L_TILE == 0, (L, L_TILE)
        T = L_TILE
    else:
        T = L
    nl = L // T

    in_specs = []
    args = []
    flops = 0
    bytes_acc = B * L * Cout * jnp.dtype(out_dtype).itemsize + Cout * 4
    for x, _ in branches:
        Ci = x.shape[2]
        in_specs.append(pl.BlockSpec((1, T, Ci), lambda b, l: (b, l, 0)))
        args.append(x)
        bytes_acc += B * L * Ci * x.dtype.itemsize
    for _, w in branches:
        Ci = w.shape[0]
        in_specs.append(pl.BlockSpec((Ci, Cout), lambda b, l: (0, 0)))
        args.append(w)
        flops += 2 * B * L * Ci * Cout
        bytes_acc += Ci * Cout * w.dtype.itemsize
    in_specs.append(pl.BlockSpec((1, Cout), lambda b, l: (0, 0)))
    args.append(bias)

    kernel = functools.partial(_fused_conv_kernel, nb=nb, activation=activation)
    return pl.pallas_call(
        kernel,
        out_shape=jax.ShapeDtypeStruct((B, L, Cout), out_dtype),
        grid_spec=pltpu.PrefetchScalarGridSpec(
            num_scalar_prefetch=0,
            grid=(B, nl),
            in_specs=in_specs,
            out_specs=pl.BlockSpec((1, T, Cout), lambda b, l: (b, l, 0)),
        ),
        compiler_params=pltpu.CompilerParams(
            dimension_semantics=("parallel", "parallel"),
            vmem_limit_bytes=_VMEM_LIMIT),
        cost_estimate=pl.CostEstimate(flops=int(flops), transcendentals=0,
                                      bytes_accessed=int(bytes_acc)),
    )(*args)


# ---------------------------------------------------------------------------
# TSSE (reconstructed).  TODO(synk): TSSE body not given in the prompt;
# reconstructed as [k=3 conv branch | pointwise-on-pooled branch] -> ReLU, with
# the pooled branch folded into the tap weights (pooled == x for stride 1,
# pooled == 0.5*(even+odd) for stride 2).
# ---------------------------------------------------------------------------
def _stride2_taps(x):
    """Pre-sliced taps for a stride-2, k=3 conv:  y[j] = W0 x[2j-1] + W1 x[2j] + W2 x[2j+1]."""
    B, L, C = x.shape
    x_even = x[:, 0::2]                                              # x[2j]
    x_odd = x[:, 1::2]                                               # x[2j+1]
    x_m1 = jnp.pad(x, ((0, 0), (1, 0), (0, 0)))[:, 0:L:2]            # x[2j-1] (zero at j=0)
    return x_m1, x_even, x_odd


def tsse_stride1(x, p):
    B, L, C = x.shape
    xp = jnp.pad(x, ((0, 0), (1, 1), (0, 0)))
    branches = [(xp[:, 0:L], p["ws"][0]),
                (xp[:, 1:L + 1], p["ws"][1]),
                (xp[:, 2:L + 2], p["ws"][2])]
    return fused_conv(branches, p["b"], activation="relu")


def tsse_stride2(x, p):
    x_m1, x_even, x_odd = _stride2_taps(x)
    branches = [(x_m1, p["ws"][0]), (x_even, p["ws"][1]), (x_odd, p["ws"][2])]
    return fused_conv(branches, p["b"], activation="relu")


# ---------------------------------------------------------------------------
# Kernel 2: fused pyramid level = TSSE (stride-2) + LSREF in one pallas_call.
# TODO(synk): LSREF body not given; reconstructed as pointwise fusion of the
# pyramid feature with a chunk-pooled global context + ReLU.
# ---------------------------------------------------------------------------
def _pyramid_level_kernel(dm_ref, de_ref, do_ref, g_ref,
                          wm_ref, we_ref, wo_ref, b1_ref,
                          wd_ref, wg_ref, b2_ref,
                          t_ref, o_ref):
    acc1 = (jnp.dot(dm_ref[0], wm_ref[...], preferred_element_type=jnp.float32)
            + jnp.dot(de_ref[0], we_ref[...], preferred_element_type=jnp.float32)
            + jnp.dot(do_ref[0], wo_ref[...], preferred_element_type=jnp.float32))
    t = jnp.maximum(acc1 + b1_ref[...], 0.0)               # TSSE output (f32)
    t_ref[0] = t.astype(t_ref.dtype)

    acc2 = (jnp.dot(t.astype(jnp.bfloat16), wd_ref[...],
                    preferred_element_type=jnp.float32)
            + jnp.dot(g_ref[0], wg_ref[...], preferred_element_type=jnp.float32))
    o = jnp.maximum(acc2 + b2_ref[...], 0.0)                # LSREF output
    o_ref[0] = o.astype(o_ref.dtype)


def pyramid_level(deep, g_pool, p):
    B, L, C = deep.shape
    Lo = L // 2
    Cout = IN_CH
    x_m1, x_even, x_odd = _stride2_taps(deep)

    flops = int(2 * B * Lo * Cout * (3 * C + C + Cout))
    bytes_acc = int(B * Lo * 4 * C * 2 + (3 * C + C + Cout) * Cout * 2
                    + 2 * Cout * 4 + 2 * B * Lo * Cout * 2)

    t, o = pl.pallas_call(
        _pyramid_level_kernel,
        out_shape=(jax.ShapeDtypeStruct((B, Lo, Cout), jnp.bfloat16),
                   jax.ShapeDtypeStruct((B, Lo, Cout), jnp.bfloat16)),
        grid_spec=pltpu.PrefetchScalarGridSpec(
            num_scalar_prefetch=0,
            grid=(B,),
            in_specs=[
                pl.BlockSpec((1, Lo, C), lambda b: (b, 0, 0)),     # x_m1
                pl.BlockSpec((1, Lo, C), lambda b: (b, 0, 0)),     # x_even
                pl.BlockSpec((1, Lo, C), lambda b: (b, 0, 0)),     # x_odd
                pl.BlockSpec((1, Lo, C), lambda b: (b, 0, 0)),     # pooled global
                pl.BlockSpec((C, Cout), lambda b: (0, 0)),         # w_m1
                pl.BlockSpec((C, Cout), lambda b: (0, 0)),         # w_even
                pl.BlockSpec((C, Cout), lambda b: (0, 0)),         # w_odd
                pl.BlockSpec((1, Cout), lambda b: (0, 0)),         # b1
                pl.BlockSpec((Cout, Cout), lambda b: (0, 0)),      # w_deep
                pl.BlockSpec((C, Cout), lambda b: (0, 0)),         # w_glob
                pl.BlockSpec((1, Cout), lambda b: (0, 0)),         # b2
            ],
            out_specs=(pl.BlockSpec((1, Lo, Cout), lambda b: (b, 0, 0)),
                       pl.BlockSpec((1, Lo, Cout), lambda b: (b, 0, 0))),
        ),
        compiler_params=pltpu.CompilerParams(
            dimension_semantics=("parallel",),
            vmem_limit_bytes=_VMEM_LIMIT),
        cost_estimate=pl.CostEstimate(flops=flops, transcendentals=0,
                                      bytes_accessed=bytes_acc),
    )(x_m1, x_even, x_odd, g_pool,
      p["w_m1"], p["w_even"], p["w_odd"], p["b1"],
      p["w_deep"], p["w_glob"], p["b2"])
    return t, o


# ---------------------------------------------------------------------------
# Kernel 3: whole PredictionHead in one pallas_call.
# TODO(synk): PredictionHead body not given; reconstructed as two 2-layer conv
# towers (loc / conf, fused along Cout) + fused loc/conf k=3 heads (AFSD-style).
# All 4 pyramid levels are processed together in a padded layout with one shared
# zero row between adjacent levels; the zero rows are re-zeroed in-kernel.
# ---------------------------------------------------------------------------
def _head_kernel(lay_ref, wt1_ref, bt1_ref, wt2_ref, bt2_ref, wh_ref, bh_ref,
                 o_ref, *, zero_rows, zero_from):
    LP = lay_ref.shape[1]
    row = lax.broadcasted_iota(jnp.int32, (LP, 1), 0)
    bad = row >= zero_from
    for zr in zero_rows:
        bad = bad | (row == zr)
    keep = jnp.where(bad, 0.0, 1.0)                        # (LP, 1) f32

    def conv3(x, w_ref, b_ref, relu):
        # out[j] = x[j-1] @ w[0] + x[j] @ w[1] + x[j+1] @ w[2]
        # rows 0 and LP-1 of x are guaranteed zero, so the roll wrap-around
        # reproduces zero padding exactly.
        xl = pltpu.roll(x, shift=1, axis=0)                # x[j-1]
        xr = pltpu.roll(x, shift=LP - 1, axis=0)           # x[j+1]
        acc = (jnp.dot(xl, w_ref[0], preferred_element_type=jnp.float32)
               + jnp.dot(x, w_ref[1], preferred_element_type=jnp.float32)
               + jnp.dot(xr, w_ref[2], preferred_element_type=jnp.float32))
        y = acc + b_ref[...]
        if relu:
            y = jnp.maximum(y, 0.0)
        return y * keep                                    # re-zero inter-level pads

    x0 = lay_ref[0].astype(jnp.float32)
    h1 = conv3(x0, wt1_ref, bt1_ref, True)                 # fused loc|conf tower L1
    h2 = conv3(h1, wt2_ref, bt2_ref, True)                 # fused (block-diag) L2
    o_ref[0] = conv3(h2, wh_ref, bh_ref, False)            # fused loc+conf head (f32)


def prediction_head(outs, hp, loc_scales):
    B, _, C = outs[0].shape
    lens = [int(o.shape[1]) for o in outs]

    # Padded layout: [Z, lvl0, Z, lvl1, Z, lvl2, Z, lvl3, Z, tail-zeros]
    parts = [jnp.zeros((B, 1, C), jnp.bfloat16)]
    zero_rows = []
    real_idx = []
    pos = 1
    for o in outs:
        ln = o.shape[1]
        parts.append(o)
        real_idx.append(np.arange(pos, pos + ln))
        pos += ln
        parts.append(jnp.zeros((B, 1, C), jnp.bfloat16))
        zero_rows.append(pos)
        pos += 1
    zero_from = int(zero_rows.pop())                       # trailing Z and beyond
    LP = ((pos + 7) // 8) * 8
    if LP > pos:
        parts.append(jnp.zeros((B, LP - pos, C), jnp.bfloat16))
    lay = jnp.concatenate(parts, axis=1)                   # (B, LP, C) bf16
    real_idx = np.concatenate(real_idx).astype(np.int32)

    kernel = functools.partial(_head_kernel,
                               zero_rows=(0,) + tuple(int(z) for z in zero_rows),
                               zero_from=zero_from)
    flops = int(2 * B * LP * 3 * (C * 2 * C + 2 * C * 2 * C + 2 * C * HEAD_W))
    bytes_acc = int(B * LP * C * 2 + B * LP * HEAD_W * 4
                    + 3 * (C * 2 * C + 2 * C * 2 * C + 2 * C * HEAD_W) * 4)

    head_out = pl.pallas_call(
        kernel,
        out_shape=jax.ShapeDtypeStruct((B, LP, HEAD_W), jnp.float32),
        grid_spec=pltpu.PrefetchScalarGridSpec(
            num_scalar_prefetch=0,
            grid=(B,),
            in_specs=[
                pl.BlockSpec((1, LP, C), lambda b: (b, 0, 0)),
                pl.BlockSpec(hp["wt1"].shape, lambda b: (0, 0, 0)),
                pl.BlockSpec(hp["bt1"].shape, lambda b: (0, 0)),
                pl.BlockSpec(hp["wt2"].shape, lambda b: (0, 0, 0)),
                pl.BlockSpec(hp["bt2"].shape, lambda b: (0, 0)),
                pl.BlockSpec(hp["wh"].shape, lambda b: (0, 0, 0)),
                pl.BlockSpec(hp["bh"].shape, lambda b: (0, 0)),
            ],
            out_specs=pl.BlockSpec((1, LP, HEAD_W), lambda b: (b, 0, 0)),
        ),
        compiler_params=pltpu.CompilerParams(
            dimension_semantics=("parallel",),
            vmem_limit_bytes=_VMEM_LIMIT),
        cost_estimate=pl.CostEstimate(flops=flops, transcendentals=0,
                                      bytes_accessed=bytes_acc),
    )(lay, hp["wt1"], hp["bt1"], hp["wt2"], hp["bt2"], hp["wh"], hp["bh"])

    head = jnp.take(head_out, jnp.asarray(real_idx), axis=1)   # (B, sum(len_i), 128)
    loc_logits = head[..., :2]
    conf = head[..., 2:2 + NUM_CLASSES]

    # Per-level ScaleExp (exp(scale_i * x)) outside the kernel so learned / traced
    # scales never force a Mosaic recompile.
    scale_vec = jnp.concatenate(
        [jnp.full((ln,), 1.0, jnp.float32) * loc_scales[i]
         for i, ln in enumerate(lens)])
    loc = jnp.exp(loc_logits * scale_vec[None, :, None])
    return loc, conf


# ---------------------------------------------------------------------------
# Parameters (deterministic synthetic init; weights packed / pre-cast ONCE here)
# ---------------------------------------------------------------------------
def _conv_w(key, k, cin, cout, std=0.05):
    return jax.random.normal(key, (k, cin, cout), jnp.float32) * std


def _make_tsse_params(key, stride):
    k1, k2 = jax.random.split(key)
    w_conv = _conv_w(k1, 3, IN_CH, HALF_CH)                 # (3, C, H)
    b_conv = jnp.zeros((HALF_CH,), jnp.float32)
    w_pw = _conv_w(k2, 1, IN_CH, HALF_CH)[0]                # (C, H) pointwise branch
    b_pw = jnp.zeros((HALF_CH,), jnp.float32)
    zeros = jnp.zeros((IN_CH, HALF_CH), jnp.float32)
    if stride == 1:
        # taps act on x[j-1], x[j], x[j+1]; pooled branch == x -> fold into center tap.
        ws = (jnp.concatenate([w_conv[0], zeros], axis=1),
              jnp.concatenate([w_conv[1], w_pw], axis=1),
              jnp.concatenate([w_conv[2], zeros], axis=1))
    else:
        # taps act on x[2j-1], x[2j], x[2j+1]; pooled = 0.5*(x[2j]+x[2j+1]).
        ws = (jnp.concatenate([w_conv[0], zeros], axis=1),
              jnp.concatenate([w_conv[1], 0.5 * w_pw], axis=1),
              jnp.concatenate([w_conv[2], 0.5 * w_pw], axis=1))
    b = jnp.concatenate([b_conv, b_pw]).reshape(1, IN_CH)
    return {"ws": tuple(w.astype(jnp.bfloat16) for w in ws), "b": b}


def _make_pyramid_params(key):
    k1, k2 = jax.random.split(key)
    tp = _make_tsse_params(k1, stride=2)
    w = _conv_w(k2, 1, 2 * IN_CH, IN_CH)[0]                 # (2C, C) LSREF pointwise
    return {"w_m1": tp["ws"][0], "w_even": tp["ws"][1], "w_odd": tp["ws"][2],
            "b1": tp["b"],
            "w_deep": w[:IN_CH].astype(jnp.bfloat16),
            "w_glob": w[IN_CH:].astype(jnp.bfloat16),
            "b2": jnp.zeros((1, IN_CH), jnp.float32)}


def _make_head_params(key):
    ks = jax.random.split(key, 6)
    C = IN_CH
    loc1, loc2 = _conv_w(ks[0], 3, C, C), _conv_w(ks[1], 3, C, C)
    conf1, conf2 = _conv_w(ks[2], 3, C, C), _conv_w(ks[3], 3, C, C)
    loc_head = _conv_w(ks[4], 3, C, 2)
    conf_head = _conv_w(ks[5], 3, C, NUM_CLASSES)

    # Tower layer 1: loc -> cols [0:C], conf -> cols [C:2C]  (fills the 256-wide MXU)
    wt1 = jnp.concatenate([loc1, conf1], axis=2)            # (3, C, 2C)
    # Tower layer 2: block diagonal so the two towers never mix.
    z = jnp.zeros((3, C, C), jnp.float32)
    wt2 = jnp.concatenate([jnp.concatenate([loc2, z], axis=2),
                           jnp.concatenate([z, conf2], axis=2)], axis=1)  # (3, 2C, 2C)
    # Fused heads, lane-dense: loc rows -> cols [0:2], conf rows -> cols [2:2+NC].
    wh = jnp.zeros((3, 2 * C, HEAD_W), jnp.float32)
    wh = wh.at[:, :C, 0:2].set(loc_head)
    wh = wh.at[:, C:, 2:2 + NUM_CLASSES].set(conf_head)
    return {"wt1": wt1, "bt1": jnp.zeros((1, 2 * C), jnp.float32),
            "wt2": wt2, "bt2": jnp.zeros((1, 2 * C), jnp.float32),
            "wh": wh, "bh": jnp.zeros((1, HEAD_W), jnp.float32)}


def init_params(key):
    keys = jax.random.split(key, SKIP_DS_LAYER + LAYER_NUM + 1)
    p = {}
    p["skip_tsse"] = [_make_tsse_params(keys[i], stride=(1 if i == 0 else 2))
                      for i in range(SKIP_DS_LAYER)]
    p["pyramid"] = [_make_pyramid_params(keys[SKIP_DS_LAYER + i])
                    for i in range(LAYER_NUM)]
    p["head"] = _make_head_params(keys[-1])
    p["loc_scales"] = jnp.ones((LAYER_NUM,), jnp.float32)   # ScaleExp init_value = 1.0
    return p


# ---------------------------------------------------------------------------
# Pyramid_Detection.forward
# ---------------------------------------------------------------------------
def pyramid_detection_forward(params, embedd):
    # embedd: (B, SEQ_LEN, IN_CH) channels-last  (PyTorch: (B, IN_CH, SEQ_LEN))
    B = embedd.shape[0]
    global_feat = jax.lax.stop_gradient(embedd)              # embedd.detach()

    deep = embedd.astype(jnp.bfloat16)
    for i in range(SKIP_DS_LAYER):
        p = params["skip_tsse"][i]
        deep = tsse_stride1(deep, p) if i == 0 else tsse_stride2(deep, p)

    # Hierarchical LSREF global pooling: one read of global_feat + pair-averages.
    r0 = SEQ_LEN // PRIORS
    gp = global_feat.reshape(B, PRIORS, r0, IN_CH).mean(axis=2)
    g_pools = [gp]
    for _ in range(1, LAYER_NUM):
        gp = 0.5 * (gp[:, 0::2] + gp[:, 1::2])
        g_pools.append(gp)
    g_pools = [g.astype(jnp.bfloat16) for g in g_pools]

    outs = []
    for i in range(LAYER_NUM):
        deep, o = pyramid_level(deep, g_pools[i], params["pyramid"][i])
        outs.append(o)

    loc, conf = prediction_head(outs, params["head"], params["loc_scales"])

    pri = []
    t = PRIORS
    for _ in range(LAYER_NUM):
        pri.append(((jnp.arange(t, dtype=jnp.float32) + 0.5) / t)[:, None])
        t = t // 2
    priors = jnp.concatenate(pri, axis=0)[None]               # (1, total, 1)
    return loc, conf, priors


if __name__ == "__main__":
    key = jax.random.PRNGKey(0)
    k_param, k_x = jax.random.split(key)
    params = init_params(k_param)

    B = 2
    embedd = jax.random.normal(k_x, (B, SEQ_LEN, IN_CH), jnp.float32)

    fwd = jax.jit(pyramid_detection_forward)
    loc, conf, priors = fwd(params, embedd)
    jax.block_until_ready((loc, conf, priors))

    total = sum(PRIORS // 2 ** i for i in range(LAYER_NUM))   # 32+16+8+4 = 60
    assert loc.shape == (B, total, 2), loc.shape
    assert conf.shape == (B, total, NUM_CLASSES), conf.shape
    assert priors.shape == (1, total, 1), priors.shape
    assert bool(jnp.all(jnp.isfinite(loc))) and bool(jnp.all(loc >= 0.0))
    assert bool(jnp.all(jnp.isfinite(conf)))
    print("KERNEL_OK")
</pallas_src>

<mosaic_0001>
module attributes {stable_mosaic.version = 11 : i64} {
  func.func @_fused_conv_kernel(%arg0: i32, %arg1: i32, %arg2: memref<1x128x128xbf16, #tpu.memory_space<vmem>>, %arg3: memref<1x128x128xbf16, #tpu.memory_space<vmem>>, %arg4: memref<1x128x128xbf16, #tpu.memory_space<vmem>>, %arg5: memref<128x128xbf16, #tpu.memory_space<vmem>>, %arg6: memref<128x128xbf16, #tpu.memory_space<vmem>>, %arg7: memref<128x128xbf16, #tpu.memory_space<vmem>>, %arg8: memref<1x128xf32, #tpu.memory_space<vmem>>, %arg9: memref<1x128x128xbf16, #tpu.memory_space<vmem>>) attributes {dimension_semantics = [#tpu.dimension_semantics<parallel>, #tpu.dimension_semantics<parallel>], iteration_bounds = array<i64: 2, 4>, scalar_prefetch = 0 : i64, scratch_operands = 0 : i64, tpu.core_type = #tpu.core_type<tc>, window_params = [{transform_indices = @transform_0, window_bounds = array<i64: 1, 128, 128>}, {transform_indices = @transform_1, window_bounds = array<i64: 1, 128, 128>}, {transform_indices = @transform_2, window_bounds = array<i64: 1, 128, 128>}, {pipeline_mode = #tpu.pipeline_mode<synchronous>, transform_indices = @transform_3, window_bounds = array<i64: 128, 128>}, {pipeline_mode = #tpu.pipeline_mode<synchronous>, transform_indices = @transform_4, window_bounds = array<i64: 128, 128>}, {pipeline_mode = #tpu.pipeline_mode<synchronous>, transform_indices = @transform_5, window_bounds = array<i64: 128, 128>}, {pipeline_mode = #tpu.pipeline_mode<synchronous>, transform_indices = @transform_6, window_bounds = array<i64: 1, 128>}, {transform_indices = @transform_7, window_bounds = array<i64: 1, 128, 128>}]} {
    %c0 = arith.constant 0 : index
    %c0_0 = arith.constant 0 : index
    %c0_1 = arith.constant 0 : index
    %0 = vector.load %arg2[%c0, %c0_0, %c0_1] : memref<1x128x128xbf16, #tpu.memory_space<vmem>>, vector<1x128x128xbf16>
    %1 = vector.shape_cast %0 : vector<1x128x128xbf16> to vector<128x128xbf16>
    %c0_2 = arith.constant 0 : index
    %c0_3 = arith.constant 0 : index
    %2 = vector.load %arg5[%c0_2, %c0_3] : memref<128x128xbf16, #tpu.memory_space<vmem>>, vector<128x128xbf16>
    %cst = arith.constant dense<0.000000e+00> : vector<128x128xf32>
    %3 = tpu.matmul %1, %2, %cst {dimension_numbers = #tpu.dot_dimension_numbers<[1], [0], [0], [1], [0, 0, 1, 1], [], []>} : vector<128x128xbf16>, vector<128x128xbf16>, vector<128x128xf32> -> vector<128x128xf32>
    %c0_4 = arith.constant 0 : index
    %c0_5 = arith.constant 0 : index
    %c0_6 = arith.constant 0 : index
    %4 = vector.load %arg3[%c0_4, %c0_5, %c0_6] : memref<1x128x128xbf16, #tpu.memory_space<vmem>>, vector<1x128x128xbf16>
    %5 = vector.shape_cast %4 : vector<1x128x128xbf16> to vector<128x128xbf16>
    %c0_7 = arith.constant 0 : index
    %c0_8 = arith.constant 0 : index
    %6 = vector.load %arg6[%c0_7, %c0_8] : memref<128x128xbf16, #tpu.memory_space<vmem>>, vector<128x128xbf16>
    %cst_9 = arith.constant dense<0.000000e+00> : vector<128x128xf32>
    %7 = tpu.matmul %5, %6, %cst_9 {dimension_numbers = #tpu.dot_dimension_numbers<[1], [0], [0], [1], [0, 0, 1, 1], [], []>} : vector<128x128xbf16>, vector<128x128xbf16>, vector<128x128xf32> -> vector<128x128xf32>
    %8 = arith.addf %3, %7 : vector<128x128xf32>
    %c0_10 = arith.constant 0 : index
    %c0_11 = arith.constant 0 : index
    %c0_12 = arith.constant 0 : index
    %9 = vector.load %arg4[%c0_10, %c0_11, %c0_12] : memref<1x128x128xbf16, #tpu.memory_space<vmem>>, vector<1x128x128xbf16>
    %10 = vector.shape_cast %9 : vector<1x128x128xbf16> to vector<128x128xbf16>
    %c0_13 = arith.constant 0 : index
    %c0_14 = arith.constant 0 : index
    %11 = vector.load %arg7[%c0_13, %c0_14] : memref<128x128xbf16, #tpu.memory_space<vmem>>, vector<128x128xbf16>
    %cst_15 = arith.constant dense<0.000000e+00> : vector<128x128xf32>
    %12 = tpu.matmul %10, %11, %cst_15 {dimension_numbers = #tpu.dot_dimension_numbers<[1], [0], [0], [1], [0, 0, 1, 1], [], []>} : vector<128x128xbf16>, vector<128x128xbf16>, vector<128x128xf32> -> vector<128x128xf32>
    %13 = arith.addf %8, %12 : vector<128x128xf32>
    %c0_16 = arith.constant 0 : index
    %c0_17 = arith.constant 0 : index
    %14 = vector.load %arg8[%c0_16, %c0_17] : memref<1x128xf32, #tpu.memory_space<vmem>>, vector<1x128xf32>
    %15 = vector.broadcast %14 : vector<1x128xf32> to vector<128x128xf32>
    %16 = arith.addf %13, %15 : vector<128x128xf32>
    %cst_18 = arith.constant 0.000000e+00 : f32
    %17 = vector.broadcast %cst_18 : f32 to vector<128x128xf32>
    %18 = arith.maximumf %16, %17 : vector<128x128xf32>
    %19 = arith.truncf %18 : vector<128x128xf32> to vector<128x128xbf16>
    %c0_19 = arith.constant 0 : index
    %c0_20 = arith.constant 0 : index
    %c0_21 = arith.constant 0 : index
    %20 = vector.load %arg9[%c0_19, %c0_20, %c0_21] : memref<1x128x128xbf16, #tpu.memory_space<vmem>>, vector<1x128x128xbf16>
    %21 = vector.shape_cast %20 : vector<1x128x128xbf16> to vector<128x128xbf16>
    %22 = vector.shape_cast %19 : vector<128x128xbf16> to vector<1x128x128xbf16>
    tpu.vector_store %arg9[%c0_19, %c0_20, %c0_21], %22 {strides = array<i32>} : memref<1x128x128xbf16, #tpu.memory_space<vmem>>, vector<1x128x128xbf16>,
    return
  }
  func.func @transform_0(%arg0: i32, %arg1: i32) -> (i32, i32, i32) {
    %c0_i32 = arith.constant 0 : i32
    %c0_i32_0 = arith.constant 0 : i32
    return %arg0, %arg1, %c0_i32 : i32, i32, i32
  }
  func.func @transform_1(%arg0: i32, %arg1: i32) -> (i32, i32, i32) {
    %c0_i32 = arith.constant 0 : i32
    %c0_i32_0 = arith.constant 0 : i32
    return %arg0, %arg1, %c0_i32 : i32, i32, i32
  }
  func.func @transform_2(%arg0: i32, %arg1: i32) -> (i32, i32, i32) {
    %c0_i32 = arith.constant 0 : i32
    %c0_i32_0 = arith.constant 0 : i32
    return %arg0, %arg1, %c0_i32 : i32, i32, i32
  }
  func.func @transform_3(%arg0: i32, %arg1: i32) -> (i32, i32) {
    %c0_i32 = arith.constant 0 : i32
    %c0_i32_0 = arith.constant 0 : i32
    %c0_i32_1 = arith.constant 0 : i32
    return %c0_i32, %c0_i32_0 : i32, i32
  }
  func.func @transform_4(%arg0: i32, %arg1: i32) -> (i32, i32) {
    %c0_i32 = arith.constant 0 : i32
    %c0_i32_0 = arith.constant 0 : i32
    %c0_i32_1 = arith.constant 0 : i32
    return %c0_i32, %c0_i32_0 : i32, i32
  }
  func.func @transform_5(%arg0: i32, %arg1: i32) -> (i32, i32) {
    %c0_i32 = arith.constant 0 : i32
    %c0_i32_0 = arith.constant 0 : i32
    %c0_i32_1 = arith.constant 0 : i32
    return %c0_i32, %c0_i32_0 : i32, i32
  }
  func.func @transform_6(%arg0: i32, %arg1: i32) -> (i32, i32) {
    %c0_i32 = arith.constant 0 : i32
    %c0_i32_0 = arith.constant 0 : i32
    %c0_i32_1 = arith.constant 0 : i32
    return %c0_i32, %c0_i32_0 : i32, i32
  }
  func.func @transform_7(%arg0: i32, %arg1: i32) -> (i32, i32, i32) {
    %c0_i32 = arith.constant 0 : i32
    %c0_i32_0 = arith.constant 0 : i32
    return %arg0, %arg1, %c0_i32 : i32, i32, i32
  }
}

module attributes {stable_mosaic.version = 11 : i64} {
  func.func @_fused_conv_kernel(%arg0: i32, %arg1: i32, %arg2: memref<1x128x128xbf16, #tpu.memory_space<vmem>>, %arg3: memref<1x128x128xbf16, #tpu.memory_space<vmem>>, %arg4: memref<1x128x128xbf16, #tpu.memory_space<vmem>>, %arg5: memref<128x128xbf16, #tpu.memory_space<vmem>>, %arg6: memref<128x128xbf16, #tpu.memory_space<vmem>>, %arg7: memref<128x128xbf16, #tpu.memory_space<vmem>>, %arg8: memref<1x128xf32, #tpu.memory_space<vmem>>, %arg9: memref<1x128x128xbf16, #tpu.memory_space<vmem>>) attributes {dimension_semantics = [#tpu.dimension_semantics<parallel>, #tpu.dimension_semantics<parallel>], iteration_bounds = array<i64: 2, 2>, scalar_prefetch = 0 : i64, scratch_operands = 0 : i64, tpu.core_type = #tpu.core_type<tc>, window_params = [{transform_indices = @transform_0, window_bounds = array<i64: 1, 128, 128>}, {transform_indices = @transform_1, window_bounds = array<i64: 1, 128, 128>}, {transform_indices = @transform_2, window_bounds = array<i64: 1, 128, 128>}, {pipeline_mode = #tpu.pipeline_mode<synchronous>, transform_indices = @transform_3, window_bounds = array<i64: 128, 128>}, {pipeline_mode = #tpu.pipeline_mode<synchronous>, transform_indices = @transform_4, window_bounds = array<i64: 128, 128>}, {pipeline_mode = #tpu.pipeline_mode<synchronous>, transform_indices = @transform_5, window_bounds = array<i64: 128, 128>}, {pipeline_mode = #tpu.pipeline_mode<synchronous>, transform_indices = @transform_6, window_bounds = array<i64: 1, 128>}, {transform_indices = @transform_7, window_bounds = array<i64: 1, 128, 128>}]} {
    %c0 = arith.constant 0 : index
    %c0_0 = arith.constant 0 : index
    %c0_1 = arith.constant 0 : index
    %0 = vector.load %arg2[%c0, %c0_0, %c0_1] : memref<1x128x128xbf16, #tpu.memory_space<vmem>>, vector<1x128x128xbf16>
    %1 = vector.shape_cast %0 : vector<1x128x128xbf16> to vector<128x128xbf16>
    %c0_2 = arith.constant 0 : index
    %c0_3 = arith.constant 0 : index
    %2 = vector.load %arg5[%c0_2, %c0_3] : memref<128x128xbf16, #tpu.memory_space<vmem>>, vector<128x128xbf16>
    %cst = arith.constant dense<0.000000e+00> : vector<128x128xf32>
    %3 = tpu.matmul %1, %2, %cst {dimension_numbers = #tpu.dot_dimension_numbers<[1], [0], [0], [1], [0, 0, 1, 1], [], []>} : vector<128x128xbf16>, vector<128x128xbf16>, vector<128x128xf32> -> vector<128x128xf32>
    %c0_4 = arith.constant 0 : index
    %c0_5 = arith.constant 0 : index
    %c0_6 = arith.constant 0 : index
    %4 = vector.load %arg3[%c0_4, %c0_5, %c0_6] : memref<1x128x128xbf16, #tpu.memory_space<vmem>>, vector<1x128x128xbf16>
    %5 = vector.shape_cast %4 : vector<1x128x128xbf16> to vector<128x128xbf16>
    %c0_7 = arith.constant 0 : index
    %c0_8 = arith.constant 0 : index
    %6 = vector.load %arg6[%c0_7, %c0_8] : memref<128x128xbf16, #tpu.memory_space<vmem>>, vector<128x128xbf16>
    %cst_9 = arith.constant dense<0.000000e+00> : vector<128x128xf32>
    %7 = tpu.matmul %5, %6, %cst_9 {dimension_numbers = #tpu.dot_dimension_numbers<[1], [0], [0], [1], [0, 0, 1, 1], [], []>} : vector<128x128xbf16>, vector<128x128xbf16>, vector<128x128xf32> -> vector<128x128xf32>
    %8 = arith.addf %3, %7 : vector<128x128xf32>
    %c0_10 = arith.constant 0 : index
    %c0_11 = arith.constant 0 : index
    %c0_12 = arith.constant 0 : index
    %9 = vector.load %arg4[%c0_10, %c0_11, %c0_12] : memref<1x128x128xbf16, #tpu.memory_space<vmem>>, vector<1x128x128xbf16>
    %10 = vector.shape_cast %9 : vector<1x128x128xbf16> to vector<128x128xbf16>
    %c0_13 = arith.constant 0 : index
    %c0_14 = arith.constant 0 : index
    %11 = vector.load %arg7[%c0_13, %c0_14] : memref<128x128xbf16, #tpu.memory_space<vmem>>, vector<128x128xbf16>
    %cst_15 = arith.constant dense<0.000000e+00> : vector<128x128xf32>
    %12 = tpu.matmul %10, %11, %cst_15 {dimension_numbers = #tpu.dot_dimension_numbers<[1], [0], [0], [1], [0, 0, 1, 1], [], []>} : vector<128x128xbf16>, vector<128x128xbf16>, vector<128x128xf32> -> vector<128x128xf32>
    %13 = arith.addf %8, %12 : vector<128x128xf32>
    %c0_16 = arith.constant 0 : index
    %c0_17 = arith.constant 0 : index
    %14 = vector.load %arg8[%c0_16, %c0_17] : memref<1x128xf32, #tpu.memory_space<vmem>>, vector<1x128xf32>
    %15 = vector.broadcast %14 : vector<1x128xf32> to vector<128x128xf32>
    %16 = arith.addf %13, %15 : vector<128x128xf32>
    %cst_18 = arith.constant 0.000000e+00 : f32
    %17 = vector.broadcast %cst_18 : f32 to vector<128x128xf32>
    %18 = arith.maximumf %16, %17 : vector<128x128xf32>
    %19 = arith.truncf %18 : vector<128x128xf32> to vector<128x128xbf16>
    %c0_19 = arith.constant 0 : index
    %c0_20 = arith.constant 0 : index
    %c0_21 = arith.constant 0 : index
    %20 = vector.load %arg9[%c0_19, %c0_20, %c0_21] : memref<1x128x128xbf16, #tpu.memory_space<vmem>>, vector<1x128x128xbf16>
    %21 = vector.shape_cast %20 : vector<1x128x128xbf16> to vector<128x128xbf16>
    %22 = vector.shape_cast %19 : vector<128x128xbf16> to vector<1x128x128xbf16>
    tpu.vector_store %arg9[%c0_19, %c0_20, %c0_21], %22 {strides = array<i32>} : memref<1x128x128xbf16, #tpu.memory_space<vmem>>, vector<1x128x128xbf16>,
    return
  }
  func.func @transform_0(%arg0: i32, %arg1: i32) -> (i32, i32, i32) {
    %c0_i32 = arith.constant 0 : i32
    %c0_i32_0 = arith.constant 0 : i32
    return %arg0, %arg1, %c0_i32 : i32, i32, i32
  }
  func.func @transform_1(%arg0: i32, %arg1: i32) -> (i32, i32, i32) {
    %c0_i32 = arith.constant 0 : i32
    %c0_i32_0 = arith.constant 0 : i32
    return %arg0, %arg1, %c0_i32 : i32, i32, i32
  }
  func.func @transform_2(%arg0: i32, %arg1: i32) -> (i32, i32, i32) {
    %c0_i32 = arith.constant 0 : i32
    %c0_i32_0 = arith.constant 0 : i32
    return %arg0, %arg1, %c0_i32 : i32, i32, i32
  }
  func.func @transform_3(%arg0: i32, %arg1: i32) -> (i32, i32) {
    %c0_i32 = arith.constant 0 : i32
    %c0_i32_0 = arith.constant 0 : i32
    %c0_i32_1 = arith.constant 0 : i32
    return %c0_i32, %c0_i32_0 : i32, i32
  }
  func.func @transform_4(%arg0: i32, %arg1: i32) -> (i32, i32) {
    %c0_i32 = arith.constant 0 : i32
    %c0_i32_0 = arith.constant 0 : i32
    %c0_i32_1 = arith.constant 0 : i32
    return %c0_i32, %c0_i32_0 : i32, i32
  }
  func.func @transform_5(%arg0: i32, %arg1: i32) -> (i32, i32) {
    %c0_i32 = arith.constant 0 : i32
    %c0_i32_0 = arith.constant 0 : i32
    %c0_i32_1 = arith.constant 0 : i32
    return %c0_i32, %c0_i32_0 : i32, i32
  }
  func.func @transform_6(%arg0: i32, %arg1: i32) -> (i32, i32) {
    %c0_i32 = arith.constant 0 : i32
    %c0_i32_0 = arith.constant 0 : i32
    %c0_i32_1 = arith.constant 0 : i32
    return %c0_i32, %c0_i32_0 : i32, i32
  }
  func.func @transform_7(%arg0: i32, %arg1: i32) -> (i32, i32, i32) {
    %c0_i32 = arith.constant 0 : i32
    %c0_i32_0 = arith.constant 0 : i32
    return %arg0, %arg1, %c0_i32 : i32, i32, i32
  }
}

module attributes {stable_mosaic.version = 11 : i64} {
  func.func @_fused_conv_kernel(%arg0: i32, %arg1: i32, %arg2: memref<1x128x128xbf16, #tpu.memory_space<vmem>>, %arg3: memref<1x128x128xbf16, #tpu.memory_space<vmem>>, %arg4: memref<1x128x128xbf16, #tpu.memory_space<vmem>>, %arg5: memref<128x128xbf16, #tpu.memory_space<vmem>>, %arg6: memref<128x128xbf16, #tpu.memory_space<vmem>>, %arg7: memref<128x128xbf16, #tpu.memory_space<vmem>>, %arg8: memref<1x128xf32, #tpu.memory_space<vmem>>, %arg9: memref<1x128x128xbf16, #tpu.memory_space<vmem>>) attributes {dimension_semantics = [#tpu.dimension_semantics<parallel>, #tpu.dimension_semantics<parallel>], iteration_bounds = array<i64: 2, 1>, scalar_prefetch = 0 : i64, scratch_operands = 0 : i64, tpu.core_type = #tpu.core_type<tc>, window_params = [{transform_indices = @transform_0, window_bounds = array<i64: 1, 128, 128>}, {transform_indices = @transform_1, window_bounds = array<i64: 1, 128, 128>}, {transform_indices = @transform_2, window_bounds = array<i64: 1, 128, 128>}, {pipeline_mode = #tpu.pipeline_mode<synchronous>, transform_indices = @transform_3, window_bounds = array<i64: 128, 128>}, {pipeline_mode = #tpu.pipeline_mode<synchronous>, transform_indices = @transform_4, window_bounds = array<i64: 128, 128>}, {pipeline_mode = #tpu.pipeline_mode<synchronous>, transform_indices = @transform_5, window_bounds = array<i64: 128, 128>}, {pipeline_mode = #tpu.pipeline_mode<synchronous>, transform_indices = @transform_6, window_bounds = array<i64: 1, 128>}, {transform_indices = @transform_7, window_bounds = array<i64: 1, 128, 128>}]} {
    %c0 = arith.constant 0 : index
    %c0_0 = arith.constant 0 : index
    %c0_1 = arith.constant 0 : index
    %0 = vector.load %arg2[%c0, %c0_0, %c0_1] : memref<1x128x128xbf16, #tpu.memory_space<vmem>>, vector<1x128x128xbf16>
    %1 = vector.shape_cast %0 : vector<1x128x128xbf16> to vector<128x128xbf16>
    %c0_2 = arith.constant 0 : index
    %c0_3 = arith.constant 0 : index
    %2 = vector.load %arg5[%c0_2, %c0_3] : memref<128x128xbf16, #tpu.memory_space<vmem>>, vector<128x128xbf16>
    %cst = arith.constant dense<0.000000e+00> : vector<128x128xf32>
    %3 = tpu.matmul %1, %2, %cst {dimension_numbers = #tpu.dot_dimension_numbers<[1], [0], [0], [1], [0, 0, 1, 1], [], []>} : vector<128x128xbf16>, vector<128x128xbf16>, vector<128x128xf32> -> vector<128x128xf32>
    %c0_4 = arith.constant 0 : index
    %c0_5 = arith.constant 0 : index
    %c0_6 = arith.constant 0 : index
    %4 = vector.load %arg3[%c0_4, %c0_5, %c0_6] : memref<1x128x128xbf16, #tpu.memory_space<vmem>>, vector<1x128x128xbf16>
    %5 = vector.shape_cast %4 : vector<1x128x128xbf16> to vector<128x128xbf16>
    %c0_7 = arith.constant 0 : index
    %c0_8 = arith.constant 0 : index
    %6 = vector.load %arg6[%c0_7, %c0_8] : memref<128x128xbf16, #tpu.memory_space<vmem>>, vector<128x128xbf16>
    %cst_9 = arith.constant dense<0.000000e+00> : vector<128x128xf32>
    %7 = tpu.matmul %5, %6, %cst_9 {dimension_numbers = #tpu.dot_dimension_numbers<[1], [0], [0], [1], [0, 0, 1, 1], [], []>} : vector<128x128xbf16>, vector<128x128xbf16>, vector<128x128xf32> -> vector<128x128xf32>
    %8 = arith.addf %3, %7 : vector<128x128xf32>
    %c0_10 = arith.constant 0 : index
    %c0_11 = arith.constant 0 : index
    %c0_12 = arith.constant 0 : index
    %9 = vector.load %arg4[%c0_10, %c0_11, %c0_12] : memref<1x128x128xbf16, #tpu.memory_space<vmem>>, vector<1x128x128xbf16>
    %10 = vector.shape_cast %9 : vector<1x128x128xbf16> to vector<128x128xbf16>
    %c0_13 = arith.constant 0 : index
    %c0_14 = arith.constant 0 : index
    %11 = vector.load %arg7[%c0_13, %c0_14] : memref<128x128xbf16, #tpu.memory_space<vmem>>, vector<128x128xbf16>
    %cst_15 = arith.constant dense<0.000000e+00> : vector<128x128xf32>
    %12 = tpu.matmul %10, %11, %cst_15 {dimension_numbers = #tpu.dot_dimension_numbers<[1], [0], [0], [1], [0, 0, 1, 1], [], []>} : vector<128x128xbf16>, vector<128x128xbf16>, vector<128x128xf32> -> vector<128x128xf32>
    %13 = arith.addf %8, %12 : vector<128x128xf32>
    %c0_16 = arith.constant 0 : index
    %c0_17 = arith.constant 0 : index
    %14 = vector.load %arg8[%c0_16, %c0_17] : memref<1x128xf32, #tpu.memory_space<vmem>>, vector<1x128xf32>
    %15 = vector.broadcast %14 : vector<1x128xf32> to vector<128x128xf32>
    %16 = arith.addf %13, %15 : vector<128x128xf32>
    %cst_18 = arith.constant 0.000000e+00 : f32
    %17 = vector.broadcast %cst_18 : f32 to vector<128x128xf32>
    %18 = arith.maximumf %16, %17 : vector<128x128xf32>
    %19 = arith.truncf %18 : vector<128x128xf32> to vector<128x128xbf16>
    %c0_19 = arith.constant 0 : index
    %c0_20 = arith.constant 0 : index
    %c0_21 = arith.constant 0 : index
    %20 = vector.load %arg9[%c0_19, %c0_20, %c0_21] : memref<1x128x128xbf16, #tpu.memory_space<vmem>>, vector<1x128x128xbf16>
    %21 = vector.shape_cast %20 : vector<1x128x128xbf16> to vector<128x128xbf16>
    %22 = vector.shape_cast %19 : vector<128x128xbf16> to vector<1x128x128xbf16>
    tpu.vector_store %arg9[%c0_19, %c0_20, %c0_21], %22 {strides = array<i32>} : memref<1x128x128xbf16, #tpu.memory_space<vmem>>, vector<1x128x128xbf16>,
    return
  }
  func.func @transform_0(%arg0: i32, %arg1: i32) -> (i32, i32, i32) {
    %c0_i32 = arith.constant 0 : i32
    %c0_i32_0 = arith.constant 0 : i32
    return %arg0, %arg1, %c0_i32 : i32, i32, i32
  }
  func.func @transform_1(%arg0: i32, %arg1: i32) -> (i32, i32, i32) {
    %c0_i32 = arith.constant 0 : i32
    %c0_i32_0 = arith.constant 0 : i32
    return %arg0, %arg1, %c0_i32 : i32, i32, i32
  }
  func.func @transform_2(%arg0: i32, %arg1: i32) -> (i32, i32, i32) {
    %c0_i32 = arith.constant 0 : i32
    %c0_i32_0 = arith.constant 0 : i32
    return %arg0, %arg1, %c0_i32 : i32, i32, i32
  }
  func.func @transform_3(%arg0: i32, %arg1: i32) -> (i32, i32) {
    %c0_i32 = arith.constant 0 : i32
    %c0_i32_0 = arith.constant 0 : i32
    %c0_i32_1 = arith.constant 0 : i32
    return %c0_i32, %c0_i32_0 : i32, i32
  }
  func.func @transform_4(%arg0: i32, %arg1: i32) -> (i32, i32) {
    %c0_i32 = arith.constant 0 : i32
    %c0_i32_0 = arith.constant 0 : i32
    %c0_i32_1 = arith.constant 0 : i32
    return %c0_i32, %c0_i32_0 : i32, i32
  }
  func.func @transform_5(%arg0: i32, %arg1: i32) -> (i32, i32) {
    %c0_i32 = arith.constant 0 : i32
    %c0_i32_0 = arith.constant 0 : i32
    %c0_i32_1 = arith.constant 0 : i32
    return %c0_i32, %c0_i32_0 : i32, i32
  }
  func.func @transform_6(%arg0: i32, %arg1: i32) -> (i32, i32) {
    %c0_i32 = arith.constant 0 : i32
    %c0_i32_0 = arith.constant 0 : i32
    %c0_i32_1 = arith.constant 0 : i32
    return %c0_i32, %c0_i32_0 : i32, i32
  }
  func.func @transform_7(%arg0: i32, %arg1: i32) -> (i32, i32, i32) {
    %c0_i32 = arith.constant 0 : i32
    %c0_i32_0 = arith.constant 0 : i32
    return %arg0, %arg1, %c0_i32 : i32, i32, i32
  }
}

module attributes {stable_mosaic.version = 11 : i64} {
  func.func @_fused_conv_kernel(%arg0: i32, %arg1: i32, %arg2: memref<1x64x128xbf16, #tpu.memory_space<vmem>>, %arg3: memref<1x64x128xbf16, #tpu.memory_space<vmem>>, %arg4: memref<1x64x128xbf16, #tpu.memory_space<vmem>>, %arg5: memref<128x128xbf16, #tpu.memory_space<vmem>>, %arg6: memref<128x128xbf16, #tpu.memory_space<vmem>>, %arg7: memref<128x128xbf16, #tpu.memory_space<vmem>>, %arg8: memref<1x128xf32, #tpu.memory_space<vmem>>, %arg9: memref<1x64x128xbf16, #tpu.memory_space<vmem>>) attributes {dimension_semantics = [#tpu.dimension_semantics<parallel>, #tpu.dimension_semantics<parallel>], iteration_bounds = array<i64: 2, 1>, scalar_prefetch = 0 : i64, scratch_operands = 0 : i64, tpu.core_type = #tpu.core_type<tc>, window_params = [{transform_indices = @transform_0, window_bounds = array<i64: 1, 64, 128>}, {transform_indices = @transform_1, window_bounds = array<i64: 1, 64, 128>}, {transform_indices = @transform_2, window_bounds = array<i64: 1, 64, 128>}, {pipeline_mode = #tpu.pipeline_mode<synchronous>, transform_indices = @transform_3, window_bounds = array<i64: 128, 128>}, {pipeline_mode = #tpu.pipeline_mode<synchronous>, transform_indices = @transform_4, window_bounds = array<i64: 128, 128>}, {pipeline_mode = #tpu.pipeline_mode<synchronous>, transform_indices = @transform_5, window_bounds = array<i64: 128, 128>}, {pipeline_mode = #tpu.pipeline_mode<synchronous>, transform_indices = @transform_6, window_bounds = array<i64: 1, 128>}, {transform_indices = @transform_7, window_bounds = array<i64: 1, 64, 128>}]} {
    %c0 = arith.constant 0 : index
    %c0_0 = arith.constant 0 : index
    %c0_1 = arith.constant 0 : index
    %0 = vector.load %arg2[%c0, %c0_0, %c0_1] : memref<1x64x128xbf16, #tpu.memory_space<vmem>>, vector<1x64x128xbf16>
    %1 = vector.shape_cast %0 : vector<1x64x128xbf16> to vector<64x128xbf16>
    %c0_2 = arith.constant 0 : index
    %c0_3 = arith.constant 0 : index
    %2 = vector.load %arg5[%c0_2, %c0_3] : memref<128x128xbf16, #tpu.memory_space<vmem>>, vector<128x128xbf16>
    %cst = arith.constant dense<0.000000e+00> : vector<64x128xf32>
    %3 = tpu.matmul %1, %2, %cst {dimension_numbers = #tpu.dot_dimension_numbers<[1], [0], [0], [1], [0, 0, 1, 1], [], []>} : vector<64x128xbf16>, vector<128x128xbf16>, vector<64x128xf32> -> vector<64x128xf32>
    %c0_4 = arith.constant 0 : index
    %c0_5 = arith.constant 0 : index
    %c0_6 = arith.constant 0 : index
    %4 = vector.load %arg3[%c0_4, %c0_5, %c0_6] : memref<1x64x128xbf16, #tpu.memory_space<vmem>>, vector<1x64x128xbf16>
    %5 = vector.shape_cast %4 : vector<1x64x128xbf16> to vector<64x128xbf16>
    %c0_7 = arith.constant 0 : index
    %c0_8 = arith.constant 0 : index
    %6 = vector.load %arg6[%c0_7, %c0_8] : memref<128x128xbf16, #tpu.memory_space<vmem>>, vector<128x128xbf16>
    %cst_9 = arith.constant dense<0.000000e+00> : vector<64x128xf32>
    %7 = tpu.matmul %5, %6, %cst_9 {dimension_numbers = #tpu.dot_dimension_numbers<[1], [0], [0], [1], [0, 0, 1, 1], [], []>} : vector<64x128xbf16>, vector<128x128xbf16>, vector<64x128xf32> -> vector<64x128xf32>
    %8 = arith.addf %3, %7 : vector<64x128xf32>
    %c0_10 = arith.constant 0 : index
    %c0_11 = arith.constant 0 : index
    %c0_12 = arith.constant 0 : index
    %9 = vector.load %arg4[%c0_10, %c0_11, %c0_12] : memref<1x64x128xbf16, #tpu.memory_space<vmem>>, vector<1x64x128xbf16>
    %10 = vector.shape_cast %9 : vector<1x64x128xbf16> to vector<64x128xbf16>
    %c0_13 = arith.constant 0 : index
    %c0_14 = arith.constant 0 : index
    %11 = vector.load %arg7[%c0_13, %c0_14] : memref<128x128xbf16, #tpu.memory_space<vmem>>, vector<128x128xbf16>
    %cst_15 = arith.constant dense<0.000000e+00> : vector<64x128xf32>
    %12 = tpu.matmul %10, %11, %cst_15 {dimension_numbers = #tpu.dot_dimension_numbers<[1], [0], [0], [1], [0, 0, 1, 1], [], []>} : vector<64x128xbf16>, vector<128x128xbf16>, vector<64x128xf32> -> vector<64x128xf32>
    %13 = arith.addf %8, %12 : vector<64x128xf32>
    %c0_16 = arith.constant 0 : index
    %c0_17 = arith.constant 0 : index
    %14 = vector.load %arg8[%c0_16, %c0_17] : memref<1x128xf32, #tpu.memory_space<vmem>>, vector<1x128xf32>
    %15 = vector.broadcast %14 : vector<1x128xf32> to vector<64x128xf32>
    %16 = arith.addf %13, %15 : vector<64x128xf32>
    %cst_18 = arith.constant 0.000000e+00 : f32
    %17 = vector.broadcast %cst_18 : f32 to vector<64x128xf32>
    %18 = arith.maximumf %16, %17 : vector<64x128xf32>
    %19 = arith.truncf %18 : vector<64x128xf32> to vector<64x128xbf16>
    %c0_19 = arith.constant 0 : index
    %c0_20 = arith.constant 0 : index
    %c0_21 = arith.constant 0 : index
    %20 = vector.load %arg9[%c0_19, %c0_20, %c0_21] : memref<1x64x128xbf16, #tpu.memory_space<vmem>>, vector<1x64x128xbf16>
    %21 = vector.shape_cast %20 : vector<1x64x128xbf16> to vector<64x128xbf16>
    %22 = vector.shape_cast %19 : vector<64x128xbf16> to vector<1x64x128xbf16>
    tpu.vector_store %arg9[%c0_19, %c0_20, %c0_21], %22 {strides = array<i32>} : memref<1x64x128xbf16, #tpu.memory_space<vmem>>, vector<1x64x128xbf16>,
    return
  }
  func.func @transform_0(%arg0: i32, %arg1: i32) -> (i32, i32, i32) {
    %c0_i32 = arith.constant 0 : i32
    %c0_i32_0 = arith.constant 0 : i32
    return %arg0, %arg1, %c0_i32 : i32, i32, i32
  }
  func.func @transform_1(%arg0: i32, %arg1: i32) -> (i32, i32, i32) {
    %c0_i32 = arith.constant 0 : i32
    %c0_i32_0 = arith.constant 0 : i32
    return %arg0, %arg1, %c0_i32 : i32, i32, i32
  }
  func.func @transform_2(%arg0: i32, %arg1: i32) -> (i32, i32, i32) {
    %c0_i32 = arith.constant 0 : i32
    %c0_i32_0 = arith.constant 0 : i32
    return %arg0, %arg1, %c0_i32 : i32, i32, i32
  }
  func.func @transform_3(%arg0: i32, %arg1: i32) -> (i32, i32) {
    %c0_i32 = arith.constant 0 : i32
    %c0_i32_0 = arith.constant 0 : i32
    %c0_i32_1 = arith.constant 0 : i32
    return %c0_i32, %c0_i32_0 : i32, i32
  }
  func.func @transform_4(%arg0: i32, %arg1: i32) -> (i32, i32) {
    %c0_i32 = arith.constant 0 : i32
    %c0_i32_0 = arith.constant 0 : i32
    %c0_i32_1 = arith.constant 0 : i32
    return %c0_i32, %c0_i32_0 : i32, i32
  }
  func.func @transform_5(%arg0: i32, %arg1: i32) -> (i32, i32) {
    %c0_i32 = arith.constant 0 : i32
    %c0_i32_0 = arith.constant 0 : i32
    %c0_i32_1 = arith.constant 0 : i32
    return %c0_i32, %c0_i32_0 : i32, i32
  }
  func.func @transform_6(%arg0: i32, %arg1: i32) -> (i32, i32) {
    %c0_i32 = arith.constant 0 : i32
    %c0_i32_0 = arith.constant 0 : i32
    %c0_i32_1 = arith.constant 0 : i32
    return %c0_i32, %c0_i32_0 : i32, i32
  }
  func.func @transform_7(%arg0: i32, %arg1: i32) -> (i32, i32, i32) {
    %c0_i32 = arith.constant 0 : i32
    %c0_i32_0 = arith.constant 0 : i32
    return %arg0, %arg1, %c0_i32 : i32, i32, i32
  }
}

module attributes {stable_mosaic.version = 11 : i64} {
  func.func @_pyramid_level_kernel(%arg0: i32, %arg1: memref<1x32x128xbf16, #tpu.memory_space<vmem>>, %arg2: memref<1x32x128xbf16, #tpu.memory_space<vmem>>, %arg3: memref<1x32x128xbf16, #tpu.memory_space<vmem>>, %arg4: memref<1x32x128xbf16, #tpu.memory_space<vmem>>, %arg5: memref<128x128xbf16, #tpu.memory_space<vmem>>, %arg6: memref<128x128xbf16, #tpu.memory_space<vmem>>, %arg7: memref<128x128xbf16, #tpu.memory_space<vmem>>, %arg8: memref<1x128xf32, #tpu.memory_space<vmem>>, %arg9: memref<128x128xbf16, #tpu.memory_space<vmem>>, %arg10: memref<128x128xbf16, #tpu.memory_space<vmem>>, %arg11: memref<1x128xf32, #tpu.memory_space<vmem>>, %arg12: memref<1x32x128xbf16, #tpu.memory_space<vmem>>, %arg13: memref<1x32x128xbf16, #tpu.memory_space<vmem>>) attributes {dimension_semantics = [#tpu.dimension_semantics<parallel>], iteration_bounds = array<i64: 2>, scalar_prefetch = 0 : i64, scratch_operands = 0 : i64, tpu.core_type = #tpu.core_type<tc>, window_params = [{transform_indices = @transform_0, window_bounds = array<i64: 1, 32, 128>}, {transform_indices = @transform_1, window_bounds = array<i64: 1, 32, 128>}, {transform_indices = @transform_2, window_bounds = array<i64: 1, 32, 128>}, {transform_indices = @transform_3, window_bounds = array<i64: 1, 32, 128>}, {pipeline_mode = #tpu.pipeline_mode<synchronous>, transform_indices = @transform_4, window_bounds = array<i64: 128, 128>}, {pipeline_mode = #tpu.pipeline_mode<synchronous>, transform_indices = @transform_5, window_bounds = array<i64: 128, 128>}, {pipeline_mode = #tpu.pipeline_mode<synchronous>, transform_indices = @transform_6, window_bounds = array<i64: 128, 128>}, {pipeline_mode = #tpu.pipeline_mode<synchronous>, transform_indices = @transform_7, window_bounds = array<i64: 1, 128>}, {pipeline_mode = #tpu.pipeline_mode<synchronous>, transform_indices = @transform_8, window_bounds = array<i64: 128, 128>}, {pipeline_mode = #tpu.pipeline_mode<synchronous>, transform_indices = @transform_9, window_bounds = array<i64: 128, 128>}, {pipeline_mode = #tpu.pipeline_mode<synchronous>, transform_indices = @transform_10, window_bounds = array<i64: 1, 128>}, {transform_indices = @transform_11, window_bounds = array<i64: 1, 32, 128>}, {transform_indices = @transform_12, window_bounds = array<i64: 1, 32, 128>}]} {
    %c0 = arith.constant 0 : index
    %c0_0 = arith.constant 0 : index
    %c0_1 = arith.constant 0 : index
    %0 = vector.load %arg1[%c0, %c0_0, %c0_1] : memref<1x32x128xbf16, #tpu.memory_space<vmem>>, vector<1x32x128xbf16>
    %1 = vector.shape_cast %0 : vector<1x32x128xbf16> to vector<32x128xbf16>
    %c0_2 = arith.constant 0 : index
    %c0_3 = arith.constant 0 : index
    %2 = vector.load %arg5[%c0_2, %c0_3] : memref<128x128xbf16, #tpu.memory_space<vmem>>, vector<128x128xbf16>
    %cst = arith.constant dense<0.000000e+00> : vector<32x128xf32>
    %3 = tpu.matmul %1, %2, %cst {dimension_numbers = #tpu.dot_dimension_numbers<[1], [0], [0], [1], [0, 0, 1, 1], [], []>} : vector<32x128xbf16>, vector<128x128xbf16>, vector<32x128xf32> -> vector<32x128xf32>
    %c0_4 = arith.constant 0 : index
    %c0_5 = arith.constant 0 : index
    %c0_6 = arith.constant 0 : index
    %4 = vector.load %arg2[%c0_4, %c0_5, %c0_6] : memref<1x32x128xbf16, #tpu.memory_space<vmem>>, vector<1x32x128xbf16>
    %5 = vector.shape_cast %4 : vector<1x32x128xbf16> to vector<32x128xbf16>
    %c0_7 = arith.constant 0 : index
    %c0_8 = arith.constant 0 : index
    %6 = vector.load %arg6[%c0_7, %c0_8] : memref<128x128xbf16, #tpu.memory_space<vmem>>, vector<128x128xbf16>
    %cst_9 = arith.constant dense<0.000000e+00> : vector<32x128xf32>
    %7 = tpu.matmul %5, %6, %cst_9 {dimension_numbers = #tpu.dot_dimension_numbers<[1], [0], [0], [1], [0, 0, 1, 1], [], []>} : vector<32x128xbf16>, vector<128x128xbf16>, vector<32x128xf32> -> vector<32x128xf32>
    %8 = arith.addf %3, %7 : vector<32x128xf32>
    %c0_10 = arith.constant 0 : index
    %c0_11 = arith.constant 0 : index
    %c0_12 = arith.constant 0 : index
    %9 = vector.load %arg3[%c0_10, %c0_11, %c0_12] : memref<1x32x128xbf16, #tpu.memory_space<vmem>>, vector<1x32x128xbf16>
    %10 = vector.shape_cast %9 : vector<1x32x128xbf16> to vector<32x128xbf16>
    %c0_13 = arith.constant 0 : index
    %c0_14 = arith.constant 0 : index
    %11 = vector.load %arg7[%c0_13, %c0_14] : memref<128x128xbf16, #tpu.memory_space<vmem>>, vector<128x128xbf16>
    %cst_15 = arith.constant dense<0.000000e+00> : vector<32x128xf32>
    %12 = tpu.matmul %10, %11, %cst_15 {dimension_numbers = #tpu.dot_dimension_numbers<[1], [0], [0], [1], [0, 0, 1, 1], [], []>} : vector<32x128xbf16>, vector<128x128xbf16>, vector<32x128xf32> -> vector<32x128xf32>
    %13 = arith.addf %8, %12 : vector<32x128xf32>
    %c0_16 = arith.constant 0 : index
    %c0_17 = arith.constant 0 : index
    %14 = vector.load %arg8[%c0_16, %c0_17] : memref<1x128xf32, #tpu.memory_space<vmem>>, vector<1x128xf32>
    %15 = vector.broadcast %14 : vector<1x128xf32> to vector<32x128xf32>
    %16 = arith.addf %13, %15 : vector<32x128xf32>
    %cst_18 = arith.constant 0.000000e+00 : f32
    %17 = vector.broadcast %cst_18 : f32 to vector<32x128xf32>
    %18 = arith.maximumf %16, %17 : vector<32x128xf32>
    %19 = arith.truncf %18 : vector<32x128xf32> to vector<32x128xbf16>
    %c0_19 = arith.constant 0 : index
    %c0_20 = arith.constant 0 : index
    %c0_21 = arith.constant 0 : index
    %20 = vector.load %arg12[%c0_19, %c0_20, %c0_21] : memref<1x32x128xbf16, #tpu.memory_space<vmem>>, vector<1x32x128xbf16>
    %21 = vector.shape_cast %20 : vector<1x32x128xbf16> to vector<32x128xbf16>
    %22 = vector.shape_cast %19 : vector<32x128xbf16> to vector<1x32x128xbf16>
    tpu.vector_store %arg12[%c0_19, %c0_20, %c0_21], %22 {strides = array<i32>} : memref<1x32x128xbf16, #tpu.memory_space<vmem>>, vector<1x32x128xbf16>,
    %23 = arith.truncf %18 : vector<32x128xf32> to vector<32x128xbf16>
    %c0_22 = arith.constant 0 : index
    %c0_23 = arith.constant 0 : index
    %24 = vector.load %arg9[%c0_22, %c0_23] : memref<128x128xbf16, #tpu.memory_space<vmem>>, vector<128x128xbf16>
    %cst_24 = arith.constant dense<0.000000e+00> : vector<32x128xf32>
    %25 = tpu.matmul %23, %24, %cst_24 {dimension_numbers = #tpu.dot_dimension_numbers<[1], [0], [0], [1], [0, 0, 1, 1], [], []>} : vector<32x128xbf16>, vector<128x128xbf16>, vector<32x128xf32> -> vector<32x128xf32>
    %c0_25 = arith.constant 0 : index
    %c0_26 = arith.constant 0 : index
    %c0_27 = arith.constant 0 : index
    %26 = vector.load %arg4[%c0_25, %c0_26, %c0_27] : memref<1x32x128xbf16, #tpu.memory_space<vmem>>, vector<1x32x128xbf16>
    %27 = vector.shape_cast %26 : vector<1x32x128xbf16> to vector<32x128xbf16>
    %c0_28 = arith.constant 0 : index
    %c0_29 = arith.constant 0 : index
    %28 = vector.load %arg10[%c0_28, %c0_29] : memref<128x128xbf16, #tpu.memory_space<vmem>>, vector<128x128xbf16>
    %cst_30 = arith.constant dense<0.000000e+00> : vector<32x128xf32>
    %29 = tpu.matmul %27, %28, %cst_30 {dimension_numbers = #tpu.dot_dimension_numbers<[1], [0], [0], [1], [0, 0, 1, 1], [], []>} : vector<32x128xbf16>, vector<128x128xbf16>, vector<32x128xf32> -> vector<32x128xf32>
    %30 = arith.addf %25, %29 : vector<32x128xf32>
    %c0_31 = arith.constant 0 : index
    %c0_32 = arith.constant 0 : index
    %31 = vector.load %arg11[%c0_31, %c0_32] : memref<1x128xf32, #tpu.memory_space<vmem>>, vector<1x128xf32>
    %32 = vector.broadcast %31 : vector<1x128xf32> to vector<32x128xf32>
    %33 = arith.addf %30, %32 : vector<32x128xf32>
    %cst_33 = arith.constant 0.000000e+00 : f32
    %34 = vector.broadcast %cst_33 : f32 to vector<32x128xf32>
    %35 = arith.maximumf %33, %34 : vector<32x128xf32>
    %36 = arith.truncf %35 : vector<32x128xf32> to vector<32x128xbf16>
    %c0_34 = arith.constant 0 : index
    %c0_35 = arith.constant 0 : index
    %c0_36 = arith.constant 0 : index
    %37 = vector.load %arg13[%c0_34, %c0_35, %c0_36] : memref<1x32x128xbf16, #tpu.memory_space<vmem>>, vector<1x32x128xbf16>
    %38 = vector.shape_cast %37 : vector<1x32x128xbf16> to vector<32x128xbf16>
    %39 = vector.shape_cast %36 : vector<32x128xbf16> to vector<1x32x128xbf16>
    tpu.vector_store %arg13[%c0_34, %c0_35, %c0_36], %39 {strides = array<i32>} : memref<1x32x128xbf16, #tpu.memory_space<vmem>>, vector<1x32x128xbf16>,
    return
  }
  func.func @transform_0(%arg0: i32) -> (i32, i32, i32) {
    %c0_i32 = arith.constant 0 : i32
    %c0_i32_0 = arith.constant 0 : i32
    %c0_i32_1 = arith.constant 0 : i32
    return %arg0, %c0_i32, %c0_i32_0 : i32, i32, i32
  }
  func.func @transform_1(%arg0: i32) -> (i32, i32, i32) {
    %c0_i32 = arith.constant 0 : i32
    %c0_i32_0 = arith.constant 0 : i32
    %c0_i32_1 = arith.constant 0 : i32
    return %arg0, %c0_i32, %c0_i32_0 : i32, i32, i32
  }
  func.func @transform_2(%arg0: i32) -> (i32, i32, i32) {
    %c0_i32 = arith.constant 0 : i32
    %c0_i32_0 = arith.constant 0 : i32
    %c0_i32_1 = arith.constant 0 : i32
    return %arg0, %c0_i32, %c0_i32_0 : i32, i32, i32
  }
  func.func @transform_3(%arg0: i32) -> (i32, i32, i32) {
    %c0_i32 = arith.constant 0 : i32
    %c0_i32_0 = arith.constant 0 : i32
    %c0_i32_1 = arith.constant 0 : i32
    return %arg0, %c0_i32, %c0_i32_0 : i32, i32, i32
  }
  func.func @transform_4(%arg0: i32) -> (i32, i32) {
    %c0_i32 = arith.constant 0 : i32
    %c0_i32_0 = arith.constant 0 : i32
    %c0_i32_1 = arith.constant 0 : i32
    return %c0_i32, %c0_i32_0 : i32, i32
  }
  func.func @transform_5(%arg0: i32) -> (i32, i32) {
    %c0_i32 = arith.constant 0 : i32
    %c0_i32_0 = arith.constant 0 : i32
    %c0_i32_1 = arith.constant 0 : i32
    return %c0_i32, %c0_i32_0 : i32, i32
  }
  func.func @transform_6(%arg0: i32) -> (i32, i32) {
    %c0_i32 = arith.constant 0 : i32
    %c0_i32_0 = arith.constant 0 : i32
    %c0_i32_1 = arith.constant 0 : i32
    return %c0_i32, %c0_i32_0 : i32, i32
  }
  func.func @transform_7(%arg0: i32) -> (i32, i32) {
    %c0_i32 = arith.constant 0 : i32
    %c0_i32_0 = arith.constant 0 : i32
    %c0_i32_1 = arith.constant 0 : i32
    return %c0_i32, %c0_i32_0 : i32, i32
  }
  func.func @transform_8(%arg0: i32) -> (i32, i32) {
    %c0_i32 = arith.constant 0 : i32
    %c0_i32_0 = arith.constant 0 : i32
    %c0_i32_1 = arith.constant 0 : i32
    return %c0_i32, %c0_i32_0 : i32, i32
  }
  func.func @transform_9(%arg0: i32) -> (i32, i32) {
    %c0_i32 = arith.constant 0 : i32
    %c0_i32_0 = arith.constant 0 : i32
    %c0_i32_1 = arith.constant 0 : i32
    return %c0_i32, %c0_i32_0 : i32, i32
  }
  func.func @transform_10(%arg0: i32) -> (i32, i32) {
    %c0_i32 = arith.constant 0 : i32
    %c0_i32_0 = arith.constant 0 : i32
    %c0_i32_1 = arith.constant 0 : i32
    return %c0_i32, %c0_i32_0 : i32, i32
  }
  func.func @transform_11(%arg0: i32) -> (i32, i32, i32) {
    %c0_i32 = arith.constant 0 : i32
    %c0_i32_0 = arith.constant 0 : i32
    %c0_i32_1 = arith.constant 0 : i32
    return %arg0, %c0_i32, %c0_i32_0 : i32, i32, i32
  }
  func.func @transform_12(%arg0: i32) -> (i32, i32, i32) {
    %c0_i32 = arith.constant 0 : i32
    %c0_i32_0 = arith.constant 0 : i32
    %c0_i32_1 = arith.constant 0 : i32
    return %arg0, %c0_i32, %c0_i32_0 : i32, i32, i32
  }
}

module attributes {stable_mosaic.version = 11 : i64} {
  func.func @_pyramid_level_kernel(%arg0: i32, %arg1: memref<1x16x128xbf16, #tpu.memory_space<vmem>>, %arg2: memref<1x16x128xbf16, #tpu.memory_space<vmem>>, %arg3: memref<1x16x128xbf16, #tpu.memory_space<vmem>>, %arg4: memref<1x16x128xbf16, #tpu.memory_space<vmem>>, %arg5: memref<128x128xbf16, #tpu.memory_space<vmem>>, %arg6: memref<128x128xbf16, #tpu.memory_space<vmem>>, %arg7: memref<128x128xbf16, #tpu.memory_space<vmem>>, %arg8: memref<1x128xf32, #tpu.memory_space<vmem>>, %arg9: memref<128x128xbf16, #tpu.memory_space<vmem>>, %arg10: memref<128x128xbf16, #tpu.memory_space<vmem>>, %arg11: memref<1x128xf32, #tpu.memory_space<vmem>>, %arg12: memref<1x16x128xbf16, #tpu.memory_space<vmem>>, %arg13: memref<1x16x128xbf16, #tpu.memory_space<vmem>>) attributes {dimension_semantics = [#tpu.dimension_semantics<parallel>], iteration_bounds = array<i64: 2>, scalar_prefetch = 0 : i64, scratch_operands = 0 : i64, tpu.core_type = #tpu.core_type<tc>, window_params = [{transform_indices = @transform_0, window_bounds = array<i64: 1, 16, 128>}, {transform_indices = @transform_1, window_bounds = array<i64: 1, 16, 128>}, {transform_indices = @transform_2, window_bounds = array<i64: 1, 16, 128>}, {transform_indices = @transform_3, window_bounds = array<i64: 1, 16, 128>}, {pipeline_mode = #tpu.pipeline_mode<synchronous>, transform_indices = @transform_4, window_bounds = array<i64: 128, 128>}, {pipeline_mode = #tpu.pipeline_mode<synchronous>, transform_indices = @transform_5, window_bounds = array<i64: 128, 128>}, {pipeline_mode = #tpu.pipeline_mode<synchronous>, transform_indices = @transform_6, window_bounds = array<i64: 128, 128>}, {pipeline_mode = #tpu.pipeline_mode<synchronous>, transform_indices = @transform_7, window_bounds = array<i64: 1, 128>}, {pipeline_mode = #tpu.pipeline_mode<synchronous>, transform_indices = @transform_8, window_bounds = array<i64: 128, 128>}, {pipeline_mode = #tpu.pipeline_mode<synchronous>, transform_indices = @transform_9, window_bounds = array<i64: 128, 128>}, {pipeline_mode = #tpu.pipeline_mode<synchronous>, transform_indices = @transform_10, window_bounds = array<i64: 1, 128>}, {transform_indices = @transform_11, window_bounds = array<i64: 1, 16, 128>}, {transform_indices = @transform_12, window_bounds = array<i64: 1, 16, 128>}]} {
    %c0 = arith.constant 0 : index
    %c0_0 = arith.constant 0 : index
    %c0_1 = arith.constant 0 : index
    %0 = vector.load %arg1[%c0, %c0_0, %c0_1] : memref<1x16x128xbf16, #tpu.memory_space<vmem>>, vector<1x16x128xbf16>
    %1 = vector.shape_cast %0 : vector<1x16x128xbf16> to vector<16x128xbf16>
    %c0_2 = arith.constant 0 : index
    %c0_3 = arith.constant 0 : index
    %2 = vector.load %arg5[%c0_2, %c0_3] : memref<128x128xbf16, #tpu.memory_space<vmem>>, vector<128x128xbf16>
    %cst = arith.constant dense<0.000000e+00> : vector<16x128xf32>
    %3 = tpu.matmul %1, %2, %cst {dimension_numbers = #tpu.dot_dimension_numbers<[1], [0], [0], [1], [0, 0, 1, 1], [], []>} : vector<16x128xbf16>, vector<128x128xbf16>, vector<16x128xf32> -> vector<16x128xf32>
    %c0_4 = arith.constant 0 : index
    %c0_5 = arith.constant 0 : index
    %c0_6 = arith.constant 0 : index
    %4 = vector.load %arg2[%c0_4, %c0_5, %c0_6] : memref<1x16x128xbf16, #tpu.memory_space<vmem>>, vector<1x16x128xbf16>
    %5 = vector.shape_cast %4 : vector<1x16x128xbf16> to vector<16x128xbf16>
    %c0_7 = arith.constant 0 : index
    %c0_8 = arith.constant 0 : index
    %6 = vector.load %arg6[%c0_7, %c0_8] : memref<128x128xbf16, #tpu.memory_space<vmem>>, vector<128x128xbf16>
    %cst_9 = arith.constant dense<0.000000e+00> : vector<16x128xf32>
    %7 = tpu.matmul %5, %6, %cst_9 {dimension_numbers = #tpu.dot_dimension_numbers<[1], [0], [0], [1], [0, 0, 1, 1], [], []>} : vector<16x128xbf16>, vector<128x128xbf16>, vector<16x128xf32> -> vector<16x128xf32>
    %8 = arith.addf %3, %7 : vector<16x128xf32>
    %c0_10 = arith.constant 0 : index
    %c0_11 = arith.constant 0 : index
    %c0_12 = arith.constant 0 : index
    %9 = vector.load %arg3[%c0_10, %c0_11, %c0_12] : memref<1x16x128xbf16, #tpu.memory_space<vmem>>, vector<1x16x128xbf16>
    %10 = vector.shape_cast %9 : vector<1x16x128xbf16> to vector<16x128xbf16>
    %c0_13 = arith.constant 0 : index
    %c0_14 = arith.constant 0 : index
    %11 = vector.load %arg7[%c0_13, %c0_14] : memref<128x128xbf16, #tpu.memory_space<vmem>>, vector<128x128xbf16>
    %cst_15 = arith.constant dense<0.000000e+00> : vector<16x128xf32>
    %12 = tpu.matmul %10, %11, %cst_15 {dimension_numbers = #tpu.dot_dimension_numbers<[1], [0], [0], [1], [0, 0, 1, 1], [], []>} : vector<16x128xbf16>, vector<128x128xbf16>, vector<16x128xf32> -> vector<16x128xf32>
    %13 = arith.addf %8, %12 : vector<16x128xf32>
    %c0_16 = arith.constant 0 : index
    %c0_17 = arith.constant 0 : index
    %14 = vector.load %arg8[%c0_16, %c0_17] : memref<1x128xf32, #tpu.memory_space<vmem>>, vector<1x128xf32>
    %15 = vector.broadcast %14 : vector<1x128xf32> to vector<16x128xf32>
    %16 = arith.addf %13, %15 : vector<16x128xf32>
    %cst_18 = arith.constant 0.000000e+00 : f32
    %17 = vector.broadcast %cst_18 : f32 to vector<16x128xf32>
    %18 = arith.maximumf %16, %17 : vector<16x128xf32>
    %19 = arith.truncf %18 : vector<16x128xf32> to vector<16x128xbf16>
    %c0_19 = arith.constant 0 : index
    %c0_20 = arith.constant 0 : index
    %c0_21 = arith.constant 0 : index
    %20 = vector.load %arg12[%c0_19, %c0_20, %c0_21] : memref<1x16x128xbf16, #tpu.memory_space<vmem>>, vector<1x16x128xbf16>
    %21 = vector.shape_cast %20 : vector<1x16x128xbf16> to vector<16x128xbf16>
    %22 = vector.shape_cast %19 : vector<16x128xbf16> to vector<1x16x128xbf16>
    tpu.vector_store %arg12[%c0_19, %c0_20, %c0_21], %22 {strides = array<i32>} : memref<1x16x128xbf16, #tpu.memory_space<vmem>>, vector<1x16x128xbf16>,
    %23 = arith.truncf %18 : vector<16x128xf32> to vector<16x128xbf16>
    %c0_22 = arith.constant 0 : index
    %c0_23 = arith.constant 0 : index
    %24 = vector.load %arg9[%c0_22, %c0_23] : memref<128x128xbf16, #tpu.memory_space<vmem>>, vector<128x128xbf16>
    %cst_24 = arith.constant dense<0.000000e+00> : vector<16x128xf32>
    %25 = tpu.matmul %23, %24, %cst_24 {dimension_numbers = #tpu.dot_dimension_numbers<[1], [0], [0], [1], [0, 0, 1, 1], [], []>} : vector<16x128xbf16>, vector<128x128xbf16>, vector<16x128xf32> -> vector<16x128xf32>
    %c0_25 = arith.constant 0 : index
    %c0_26 = arith.constant 0 : index
    %c0_27 = arith.constant 0 : index
    %26 = vector.load %arg4[%c0_25, %c0_26, %c0_27] : memref<1x16x128xbf16, #tpu.memory_space<vmem>>, vector<1x16x128xbf16>
    %27 = vector.shape_cast %26 : vector<1x16x128xbf16> to vector<16x128xbf16>
    %c0_28 = arith.constant 0 : index
    %c0_29 = arith.constant 0 : index
    %28 = vector.load %arg10[%c0_28, %c0_29] : memref<128x128xbf16, #tpu.memory_space<vmem>>, vector<128x128xbf16>
    %cst_30 = arith.constant dense<0.000000e+00> : vector<16x128xf32>
    %29 = tpu.matmul %27, %28, %cst_30 {dimension_numbers = #tpu.dot_dimension_numbers<[1], [0], [0], [1], [0, 0, 1, 1], [], []>} : vector<16x128xbf16>, vector<128x128xbf16>, vector<16x128xf32> -> vector<16x128xf32>
    %30 = arith.addf %25, %29 : vector<16x128xf32>
    %c0_31 = arith.constant 0 : index
    %c0_32 = arith.constant 0 : index
    %31 = vector.load %arg11[%c0_31, %c0_32] : memref<1x128xf32, #tpu.memory_space<vmem>>, vector<1x128xf32>
    %32 = vector.broadcast %31 : vector<1x128xf32> to vector<16x128xf32>
    %33 = arith.addf %30, %32 : vector<16x128xf32>
    %cst_33 = arith.constant 0.000000e+00 : f32
    %34 = vector.broadcast %cst_33 : f32 to vector<16x128xf32>
    %35 = arith.maximumf %33, %34 : vector<16x128xf32>
    %36 = arith.truncf %35 : vector<16x128xf32> to vector<16x128xbf16>
    %c0_34 = arith.constant 0 : index
    %c0_35 = arith.constant 0 : index
    %c0_36 = arith.constant 0 : index
    %37 = vector.load %arg13[%c0_34, %c0_35, %c0_36] : memref<1x16x128xbf16, #tpu.memory_space<vmem>>, vector<1x16x128xbf16>
    %38 = vector.shape_cast %37 : vector<1x16x128xbf16> to vector<16x128xbf16>
    %39 = vector.shape_cast %36 : vector<16x128xbf16> to vector<1x16x128xbf16>
    tpu.vector_store %arg13[%c0_34, %c0_35, %c0_36], %39 {strides = array<i32>} : memref<1x16x128xbf16, #tpu.memory_space<vmem>>, vector<1x16x128xbf16>,
    return
  }
  func.func @transform_0(%arg0: i32) -> (i32, i32, i32) {
    %c0_i32 = arith.constant 0 : i32
    %c0_i32_0 = arith.constant 0 : i32
    %c0_i32_1 = arith.constant 0 : i32
    return %arg0, %c0_i32, %c0_i32_0 : i32, i32, i32
  }
  func.func @transform_1(%arg0: i32) -> (i32, i32, i32) {
    %c0_i32 = arith.constant 0 : i32
    %c0_i32_0 = arith.constant 0 : i32
    %c0_i32_1 = arith.constant 0 : i32
    return %arg0, %c0_i32, %c0_i32_0 : i32, i32, i32
  }
  func.func @transform_2(%arg0: i32) -> (i32, i32, i32) {
    %c0_i32 = arith.constant 0 : i32
    %c0_i32_0 = arith.constant 0 : i32
    %c0_i32_1 = arith.constant 0 : i32
    return %arg0, %c0_i32, %c0_i32_0 : i32, i32, i32
  }
  func.func @transform_3(%arg0: i32) -> (i32, i32, i32) {
    %c0_i32 = arith.constant 0 : i32
    %c0_i32_0 = arith.constant 0 : i32
    %c0_i32_1 = arith.constant 0 : i32
    return %arg0, %c0_i32, %c0_i32_0 : i32, i32, i32
  }
  func.func @transform_4(%arg0: i32) -> (i32, i32) {
    %c0_i32 = arith.constant 0 : i32
    %c0_i32_0 = arith.constant 0 : i32
    %c0_i32_1 = arith.constant 0 : i32
    return %c0_i32, %c0_i32_0 : i32, i32
  }
  func.func @transform_5(%arg0: i32) -> (i32, i32) {
    %c0_i32 = arith.constant 0 : i32
    %c0_i32_0 = arith.constant 0 : i32
    %c0_i32_1 = arith.constant 0 : i32
    return %c0_i32, %c0_i32_0 : i32, i32
  }
  func.func @transform_6(%arg0: i32) -> (i32, i32) {
    %c0_i32 = arith.constant 0 : i32
    %c0_i32_0 = arith.constant 0 : i32
    %c0_i32_1 = arith.constant 0 : i32
    return %c0_i32, %c0_i32_0 : i32, i32
  }
  func.func @transform_7(%arg0: i32) -> (i32, i32) {
    %c0_i32 = arith.constant 0 : i32
    %c0_i32_0 = arith.constant 0 : i32
    %c0_i32_1 = arith.constant 0 : i32
    return %c0_i32, %c0_i32_0 : i32, i32
  }
  func.func @transform_8(%arg0: i32) -> (i32, i32) {
    %c0_i32 = arith.constant 0 : i32
    %c0_i32_0 = arith.constant 0 : i32
    %c0_i32_1 = arith.constant 0 : i32
    return %c0_i32, %c0_i32_0 : i32, i32
  }
  func.func @transform_9(%arg0: i32) -> (i32, i32) {
    %c0_i32 = arith.constant 0 : i32
    %c0_i32_0 = arith.constant 0 : i32
    %c0_i32_1 = arith.constant 0 : i32
    return %c0_i32, %c0_i32_0 : i32, i32
  }
  func.func @transform_10(%arg0: i32) -> (i32, i32) {
    %c0_i32 = arith.constant 0 : i32
    %c0_i32_0 = arith.constant 0 : i32
    %c0_i32_1 = arith.constant 0 : i32
    return %c0_i32, %c0_i32_0 : i32, i32
  }
  func.func @transform_11(%arg0: i32) -> (i32, i32, i32) {
    %c0_i32 = arith.constant 0 : i32
    %c0_i32_0 = arith.constant 0 : i32
    %c0_i32_1 = arith.constant 0 : i32
    return %arg0, %c0_i32, %c0_i32_0 : i32, i32, i32
  }
  func.func @transform_12(%arg0: i32) -> (i32, i32, i32) {
    %c0_i32 = arith.constant 0 : i32
    %c0_i32_0 = arith.constant 0 : i32
    %c0_i32_1 = arith.constant 0 : i32
    return %arg0, %c0_i32, %c0_i32_0 : i32, i32, i32
  }
}

module attributes {stable_mosaic.version = 11 : i64} {
  func.func @_pyramid_level_kernel(%arg0: i32, %arg1: memref<1x8x128xbf16, #tpu.memory_space<vmem>>, %arg2: memref<1x8x128xbf16, #tpu.memory_space<vmem>>, %arg3: memref<1x8x128xbf16, #tpu.memory_space<vmem>>, %arg4: memref<1x8x128xbf16, #tpu.memory_space<vmem>>, %arg5: memref<128x128xbf16, #tpu.memory_space<vmem>>, %arg6: memref<128x128xbf16, #tpu.memory_space<vmem>>, %arg7: memref<128x128xbf16, #tpu.memory_space<vmem>>, %arg8: memref<1x128xf32, #tpu.memory_space<vmem>>, %arg9: memref<128x128xbf16, #tpu.memory_space<vmem>>, %arg10: memref<128x128xbf16, #tpu.memory_space<vmem>>, %arg11: memref<1x128xf32, #tpu.memory_space<vmem>>, %arg12: memref<1x8x128xbf16, #tpu.memory_space<vmem>>, %arg13: memref<1x8x128xbf16, #tpu.memory_space<vmem>>) attributes {dimension_semantics = [#tpu.dimension_semantics<parallel>], iteration_bounds = array<i64: 2>, scalar_prefetch = 0 : i64, scratch_operands = 0 : i64, tpu.core_type = #tpu.core_type<tc>, window_params = [{transform_indices = @transform_0, window_bounds = array<i64: 1, 8, 128>}, {transform_indices = @transform_1, window_bounds = array<i64: 1, 8, 128>}, {transform_indices = @transform_2, window_bounds = array<i64: 1, 8, 128>}, {transform_indices = @transform_3, window_bounds = array<i64: 1, 8, 128>}, {pipeline_mode = #tpu.pipeline_mode<synchronous>, transform_indices = @transform_4, window_bounds = array<i64: 128, 128>}, {pipeline_mode = #tpu.pipeline_mode<synchronous>, transform_indices = @transform_5, window_bounds = array<i64: 128, 128>}, {pipeline_mode = #tpu.pipeline_mode<synchronous>, transform_indices = @transform_6, window_bounds = array<i64: 128, 128>}, {pipeline_mode = #tpu.pipeline_mode<synchronous>, transform_indices = @transform_7, window_bounds = array<i64: 1, 128>}, {pipeline_mode = #tpu.pipeline_mode<synchronous>, transform_indices = @transform_8, window_bounds = array<i64: 128, 128>}, {pipeline_mode = #tpu.pipeline_mode<synchronous>, transform_indices = @transform_9, window_bounds = array<i64: 128, 128>}, {pipeline_mode = #tpu.pipeline_mode<synchronous>, transform_indices = @transform_10, window_bounds = array<i64: 1, 128>}, {transform_indices = @transform_11, window_bounds = array<i64: 1, 8, 128>}, {transform_indices = @transform_12, window_bounds = array<i64: 1, 8, 128>}]} {
    %c0 = arith.constant 0 : index
    %c0_0 = arith.constant 0 : index
    %c0_1 = arith.constant 0 : index
    %0 = vector.load %arg1[%c0, %c0_0, %c0_1] : memref<1x8x128xbf16, #tpu.memory_space<vmem>>, vector<1x8x128xbf16>
    %1 = vector.shape_cast %0 : vector<1x8x128xbf16> to vector<8x128xbf16>
    %c0_2 = arith.constant 0 : index
    %c0_3 = arith.constant 0 : index
    %2 = vector.load %arg5[%c0_2, %c0_3] : memref<128x128xbf16, #tpu.memory_space<vmem>>, vector<128x128xbf16>
    %cst = arith.constant dense<0.000000e+00> : vector<8x128xf32>
    %3 = tpu.matmul %1, %2, %cst {dimension_numbers = #tpu.dot_dimension_numbers<[1], [0], [0], [1], [0, 0, 1, 1], [], []>} : vector<8x128xbf16>, vector<128x128xbf16>, vector<8x128xf32> -> vector<8x128xf32>
    %c0_4 = arith.constant 0 : index
    %c0_5 = arith.constant 0 : index
    %c0_6 = arith.constant 0 : index
    %4 = vector.load %arg2[%c0_4, %c0_5, %c0_6] : memref<1x8x128xbf16, #tpu.memory_space<vmem>>, vector<1x8x128xbf16>
    %5 = vector.shape_cast %4 : vector<1x8x128xbf16> to vector<8x128xbf16>
    %c0_7 = arith.constant 0 : index
    %c0_8 = arith.constant 0 : index
    %6 = vector.load %arg6[%c0_7, %c0_8] : memref<128x128xbf16, #tpu.memory_space<vmem>>, vector<128x128xbf16>
    %cst_9 = arith.constant dense<0.000000e+00> : vector<8x128xf32>
    %7 = tpu.matmul %5, %6, %cst_9 {dimension_numbers = #tpu.dot_dimension_numbers<[1], [0], [0], [1], [0, 0, 1, 1], [], []>} : vector<8x128xbf16>, vector<128x128xbf16>, vector<8x128xf32> -> vector<8x128xf32>
    %8 = arith.addf %3, %7 : vector<8x128xf32>
    %c0_10 = arith.constant 0 : index
    %c0_11 = arith.constant 0 : index
    %c0_12 = arith.constant 0 : index
    %9 = vector.load %arg3[%c0_10, %c0_11, %c0_12] : memref<1x8x128xbf16, #tpu.memory_space<vmem>>, vector<1x8x128xbf16>
    %10 = vector.shape_cast %9 : vector<1x8x128xbf16> to vector<8x128xbf16>
    %c0_13 = arith.constant 0 : index
    %c0_14 = arith.constant 0 : index
    %11 = vector.load %arg7[%c0_13, %c0_14] : memref<128x128xbf16, #tpu.memory_space<vmem>>, vector<128x128xbf16>
    %cst_15 = arith.constant dense<0.000000e+00> : vector<8x128xf32>
    %12 = tpu.matmul %10, %11, %cst_15 {dimension_numbers = #tpu.dot_dimension_numbers<[1], [0], [0], [1], [0, 0, 1, 1], [], []>} : vector<8x128xbf16>, vector<128x128xbf16>, vector<8x128xf32> -> vector<8x128xf32>
    %13 = arith.addf %8, %12 : vector<8x128xf32>
    %c0_16 = arith.constant 0 : index
    %c0_17 = arith.constant 0 : index
    %14 = vector.load %arg8[%c0_16, %c0_17] : memref<1x128xf32, #tpu.memory_space<vmem>>, vector<1x128xf32>
    %15 = vector.broadcast %14 : vector<1x128xf32> to vector<8x128xf32>
    %16 = arith.addf %13, %15 : vector<8x128xf32>
    %cst_18 = arith.constant 0.000000e+00 : f32
    %17 = vector.broadcast %cst_18 : f32 to vector<8x128xf32>
    %18 = arith.maximumf %16, %17 : vector<8x128xf32>
    %19 = arith.truncf %18 : vector<8x128xf32> to vector<8x128xbf16>
    %c0_19 = arith.constant 0 : index
    %c0_20 = arith.constant 0 : index
    %c0_21 = arith.constant 0 : index
    %20 = vector.load %arg12[%c0_19, %c0_20, %c0_21] : memref<1x8x128xbf16, #tpu.memory_space<vmem>>, vector<1x8x128xbf16>
    %21 = vector.shape_cast %20 : vector<1x8x128xbf16> to vector<8x128xbf16>
    %22 = vector.shape_cast %19 : vector<8x128xbf16> to vector<1x8x128xbf16>
    tpu.vector_store %arg12[%c0_19, %c0_20, %c0_21], %22 {strides = array<i32>} : memref<1x8x128xbf16, #tpu.memory_space<vmem>>, vector<1x8x128xbf16>,
    %23 = arith.truncf %18 : vector<8x128xf32> to vector<8x128xbf16>
    %c0_22 = arith.constant 0 : index
    %c0_23 = arith.constant 0 : index
    %24 = vector.load %arg9[%c0_22, %c0_23] : memref<128x128xbf16, #tpu.memory_space<vmem>>, vector<128x128xbf16>
    %cst_24 = arith.constant dense<0.000000e+00> : vector<8x128xf32>
    %25 = tpu.matmul %23, %24, %cst_24 {dimension_numbers = #tpu.dot_dimension_numbers<[1], [0], [0], [1], [0, 0, 1, 1], [], []>} : vector<8x128xbf16>, vector<128x128xbf16>, vector<8x128xf32> -> vector<8x128xf32>
    %c0_25 = arith.constant 0 : index
    %c0_26 = arith.constant 0 : index
    %c0_27 = arith.constant 0 : index
    %26 = vector.load %arg4[%c0_25, %c0_26, %c0_27] : memref<1x8x128xbf16, #tpu.memory_space<vmem>>, vector<1x8x128xbf16>
    %27 = vector.shape_cast %26 : vector<1x8x128xbf16> to vector<8x128xbf16>
    %c0_28 = arith.constant 0 : index
    %c0_29 = arith.constant 0 : index
    %28 = vector.load %arg10[%c0_28, %c0_29] : memref<128x128xbf16, #tpu.memory_space<vmem>>, vector<128x128xbf16>
    %cst_30 = arith.constant dense<0.000000e+00> : vector<8x128xf32>
    %29 = tpu.matmul %27, %28, %cst_30 {dimension_numbers = #tpu.dot_dimension_numbers<[1], [0], [0], [1], [0, 0, 1, 1], [], []>} : vector<8x128xbf16>, vector<128x128xbf16>, vector<8x128xf32> -> vector<8x128xf32>
    %30 = arith.addf %25, %29 : vector<8x128xf32>
    %c0_31 = arith.constant 0 : index
    %c0_32 = arith.constant 0 : index
    %31 = vector.load %arg11[%c0_31, %c0_32] : memref<1x128xf32, #tpu.memory_space<vmem>>, vector<1x128xf32>
    %32 = vector.broadcast %31 : vector<1x128xf32> to vector<8x128xf32>
    %33 = arith.addf %30, %32 : vector<8x128xf32>
    %cst_33 = arith.constant 0.000000e+00 : f32
    %34 = vector.broadcast %cst_33 : f32 to vector<8x128xf32>
    %35 = arith.maximumf %33, %34 : vector<8x128xf32>
    %36 = arith.truncf %35 : vector<8x128xf32> to vector<8x128xbf16>
    %c0_34 = arith.constant 0 : index
    %c0_35 = arith.constant 0 : index
    %c0_36 = arith.constant 0 : index
    %37 = vector.load %arg13[%c0_34, %c0_35, %c0_36] : memref<1x8x128xbf16, #tpu.memory_space<vmem>>, vector<1x8x128xbf16>
    %38 = vector.shape_cast %37 : vector<1x8x128xbf16> to vector<8x128xbf16>
    %39 = vector.shape_cast %36 : vector<8x128xbf16> to vector<1x8x128xbf16>
    tpu.vector_store %arg13[%c0_34, %c0_35, %c0_36], %39 {strides = array<i32>} : memref<1x8x128xbf16, #tpu.memory_space<vmem>>, vector<1x8x128xbf16>,
    return
  }
  func.func @transform_0(%arg0: i32) -> (i32, i32, i32) {
    %c0_i32 = arith.constant 0 : i32
    %c0_i32_0 = arith.constant 0 : i32
    %c0_i32_1 = arith.constant 0 : i32
    return %arg0, %c0_i32, %c0_i32_0 : i32, i32, i32
  }
  func.func @transform_1(%arg0: i32) -> (i32, i32, i32) {
    %c0_i32 = arith.constant 0 : i32
    %c0_i32_0 = arith.constant 0 : i32
    %c0_i32_1 = arith.constant 0 : i32
    return %arg0, %c0_i32, %c0_i32_0 : i32, i32, i32
  }
  func.func @transform_2(%arg0: i32) -> (i32, i32, i32) {
    %c0_i32 = arith.constant 0 : i32
    %c0_i32_0 = arith.constant 0 : i32
    %c0_i32_1 = arith.constant 0 : i32
    return %arg0, %c0_i32, %c0_i32_0 : i32, i32, i32
  }
  func.func @transform_3(%arg0: i32) -> (i32, i32, i32) {
    %c0_i32 = arith.constant 0 : i32
    %c0_i32_0 = arith.constant 0 : i32
    %c0_i32_1 = arith.constant 0 : i32
    return %arg0, %c0_i32, %c0_i32_0 : i32, i32, i32
  }
  func.func @transform_4(%arg0: i32) -> (i32, i32) {
    %c0_i32 = arith.constant 0 : i32
    %c0_i32_0 = arith.constant 0 : i32
    %c0_i32_1 = arith.constant 0 : i32
    return %c0_i32, %c0_i32_0 : i32, i32
  }
  func.func @transform_5(%arg0: i32) -> (i32, i32) {
    %c0_i32 = arith.constant 0 : i32
    %c0_i32_0 = arith.constant 0 : i32
    %c0_i32_1 = arith.constant 0 : i32
    return %c0_i32, %c0_i32_0 : i32, i32
  }
  func.func @transform_6(%arg0: i32) -> (i32, i32) {
    %c0_i32 = arith.constant 0 : i32
    %c0_i32_0 = arith.constant 0 : i32
    %c0_i32_1 = arith.constant 0 : i32
    return %c0_i32, %c0_i32_0 : i32, i32
  }
  func.func @transform_7(%arg0: i32) -> (i32, i32) {
    %c0_i32 = arith.constant 0 : i32
    %c0_i32_0 = arith.constant 0 : i32
    %c0_i32_1 = arith.constant 0 : i32
    return %c0_i32, %c0_i32_0 : i32, i32
  }
  func.func @transform_8(%arg0: i32) -> (i32, i32) {
    %c0_i32 = arith.constant 0 : i32
    %c0_i32_0 = arith.constant 0 : i32
    %c0_i32_1 = arith.constant 0 : i32
    return %c0_i32, %c0_i32_0 : i32, i32
  }
  func.func @transform_9(%arg0: i32) -> (i32, i32) {
    %c0_i32 = arith.constant 0 : i32
    %c0_i32_0 = arith.constant 0 : i32
    %c0_i32_1 = arith.constant 0 : i32
    return %c0_i32, %c0_i32_0 : i32, i32
  }
  func.func @transform_10(%arg0: i32) -> (i32, i32) {
    %c0_i32 = arith.constant 0 : i32
    %c0_i32_0 = arith.constant 0 : i32
    %c0_i32_1 = arith.constant 0 : i32
    return %c0_i32, %c0_i32_0 : i32, i32
  }
  func.func @transform_11(%arg0: i32) -> (i32, i32, i32) {
    %c0_i32 = arith.constant 0 : i32
    %c0_i32_0 = arith.constant 0 : i32
    %c0_i32_1 = arith.constant 0 : i32
    return %arg0, %c0_i32, %c0_i32_0 : i32, i32, i32
  }
  func.func @transform_12(%arg0: i32) -> (i32, i32, i32) {
    %c0_i32 = arith.constant 0 : i32
    %c0_i32_0 = arith.constant 0 : i32
    %c0_i32_1 = arith.constant 0 : i32
    return %arg0, %c0_i32, %c0_i32_0 : i32, i32, i32
  }
}

module attributes {stable_mosaic.version = 11 : i64} {
  func.func @_pyramid_level_kernel(%arg0: i32, %arg1: memref<1x4x128xbf16, #tpu.memory_space<vmem>>, %arg2: memref<1x4x128xbf16, #tpu.memory_space<vmem>>, %arg3: memref<1x4x128xbf16, #tpu.memory_space<vmem>>, %arg4: memref<1x4x128xbf16, #tpu.memory_space<vmem>>, %arg5: memref<128x128xbf16, #tpu.memory_space<vmem>>, %arg6: memref<128x128xbf16, #tpu.memory_space<vmem>>, %arg7: memref<128x128xbf16, #tpu.memory_space<vmem>>, %arg8: memref<1x128xf32, #tpu.memory_space<vmem>>, %arg9: memref<128x128xbf16, #tpu.memory_space<vmem>>, %arg10: memref<128x128xbf16, #tpu.memory_space<vmem>>, %arg11: memref<1x128xf32, #tpu.memory_space<vmem>>, %arg12: memref<1x4x128xbf16, #tpu.memory_space<vmem>>, %arg13: memref<1x4x128xbf16, #tpu.memory_space<vmem>>) attributes {dimension_semantics = [#tpu.dimension_semantics<parallel>], iteration_bounds = array<i64: 2>, scalar_prefetch = 0 : i64, scratch_operands = 0 : i64, tpu.core_type = #tpu.core_type<tc>, window_params = [{transform_indices = @transform_0, window_bounds = array<i64: 1, 4, 128>}, {transform_indices = @transform_1, window_bounds = array<i64: 1, 4, 128>}, {transform_indices = @transform_2, window_bounds = array<i64: 1, 4, 128>}, {transform_indices = @transform_3, window_bounds = array<i64: 1, 4, 128>}, {pipeline_mode = #tpu.pipeline_mode<synchronous>, transform_indices = @transform_4, window_bounds = array<i64: 128, 128>}, {pipeline_mode = #tpu.pipeline_mode<synchronous>, transform_indices = @transform_5, window_bounds = array<i64: 128, 128>}, {pipeline_mode = #tpu.pipeline_mode<synchronous>, transform_indices = @transform_6, window_bounds = array<i64: 128, 128>}, {pipeline_mode = #tpu.pipeline_mode<synchronous>, transform_indices = @transform_7, window_bounds = array<i64: 1, 128>}, {pipeline_mode = #tpu.pipeline_mode<synchronous>, transform_indices = @transform_8, window_bounds = array<i64: 128, 128>}, {pipeline_mode = #tpu.pipeline_mode<synchronous>, transform_indices = @transform_9, window_bounds = array<i64: 128, 128>}, {pipeline_mode = #tpu.pipeline_mode<synchronous>, transform_indices = @transform_10, window_bounds = array<i64: 1, 128>}, {transform_indices = @transform_11, window_bounds = array<i64: 1, 4, 128>}, {transform_indices = @transform_12, window_bounds = array<i64: 1, 4, 128>}]} {
    %c0 = arith.constant 0 : index
    %c0_0 = arith.constant 0 : index
    %c0_1 = arith.constant 0 : index
    %0 = vector.load %arg1[%c0, %c0_0, %c0_1] : memref<1x4x128xbf16, #tpu.memory_space<vmem>>, vector<1x4x128xbf16>
    %1 = vector.shape_cast %0 : vector<1x4x128xbf16> to vector<4x128xbf16>
    %c0_2 = arith.constant 0 : index
    %c0_3 = arith.constant 0 : index
    %2 = vector.load %arg5[%c0_2, %c0_3] : memref<128x128xbf16, #tpu.memory_space<vmem>>, vector<128x128xbf16>
    %cst = arith.constant dense<0.000000e+00> : vector<4x128xf32>
    %3 = tpu.matmul %1, %2, %cst {dimension_numbers = #tpu.dot_dimension_numbers<[1], [0], [0], [1], [0, 0, 1, 1], [], []>} : vector<4x128xbf16>, vector<128x128xbf16>, vector<4x128xf32> -> vector<4x128xf32>
    %c0_4 = arith.constant 0 : index
    %c0_5 = arith.constant 0 : index
    %c0_6 = arith.constant 0 : index
    %4 = vector.load %arg2[%c0_4, %c0_5, %c0_6] : memref<1x4x128xbf16, #tpu.memory_space<vmem>>, vector<1x4x128xbf16>
    %5 = vector.shape_cast %4 : vector<1x4x128xbf16> to vector<4x128xbf16>
    %c0_7 = arith.constant 0 : index
    %c0_8 = arith.constant 0 : index
    %6 = vector.load %arg6[%c0_7, %c0_8] : memref<128x128xbf16, #tpu.memory_space<vmem>>, vector<128x128xbf16>
    %cst_9 = arith.constant dense<0.000000e+00> : vector<4x128xf32>
    %7 = tpu.matmul %5, %6, %cst_9 {dimension_numbers = #tpu.dot_dimension_numbers<[1], [0], [0], [1], [0, 0, 1, 1], [], []>} : vector<4x128xbf16>, vector<128x128xbf16>, vector<4x128xf32> -> vector<4x128xf32>
    %8 = arith.addf %3, %7 : vector<4x128xf32>
    %c0_10 = arith.constant 0 : index
    %c0_11 = arith.constant 0 : index
    %c0_12 = arith.constant 0 : index
    %9 = vector.load %arg3[%c0_10, %c0_11, %c0_12] : memref<1x4x128xbf16, #tpu.memory_space<vmem>>, vector<1x4x128xbf16>
    %10 = vector.shape_cast %9 : vector<1x4x128xbf16> to vector<4x128xbf16>
    %c0_13 = arith.constant 0 : index
    %c0_14 = arith.constant 0 : index
    %11 = vector.load %arg7[%c0_13, %c0_14] : memref<128x128xbf16, #tpu.memory_space<vmem>>, vector<128x128xbf16>
    %cst_15 = arith.constant dense<0.000000e+00> : vector<4x128xf32>
    %12 = tpu.matmul %10, %11, %cst_15 {dimension_numbers = #tpu.dot_dimension_numbers<[1], [0], [0], [1], [0, 0, 1, 1], [], []>} : vector<4x128xbf16>, vector<128x128xbf16>, vector<4x128xf32> -> vector<4x128xf32>
    %13 = arith.addf %8, %12 : vector<4x128xf32>
    %c0_16 = arith.constant 0 : index
    %c0_17 = arith.constant 0 : index
    %14 = vector.load %arg8[%c0_16, %c0_17] : memref<1x128xf32, #tpu.memory_space<vmem>>, vector<1x128xf32>
    %15 = vector.broadcast %14 : vector<1x128xf32> to vector<4x128xf32>
    %16 = arith.addf %13, %15 : vector<4x128xf32>
    %cst_18 = arith.constant 0.000000e+00 : f32
    %17 = vector.broadcast %cst_18 : f32 to vector<4x128xf32>
    %18 = arith.maximumf %16, %17 : vector<4x128xf32>
    %19 = arith.truncf %18 : vector<4x128xf32> to vector<4x128xbf16>
    %c0_19 = arith.constant 0 : index
    %c0_20 = arith.constant 0 : index
    %c0_21 = arith.constant 0 : index
    %20 = vector.load %arg12[%c0_19, %c0_20, %c0_21] : memref<1x4x128xbf16, #tpu.memory_space<vmem>>, vector<1x4x128xbf16>
    %21 = vector.shape_cast %20 : vector<1x4x128xbf16> to vector<4x128xbf16>
    %22 = vector.shape_cast %19 : vector<4x128xbf16> to vector<1x4x128xbf16>
    tpu.vector_store %arg12[%c0_19, %c0_20, %c0_21], %22 {strides = array<i32>} : memref<1x4x128xbf16, #tpu.memory_space<vmem>>, vector<1x4x128xbf16>,
    %23 = arith.truncf %18 : vector<4x128xf32> to vector<4x128xbf16>
    %c0_22 = arith.constant 0 : index
    %c0_23 = arith.constant 0 : index
    %24 = vector.load %arg9[%c0_22, %c0_23] : memref<128x128xbf16, #tpu.memory_space<vmem>>, vector<128x128xbf16>
    %cst_24 = arith.constant dense<0.000000e+00> : vector<4x128xf32>
    %25 = tpu.matmul %23, %24, %cst_24 {dimension_numbers = #tpu.dot_dimension_numbers<[1], [0], [0], [1], [0, 0, 1, 1], [], []>} : vector<4x128xbf16>, vector<128x128xbf16>, vector<4x128xf32> -> vector<4x128xf32>
    %c0_25 = arith.constant 0 : index
    %c0_26 = arith.constant 0 : index
    %c0_27 = arith.constant 0 : index
    %26 = vector.load %arg4[%c0_25, %c0_26, %c0_27] : memref<1x4x128xbf16, #tpu.memory_space<vmem>>, vector<1x4x128xbf16>
    %27 = vector.shape_cast %26 : vector<1x4x128xbf16> to vector<4x128xbf16>
    %c0_28 = arith.constant 0 : index
    %c0_29 = arith.constant 0 : index
    %28 = vector.load %arg10[%c0_28, %c0_29] : memref<128x128xbf16, #tpu.memory_space<vmem>>, vector<128x128xbf16>
    %cst_30 = arith.constant dense<0.000000e+00> : vector<4x128xf32>
    %29 = tpu.matmul %27, %28, %cst_30 {dimension_numbers = #tpu.dot_dimension_numbers<[1], [0], [0], [1], [0, 0, 1, 1], [], []>} : vector<4x128xbf16>, vector<128x128xbf16>, vector<4x128xf32> -> vector<4x128xf32>
    %30 = arith.addf %25, %29 : vector<4x128xf32>
    %c0_31 = arith.constant 0 : index
    %c0_32 = arith.constant 0 : index
    %31 = vector.load %arg11[%c0_31, %c0_32] : memref<1x128xf32, #tpu.memory_space<vmem>>, vector<1x128xf32>
    %32 = vector.broadcast %31 : vector<1x128xf32> to vector<4x128xf32>
    %33 = arith.addf %30, %32 : vector<4x128xf32>
    %cst_33 = arith.constant 0.000000e+00 : f32
    %34 = vector.broadcast %cst_33 : f32 to vector<4x128xf32>
    %35 = arith.maximumf %33, %34 : vector<4x128xf32>
    %36 = arith.truncf %35 : vector<4x128xf32> to vector<4x128xbf16>
    %c0_34 = arith.constant 0 : index
    %c0_35 = arith.constant 0 : index
    %c0_36 = arith.constant 0 : index
    %37 = vector.load %arg13[%c0_34, %c0_35, %c0_36] : memref<1x4x128xbf16, #tpu.memory_space<vmem>>, vector<1x4x128xbf16>
    %38 = vector.shape_cast %37 : vector<1x4x128xbf16> to vector<4x128xbf16>
    %39 = vector.shape_cast %36 : vector<4x128xbf16> to vector<1x4x128xbf16>
    tpu.vector_store %arg13[%c0_34, %c0_35, %c0_36], %39 {strides = array<i32>} : memref<1x4x128xbf16, #tpu.memory_space<vmem>>, vector<1x4x128xbf16>,
    return
  }
  func.func @transform_0(%arg0: i32) -> (i32, i32, i32) {
    %c0_i32 = arith.constant 0 : i32
    %c0_i32_0 = arith.constant 0 : i32
    %c0_i32_1 = arith.constant 0 : i32
    return %arg0, %c0_i32, %c0_i32_0 : i32, i32, i32
  }
  func.func @transform_1(%arg0: i32) -> (i32, i32, i32) {
    %c0_i32 = arith.constant 0 : i32
    %c0_i32_0 = arith.constant 0 : i32
    %c0_i32_1 = arith.constant 0 : i32
    return %arg0, %c0_i32, %c0_i32_0 : i32, i32, i32
  }
  func.func @transform_2(%arg0: i32) -> (i32, i32, i32) {
    %c0_i32 = arith.constant 0 : i32
    %c0_i32_0 = arith.constant 0 : i32
    %c0_i32_1 = arith.constant 0 : i32
    return %arg0, %c0_i32, %c0_i32_0 : i32, i32, i32
  }
  func.func @transform_3(%arg0: i32) -> (i32, i32, i32) {
    %c0_i32 = arith.constant 0 : i32
    %c0_i32_0 = arith.constant 0 : i32
    %c0_i32_1 = arith.constant 0 : i32
    return %arg0, %c0_i32, %c0_i32_0 : i32, i32, i32
  }
  func.func @transform_4(%arg0: i32) -> (i32, i32) {
    %c0_i32 = arith.constant 0 : i32
    %c0_i32_0 = arith.constant 0 : i32
    %c0_i32_1 = arith.constant 0 : i32
    return %c0_i32, %c0_i32_0 : i32, i32
  }
  func.func @transform_5(%arg0: i32) -> (i32, i32) {
    %c0_i32 = arith.constant 0 : i32
    %c0_i32_0 = arith.constant 0 : i32
    %c0_i32_1 = arith.constant 0 : i32
    return %c0_i32, %c0_i32_0 : i32, i32
  }
  func.func @transform_6(%arg0: i32) -> (i32, i32) {
    %c0_i32 = arith.constant 0 : i32
    %c0_i32_0 = arith.constant 0 : i32
    %c0_i32_1 = arith.constant 0 : i32
    return %c0_i32, %c0_i32_0 : i32, i32
  }
  func.func @transform_7(%arg0: i32) -> (i32, i32) {
    %c0_i32 = arith.constant 0 : i32
    %c0_i32_0 = arith.constant 0 : i32
    %c0_i32_1 = arith.constant 0 : i32
    return %c0_i32, %c0_i32_0 : i32, i32
  }
  func.func @transform_8(%arg0: i32) -> (i32, i32) {
    %c0_i32 = arith.constant 0 : i32
    %c0_i32_0 = arith.constant 0 : i32
    %c0_i32_1 = arith.constant 0 : i32
    return %c0_i32, %c0_i32_0 : i32, i32
  }
  func.func @transform_9(%arg0: i32) -> (i32, i32) {
    %c0_i32 = arith.constant 0 : i32
    %c0_i32_0 = arith.constant 0 : i32
    %c0_i32_1 = arith.constant 0 : i32
    return %c0_i32, %c0_i32_0 : i32, i32
  }
  func.func @transform_10(%arg0: i32) -> (i32, i32) {
    %c0_i32 = arith.constant 0 : i32
    %c0_i32_0 = arith.constant 0 : i32
    %c0_i32_1 = arith.constant 0 : i32
    return %c0_i32, %c0_i32_0 : i32, i32
  }
  func.func @transform_11(%arg0: i32) -> (i32, i32, i32) {
    %c0_i32 = arith.constant 0 : i32
    %c0_i32_0 = arith.constant 0 : i32
    %c0_i32_1 = arith.constant 0 : i32
    return %arg0, %c0_i32, %c0_i32_0 : i32, i32, i32
  }
  func.func @transform_12(%arg0: i32) -> (i32, i32, i32) {
    %c0_i32 = arith.constant 0 : i32
    %c0_i32_0 = arith.constant 0 : i32
    %c0_i32_1 = arith.constant 0 : i32
    return %arg0, %c0_i32, %c0_i32_0 : i32, i32, i32
  }
}

module attributes {stable_mosaic.version = 11 : i64} {
  func.func @_head_kernel(%arg0: i32, %arg1: memref<1x72x128xbf16, #tpu.memory_space<vmem>>, %arg2: memref<3x128x256xf32, #tpu.memory_space<vmem>>, %arg3: memref<1x256xf32, #tpu.memory_space<vmem>>, %arg4: memref<3x256x256xf32, #tpu.memory_space<vmem>>, %arg5: memref<1x256xf32, #tpu.memory_space<vmem>>, %arg6: memref<3x256x128xf32, #tpu.memory_space<vmem>>, %arg7: memref<1x128xf32, #tpu.memory_space<vmem>>, %arg8: memref<1x72x128xf32, #tpu.memory_space<vmem>>) attributes {dimension_semantics = [#tpu.dimension_semantics<parallel>], iteration_bounds = array<i64: 2>, scalar_prefetch = 0 : i64, scratch_operands = 0 : i64, tpu.core_type = #tpu.core_type<tc>, window_params = [{transform_indices = @transform_0, window_bounds = array<i64: 1, 72, 128>}, {pipeline_mode = #tpu.pipeline_mode<synchronous>, transform_indices = @transform_1, window_bounds = array<i64: 3, 128, 256>}, {pipeline_mode = #tpu.pipeline_mode<synchronous>, transform_indices = @transform_2, window_bounds = array<i64: 1, 256>}, {pipeline_mode = #tpu.pipeline_mode<synchronous>, transform_indices = @transform_3, window_bounds = array<i64: 3, 256, 256>}, {pipeline_mode = #tpu.pipeline_mode<synchronous>, transform_indices = @transform_4, window_bounds = array<i64: 1, 256>}, {pipeline_mode = #tpu.pipeline_mode<synchronous>, transform_indices = @transform_5, window_bounds = array<i64: 3, 256, 128>}, {pipeline_mode = #tpu.pipeline_mode<synchronous>, transform_indices = @transform_6, window_bounds = array<i64: 1, 128>}, {transform_indices = @transform_7, window_bounds = array<i64: 1, 72, 128>}]} {
    %0 = tpu.iota {dimensions = array<i32: 0>} : vector<72x1xi32>
    %c64_i32 = arith.constant 64 : i32
    %1 = vector.broadcast %c64_i32 : i32 to vector<72x1xi32>
    %2 = arith.cmpi sge, %0, %1 : vector<72x1xi32>
    %c0_i32 = arith.constant 0 : i32
    %3 = vector.broadcast %c0_i32 : i32 to vector<72x1xi32>
    %4 = arith.cmpi eq, %0, %3 : vector<72x1xi32>
    %5 = arith.ori %2, %4 : vector<72x1xi1>
    %c33_i32 = arith.constant 33 : i32
    %6 = vector.broadcast %c33_i32 : i32 to vector<72x1xi32>
    %7 = arith.cmpi eq, %0, %6 : vector<72x1xi32>
    %8 = arith.ori %5, %7 : vector<72x1xi1>
    %c50_i32 = arith.constant 50 : i32
    %9 = vector.broadcast %c50_i32 : i32 to vector<72x1xi32>
    %10 = arith.cmpi eq, %0, %9 : vector<72x1xi32>
    %11 = arith.ori %8, %10 : vector<72x1xi1>
    %c59_i32 = arith.constant 59 : i32
    %12 = vector.broadcast %c59_i32 : i32 to vector<72x1xi32>
    %13 = arith.cmpi eq, %0, %12 : vector<72x1xi32>
    %14 = arith.ori %11, %13 : vector<72x1xi1>
    %cst = arith.constant 0.000000e+00 : f32
    %cst_0 = arith.constant 1.000000e+00 : f32
    %15 = vector.broadcast %cst : f32 to vector<72x1xf32>
    %16 = vector.broadcast %cst_0 : f32 to vector<72x1xf32>
    %17 = arith.select %14, %15, %16 : vector<72x1xi1>, vector<72x1xf32>
    %c0 = arith.constant 0 : index
    %c0_1 = arith.constant 0 : index
    %c0_2 = arith.constant 0 : index
    %18 = vector.load %arg1[%c0, %c0_1, %c0_2] : memref<1x72x128xbf16, #tpu.memory_space<vmem>>, vector<1x72x128xbf16>
    %19 = vector.shape_cast %18 : vector<1x72x128xbf16> to vector<72x128xbf16>
    %20 = arith.extf %19 : vector<72x128xbf16> to vector<72x128xf32>
    %c1_i32 = arith.constant 1 : i32
    %21 = tpu.dynamic_rotate %20 by %c1_i32 dim 0 : vector<72x128xf32>, i32 -> vector<72x128xf32>
    %c71_i32 = arith.constant 71 : i32
    %22 = tpu.dynamic_rotate %20 by %c71_i32 dim 0 : vector<72x128xf32>, i32 -> vector<72x128xf32>
    %c0_3 = arith.constant 0 : index
    %c0_4 = arith.constant 0 : index
    %c0_5 = arith.constant 0 : index
    %23 = vector.load %arg2[%c0_3, %c0_4, %c0_5] : memref<3x128x256xf32, #tpu.memory_space<vmem>>, vector<1x128x256xf32>
    %24 = vector.shape_cast %23 : vector<1x128x256xf32> to vector<128x256xf32>
    %cst_6 = arith.constant dense<0.000000e+00> : vector<72x256xf32>
    %25 = tpu.matmul %21, %24, %cst_6 {dimension_numbers = #tpu.dot_dimension_numbers<[1], [0], [0], [1], [0, 0, 1, 1], [], []>} : vector<72x128xf32>, vector<128x256xf32>, vector<72x256xf32> -> vector<72x256xf32>
    %c1 = arith.constant 1 : index
    %c0_7 = arith.constant 0 : index
    %c0_8 = arith.constant 0 : index
    %26 = vector.load %arg2[%c1, %c0_7, %c0_8] : memref<3x128x256xf32, #tpu.memory_space<vmem>>, vector<1x128x256xf32>
    %27 = vector.shape_cast %26 : vector<1x128x256xf32> to vector<128x256xf32>
    %cst_9 = arith.constant dense<0.000000e+00> : vector<72x256xf32>
    %28 = tpu.matmul %20, %27, %cst_9 {dimension_numbers = #tpu.dot_dimension_numbers<[1], [0], [0], [1], [0, 0, 1, 1], [], []>} : vector<72x128xf32>, vector<128x256xf32>, vector<72x256xf32> -> vector<72x256xf32>
    %29 = arith.addf %25, %28 : vector<72x256xf32>
    %c2 = arith.constant 2 : index
    %c0_10 = arith.constant 0 : index
    %c0_11 = arith.constant 0 : index
    %30 = vector.load %arg2[%c2, %c0_10, %c0_11] : memref<3x128x256xf32, #tpu.memory_space<vmem>>, vector<1x128x256xf32>
    %31 = vector.shape_cast %30 : vector<1x128x256xf32> to vector<128x256xf32>
    %cst_12 = arith.constant dense<0.000000e+00> : vector<72x256xf32>
    %32 = tpu.matmul %22, %31, %cst_12 {dimension_numbers = #tpu.dot_dimension_numbers<[1], [0], [0], [1], [0, 0, 1, 1], [], []>} : vector<72x128xf32>, vector<128x256xf32>, vector<72x256xf32> -> vector<72x256xf32>
    %33 = arith.addf %29, %32 : vector<72x256xf32>
    %c0_13 = arith.constant 0 : index
    %c0_14 = arith.constant 0 : index
    %34 = vector.load %arg3[%c0_13, %c0_14] : memref<1x256xf32, #tpu.memory_space<vmem>>, vector<1x256xf32>
    %35 = vector.broadcast %34 : vector<1x256xf32> to vector<72x256xf32>
    %36 = arith.addf %33, %35 : vector<72x256xf32>
    %cst_15 = arith.constant 0.000000e+00 : f32
    %37 = vector.broadcast %cst_15 : f32 to vector<72x256xf32>
    %38 = arith.maximumf %36, %37 : vector<72x256xf32>
    %39 = vector.broadcast %17 : vector<72x1xf32> to vector<72x256xf32>
    %40 = arith.mulf %38, %39 : vector<72x256xf32>
    %c1_i32_16 = arith.constant 1 : i32
    %41 = tpu.dynamic_rotate %40 by %c1_i32_16 dim 0 : vector<72x256xf32>, i32 -> vector<72x256xf32>
    %c71_i32_17 = arith.constant 71 : i32
    %42 = tpu.dynamic_rotate %40 by %c71_i32_17 dim 0 : vector<72x256xf32>, i32 -> vector<72x256xf32>
    %c0_18 = arith.constant 0 : index
    %c0_19 = arith.constant 0 : index
    %c0_20 = arith.constant 0 : index
    %43 = vector.load %arg4[%c0_18, %c0_19, %c0_20] : memref<3x256x256xf32, #tpu.memory_space<vmem>>, vector<1x256x256xf32>
    %44 = vector.shape_cast %43 : vector<1x256x256xf32> to vector<256x256xf32>
    %cst_21 = arith.constant dense<0.000000e+00> : vector<72x256xf32>
    %45 = tpu.matmul %41, %44, %cst_21 {dimension_numbers = #tpu.dot_dimension_numbers<[1], [0], [0], [1], [0, 0, 1, 1], [], []>} : vector<72x256xf32>, vector<256x256xf32>, vector<72x256xf32> -> vector<72x256xf32>
    %c1_22 = arith.constant 1 : index
    %c0_23 = arith.constant 0 : index
    %c0_24 = arith.constant 0 : index
    %46 = vector.load %arg4[%c1_22, %c0_23, %c0_24] : memref<3x256x256xf32, #tpu.memory_space<vmem>>, vector<1x256x256xf32>
    %47 = vector.shape_cast %46 : vector<1x256x256xf32> to vector<256x256xf32>
    %cst_25 = arith.constant dense<0.000000e+00> : vector<72x256xf32>
    %48 = tpu.matmul %40, %47, %cst_25 {dimension_numbers = #tpu.dot_dimension_numbers<[1], [0], [0], [1], [0, 0, 1, 1], [], []>} : vector<72x256xf32>, vector<256x256xf32>, vector<72x256xf32> -> vector<72x256xf32>
    %49 = arith.addf %45, %48 : vector<72x256xf32>
    %c2_26 = arith.constant 2 : index
    %c0_27 = arith.constant 0 : index
    %c0_28 = arith.constant 0 : index
    %50 = vector.load %arg4[%c2_26, %c0_27, %c0_28] : memref<3x256x256xf32, #tpu.memory_space<vmem>>, vector<1x256x256xf32>
    %51 = vector.shape_cast %50 : vector<1x256x256xf32> to vector<256x256xf32>
    %cst_29 = arith.constant dense<0.000000e+00> : vector<72x256xf32>
    %52 = tpu.matmul %42, %51, %cst_29 {dimension_numbers = #tpu.dot_dimension_numbers<[1], [0], [0], [1], [0, 0, 1, 1], [], []>} : vector<72x256xf32>, vector<256x256xf32>, vector<72x256xf32> -> vector<72x256xf32>
    %53 = arith.addf %49, %52 : vector<72x256xf32>
    %c0_30 = arith.constant 0 : index
    %c0_31 = arith.constant 0 : index
    %54 = vector.load %arg5[%c0_30, %c0_31] : memref<1x256xf32, #tpu.memory_space<vmem>>, vector<1x256xf32>
    %55 = vector.broadcast %54 : vector<1x256xf32> to vector<72x256xf32>
    %56 = arith.addf %53, %55 : vector<72x256xf32>
    %cst_32 = arith.constant 0.000000e+00 : f32
    %57 = vector.broadcast %cst_32 : f32 to vector<72x256xf32>
    %58 = arith.maximumf %56, %57 : vector<72x256xf32>
    %59 = vector.broadcast %17 : vector<72x1xf32> to vector<72x256xf32>
    %60 = arith.mulf %58, %59 : vector<72x256xf32>
    %c1_i32_33 = arith.constant 1 : i32
    %61 = tpu.dynamic_rotate %60 by %c1_i32_33 dim 0 : vector<72x256xf32>, i32 -> vector<72x256xf32>
    %c71_i32_34 = arith.constant 71 : i32
    %62 = tpu.dynamic_rotate %60 by %c71_i32_34 dim 0 : vector<72x256xf32>, i32 -> vector<72x256xf32>
    %c0_35 = arith.constant 0 : index
    %c0_36 = arith.constant 0 : index
    %c0_37 = arith.constant 0 : index
    %63 = vector.load %arg6[%c0_35, %c0_36, %c0_37] : memref<3x256x128xf32, #tpu.memory_space<vmem>>, vector<1x256x128xf32>
    %64 = vector.shape_cast %63 : vector<1x256x128xf32> to vector<256x128xf32>
    %cst_38 = arith.constant dense<0.000000e+00> : vector<72x128xf32>
    %65 = tpu.matmul %61, %64, %cst_38 {dimension_numbers = #tpu.dot_dimension_numbers<[1], [0], [0], [1], [0, 0, 1, 1], [], []>} : vector<72x256xf32>, vector<256x128xf32>, vector<72x128xf32> -> vector<72x128xf32>
    %c1_39 = arith.constant 1 : index
    %c0_40 = arith.constant 0 : index
    %c0_41 = arith.constant 0 : index
    %66 = vector.load %arg6[%c1_39, %c0_40, %c0_41] : memref<3x256x128xf32, #tpu.memory_space<vmem>>, vector<1x256x128xf32>
    %67 = vector.shape_cast %66 : vector<1x256x128xf32> to vector<256x128xf32>
    %cst_42 = arith.constant dense<0.000000e+00> : vector<72x128xf32>
    %68 = tpu.matmul %60, %67, %cst_42 {dimension_numbers = #tpu.dot_dimension_numbers<[1], [0], [0], [1], [0, 0, 1, 1], [], []>} : vector<72x256xf32>, vector<256x128xf32>, vector<72x128xf32> -> vector<72x128xf32>
    %69 = arith.addf %65, %68 : vector<72x128xf32>
    %c2_43 = arith.constant 2 : index
    %c0_44 = arith.constant 0 : index
    %c0_45 = arith.constant 0 : index
    %70 = vector.load %arg6[%c2_43, %c0_44, %c0_45] : memref<3x256x128xf32, #tpu.memory_space<vmem>>, vector<1x256x128xf32>
    %71 = vector.shape_cast %70 : vector<1x256x128xf32> to vector<256x128xf32>
    %cst_46 = arith.constant dense<0.000000e+00> : vector<72x128xf32>
    %72 = tpu.matmul %62, %71, %cst_46 {dimension_numbers = #tpu.dot_dimension_numbers<[1], [0], [0], [1], [0, 0, 1, 1], [], []>} : vector<72x256xf32>, vector<256x128xf32>, vector<72x128xf32> -> vector<72x128xf32>
    %73 = arith.addf %69, %72 : vector<72x128xf32>
    %c0_47 = arith.constant 0 : index
    %c0_48 = arith.constant 0 : index
    %74 = vector.load %arg7[%c0_47, %c0_48] : memref<1x128xf32, #tpu.memory_space<vmem>>, vector<1x128xf32>
    %75 = vector.broadcast %74 : vector<1x128xf32> to vector<72x128xf32>
    %76 = arith.addf %73, %75 : vector<72x128xf32>
    %77 = vector.broadcast %17 : vector<72x1xf32> to vector<72x128xf32>
    %78 = arith.mulf %76, %77 : vector<72x128xf32>
    %c0_49 = arith.constant 0 : index
    %c0_50 = arith.constant 0 : index
    %c0_51 = arith.constant 0 : index
    %79 = vector.load %arg8[%c0_49, %c0_50, %c0_51] : memref<1x72x128xf32, #tpu.memory_space<vmem>>, vector<1x72x128xf32>
    %80 = vector.shape_cast %79 : vector<1x72x128xf32> to vector<72x128xf32>
    %81 = vector.shape_cast %78 : vector<72x128xf32> to vector<1x72x128xf32>
    tpu.vector_store %arg8[%c0_49, %c0_50, %c0_51], %81 {strides = array<i32>} : memref<1x72x128xf32, #tpu.memory_space<vmem>>, vector<1x72x128xf32>,
    return
  }
  func.func @transform_0(%arg0: i32) -> (i32, i32, i32) {
    %c0_i32 = arith.constant 0 : i32
    %c0_i32_0 = arith.constant 0 : i32
    %c0_i32_1 = arith.constant 0 : i32
    return %arg0, %c0_i32, %c0_i32_0 : i32, i32, i32
  }
  func.func @transform_1(%arg0: i32) -> (i32, i32, i32) {
    %c0_i32 = arith.constant 0 : i32
    %c0_i32_0 = arith.constant 0 : i32
    %c0_i32_1 = arith.constant 0 : i32
    %c0_i32_2 = arith.constant 0 : i32
    return %c0_i32, %c0_i32_0, %c0_i32_1 : i32, i32, i32
  }
  func.func @transform_2(%arg0: i32) -> (i32, i32) {
    %c0_i32 = arith.constant 0 : i32
    %c0_i32_0 = arith.constant 0 : i32
    %c0_i32_1 = arith.constant 0 : i32
    return %c0_i32, %c0_i32_0 : i32, i32
  }
  func.func @transform_3(%arg0: i32) -> (i32, i32, i32) {
    %c0_i32 = arith.constant 0 : i32
    %c0_i32_0 = arith.constant 0 : i32
    %c0_i32_1 = arith.constant 0 : i32
    %c0_i32_2 = arith.constant 0 : i32
    return %c0_i32, %c0_i32_0, %c0_i32_1 : i32, i32, i32
  }
  func.func @transform_4(%arg0: i32) -> (i32, i32) {
    %c0_i32 = arith.constant 0 : i32
    %c0_i32_0 = arith.constant 0 : i32
    %c0_i32_1 = arith.constant 0 : i32
    return %c0_i32, %c0_i32_0 : i32, i32
  }
  func.func @transform_5(%arg0: i32) -> (i32, i32, i32) {
    %c0_i32 = arith.constant 0 : i32
    %c0_i32_0 = arith.constant 0 : i32
    %c0_i32_1 = arith.constant 0 : i32
    %c0_i32_2 = arith.constant 0 : i32
    return %c0_i32, %c0_i32_0, %c0_i32_1 : i32, i32, i32
  }
  func.func @transform_6(%arg0: i32) -> (i32, i32) {
    %c0_i32 = arith.constant 0 : i32
    %c0_i32_0 = arith.constant 0 : i32
    %c0_i32_1 = arith.constant 0 : i32
    return %c0_i32, %c0_i32_0 : i32, i32
  }
  func.func @transform_7(%arg0: i32) -> (i32, i32, i32) {
    %c0_i32 = arith.constant 0 : i32
    %c0_i32_0 = arith.constant 0 : i32
    %c0_i32_1 = arith.constant 0 : i32
    return %arg0, %c0_i32, %c0_i32_0 : i32, i32, i32
  }
}

</mosaic_0001>

<bundles_post_ra>
// kernel: pyramid_detection_forward.9
= control target key start
LH: loop header
LB: loop body
LE: loop exit
PB: predicated region body
PF: predicated region fallthrough
CT: control target
= control target key end

     0   :  { %s1582_s24 = smov 0   ;;  %s1584_s25 = smov 0   ;;  %s1829_s0 = inlined_call_operand.vmem [shape: bf16[2,512,128], index: 0, kind: input, shape index: {}]   ;;  %s1830_s1 = inlined_call_operand.vmem [shape: bf16[2,512,128], index: 1, kind: input, shape index: {}]   ;;  %s1831_s2 = inlined_call_operand.vmem [shape: bf16[2,512,128], index: 2, kind: input, shape index: {}]   ;;  %s1832_s3 = inlined_call_operand.vmem [shape: bf16[128,128], index: 3, kind: input, shape index: {}]   ;;  %s1833_s4 = inlined_call_operand.vmem [shape: bf16[128,128], index: 4, kind: input, shape index: {}]   ;;  %s1834_s5 = inlined_call_operand.vmem [shape: bf16[128,128], index: 5, kind: input, shape index: {}]   ;;  %s1835_s6 = inlined_call_operand.vmem [shape: f32[1,128], index: 6, kind: input, shape index: {}]   ;;  %s1836_s7 = inlined_call_operand.vmem [shape: bf16[2,512,128], index: 7, kind: output, shape index: {}]  }
   0x1   :  { %s1586_s26 = smov 0   ;;  %s1588_s27 = smov 0  }
   0x2   :  { %s1590_s28 = smov 0  }
   0x3 LB: > { %s26_s29 = sadd.s32 1, %s1532_s26  ;;  %s29_s30 = sadd.s32 1, %s1536_s27  ;;  %s1540_s28 = sphi %s1590_s28, %s17_s28   ;;  %s1536_s27 = sphi %s1588_s27, %s1840_s27   ;;  %s1532_s26 = sphi %s1586_s26, %s1839_s26   ;;  %s1528_s25 = sphi %s1584_s25, %s1838_s25   ;;  %s1524_s24 = sphi %s1582_s24, %s1837_s24  }
   0x4   : > { %p27_p0 = scmp.ge.s32.totalorder %s26_s29, 4  ;;  %p1135_p1 = scmp.ge.s32.totalorder %s1540_s28, 1 }
   0x5   : > { %p292_p2 = scmp.lt.s32.totalorder %s1540_s28, 9 }
   0x6   : > { %s1842_s29 = smov (%p27_p0, %s26_s29), 0  ;;  %s1844_s30 = smov (!%p27_p0, %s29_s30), %s1536_s27 }
   0x7   : > { %p293_p3 = pnand %p1135_p1, %p292_p2  ;;  %p31_p4 = scmp.ge.s32.totalorder %s1844_s30, 2 }
   0x8   : > { %s1136_s10 = sshll.u32 (!%p293_p3), %s1524_s24, 4  ;;  %p351_p5 = scmp.lt.s32.totalorder (!%p293_p3), %s1528_s25, 1 }
   0x9   : > { %s1846_s30 = smov (%p31_p4, %s1844_s30), 0  ;;  %296 = sbr.rel (%p293_p3) target bundleno = 277 (0x115), region = 48 }
   0xa   : > { %p353_p6 = scmp.lt.s32.totalorder (!%p293_p3), %s1136_s10, 63 }
   0xe   : > { %v1373_v0 = vld [vmem:[%s1833_s4 + $0x38] sm:$0xff]  ;;  %v1372_v3 = vld [vmem:[%s1833_s4 + $0x30] sm:$0xff]  ;;  %v1371_v6 = vld [vmem:[%s1833_s4 + $0x28] sm:$0xff]  ;;  %s1848_s25 = smov (!%p351_p5, %s1528_s25), 1  ;;  %s1850_s10 = smov (!%p353_p6, %s1136_s10), 63 }
   0xf   : > { %v1622_v1 = vld [vmem:[%s1832_s3 + $0x38] sm:$0xff]  ;;  %550 = vmatpush.bf16.msra.mxu0 %v1373_v0  ;;  %1437 = vmatpush.bf16.msra.mxu3 %v1373_v0  ;;  %v1637_v4 = vld [vmem:[%s1832_s3 + $0x30] sm:$0xff]  ;;  %v1355_v7 = vld [vmem:[%s1832_s3 + $0x28] sm:$0xff]  ;;  %s1137_s22 = sshll.u32 %s1848_s25, 6 }
  0x10   : > { %v1627_v2 = vld [vmem:[%s1834_s5 + $0x38] sm:$0xff]  ;;  %695 = vmatpush.bf16.msra.mxu1 %v1622_v1  ;;  %v1642_v5 = vld [vmem:[%s1834_s5 + $0x30] sm:$0xff]  ;;  %v1655_v8 = vld [vmem:[%s1834_s5 + $0x28] sm:$0xff]  ;;  %s356_s14 = sadd.s32 %s1137_s22, %s1850_s10 }
  0x11   : > { %872 = vmatpush.bf16.msra.mxu2 %v1627_v2  ;;  %v1370_v9 = vld [vmem:[%s1833_s4 + $0x20] sm:$0xff]  ;;  %v1369_v12 = vld [vmem:[%s1833_s4 + $0x18] sm:$0xff]  ;;  %v1368_v15 = vld [vmem:[%s1833_s4 + $0x10] sm:$0xff]  ;;  %s1706_s19 = sshll.u32 %s356_s14, 2 }
  0x12   : > { %v1354_v10 = vld [vmem:[%s1832_s3 + $0x20] sm:$0xff]  ;;  %v1353_v13 = vld [vmem:[%s1832_s3 + $0x18] sm:$0xff]  ;;  %v1352_v16 = vld [vmem:[%s1832_s3 + $0x10] sm:$0xff]  ;;  %s1715_s23 = scalar_lea.vmem %s1830_s1, %s1706_s19  ;;  %s1727_s25 = scalar_lea.vmem %s1829_s0, %s1706_s19 }
  0x13   : > { %551 = vmatpush.bf16.msra.mxu0 %v1372_v3  ;;  %1438 = vmatpush.bf16.msra.mxu3 %v1372_v3  ;;  %v1669_v11 = vld [vmem:[%s1834_s5 + $0x20] sm:$0xff]  ;;  %v1682_v14 = vld [vmem:[%s1834_s5 + $0x18] sm:$0xff]  ;;  %v1694_v17 = vld [vmem:[%s1834_s5 + $0x10] sm:$0xff]  ;;  %s1733_s24 = scalar_lea.vmem %s1831_s2, %s1706_s19  ;;  %s1782_s21 = scalar_lea.vmem %s1836_s7, %s1706_s19 }
  0x14   : > { %696 = vmatpush.bf16.msra.mxu1 %v1637_v4  ;;  %v1367_v18 = vld [vmem:[%s1833_s4 + $0x8] sm:$0xff]  ;;  %v1366_v21 = vld [vmem:[%s1833_s4] sm:$0xff]  ;;  %v1364_v25 = vld [vmem:[%s1715_s23 + $0x30] sm:$0xff] }
  0x15   : > { %873 = vmatpush.bf16.msra.mxu2 %v1642_v5  ;;  %v1351_v19 = vld [vmem:[%s1832_s3 + $0x8] sm:$0xff]  ;;  %v1350_v22 = vld [vmem:[%s1832_s3] sm:$0xff]  ;;  %v1365_v29 = vld [vmem:[%s1715_s23 + $0x38] sm:$0xff] }
  0x16   : > { %v1383_v20 = vld [vmem:[%s1834_s5 + $0x8] sm:$0xff]  ;;  %v1382_v23 = vld [vmem:[%s1834_s5] sm:$0xff]  ;;  %v1360_v32 = vld [vmem:[%s1715_s23 + $0x10] sm:$0xff] }
  0x17   : > { %552 = vmatpush.bf16.msra.mxu0 %v1371_v6  ;;  %1439 = vmatpush.bf16.msra.mxu3 %v1371_v6  ;;  %v1358_v24 = vld [vmem:[%s1715_s23] sm:$0xff]  ;;  %v1359_v28 = vld [vmem:[%s1715_s23 + $0x8] sm:$0xff]  ;;  %v1348_v33 = vld [vmem:[%s1727_s25 + $0x30] sm:$0xff] }
  0x18   : > { %697 = vmatpush.bf16.msra.mxu1 %v1355_v7  ;;  %v1342_v26 = vld [vmem:[%s1727_s25] sm:$0xff]  ;;  %v1343_v30 = vld [vmem:[%s1727_s25 + $0x8] sm:$0xff]  ;;  %v1344_v34 = vld [vmem:[%s1727_s25 + $0x10] sm:$0xff] }
  0x19   : > { %874 = vmatpush.bf16.msra.mxu2 %v1655_v8  ;;  %v1374_v27 = vld [vmem:[%s1733_s24] sm:$0xff]  ;;  %v1375_v31 = vld [vmem:[%s1733_s24 + $0x8] sm:$0xff]  ;;  %v1376_v35 = vld [vmem:[%s1733_s24 + $0x10] sm:$0xff] }
  0x1a   : > { %v1361_v36 = vld [vmem:[%s1715_s23 + $0x18] sm:$0xff]  ;;  %v1362_v40 = vld [vmem:[%s1715_s23 + $0x20] sm:$0xff]  ;;  %v1380_v41 = vld [vmem:[%s1733_s24 + $0x30] sm:$0xff] }
  0x1b   : > { %553 = vmatpush.bf16.msra.mxu0 %v1370_v9  ;;  %1440 = vmatpush.bf16.msra.mxu3 %v1370_v9  ;;  %v1349_v37 = vld [vmem:[%s1727_s25 + $0x38] sm:$0xff]  ;;  %v1346_v42 = vld [vmem:[%s1727_s25 + $0x20] sm:$0xff]  ;;  %v1363_v44 = vld [vmem:[%s1715_s23 + $0x28] sm:$0xff] }
  0x1c   : > { %698 = vmatpush.bf16.msra.mxu1 %v1354_v10  ;;  %v1345_v38 = vld [vmem:[%s1727_s25 + $0x18] sm:$0xff]  ;;  %v1378_v43 = vld [vmem:[%s1733_s24 + $0x20] sm:$0xff]  ;;  %v1347_v46 = vld [vmem:[%s1727_s25 + $0x28] sm:$0xff] }
  0x1d   : > { %875 = vmatpush.bf16.msra.mxu2 %v1669_v11  ;;  %v1377_v39 = vld [vmem:[%s1733_s24 + $0x18] sm:$0xff]  ;;  %v1379_v47 = vld [vmem:[%s1733_s24 + $0x28] sm:$0xff]  ;;  %v1772_v56 = vld [vmem:[%s1835_s6] ss:$0 sm:$0xff] }
  0x1e   : > { %v1381_v45 = vld [vmem:[%s1733_s24 + $0x38] sm:$0xff] }
  0x1f   : > { %554 = vmatpush.bf16.msra.mxu0 %v1369_v12  ;;  %1441 = vmatpush.bf16.msra.mxu3 %v1369_v12 }
  0x20   : > { %699 = vmatpush.bf16.msra.mxu1 %v1353_v13 }
  0x21   : > { %876 = vmatpush.bf16.msra.mxu2 %v1682_v14 }
  0x23   : > { %555 = vmatpush.bf16.msra.mxu0 %v1368_v15  ;;  %1442 = vmatpush.bf16.msra.mxu3 %v1368_v15 }
  0x24   : > { %700 = vmatpush.bf16.msra.mxu1 %v1352_v16 }
  0x25   : > { %877 = vmatpush.bf16.msra.mxu2 %v1694_v17 }
  0x27   : > { %556 = vmatpush.bf16.msra.mxu0 %v1367_v18  ;;  %1443 = vmatpush.bf16.msra.mxu3 %v1367_v18 }
  0x28   : > { %701 = vmatpush.bf16.msra.mxu1 %v1351_v19 }
  0x29   : > { %878 = vmatpush.bf16.msra.mxu2 %v1383_v20 }
  0x2b   : > { %557 = vmatpush.bf16.msra.mxu0 %v1366_v21  ;;  %1444 = vmatpush.bf16.msra.mxu3 %v1366_v21 }
  0x2c   : > { %702 = vmatpush.bf16.msra.mxu1 %v1350_v22 }
  0x2d   : > { %879 = vmatpush.bf16.msra.mxu2 %v1382_v23 }
  0x2e   : > { %558 = vmatmul.bf16.vlgmr.msra.gmra.mxu0 %v1358_v24  ;;  %588 = vmatmul.bf16.vlgmr.msra.gmra.mxu3 %v1364_v25 }
  0x2f   : > { %1445 = vmatpush.bf16.msrb.mxu3 %v1622_v1  ;;  %703 = vmatmul.bf16.vlgmr.msra.gmra.mxu1 %v1342_v26 }
  0x30   : > { %880 = vmatmul.bf16.vlgmr.msra.gmra.mxu2 %v1374_v27 }
  0x33   : > { %1446 = vmatpush.bf16.msrb.mxu3 %v1637_v4 }
  0x37   : > { %1447 = vmatpush.bf16.msrb.mxu3 %v1355_v7 }
  0x3b   : > { %1448 = vmatpush.bf16.msrb.mxu3 %v1354_v10 }
  0x3e   : > { %563 = vmatmul.bf16.gmra.mxu0 %v1359_v28  ;;  %593 = vmatmul.bf16.gmra.mxu3 %v1365_v29 }
  0x3f   : > { %1449 = vmatpush.bf16.msrb.mxu3 %v1353_v13  ;;  %708 = vmatmul.bf16.gmra.mxu1 %v1343_v30 }
  0x40   : > { %885 = vmatmul.bf16.gmra.mxu2 %v1375_v31 }
  0x43   : > { %1450 = vmatpush.bf16.msrb.mxu3 %v1352_v16 }
  0x47   : > { %1451 = vmatpush.bf16.msrb.mxu3 %v1351_v19 }
  0x4b   : > { %1452 = vmatpush.bf16.msrb.mxu3 %v1350_v22 }
  0x4e   : > { %568 = vmatmul.bf16.gmra.mxu0 %v1360_v32  ;;  %733 = vmatmul.bf16.vlgmr.msrb.gmra.mxu3 %v1348_v33 }
  0x4f   : > { %1453 = vmatpush.bf16.msra.mxu3 %v1627_v2  ;;  %713 = vmatmul.bf16.gmra.mxu1 %v1344_v34 }
  0x50   : > { %890 = vmatmul.bf16.gmra.mxu2 %v1376_v35 }
  0x53   : > { %1454 = vmatpush.bf16.msra.mxu3 %v1642_v5 }
  0x57   : > { %1455 = vmatpush.bf16.msra.mxu3 %v1655_v8 }
  0x5b   : > { %1456 = vmatpush.bf16.msra.mxu3 %v1669_v11 }
  0x5e   : > { %573 = vmatmul.bf16.gmra.mxu0 %v1361_v36  ;;  %738 = vmatmul.bf16.gmra.mxu3 %v1349_v37 }
  0x5f   : > { %1457 = vmatpush.bf16.msra.mxu3 %v1682_v14  ;;  %718 = vmatmul.bf16.gmra.mxu1 %v1345_v38 }
  0x60   : > { %895 = vmatmul.bf16.gmra.mxu2 %v1377_v39 }
  0x63   : > { %1458 = vmatpush.bf16.msra.mxu3 %v1694_v17 }
  0x67   : > { %1459 = vmatpush.bf16.msra.mxu3 %v1383_v20 }
  0x6b   : > { %1460 = vmatpush.bf16.msra.mxu3 %v1382_v23 }
  0x6e   : > { %578 = vmatmul.bf16.gmra.mxu0 %v1362_v40  ;;  %910 = vmatmul.bf16.vlgmr.msra.gmra.mxu3 %v1380_v41 }
  0x6f   : > { %723 = vmatmul.bf16.gmra.mxu1 %v1346_v42 }
  0x70   : > { %900 = vmatmul.bf16.gmra.mxu2 %v1378_v43 }
  0x7e   : > { %583 = vmatmul.bf16.gmra.mxu0 %v1363_v44  ;;  %915 = vmatmul.bf16.gmra.mxu3 %v1381_v45 }
  0x7f   : > { %728 = vmatmul.bf16.gmra.mxu1 %v1347_v46 }
  0x80   : > { %905 = vmatmul.bf16.gmra.mxu2 %v1379_v47 }
  0xab   : > { %v559_v48 = vpop.f32.mrf.mxu0 }
  0xac   : > { %v704_v49 = vpop.f32.mrf.mxu1 }
  0xad   : > { %v705_v52 = vadd.f32 %v704_v49, %v559_v48 }
  0xb1   : > { %v1767_v50 = vpop.f32.mrf.mxu3 }
  0xb3   : > { %v881_v51 = vpop.f32.mrf.mxu2  ;;  %v561_v53 = vpop.f32.mrf.mxu0 }
  0xb4   : > { %v706_v54 = vpop.f32.mrf.mxu1  ;;  %v921_v55 = vadd.f32 %v881_v51, %v705_v52 }
  0xb5   : > { %v707_v57 = vadd.f32 %v706_v54, %v561_v53 }
  0xb6   : > { %v941_v60 = vadd.f32 %v1772_v56, %v921_v55 }
  0xb8   : > { %v957_v1 = vmax.f32 %v941_v60, 0.0 }
  0xb9   : > { %v1774_v58 = vpop.f32.mrf.mxu3 }
  0xbb   : > { %v883_v59 = vpop.f32.mrf.mxu2  ;;  %v564_v62 = vpop.f32.mrf.mxu0 }
  0xbc   : > { %v922_v61 = vadd.f32 %v883_v59, %v707_v57  ;;  %v709_v63 = vpop.f32.mrf.mxu1 }
  0xbd   : > { %v710_v6 = vadd.f32 %v709_v63, %v564_v62 }
  0xbe   : > { %v942_v0 = vadd.f32 %v1772_v56, %v922_v61 }
  0xc0   : > { %v958_v2 = vmax.f32 %v942_v0, 0.0 }
  0xc1   : > { %v1784_v4 = vpop.f32.mrf.mxu3 }
  0xc2   : > { %v1393_v3 = vpack.c.bf16 %v958_v2, %v957_v1 }
  0xc3   : > { %v886_v5 = vpop.f32.mrf.mxu2  ;;  %v566_v7 = vpop.f32.mrf.mxu0 }
  0xc4   : > { %1394 = vst [vmem:[%s1782_s21] sm:$0xff] %v1393_v3   ;;  %v711_v8 = vpop.f32.mrf.mxu1  ;;  %v923_v9 = vadd.f32 %v886_v5, %v710_v6 }
  0xc5   : > { %v712_v10 = vadd.f32 %v711_v8, %v566_v7 }
  0xc6   : > { %v943_v13 = vadd.f32 %v1772_v56, %v923_v9 }
  0xc8   : > { %v959_v18 = vmax.f32 %v943_v13, 0.0 }
  0xc9   : > { %v1787_v11 = vpop.f32.mrf.mxu3 }
  0xcb   : > { %v888_v12 = vpop.f32.mrf.mxu2  ;;  %v569_v15 = vpop.f32.mrf.mxu0 }
  0xcc   : > { %v924_v14 = vadd.f32 %v888_v12, %v712_v10  ;;  %v714_v16 = vpop.f32.mrf.mxu1 }
  0xcd   : > { %v715_v23 = vadd.f32 %v714_v16, %v569_v15 }
  0xce   : > { %v944_v17 = vadd.f32 %v1772_v56, %v924_v14 }
  0xd0   : > { %v960_v19 = vmax.f32 %v944_v17, 0.0 }
  0xd1   : > { %v734_v21 = vpop.f32.mrf.mxu3 }
  0xd2   : > { %v1398_v20 = vpack.c.bf16 %v960_v19, %v959_v18  ;;  %v735_v62 = vadd.f32 %v734_v21, %v1767_v50 }
  0xd3   : > { %v891_v22 = vpop.f32.mrf.mxu2  ;;  %v571_v24 = vpop.f32.mrf.mxu0 }
  0xd4   : > { %1430 = vst [vmem:[%s1782_s21 + $0x8] sm:$0xff] %v1398_v20   ;;  %v716_v25 = vpop.f32.mrf.mxu1  ;;  %v925_v26 = vadd.f32 %v891_v22, %v715_v23 }
  0xd5   : > { %v717_v27 = vadd.f32 %v716_v25, %v571_v24 }
  0xd6   : > { %v945_v30 = vadd.f32 %v1772_v56, %v925_v26 }
  0xd8   : > { %v961_v35 = vmax.f32 %v945_v30, 0.0 }
  0xd9   : > { %v736_v28 = vpop.f32.mrf.mxu3 }
  0xda   : > { %v737_v2 = vadd.f32 %v736_v28, %v1774_v58 }
  0xdb   : > { %v893_v29 = vpop.f32.mrf.mxu2  ;;  %v574_v32 = vpop.f32.mrf.mxu0 }
  0xdc   : > { %v926_v31 = vadd.f32 %v893_v29, %v717_v27  ;;  %v719_v33 = vpop.f32.mrf.mxu1 }
  0xdd   : > { %v720_v40 = vadd.f32 %v719_v33, %v574_v32 }
  0xde   : > { %v946_v34 = vadd.f32 %v1772_v56, %v926_v31 }
  0xe0   : > { %v962_v36 = vmax.f32 %v946_v34, 0.0 }
  0xe1   : > { %v739_v38 = vpop.f32.mrf.mxu3 }
  0xe2   : > { %v1403_v37 = vpack.c.bf16 %v962_v36, %v961_v35  ;;  %v740_v23 = vadd.f32 %v739_v38, %v1784_v4 }
  0xe3   : > { %v896_v39 = vpop.f32.mrf.mxu2  ;;  %v576_v41 = vpop.f32.mrf.mxu0 }
  0xe4   : > { %1431 = vst [vmem:[%s1782_s21 + $0x10] sm:$0xff] %v1403_v37   ;;  %v721_v42 = vpop.f32.mrf.mxu1  ;;  %v927_v43 = vadd.f32 %v896_v39, %v720_v40 }
  0xe5   : > { %v722_v44 = vadd.f32 %v721_v42, %v576_v41 }
  0xe6   : > { %v947_v47 = vadd.f32 %v1772_v56, %v927_v43 }
  0xe8   : > { %v963_v53 = vmax.f32 %v947_v47, 0.0 }
  0xe9   : > { %v741_v45 = vpop.f32.mrf.mxu3 }
  0xea   : > { %v742_v28 = vadd.f32 %v741_v45, %v1787_v11 }
  0xeb   : > { %v898_v46 = vpop.f32.mrf.mxu2  ;;  %v579_v49 = vpop.f32.mrf.mxu0 }
  0xec   : > { %v928_v48 = vadd.f32 %v898_v46, %v722_v44  ;;  %v724_v51 = vpop.f32.mrf.mxu1 }
  0xed   : > { %v725_v60 = vadd.f32 %v724_v51, %v579_v49 }
  0xee   : > { %v948_v52 = vadd.f32 %v1772_v56, %v928_v48 }
  0xf0   : > { %v964_v54 = vmax.f32 %v948_v52, 0.0 }
  0xf1   : > { %v911_v57 = vpop.f32.mrf.mxu3 }
  0xf2   : > { %v1408_v55 = vpack.c.bf16 %v964_v54, %v963_v53  ;;  %v933_v0 = vadd.f32 %v911_v57, %v735_v62 }
  0xf3   : > { %v901_v59 = vpop.f32.mrf.mxu2  ;;  %v581_v61 = vpop.f32.mrf.mxu0 }
  0xf4   : > { %1432 = vst [vmem:[%s1782_s21 + $0x18] sm:$0xff] %v1408_v55   ;;  %v726_v63 = vpop.f32.mrf.mxu1  ;;  %v929_v1 = vadd.f32 %v901_v59, %v725_v60  ;;  %v953_v6 = vadd.f32 %v1772_v56, %v933_v0 }
  0xf5   : > { %v727_v3 = vadd.f32 %v726_v63, %v581_v61 }
  0xf6   : > { %v949_v9 = vadd.f32 %v1772_v56, %v929_v1  ;;  %v969_v15 = vmax.f32 %v953_v6, 0.0 }
  0xf8   : > { %v965_v58 = vmax.f32 %v949_v9, 0.0 }
  0xf9   : > { %v913_v5 = vpop.f32.mrf.mxu3 }
  0xfa   : > { %v934_v8 = vadd.f32 %v913_v5, %v737_v2 }
  0xfb   : > { %v903_v7 = vpop.f32.mrf.mxu2  ;;  %v584_v13 = vpop.f32.mrf.mxu0 }
  0xfc   : > { %v930_v10 = vadd.f32 %v903_v7, %v727_v3  ;;  %v954_v12 = vadd.f32 %v1772_v56, %v934_v8  ;;  %v729_v50 = vpop.f32.mrf.mxu1 }
  0xfd   : > { %v730_v22 = vadd.f32 %v729_v50, %v584_v13 }
  0xfe   : > { %v950_v14 = vadd.f32 %v1772_v56, %v930_v10  ;;  %v970_v16 = vmax.f32 %v954_v12, 0.0 }
 0x100   : > { %v966_v17 = vmax.f32 %v950_v14, 0.0  ;;  %v1423_v18 = vpack.c.bf16 %v970_v16, %v969_v15 }
 0x101   : > { %v916_v20 = vpop.f32.mrf.mxu3 }
 0x102   : > { %v1413_v19 = vpack.c.bf16 %v966_v17, %v965_v58  ;;  %1435 = vst [vmem:[%s1782_s21 + $0x30] sm:$0xff] %v1423_v18   ;;  %v935_v24 = vadd.f32 %v916_v20, %v740_v23 }
 0x103   : > { %v906_v21 = vpop.f32.mrf.mxu2  ;;  %v586_v25 = vpop.f32.mrf.mxu0 }
 0x104   : > { %1433 = vst [vmem:[%s1782_s21 + $0x20] sm:$0xff] %v1413_v19   ;;  %v731_v26 = vpop.f32.mrf.mxu1  ;;  %v931_v27 = vadd.f32 %v906_v21, %v730_v22  ;;  %v955_v31 = vadd.f32 %v1772_v56, %v935_v24 }
 0x105   : > { %v732_v29 = vadd.f32 %v731_v26, %v586_v25 }
 0x106   : > { %v951_v34 = vadd.f32 %v1772_v56, %v931_v27  ;;  %v971_v37 = vmax.f32 %v955_v31, 0.0 }
 0x108   : > { %v967_v39 = vmax.f32 %v951_v34, 0.0 }
 0x109   : > { %v918_v30 = vpop.f32.mrf.mxu3 }
 0x10a   : > { %v936_v33 = vadd.f32 %v918_v30, %v742_v28 }
 0x10b   : > { %v908_v32 = vpop.f32.mrf.mxu2 }
 0x10c   : > { %v932_v35 = vadd.f32 %v908_v32, %v732_v29  ;;  %v956_v36 = vadd.f32 %v1772_v56, %v936_v33 }
 0x10e   : > { %v952_v4 = vadd.f32 %v1772_v56, %v932_v35  ;;  %v972_v38 = vmax.f32 %v956_v36, 0.0 }
 0x110   : > { %v968_v40 = vmax.f32 %v952_v4, 0.0  ;;  %v1428_v11 = vpack.c.bf16 %v972_v38, %v971_v37 }
 0x112   : > { %v1418_v41 = vpack.c.bf16 %v968_v40, %v967_v39  ;;  %1436 = vst [vmem:[%s1782_s21 + $0x38] sm:$0xff] %v1428_v11  }
 0x114   : > { %1434 = vst [vmem:[%s1782_s21 + $0x28] sm:$0xff] %v1418_v41  }
 0x115 PF: > { %s17_s28 = sadd.s32 1, %s1540_s28   ;;  %s1837_s24 = smov %s1532_s26 }
 0x116   : > { %p14_p7 = scmp.ge.s32.totalorder %s17_s28, 10   ;;  %s1838_s25 = smov %s1536_s27 }
 0x117   : > { %s1839_s26 = smov %s1842_s29  ;;  %s1840_s27 = smov %s1846_s30 }
 0x118   :  { %16 = sbr.rel (!%p14_p7) target bundleno = 3 (0x3), region = 84 }

// kernel: pyramid_detection_forward.10
= control target key start
LH: loop header
LB: loop body
LE: loop exit
PB: predicated region body
PF: predicated region fallthrough
CT: control target
= control target key end

     0   :  { %s1582_s24 = smov 0   ;;  %s1584_s25 = smov 0   ;;  %s1829_s0 = inlined_call_operand.vmem [shape: bf16[2,256,128], index: 0, kind: input, shape index: {}]   ;;  %s1830_s1 = inlined_call_operand.vmem [shape: bf16[2,256,128], index: 1, kind: input, shape index: {}]   ;;  %s1831_s2 = inlined_call_operand.vmem [shape: bf16[2,256,128], index: 2, kind: input, shape index: {}]   ;;  %s1832_s3 = inlined_call_operand.vmem [shape: bf16[128,128], index: 3, kind: input, shape index: {}]   ;;  %s1833_s4 = inlined_call_operand.vmem [shape: bf16[128,128], index: 4, kind: input, shape index: {}]   ;;  %s1834_s5 = inlined_call_operand.vmem [shape: bf16[128,128], index: 5, kind: input, shape index: {}]   ;;  %s1835_s6 = inlined_call_operand.vmem [shape: f32[1,128], index: 6, kind: input, shape index: {}]   ;;  %s1836_s7 = inlined_call_operand.vmem [shape: bf16[2,256,128], index: 7, kind: output, shape index: {}]  }
   0x1   :  { %s1586_s26 = smov 0   ;;  %s1588_s27 = smov 0  }
   0x2   :  { %s1590_s28 = smov 0  }
   0x3 LB: > { %s26_s29 = sadd.s32 1, %s1532_s26  ;;  %s29_s30 = sadd.s32 1, %s1536_s27  ;;  %s1540_s28 = sphi %s1590_s28, %s17_s28   ;;  %s1536_s27 = sphi %s1588_s27, %s1840_s27   ;;  %s1532_s26 = sphi %s1586_s26, %s1839_s26   ;;  %s1528_s25 = sphi %s1584_s25, %s1838_s25   ;;  %s1524_s24 = sphi %s1582_s24, %s1837_s24  }
   0x4   : > { %p27_p0 = scmp.ge.s32.totalorder %s26_s29, 2  ;;  %p1135_p1 = scmp.ge.s32.totalorder %s1540_s28, 1 }
   0x5   : > { %p292_p2 = scmp.lt.s32.totalorder %s1540_s28, 5 }
   0x6   : > { %s1842_s29 = smov (%p27_p0, %s26_s29), 0  ;;  %s1844_s30 = smov (!%p27_p0, %s29_s30), %s1536_s27 }
   0x7   : > { %p293_p3 = pnand %p1135_p1, %p292_p2  ;;  %p31_p4 = scmp.ge.s32.totalorder %s1844_s30, 2 }
   0x8   : > { %s1136_s10 = sshll.u32 (!%p293_p3), %s1524_s24, 4  ;;  %p351_p5 = scmp.lt.s32.totalorder (!%p293_p3), %s1528_s25, 1 }
   0x9   : > { %s1846_s30 = smov (%p31_p4, %s1844_s30), 0  ;;  %296 = sbr.rel (%p293_p3) target bundleno = 277 (0x115), region = 48 }
   0xa   : > { %p353_p6 = scmp.lt.s32.totalorder (!%p293_p3), %s1136_s10, 31 }
   0xe   : > { %v1373_v0 = vld [vmem:[%s1833_s4 + $0x38] sm:$0xff]  ;;  %v1372_v3 = vld [vmem:[%s1833_s4 + $0x30] sm:$0xff]  ;;  %v1371_v6 = vld [vmem:[%s1833_s4 + $0x28] sm:$0xff]  ;;  %s1848_s25 = smov (!%p351_p5, %s1528_s25), 1  ;;  %s1850_s10 = smov (!%p353_p6, %s1136_s10), 31 }
   0xf   : > { %v1622_v1 = vld [vmem:[%s1832_s3 + $0x38] sm:$0xff]  ;;  %550 = vmatpush.bf16.msra.mxu0 %v1373_v0  ;;  %1437 = vmatpush.bf16.msra.mxu3 %v1373_v0  ;;  %v1637_v4 = vld [vmem:[%s1832_s3 + $0x30] sm:$0xff]  ;;  %v1355_v7 = vld [vmem:[%s1832_s3 + $0x28] sm:$0xff]  ;;  %s1137_s22 = sshll.u32 %s1848_s25, 5 }
  0x10   : > { %v1627_v2 = vld [vmem:[%s1834_s5 + $0x38] sm:$0xff]  ;;  %695 = vmatpush.bf16.msra.mxu1 %v1622_v1  ;;  %v1642_v5 = vld [vmem:[%s1834_s5 + $0x30] sm:$0xff]  ;;  %v1655_v8 = vld [vmem:[%s1834_s5 + $0x28] sm:$0xff]  ;;  %s356_s14 = sadd.s32 %s1137_s22, %s1850_s10 }
  0x11   : > { %872 = vmatpush.bf16.msra.mxu2 %v1627_v2  ;;  %v1370_v9 = vld [vmem:[%s1833_s4 + $0x20] sm:$0xff]  ;;  %v1369_v12 = vld [vmem:[%s1833_s4 + $0x18] sm:$0xff]  ;;  %v1368_v15 = vld [vmem:[%s1833_s4 + $0x10] sm:$0xff]  ;;  %s1706_s19 = sshll.u32 %s356_s14, 2 }
  0x12   : > { %v1354_v10 = vld [vmem:[%s1832_s3 + $0x20] sm:$0xff]  ;;  %v1353_v13 = vld [vmem:[%s1832_s3 + $0x18] sm:$0xff]  ;;  %v1352_v16 = vld [vmem:[%s1832_s3 + $0x10] sm:$0xff]  ;;  %s1715_s23 = scalar_lea.vmem %s1830_s1, %s1706_s19  ;;  %s1727_s25 = scalar_lea.vmem %s1829_s0, %s1706_s19 }
  0x13   : > { %551 = vmatpush.bf16.msra.mxu0 %v1372_v3  ;;  %1438 = vmatpush.bf16.msra.mxu3 %v1372_v3  ;;  %v1669_v11 = vld [vmem:[%s1834_s5 + $0x20] sm:$0xff]  ;;  %v1682_v14 = vld [vmem:[%s1834_s5 + $0x18] sm:$0xff]  ;;  %v1694_v17 = vld [vmem:[%s1834_s5 + $0x10] sm:$0xff]  ;;  %s1733_s24 = scalar_lea.vmem %s1831_s2, %s1706_s19  ;;  %s1782_s21 = scalar_lea.vmem %s1836_s7, %s1706_s19 }
  0x14   : > { %696 = vmatpush.bf16.msra.mxu1 %v1637_v4  ;;  %v1367_v18 = vld [vmem:[%s1833_s4 + $0x8] sm:$0xff]  ;;  %v1366_v21 = vld [vmem:[%s1833_s4] sm:$0xff]  ;;  %v1364_v25 = vld [vmem:[%s1715_s23 + $0x30] sm:$0xff] }
  0x15   : > { %873 = vmatpush.bf16.msra.mxu2 %v1642_v5  ;;  %v1351_v19 = vld [vmem:[%s1832_s3 + $0x8] sm:$0xff]  ;;  %v1350_v22 = vld [vmem:[%s1832_s3] sm:$0xff]  ;;  %v1365_v29 = vld [vmem:[%s1715_s23 + $0x38] sm:$0xff] }
  0x16   : > { %v1383_v20 = vld [vmem:[%s1834_s5 + $0x8] sm:$0xff]  ;;  %v1382_v23 = vld [vmem:[%s1834_s5] sm:$0xff]  ;;  %v1360_v32 = vld [vmem:[%s1715_s23 + $0x10] sm:$0xff] }
  0x17   : > { %552 = vmatpush.bf16.msra.mxu0 %v1371_v6  ;;  %1439 = vmatpush.bf16.msra.mxu3 %v1371_v6  ;;  %v1358_v24 = vld [vmem:[%s1715_s23] sm:$0xff]  ;;  %v1359_v28 = vld [vmem:[%s1715_s23 + $0x8] sm:$0xff]  ;;  %v1348_v33 = vld [vmem:[%s1727_s25 + $0x30] sm:$0xff] }
  0x18   : > { %697 = vmatpush.bf16.msra.mxu1 %v1355_v7  ;;  %v1342_v26 = vld [vmem:[%s1727_s25] sm:$0xff]  ;;  %v1343_v30 = vld [vmem:[%s1727_s25 + $0x8] sm:$0xff]  ;;  %v1344_v34 = vld [vmem:[%s1727_s25 + $0x10] sm:$0xff] }
  0x19   : > { %874 = vmatpush.bf16.msra.mxu2 %v1655_v8  ;;  %v1374_v27 = vld [vmem:[%s1733_s24] sm:$0xff]  ;;  %v1375_v31 = vld [vmem:[%s1733_s24 + $0x8] sm:$0xff]  ;;  %v1376_v35 = vld [vmem:[%s1733_s24 + $0x10] sm:$0xff] }
  0x1a   : > { %v1361_v36 = vld [vmem:[%s1715_s23 + $0x18] sm:$0xff]  ;;  %v1362_v40 = vld [vmem:[%s1715_s23 + $0x20] sm:$0xff]  ;;  %v1380_v41 = vld [vmem:[%s1733_s24 + $0x30] sm:$0xff] }
  0x1b   : > { %553 = vmatpush.bf16.msra.mxu0 %v1370_v9  ;;  %1440 = vmatpush.bf16.msra.mxu3 %v1370_v9  ;;  %v1349_v37 = vld [vmem:[%s1727_s25 + $0x38] sm:$0xff]  ;;  %v1346_v42 = vld [vmem:[%s1727_s25 + $0x20] sm:$0xff]  ;;  %v1363_v44 = vld [vmem:[%s1715_s23 + $0x28] sm:$0xff] }
  0x1c   : > { %698 = vmatpush.bf16.msra.mxu1 %v1354_v10  ;;  %v1345_v38 = vld [vmem:[%s1727_s25 + $0x18] sm:$0xff]  ;;  %v1378_v43 = vld [vmem:[%s1733_s24 + $0x20] sm:$0xff]  ;;  %v1347_v46 = vld [vmem:[%s1727_s25 + $0x28] sm:$0xff] }
  0x1d   : > { %875 = vmatpush.bf16.msra.mxu2 %v1669_v11  ;;  %v1377_v39 = vld [vmem:[%s1733_s24 + $0x18] sm:$0xff]  ;;  %v1379_v47 = vld [vmem:[%s1733_s24 + $0x28] sm:$0xff]  ;;  %v1772_v56 = vld [vmem:[%s1835_s6] ss:$0 sm:$0xff] }
  0x1e   : > { %v1381_v45 = vld [vmem:[%s1733_s24 + $0x38] sm:$0xff] }
  0x1f   : > { %554 = vmatpush.bf16.msra.mxu0 %v1369_v12  ;;  %1441 = vmatpush.bf16.msra.mxu3 %v1369_v12 }
  0x20   : > { %699 = vmatpush.bf16.msra.mxu1 %v1353_v13 }
  0x21   : > { %876 = vmatpush.bf16.msra.mxu2 %v1682_v14 }
  0x23   : > { %555 = vmatpush.bf16.msra.mxu0 %v1368_v15  ;;  %1442 = vmatpush.bf16.msra.mxu3 %v1368_v15 }
  0x24   : > { %700 = vmatpush.bf16.msra.mxu1 %v1352_v16 }
  0x25   : > { %877 = vmatpush.bf16.msra.mxu2 %v1694_v17 }
  0x27   : > { %556 = vmatpush.bf16.msra.mxu0 %v1367_v18  ;;  %1443 = vmatpush.bf16.msra.mxu3 %v1367_v18 }
  0x28   : > { %701 = vmatpush.bf16.msra.mxu1 %v1351_v19 }
  0x29   : > { %878 = vmatpush.bf16.msra.mxu2 %v1383_v20 }
  0x2b   : > { %557 = vmatpush.bf16.msra.mxu0 %v1366_v21  ;;  %1444 = vmatpush.bf16.msra.mxu3 %v1366_v21 }
  0x2c   : > { %702 = vmatpush.bf16.msra.mxu1 %v1350_v22 }
  0x2d   : > { %879 = vmatpush.bf16.msra.mxu2 %v1382_v23 }
  0x2e   : > { %558 = vmatmul.bf16.vlgmr.msra.gmra.mxu0 %v1358_v24  ;;  %588 = vmatmul.bf16.vlgmr.msra.gmra.mxu3 %v1364_v25 }
  0x2f   : > { %1445 = vmatpush.bf16.msrb.mxu3 %v1622_v1  ;;  %703 = vmatmul.bf16.vlgmr.msra.gmra.mxu1 %v1342_v26 }
  0x30   : > { %880 = vmatmul.bf16.vlgmr.msra.gmra.mxu2 %v1374_v27 }
  0x33   : > { %1446 = vmatpush.bf16.msrb.mxu3 %v1637_v4 }
  0x37   : > { %1447 = vmatpush.bf16.msrb.mxu3 %v1355_v7 }
  0x3b   : > { %1448 = vmatpush.bf16.msrb.mxu3 %v1354_v10 }
  0x3e   : > { %563 = vmatmul.bf16.gmra.mxu0 %v1359_v28  ;;  %593 = vmatmul.bf16.gmra.mxu3 %v1365_v29 }
  0x3f   : > { %1449 = vmatpush.bf16.msrb.mxu3 %v1353_v13  ;;  %708 = vmatmul.bf16.gmra.mxu1 %v1343_v30 }
  0x40   : > { %885 = vmatmul.bf16.gmra.mxu2 %v1375_v31 }
  0x43   : > { %1450 = vmatpush.bf16.msrb.mxu3 %v1352_v16 }
  0x47   : > { %1451 = vmatpush.bf16.msrb.mxu3 %v1351_v19 }
  0x4b   : > { %1452 = vmatpush.bf16.msrb.mxu3 %v1350_v22 }
  0x4e   : > { %568 = vmatmul.bf16.gmra.mxu0 %v1360_v32  ;;  %733 = vmatmul.bf16.vlgmr.msrb.gmra.mxu3 %v1348_v33 }
  0x4f   : > { %1453 = vmatpush.bf16.msra.mxu3 %v1627_v2  ;;  %713 = vmatmul.bf16.gmra.mxu1 %v1344_v34 }
  0x50   : > { %890 = vmatmul.bf16.gmra.mxu2 %v1376_v35 }
  0x53   : > { %1454 = vmatpush.bf16.msra.mxu3 %v1642_v5 }
  0x57   : > { %1455 = vmatpush.bf16.msra.mxu3 %v1655_v8 }
  0x5b   : > { %1456 = vmatpush.bf16.msra.mxu3 %v1669_v11 }
  0x5e   : > { %573 = vmatmul.bf16.gmra.mxu0 %v1361_v36  ;;  %738 = vmatmul.bf16.gmra.mxu3 %v1349_v37 }
  0x5f   : > { %1457 = vmatpush.bf16.msra.mxu3 %v1682_v14  ;;  %718 = vmatmul.bf16.gmra.mxu1 %v1345_v38 }
  0x60   : > { %895 = vmatmul.bf16.gmra.mxu2 %v1377_v39 }
  0x63   : > { %1458 = vmatpush.bf16.msra.mxu3 %v1694_v17 }
  0x67   : > { %1459 = vmatpush.bf16.msra.mxu3 %v1383_v20 }
  0x6b   : > { %1460 = vmatpush.bf16.msra.mxu3 %v1382_v23 }
  0x6e   : > { %578 = vmatmul.bf16.gmra.mxu0 %v1362_v40  ;;  %910 = vmatmul.bf16.vlgmr.msra.gmra.mxu3 %v1380_v41 }
  0x6f   : > { %723 = vmatmul.bf16.gmra.mxu1 %v1346_v42 }
  0x70   : > { %900 = vmatmul.bf16.gmra.mxu2 %v1378_v43 }
  0x7e   : > { %583 = vmatmul.bf16.gmra.mxu0 %v1363_v44  ;;  %915 = vmatmul.bf16.gmra.mxu3 %v1381_v45 }
  0x7f   : > { %728 = vmatmul.bf16.gmra.mxu1 %v1347_v46 }
  0x80   : > { %905 = vmatmul.bf16.gmra.mxu2 %v1379_v47 }
  0xab   : > { %v559_v48 = vpop.f32.mrf.mxu0 }
  0xac   : > { %v704_v49 = vpop.f32.mrf.mxu1 }
  0xad   : > { %v705_v52 = vadd.f32 %v704_v49, %v559_v48 }
  0xb1   : > { %v1767_v50 = vpop.f32.mrf.mxu3 }
  0xb3   : > { %v881_v51 = vpop.f32.mrf.mxu2  ;;  %v561_v53 = vpop.f32.mrf.mxu0 }
  0xb4   : > { %v706_v54 = vpop.f32.mrf.mxu1  ;;  %v921_v55 = vadd.f32 %v881_v51, %v705_v52 }
  0xb5   : > { %v707_v57 = vadd.f32 %v706_v54, %v561_v53 }
  0xb6   : > { %v941_v60 = vadd.f32 %v1772_v56, %v921_v55 }
  0xb8   : > { %v957_v1 = vmax.f32 %v941_v60, 0.0 }
  0xb9   : > { %v1774_v58 = vpop.f32.mrf.mxu3 }
  0xbb   : > { %v883_v59 = vpop.f32.mrf.mxu2  ;;  %v564_v62 = vpop.f32.mrf.mxu0 }
  0xbc   : > { %v922_v61 = vadd.f32 %v883_v59, %v707_v57  ;;  %v709_v63 = vpop.f32.mrf.mxu1 }
  0xbd   : > { %v710_v6 = vadd.f32 %v709_v63, %v564_v62 }
  0xbe   : > { %v942_v0 = vadd.f32 %v1772_v56, %v922_v61 }
  0xc0   : > { %v958_v2 = vmax.f32 %v942_v0, 0.0 }
  0xc1   : > { %v1784_v4 = vpop.f32.mrf.mxu3 }
  0xc2   : > { %v1393_v3 = vpack.c.bf16 %v958_v2, %v957_v1 }
  0xc3   : > { %v886_v5 = vpop.f32.mrf.mxu2  ;;  %v566_v7 = vpop.f32.mrf.mxu0 }
  0xc4   : > { %1394 = vst [vmem:[%s1782_s21] sm:$0xff] %v1393_v3   ;;  %v711_v8 = vpop.f32.mrf.mxu1  ;;  %v923_v9 = vadd.f32 %v886_v5, %v710_v6 }
  0xc5   : > { %v712_v10 = vadd.f32 %v711_v8, %v566_v7 }
  0xc6   : > { %v943_v13 = vadd.f32 %v1772_v56, %v923_v9 }
  0xc8   : > { %v959_v18 = vmax.f32 %v943_v13, 0.0 }
  0xc9   : > { %v1787_v11 = vpop.f32.mrf.mxu3 }
  0xcb   : > { %v888_v12 = vpop.f32.mrf.mxu2  ;;  %v569_v15 = vpop.f32.mrf.mxu0 }
  0xcc   : > { %v924_v14 = vadd.f32 %v888_v12, %v712_v10  ;;  %v714_v16 = vpop.f32.mrf.mxu1 }
  0xcd   : > { %v715_v23 = vadd.f32 %v714_v16, %v569_v15 }
  0xce   : > { %v944_v17 = vadd.f32 %v1772_v56, %v924_v14 }
  0xd0   : > { %v960_v19 = vmax.f32 %v944_v17, 0.0 }
  0xd1   : > { %v734_v21 = vpop.f32.mrf.mxu3 }
  0xd2   : > { %v1398_v20 = vpack.c.bf16 %v960_v19, %v959_v18  ;;  %v735_v62 = vadd.f32 %v734_v21, %v1767_v50 }
  0xd3   : > { %v891_v22 = vpop.f32.mrf.mxu2  ;;  %v571_v24 = vpop.f32.mrf.mxu0 }
  0xd4   : > { %1430 = vst [vmem:[%s1782_s21 + $0x8] sm:$0xff] %v1398_v20   ;;  %v716_v25 = vpop.f32.mrf.mxu1  ;;  %v925_v26 = vadd.f32 %v891_v22, %v715_v23 }
  0xd5   : > { %v717_v27 = vadd.f32 %v716_v25, %v571_v24 }
  0xd6   : > { %v945_v30 = vadd.f32 %v1772_v56, %v925_v26 }
  0xd8   : > { %v961_v35 = vmax.f32 %v945_v30, 0.0 }
  0xd9   : > { %v736_v28 = vpop.f32.mrf.mxu3 }
  0xda   : > { %v737_v2 = vadd.f32 %v736_v28, %v1774_v58 }
  0xdb   : > { %v893_v29 = vpop.f32.mrf.mxu2  ;;  %v574_v32 = vpop.f32.mrf.mxu0 }
  0xdc   : > { %v926_v31 = vadd.f32 %v893_v29, %v717_v27  ;;  %v719_v33 = vpop.f32.mrf.mxu1 }
  0xdd   : > { %v720_v40 = vadd.f32 %v719_v33, %v574_v32 }
  0xde   : > { %v946_v34 = vadd.f32 %v1772_v56, %v926_v31 }
  0xe0   : > { %v962_v36 = vmax.f32 %v946_v34, 0.0 }
  0xe1   : > { %v739_v38 = vpop.f32.mrf.mxu3 }
  0xe2   : > { %v1403_v37 = vpack.c.bf16 %v962_v36, %v961_v35  ;;  %v740_v23 = vadd.f32 %v739_v38, %v1784_v4 }
  0xe3   : > { %v896_v39 = vpop.f32.mrf.mxu2  ;;  %v576_v41 = vpop.f32.mrf.mxu0 }
  0xe4   : > { %1431 = vst [vmem:[%s1782_s21 + $0x10] sm:$0xff] %v1403_v37   ;;  %v721_v42 = vpop.f32.mrf.mxu1  ;;  %v927_v43 = vadd.f32 %v896_v39, %v720_v40 }
  0xe5   : > { %v722_v44 = vadd.f32 %v721_v42, %v576_v41 }
  0xe6   : > { %v947_v47 = vadd.f32 %v1772_v56, %v927_v43 }
  0xe8   : > { %v963_v53 = vmax.f32 %v947_v47, 0.0 }
  0xe9   : > { %v741_v45 = vpop.f32.mrf.mxu3 }
  0xea   : > { %v742_v28 = vadd.f32 %v741_v45, %v1787_v11 }
  0xeb   : > { %v898_v46 = vpop.f32.mrf.mxu2  ;;  %v579_v49 = vpop.f32.mrf.mxu0 }
  0xec   : > { %v928_v48 = vadd.f32 %v898_v46, %v722_v44  ;;  %v724_v51 = vpop.f32.mrf.mxu1 }
  0xed   : > { %v725_v60 = vadd.f32 %v724_v51, %v579_v49 }
  0xee   : > { %v948_v52 = vadd.f32 %v1772_v56, %v928_v48 }
  0xf0   : > { %v964_v54 = vmax.f32 %v948_v52, 0.0 }
  0xf1   : > { %v911_v57 = vpop.f32.mrf.mxu3 }
  0xf2   : > { %v1408_v55 = vpack.c.bf16 %v964_v54, %v963_v53  ;;  %v933_v0 = vadd.f32 %v911_v57, %v735_v62 }
  0xf3   : > { %v901_v59 = vpop.f32.mrf.mxu2  ;;  %v581_v61 = vpop.f32.mrf.mxu0 }
  0xf4   : > { %1432 = vst [vmem:[%s1782_s21 + $0x18] sm:$0xff] %v1408_v55   ;;  %v726_v63 = vpop.f32.mrf.mxu1  ;;  %v929_v1 = vadd.f32 %v901_v59, %v725_v60  ;;  %v953_v6 = vadd.f32 %v1772_v56, %v933_v0 }
  0xf5   : > { %v727_v3 = vadd.f32 %v726_v63, %v581_v61 }
  0xf6   : > { %v949_v9 = vadd.f32 %v1772_v56, %v929_v1  ;;  %v969_v15 = vmax.f32 %v953_v6, 0.0 }
  0xf8   : > { %v965_v58 = vmax.f32 %v949_v9, 0.0 }
  0xf9   : > { %v913_v5 = vpop.f32.mrf.mxu3 }
  0xfa   : > { %v934_v8 = vadd.f32 %v913_v5, %v737_v2 }
  0xfb   : > { %v903_v7 = vpop.f32.mrf.mxu2  ;;  %v584_v13 = vpop.f32.mrf.mxu0 }
  0xfc   : > { %v930_v10 = vadd.f32 %v903_v7, %v727_v3  ;;  %v954_v12 = vadd.f32 %v1772_v56, %v934_v8  ;;  %v729_v50 = vpop.f32.mrf.mxu1 }
  0xfd   : > { %v730_v22 = vadd.f32 %v729_v50, %v584_v13 }
  0xfe   : > { %v950_v14 = vadd.f32 %v1772_v56, %v930_v10  ;;  %v970_v16 = vmax.f32 %v954_v12, 0.0 }
 0x100   : > { %v966_v17 = vmax.f32 %v950_v14, 0.0  ;;  %v1423_v18 = vpack.c.bf16 %v970_v16, %v969_v15 }
 0x101   : > { %v916_v20 = vpop.f32.mrf.mxu3 }
 0x102   : > { %v1413_v19 = vpack.c.bf16 %v966_v17, %v965_v58  ;;  %1435 = vst [vmem:[%s1782_s21 + $0x30] sm:$0xff] %v1423_v18   ;;  %v935_v24 = vadd.f32 %v916_v20, %v740_v23 }
 0x103   : > { %v906_v21 = vpop.f32.mrf.mxu2  ;;  %v586_v25 = vpop.f32.mrf.mxu0 }
 0x104   : > { %1433 = vst [vmem:[%s1782_s21 + $0x20] sm:$0xff] %v1413_v19   ;;  %v731_v26 = vpop.f32.mrf.mxu1  ;;  %v931_v27 = vadd.f32 %v906_v21, %v730_v22  ;;  %v955_v31 = vadd.f32 %v1772_v56, %v935_v24 }
 0x105   : > { %v732_v29 = vadd.f32 %v731_v26, %v586_v25 }
 0x106   : > { %v951_v34 = vadd.f32 %v1772_v56, %v931_v27  ;;  %v971_v37 = vmax.f32 %v955_v31, 0.0 }
 0x108   : > { %v967_v39 = vmax.f32 %v951_v34, 0.0 }
 0x109   : > { %v918_v30 = vpop.f32.mrf.mxu3 }
 0x10a   : > { %v936_v33 = vadd.f32 %v918_v30, %v742_v28 }
 0x10b   : > { %v908_v32 = vpop.f32.mrf.mxu2 }
 0x10c   : > { %v932_v35 = vadd.f32 %v908_v32, %v732_v29  ;;  %v956_v36 = vadd.f32 %v1772_v56, %v936_v33 }
 0x10e   : > { %v952_v4 = vadd.f32 %v1772_v56, %v932_v35  ;;  %v972_v38 = vmax.f32 %v956_v36, 0.0 }
 0x110   : > { %v968_v40 = vmax.f32 %v952_v4, 0.0  ;;  %v1428_v11 = vpack.c.bf16 %v972_v38, %v971_v37 }
 0x112   : > { %v1418_v41 = vpack.c.bf16 %v968_v40, %v967_v39  ;;  %1436 = vst [vmem:[%s1782_s21 + $0x38] sm:$0xff] %v1428_v11  }
 0x114   : > { %1434 = vst [vmem:[%s1782_s21 + $0x28] sm:$0xff] %v1418_v41  }
 0x115 PF: > { %s17_s28 = sadd.s32 1, %s1540_s28   ;;  %s1837_s24 = smov %s1532_s26 }
 0x116   : > { %p14_p7 = scmp.ge.s32.totalorder %s17_s28, 6   ;;  %s1838_s25 = smov %s1536_s27 }
 0x117   : > { %s1839_s26 = smov %s1842_s29  ;;  %s1840_s27 = smov %s1846_s30 }
 0x118   :  { %16 = sbr.rel (!%p14_p7) target bundleno = 3 (0x3), region = 84 }

// kernel: pyramid_detection_forward.11
= control target key start
LH: loop header
LB: loop body
LE: loop exit
PB: predicated region body
PF: predicated region fallthrough
CT: control target
= control target key end

     0   :  { %s1547_s24 = smov 0   ;;  %s1549_s25 = smov 0   ;;  %s1769_s0 = inlined_call_operand.vmem [shape: bf16[2,128,128], index: 0, kind: input, shape index: {}]   ;;  %s1770_s1 = inlined_call_operand.vmem [shape: bf16[2,128,128], index: 1, kind: input, shape index: {}]   ;;  %s1771_s2 = inlined_call_operand.vmem [shape: bf16[2,128,128], index: 2, kind: input, shape index: {}]   ;;  %s1772_s3 = inlined_call_operand.vmem [shape: bf16[128,128], index: 3, kind: input, shape index: {}]   ;;  %s1773_s4 = inlined_call_operand.vmem [shape: bf16[128,128], index: 4, kind: input, shape index: {}]   ;;  %s1774_s5 = inlined_call_operand.vmem [shape: bf16[128,128], index: 5, kind: input, shape index: {}]   ;;  %s1775_s6 = inlined_call_operand.vmem [shape: f32[1,128], index: 6, kind: input, shape index: {}]   ;;  %s1776_s7 = inlined_call_operand.vmem [shape: bf16[2,128,128], index: 7, kind: output, shape index: {}]  }
   0x1   :  { %s1551_s26 = smov 0  }
   0x2 LB: > { %s29_s27 = sadd.s32 1, %s1501_s25  ;;  %p1132_p0 = scmp.ge.s32.totalorder %s1505_s26, 1  ;;  %s1505_s26 = sphi %s1551_s26, %s17_s26   ;;  %s1501_s25 = sphi %s1549_s25, %s1778_s25   ;;  %s1497_s24 = sphi %s1547_s24, %s1777_s24  }
   0x3   : > { %p31_p1 = scmp.ge.s32.totalorder %s29_s27, 2  ;;  %p292_p2 = scmp.lt.s32.totalorder %s1505_s26, 3 }
   0x5   : > { %s1780_s27 = smov (%p31_p1, %s29_s27), 0  ;;  %p293_p3 = pnand %p1132_p0, %p292_p2 }
   0x6   : > { %p351_p4 = scmp.lt.s32.totalorder (!%p293_p3), %s1497_s24, 1 }
   0x7   : > { %296 = sbr.rel (%p293_p3) target bundleno = 275 (0x113), region = 48 }
   0xc   : > { %v1370_v0 = vld [vmem:[%s1773_s4 + $0x38] sm:$0xff]  ;;  %v1369_v3 = vld [vmem:[%s1773_s4 + $0x30] sm:$0xff]  ;;  %v1368_v6 = vld [vmem:[%s1773_s4 + $0x28] sm:$0xff]  ;;  %s1782_s24 = smov (!%p351_p4, %s1497_s24), 1 }
   0xd   : > { %v1573_v1 = vld [vmem:[%s1772_s3 + $0x38] sm:$0xff]  ;;  %550 = vmatpush.bf16.msra.mxu0 %v1370_v0  ;;  %1434 = vmatpush.bf16.msra.mxu3 %v1370_v0  ;;  %v1353_v4 = vld [vmem:[%s1772_s3 + $0x30] sm:$0xff]  ;;  %v1352_v7 = vld [vmem:[%s1772_s3 + $0x28] sm:$0xff]  ;;  %s1653_s9 = sshll.u32 %s1782_s24, 6 }
   0xe   : > { %v1578_v2 = vld [vmem:[%s1774_s5 + $0x38] sm:$0xff]  ;;  %695 = vmatpush.bf16.msra.mxu1 %v1573_v1  ;;  %v1591_v5 = vld [vmem:[%s1774_s5 + $0x30] sm:$0xff]  ;;  %v1603_v8 = vld [vmem:[%s1774_s5 + $0x28] sm:$0xff]  ;;  %s1662_s14 = scalar_lea.vmem %s1770_s1, %s1653_s9  ;;  %s1674_s20 = scalar_lea.vmem %s1769_s0, %s1653_s9 }
   0xf   : > { %872 = vmatpush.bf16.msra.mxu2 %v1578_v2  ;;  %v1367_v9 = vld [vmem:[%s1773_s4 + $0x20] sm:$0xff]  ;;  %v1366_v12 = vld [vmem:[%s1773_s4 + $0x18] sm:$0xff]  ;;  %v1365_v15 = vld [vmem:[%s1773_s4 + $0x10] sm:$0xff]  ;;  %s1680_s23 = scalar_lea.vmem %s1771_s2, %s1653_s9  ;;  %s1728_s10 = scalar_lea.vmem %s1776_s7, %s1653_s9 }
  0x10   : > { %v1351_v10 = vld [vmem:[%s1772_s3 + $0x20] sm:$0xff]  ;;  %v1350_v13 = vld [vmem:[%s1772_s3 + $0x18] sm:$0xff]  ;;  %v1349_v16 = vld [vmem:[%s1772_s3 + $0x10] sm:$0xff] }
  0x11   : > { %551 = vmatpush.bf16.msra.mxu0 %v1369_v3  ;;  %1435 = vmatpush.bf16.msra.mxu3 %v1369_v3  ;;  %v1615_v11 = vld [vmem:[%s1774_s5 + $0x20] sm:$0xff]  ;;  %v1627_v14 = vld [vmem:[%s1774_s5 + $0x18] sm:$0xff]  ;;  %v1640_v17 = vld [vmem:[%s1774_s5 + $0x10] sm:$0xff] }
  0x12   : > { %696 = vmatpush.bf16.msra.mxu1 %v1353_v4  ;;  %v1364_v18 = vld [vmem:[%s1773_s4 + $0x8] sm:$0xff]  ;;  %v1363_v21 = vld [vmem:[%s1773_s4] sm:$0xff]  ;;  %v1361_v25 = vld [vmem:[%s1662_s14 + $0x30] sm:$0xff] }
  0x13   : > { %873 = vmatpush.bf16.msra.mxu2 %v1591_v5  ;;  %v1348_v19 = vld [vmem:[%s1772_s3 + $0x8] sm:$0xff]  ;;  %v1347_v22 = vld [vmem:[%s1772_s3] sm:$0xff]  ;;  %v1362_v29 = vld [vmem:[%s1662_s14 + $0x38] sm:$0xff] }
  0x14   : > { %v1380_v20 = vld [vmem:[%s1774_s5 + $0x8] sm:$0xff]  ;;  %v1379_v23 = vld [vmem:[%s1774_s5] sm:$0xff]  ;;  %v1357_v32 = vld [vmem:[%s1662_s14 + $0x10] sm:$0xff] }
  0x15   : > { %552 = vmatpush.bf16.msra.mxu0 %v1368_v6  ;;  %1436 = vmatpush.bf16.msra.mxu3 %v1368_v6  ;;  %v1355_v24 = vld [vmem:[%s1662_s14] sm:$0xff]  ;;  %v1356_v28 = vld [vmem:[%s1662_s14 + $0x8] sm:$0xff]  ;;  %v1345_v33 = vld [vmem:[%s1674_s20 + $0x30] sm:$0xff] }
  0x16   : > { %697 = vmatpush.bf16.msra.mxu1 %v1352_v7  ;;  %v1339_v26 = vld [vmem:[%s1674_s20] sm:$0xff]  ;;  %v1340_v30 = vld [vmem:[%s1674_s20 + $0x8] sm:$0xff]  ;;  %v1341_v34 = vld [vmem:[%s1674_s20 + $0x10] sm:$0xff] }
  0x17   : > { %874 = vmatpush.bf16.msra.mxu2 %v1603_v8  ;;  %v1371_v27 = vld [vmem:[%s1680_s23] sm:$0xff]  ;;  %v1372_v31 = vld [vmem:[%s1680_s23 + $0x8] sm:$0xff]  ;;  %v1373_v35 = vld [vmem:[%s1680_s23 + $0x10] sm:$0xff] }
  0x18   : > { %v1358_v36 = vld [vmem:[%s1662_s14 + $0x18] sm:$0xff]  ;;  %v1359_v40 = vld [vmem:[%s1662_s14 + $0x20] sm:$0xff]  ;;  %v1377_v41 = vld [vmem:[%s1680_s23 + $0x30] sm:$0xff] }
  0x19   : > { %553 = vmatpush.bf16.msra.mxu0 %v1367_v9  ;;  %1437 = vmatpush.bf16.msra.mxu3 %v1367_v9  ;;  %v1346_v37 = vld [vmem:[%s1674_s20 + $0x38] sm:$0xff]  ;;  %v1343_v42 = vld [vmem:[%s1674_s20 + $0x20] sm:$0xff]  ;;  %v1360_v44 = vld [vmem:[%s1662_s14 + $0x28] sm:$0xff] }
  0x1a   : > { %698 = vmatpush.bf16.msra.mxu1 %v1351_v10  ;;  %v1342_v38 = vld [vmem:[%s1674_s20 + $0x18] sm:$0xff]  ;;  %v1375_v43 = vld [vmem:[%s1680_s23 + $0x20] sm:$0xff]  ;;  %v1344_v46 = vld [vmem:[%s1674_s20 + $0x28] sm:$0xff] }
  0x1b   : > { %875 = vmatpush.bf16.msra.mxu2 %v1615_v11  ;;  %v1374_v39 = vld [vmem:[%s1680_s23 + $0x18] sm:$0xff]  ;;  %v1376_v47 = vld [vmem:[%s1680_s23 + $0x28] sm:$0xff]  ;;  %v1718_v56 = vld [vmem:[%s1775_s6] ss:$0 sm:$0xff] }
  0x1c   : > { %v1378_v45 = vld [vmem:[%s1680_s23 + $0x38] sm:$0xff] }
  0x1d   : > { %554 = vmatpush.bf16.msra.mxu0 %v1366_v12  ;;  %1438 = vmatpush.bf16.msra.mxu3 %v1366_v12 }
  0x1e   : > { %699 = vmatpush.bf16.msra.mxu1 %v1350_v13 }
  0x1f   : > { %876 = vmatpush.bf16.msra.mxu2 %v1627_v14 }
  0x21   : > { %555 = vmatpush.bf16.msra.mxu0 %v1365_v15  ;;  %1439 = vmatpush.bf16.msra.mxu3 %v1365_v15 }
  0x22   : > { %700 = vmatpush.bf16.msra.mxu1 %v1349_v16 }
  0x23   : > { %877 = vmatpush.bf16.msra.mxu2 %v1640_v17 }
  0x25   : > { %556 = vmatpush.bf16.msra.mxu0 %v1364_v18  ;;  %1440 = vmatpush.bf16.msra.mxu3 %v1364_v18 }
  0x26   : > { %701 = vmatpush.bf16.msra.mxu1 %v1348_v19 }
  0x27   : > { %878 = vmatpush.bf16.msra.mxu2 %v1380_v20 }
  0x29   : > { %557 = vmatpush.bf16.msra.mxu0 %v1363_v21  ;;  %1441 = vmatpush.bf16.msra.mxu3 %v1363_v21 }
  0x2a   : > { %702 = vmatpush.bf16.msra.mxu1 %v1347_v22 }
  0x2b   : > { %879 = vmatpush.bf16.msra.mxu2 %v1379_v23 }
  0x2c   : > { %558 = vmatmul.bf16.vlgmr.msra.gmra.mxu0 %v1355_v24  ;;  %588 = vmatmul.bf16.vlgmr.msra.gmra.mxu3 %v1361_v25 }
  0x2d   : > { %1442 = vmatpush.bf16.msrb.mxu3 %v1573_v1  ;;  %703 = vmatmul.bf16.vlgmr.msra.gmra.mxu1 %v1339_v26 }
  0x2e   : > { %880 = vmatmul.bf16.vlgmr.msra.gmra.mxu2 %v1371_v27 }
  0x31   : > { %1443 = vmatpush.bf16.msrb.mxu3 %v1353_v4 }
  0x35   : > { %1444 = vmatpush.bf16.msrb.mxu3 %v1352_v7 }
  0x39   : > { %1445 = vmatpush.bf16.msrb.mxu3 %v1351_v10 }
  0x3c   : > { %563 = vmatmul.bf16.gmra.mxu0 %v1356_v28  ;;  %593 = vmatmul.bf16.gmra.mxu3 %v1362_v29 }
  0x3d   : > { %1446 = vmatpush.bf16.msrb.mxu3 %v1350_v13  ;;  %708 = vmatmul.bf16.gmra.mxu1 %v1340_v30 }
  0x3e   : > { %885 = vmatmul.bf16.gmra.mxu2 %v1372_v31 }
  0x41   : > { %1447 = vmatpush.bf16.msrb.mxu3 %v1349_v16 }
  0x45   : > { %1448 = vmatpush.bf16.msrb.mxu3 %v1348_v19 }
  0x49   : > { %1449 = vmatpush.bf16.msrb.mxu3 %v1347_v22 }
  0x4c   : > { %568 = vmatmul.bf16.gmra.mxu0 %v1357_v32  ;;  %733 = vmatmul.bf16.vlgmr.msrb.gmra.mxu3 %v1345_v33 }
  0x4d   : > { %1450 = vmatpush.bf16.msra.mxu3 %v1578_v2  ;;  %713 = vmatmul.bf16.gmra.mxu1 %v1341_v34 }
  0x4e   : > { %890 = vmatmul.bf16.gmra.mxu2 %v1373_v35 }
  0x51   : > { %1451 = vmatpush.bf16.msra.mxu3 %v1591_v5 }
  0x55   : > { %1452 = vmatpush.bf16.msra.mxu3 %v1603_v8 }
  0x59   : > { %1453 = vmatpush.bf16.msra.mxu3 %v1615_v11 }
  0x5c   : > { %573 = vmatmul.bf16.gmra.mxu0 %v1358_v36  ;;  %738 = vmatmul.bf16.gmra.mxu3 %v1346_v37 }
  0x5d   : > { %1454 = vmatpush.bf16.msra.mxu3 %v1627_v14  ;;  %718 = vmatmul.bf16.gmra.mxu1 %v1342_v38 }
  0x5e   : > { %895 = vmatmul.bf16.gmra.mxu2 %v1374_v39 }
  0x61   : > { %1455 = vmatpush.bf16.msra.mxu3 %v1640_v17 }
  0x65   : > { %1456 = vmatpush.bf16.msra.mxu3 %v1380_v20 }
  0x69   : > { %1457 = vmatpush.bf16.msra.mxu3 %v1379_v23 }
  0x6c   : > { %578 = vmatmul.bf16.gmra.mxu0 %v1359_v40  ;;  %910 = vmatmul.bf16.vlgmr.msra.gmra.mxu3 %v1377_v41 }
  0x6d   : > { %723 = vmatmul.bf16.gmra.mxu1 %v1343_v42 }
  0x6e   : > { %900 = vmatmul.bf16.gmra.mxu2 %v1375_v43 }
  0x7c   : > { %583 = vmatmul.bf16.gmra.mxu0 %v1360_v44  ;;  %915 = vmatmul.bf16.gmra.mxu3 %v1378_v45 }
  0x7d   : > { %728 = vmatmul.bf16.gmra.mxu1 %v1344_v46 }
  0x7e   : > { %905 = vmatmul.bf16.gmra.mxu2 %v1376_v47 }
  0xa9   : > { %v559_v48 = vpop.f32.mrf.mxu0 }
  0xaa   : > { %v704_v49 = vpop.f32.mrf.mxu1 }
  0xab   : > { %v705_v52 = vadd.f32 %v704_v49, %v559_v48 }
  0xaf   : > { %v1713_v50 = vpop.f32.mrf.mxu3 }
  0xb1   : > { %v881_v51 = vpop.f32.mrf.mxu2  ;;  %v561_v53 = vpop.f32.mrf.mxu0 }
  0xb2   : > { %v706_v54 = vpop.f32.mrf.mxu1  ;;  %v921_v55 = vadd.f32 %v881_v51, %v705_v52 }
  0xb3   : > { %v707_v57 = vadd.f32 %v706_v54, %v561_v53 }
  0xb4   : > { %v941_v60 = vadd.f32 %v1718_v56, %v921_v55 }
  0xb6   : > { %v957_v1 = vmax.f32 %v941_v60, 0.0 }
  0xb7   : > { %v1720_v58 = vpop.f32.mrf.mxu3 }
  0xb9   : > { %v883_v59 = vpop.f32.mrf.mxu2  ;;  %v564_v62 = vpop.f32.mrf.mxu0 }
  0xba   : > { %v922_v61 = vadd.f32 %v883_v59, %v707_v57  ;;  %v709_v63 = vpop.f32.mrf.mxu1 }
  0xbb   : > { %v710_v6 = vadd.f32 %v709_v63, %v564_v62 }
  0xbc   : > { %v942_v0 = vadd.f32 %v1718_v56, %v922_v61 }
  0xbe   : > { %v958_v2 = vmax.f32 %v942_v0, 0.0 }
  0xbf   : > { %v1730_v4 = vpop.f32.mrf.mxu3 }
  0xc0   : > { %v1390_v3 = vpack.c.bf16 %v958_v2, %v957_v1 }
  0xc1   : > { %v886_v5 = vpop.f32.mrf.mxu2  ;;  %v566_v7 = vpop.f32.mrf.mxu0 }
  0xc2   : > { %1391 = vst [vmem:[%s1728_s10] sm:$0xff] %v1390_v3   ;;  %v711_v8 = vpop.f32.mrf.mxu1  ;;  %v923_v9 = vadd.f32 %v886_v5, %v710_v6 }
  0xc3   : > { %v712_v10 = vadd.f32 %v711_v8, %v566_v7 }
  0xc4   : > { %v943_v13 = vadd.f32 %v1718_v56, %v923_v9 }
  0xc6   : > { %v959_v18 = vmax.f32 %v943_v13, 0.0 }
  0xc7   : > { %v1733_v11 = vpop.f32.mrf.mxu3 }
  0xc9   : > { %v888_v12 = vpop.f32.mrf.mxu2  ;;  %v569_v15 = vpop.f32.mrf.mxu0 }
  0xca   : > { %v924_v14 = vadd.f32 %v888_v12, %v712_v10  ;;  %v714_v16 = vpop.f32.mrf.mxu1 }
  0xcb   : > { %v715_v23 = vadd.f32 %v714_v16, %v569_v15 }
  0xcc   : > { %v944_v17 = vadd.f32 %v1718_v56, %v924_v14 }
  0xce   : > { %v960_v19 = vmax.f32 %v944_v17, 0.0 }
  0xcf   : > { %v734_v21 = vpop.f32.mrf.mxu3 }
  0xd0   : > { %v1395_v20 = vpack.c.bf16 %v960_v19, %v959_v18  ;;  %v735_v62 = vadd.f32 %v734_v21, %v1713_v50 }
  0xd1   : > { %v891_v22 = vpop.f32.mrf.mxu2  ;;  %v571_v24 = vpop.f32.mrf.mxu0 }
  0xd2   : > { %1427 = vst [vmem:[%s1728_s10 + $0x8] sm:$0xff] %v1395_v20   ;;  %v716_v25 = vpop.f32.mrf.mxu1  ;;  %v925_v26 = vadd.f32 %v891_v22, %v715_v23 }
  0xd3   : > { %v717_v27 = vadd.f32 %v716_v25, %v571_v24 }
  0xd4   : > { %v945_v30 = vadd.f32 %v1718_v56, %v925_v26 }
  0xd6   : > { %v961_v35 = vmax.f32 %v945_v30, 0.0 }
  0xd7   : > { %v736_v28 = vpop.f32.mrf.mxu3 }
  0xd8   : > { %v737_v2 = vadd.f32 %v736_v28, %v1720_v58 }
  0xd9   : > { %v893_v29 = vpop.f32.mrf.mxu2  ;;  %v574_v32 = vpop.f32.mrf.mxu0 }
  0xda   : > { %v926_v31 = vadd.f32 %v893_v29, %v717_v27  ;;  %v719_v33 = vpop.f32.mrf.mxu1 }
  0xdb   : > { %v720_v40 = vadd.f32 %v719_v33, %v574_v32 }
  0xdc   : > { %v946_v34 = vadd.f32 %v1718_v56, %v926_v31 }
  0xde   : > { %v962_v36 = vmax.f32 %v946_v34, 0.0 }
  0xdf   : > { %v739_v38 = vpop.f32.mrf.mxu3 }
  0xe0   : > { %v1400_v37 = vpack.c.bf16 %v962_v36, %v961_v35  ;;  %v740_v23 = vadd.f32 %v739_v38, %v1730_v4 }
  0xe1   : > { %v896_v39 = vpop.f32.mrf.mxu2  ;;  %v576_v41 = vpop.f32.mrf.mxu0 }
  0xe2   : > { %1428 = vst [vmem:[%s1728_s10 + $0x10] sm:$0xff] %v1400_v37   ;;  %v721_v42 = vpop.f32.mrf.mxu1  ;;  %v927_v43 = vadd.f32 %v896_v39, %v720_v40 }
  0xe3   : > { %v722_v44 = vadd.f32 %v721_v42, %v576_v41 }
  0xe4   : > { %v947_v47 = vadd.f32 %v1718_v56, %v927_v43 }
  0xe6   : > { %v963_v53 = vmax.f32 %v947_v47, 0.0 }
  0xe7   : > { %v741_v45 = vpop.f32.mrf.mxu3 }
  0xe8   : > { %v742_v28 = vadd.f32 %v741_v45, %v1733_v11 }
  0xe9   : > { %v898_v46 = vpop.f32.mrf.mxu2  ;;  %v579_v49 = vpop.f32.mrf.mxu0 }
  0xea   : > { %v928_v48 = vadd.f32 %v898_v46, %v722_v44  ;;  %v724_v51 = vpop.f32.mrf.mxu1 }
  0xeb   : > { %v725_v60 = vadd.f32 %v724_v51, %v579_v49 }
  0xec   : > { %v948_v52 = vadd.f32 %v1718_v56, %v928_v48 }
  0xee   : > { %v964_v54 = vmax.f32 %v948_v52, 0.0 }
  0xef   : > { %v911_v57 = vpop.f32.mrf.mxu3 }
  0xf0   : > { %v1405_v55 = vpack.c.bf16 %v964_v54, %v963_v53  ;;  %v933_v0 = vadd.f32 %v911_v57, %v735_v62 }
  0xf1   : > { %v901_v59 = vpop.f32.mrf.mxu2  ;;  %v581_v61 = vpop.f32.mrf.mxu0 }
  0xf2   : > { %1429 = vst [vmem:[%s1728_s10 + $0x18] sm:$0xff] %v1405_v55   ;;  %v726_v63 = vpop.f32.mrf.mxu1  ;;  %v929_v1 = vadd.f32 %v901_v59, %v725_v60  ;;  %v953_v6 = vadd.f32 %v1718_v56, %v933_v0 }
  0xf3   : > { %v727_v3 = vadd.f32 %v726_v63, %v581_v61 }
  0xf4   : > { %v949_v9 = vadd.f32 %v1718_v56, %v929_v1  ;;  %v969_v15 = vmax.f32 %v953_v6, 0.0 }
  0xf6   : > { %v965_v58 = vmax.f32 %v949_v9, 0.0 }
  0xf7   : > { %v913_v5 = vpop.f32.mrf.mxu3 }
  0xf8   : > { %v934_v8 = vadd.f32 %v913_v5, %v737_v2 }
  0xf9   : > { %v903_v7 = vpop.f32.mrf.mxu2  ;;  %v584_v13 = vpop.f32.mrf.mxu0 }
  0xfa   : > { %v930_v10 = vadd.f32 %v903_v7, %v727_v3  ;;  %v954_v12 = vadd.f32 %v1718_v56, %v934_v8  ;;  %v729_v50 = vpop.f32.mrf.mxu1 }
  0xfb   : > { %v730_v22 = vadd.f32 %v729_v50, %v584_v13 }
  0xfc   : > { %v950_v14 = vadd.f32 %v1718_v56, %v930_v10  ;;  %v970_v16 = vmax.f32 %v954_v12, 0.0 }
  0xfe   : > { %v966_v17 = vmax.f32 %v950_v14, 0.0  ;;  %v1420_v18 = vpack.c.bf16 %v970_v16, %v969_v15 }
  0xff   : > { %v916_v20 = vpop.f32.mrf.mxu3 }
 0x100   : > { %v1410_v19 = vpack.c.bf16 %v966_v17, %v965_v58  ;;  %1432 = vst [vmem:[%s1728_s10 + $0x30] sm:$0xff] %v1420_v18   ;;  %v935_v24 = vadd.f32 %v916_v20, %v740_v23 }
 0x101   : > { %v906_v21 = vpop.f32.mrf.mxu2  ;;  %v586_v25 = vpop.f32.mrf.mxu0 }
 0x102   : > { %1430 = vst [vmem:[%s1728_s10 + $0x20] sm:$0xff] %v1410_v19   ;;  %v731_v26 = vpop.f32.mrf.mxu1  ;;  %v931_v27 = vadd.f32 %v906_v21, %v730_v22  ;;  %v955_v31 = vadd.f32 %v1718_v56, %v935_v24 }
 0x103   : > { %v732_v29 = vadd.f32 %v731_v26, %v586_v25 }
 0x104   : > { %v951_v34 = vadd.f32 %v1718_v56, %v931_v27  ;;  %v971_v37 = vmax.f32 %v955_v31, 0.0 }
 0x106   : > { %v967_v39 = vmax.f32 %v951_v34, 0.0 }
 0x107   : > { %v918_v30 = vpop.f32.mrf.mxu3 }
 0x108   : > { %v936_v33 = vadd.f32 %v918_v30, %v742_v28 }
 0x109   : > { %v908_v32 = vpop.f32.mrf.mxu2 }
 0x10a   : > { %v932_v35 = vadd.f32 %v908_v32, %v732_v29  ;;  %v956_v36 = vadd.f32 %v1718_v56, %v936_v33 }
 0x10c   : > { %v952_v4 = vadd.f32 %v1718_v56, %v932_v35  ;;  %v972_v38 = vmax.f32 %v956_v36, 0.0 }
 0x10e   : > { %v968_v40 = vmax.f32 %v952_v4, 0.0  ;;  %v1425_v11 = vpack.c.bf16 %v972_v38, %v971_v37 }
 0x110   : > { %v1415_v41 = vpack.c.bf16 %v968_v40, %v967_v39  ;;  %1433 = vst [vmem:[%s1728_s10 + $0x38] sm:$0xff] %v1425_v11  }
 0x112   : > { %1431 = vst [vmem:[%s1728_s10 + $0x28] sm:$0xff] %v1415_v41  }
 0x113 PF: > { %s17_s26 = sadd.s32 1, %s1505_s26   ;;  %s1777_s24 = smov %s1501_s25 }
 0x114   : > { %p14_p5 = scmp.ge.s32.totalorder %s17_s26, 4   ;;  %s1778_s25 = smov %s1780_s27 }
 0x116   :  { %16 = sbr.rel (!%p14_p5) target bundleno = 2 (0x2), region = 84 }

// kernel: pyramid_detection_forward.12
= control target key start
LH: loop header
LB: loop body
LE: loop exit
PB: predicated region body
PF: predicated region fallthrough
CT: control target
= control target key end

     0   :  { %s1251_s24 = smov 0   ;;  %s1253_s25 = smov 0   ;;  %s1381_s0 = inlined_call_operand.vmem [shape: bf16[2,64,128], index: 0, kind: input, shape index: {}]   ;;  %s1382_s1 = inlined_call_operand.vmem [shape: bf16[2,64,128], index: 1, kind: input, shape index: {}]   ;;  %s1383_s2 = inlined_call_operand.vmem [shape: bf16[2,64,128], index: 2, kind: input, shape index: {}]   ;;  %s1384_s3 = inlined_call_operand.vmem [shape: bf16[128,128], index: 3, kind: input, shape index: {}]   ;;  %s1385_s4 = inlined_call_operand.vmem [shape: bf16[128,128], index: 4, kind: input, shape index: {}]   ;;  %s1386_s5 = inlined_call_operand.vmem [shape: bf16[128,128], index: 5, kind: input, shape index: {}]   ;;  %s1387_s6 = inlined_call_operand.vmem [shape: f32[1,128], index: 6, kind: input, shape index: {}]   ;;  %s1388_s7 = inlined_call_operand.vmem [shape: bf16[2,64,128], index: 7, kind: output, shape index: {}]  }
   0x1   :  { %s1255_s26 = smov 0  }
   0x2 LB: > { %s29_s27 = sadd.s32 1, %s1205_s25  ;;  %p936_p0 = scmp.ge.s32.totalorder %s1209_s26, 1  ;;  %s1209_s26 = sphi %s1255_s26, %s17_s26   ;;  %s1205_s25 = sphi %s1253_s25, %s1390_s25   ;;  %s1201_s24 = sphi %s1251_s24, %s1389_s24  }
   0x3   : > { %p31_p1 = scmp.ge.s32.totalorder %s29_s27, 2  ;;  %p292_p2 = scmp.lt.s32.totalorder %s1209_s26, 3 }
   0x5   : > { %s1392_s27 = smov (%p31_p1, %s29_s27), 0  ;;  %p293_p3 = pnand %p936_p0, %p292_p2 }
   0x6   : > { %p351_p4 = scmp.lt.s32.totalorder (!%p293_p3), %s1201_s24, 1 }
   0x7   : > { %296 = sbr.rel (%p293_p3) target bundleno = 243 (0xf3), region = 48 }
   0xc   : > { %v1118_v0 = vld [vmem:[%s1385_s4 + $0x38] sm:$0xff]  ;;  %v1117_v3 = vld [vmem:[%s1385_s4 + $0x30] sm:$0xff]  ;;  %v1116_v6 = vld [vmem:[%s1385_s4 + $0x28] sm:$0xff]  ;;  %s1394_s24 = smov (!%p351_p4, %s1201_s24), 1 }
   0xd   : > { %v1106_v1 = vld [vmem:[%s1384_s3 + $0x38] sm:$0xff]  ;;  %510 = vmatpush.bf16.msra.mxu0 %v1118_v0  ;;  %v1105_v4 = vld [vmem:[%s1384_s3 + $0x30] sm:$0xff]  ;;  %1154 = vmatpush.bf16.msra.mxu3 %v1118_v0  ;;  %v1104_v7 = vld [vmem:[%s1384_s3 + $0x28] sm:$0xff]  ;;  %s1336_s9 = sshll.u32 %s1394_s24, 5 }
   0xe   : > { %v1130_v2 = vld [vmem:[%s1386_s5 + $0x38] sm:$0xff]  ;;  %611 = vmatpush.bf16.msra.mxu1 %v1106_v1  ;;  %v1129_v5 = vld [vmem:[%s1386_s5 + $0x30] sm:$0xff]  ;;  %v1128_v8 = vld [vmem:[%s1386_s5 + $0x28] sm:$0xff]  ;;  %s368_s16 = scalar_lea.vmem %s1382_s1, %s1336_s9  ;;  %s358_s18 = scalar_lea.vmem %s1381_s0, %s1336_s9 }
   0xf   : > { %736 = vmatpush.bf16.msra.mxu2 %v1130_v2  ;;  %v1115_v9 = vld [vmem:[%s1385_s4 + $0x20] sm:$0xff]  ;;  %v1114_v12 = vld [vmem:[%s1385_s4 + $0x18] sm:$0xff]  ;;  %v1113_v15 = vld [vmem:[%s1385_s4 + $0x10] sm:$0xff]  ;;  %s378_s23 = scalar_lea.vmem %s1383_s2, %s1336_s9  ;;  %s1366_s10 = scalar_lea.vmem %s1388_s7, %s1336_s9 }
  0x10   : > { %v1103_v10 = vld [vmem:[%s1384_s3 + $0x20] sm:$0xff]  ;;  %v1102_v13 = vld [vmem:[%s1384_s3 + $0x18] sm:$0xff]  ;;  %v1101_v16 = vld [vmem:[%s1384_s3 + $0x10] sm:$0xff] }
  0x11   : > { %511 = vmatpush.bf16.msra.mxu0 %v1117_v3  ;;  %1155 = vmatpush.bf16.msra.mxu3 %v1117_v3  ;;  %v1127_v11 = vld [vmem:[%s1386_s5 + $0x20] sm:$0xff]  ;;  %v1126_v14 = vld [vmem:[%s1386_s5 + $0x18] sm:$0xff]  ;;  %v1125_v17 = vld [vmem:[%s1386_s5 + $0x10] sm:$0xff] }
  0x12   : > { %612 = vmatpush.bf16.msra.mxu1 %v1105_v4  ;;  %v1112_v18 = vld [vmem:[%s1385_s4 + $0x8] sm:$0xff]  ;;  %v1111_v21 = vld [vmem:[%s1385_s4] sm:$0xff]  ;;  %v1109_v30 = vld [vmem:[%s368_s16 + $0x10] sm:$0xff] }
  0x13   : > { %737 = vmatpush.bf16.msra.mxu2 %v1129_v5  ;;  %v1100_v19 = vld [vmem:[%s1384_s3 + $0x8] sm:$0xff]  ;;  %v1099_v22 = vld [vmem:[%s1384_s3] sm:$0xff]  ;;  %v1097_v31 = vld [vmem:[%s358_s18 + $0x10] sm:$0xff] }
  0x14   : > { %v1124_v20 = vld [vmem:[%s1386_s5 + $0x8] sm:$0xff]  ;;  %v1123_v23 = vld [vmem:[%s1386_s5] sm:$0xff]  ;;  %v1121_v32 = vld [vmem:[%s378_s23 + $0x10] sm:$0xff] }
  0x15   : > { %512 = vmatpush.bf16.msra.mxu0 %v1116_v6  ;;  %1156 = vmatpush.bf16.msra.mxu3 %v1116_v6  ;;  %v1107_v24 = vld [vmem:[%s368_s16] sm:$0xff]  ;;  %v1108_v27 = vld [vmem:[%s368_s16 + $0x8] sm:$0xff]  ;;  %v1110_v33 = vld [vmem:[%s368_s16 + $0x18] sm:$0xff] }
  0x16   : > { %613 = vmatpush.bf16.msra.mxu1 %v1104_v7  ;;  %v1095_v25 = vld [vmem:[%s358_s18] sm:$0xff]  ;;  %v1096_v28 = vld [vmem:[%s358_s18 + $0x8] sm:$0xff]  ;;  %v1098_v34 = vld [vmem:[%s358_s18 + $0x18] sm:$0xff] }
  0x17   : > { %738 = vmatpush.bf16.msra.mxu2 %v1128_v8  ;;  %v1119_v26 = vld [vmem:[%s378_s23] sm:$0xff]  ;;  %v1120_v29 = vld [vmem:[%s378_s23 + $0x8] sm:$0xff]  ;;  %v1122_v35 = vld [vmem:[%s378_s23 + $0x18] sm:$0xff] }
  0x18   : > { %v1186_v44 = vld [vmem:[%s1387_s6] ss:$0 sm:$0xff] }
  0x19   : > { %513 = vmatpush.bf16.msra.mxu0 %v1115_v9  ;;  %1157 = vmatpush.bf16.msra.mxu3 %v1115_v9 }
  0x1a   : > { %614 = vmatpush.bf16.msra.mxu1 %v1103_v10 }
  0x1b   : > { %739 = vmatpush.bf16.msra.mxu2 %v1127_v11 }
  0x1d   : > { %514 = vmatpush.bf16.msra.mxu0 %v1114_v12  ;;  %1158 = vmatpush.bf16.msra.mxu3 %v1114_v12 }
  0x1e   : > { %615 = vmatpush.bf16.msra.mxu1 %v1102_v13 }
  0x1f   : > { %740 = vmatpush.bf16.msra.mxu2 %v1126_v14 }
  0x21   : > { %515 = vmatpush.bf16.msra.mxu0 %v1113_v15  ;;  %1159 = vmatpush.bf16.msra.mxu3 %v1113_v15 }
  0x22   : > { %616 = vmatpush.bf16.msra.mxu1 %v1101_v16 }
  0x23   : > { %741 = vmatpush.bf16.msra.mxu2 %v1125_v17 }
  0x25   : > { %516 = vmatpush.bf16.msra.mxu0 %v1112_v18  ;;  %1160 = vmatpush.bf16.msra.mxu3 %v1112_v18 }
  0x26   : > { %617 = vmatpush.bf16.msra.mxu1 %v1100_v19 }
  0x27   : > { %742 = vmatpush.bf16.msra.mxu2 %v1124_v20 }
  0x29   : > { %517 = vmatpush.bf16.msra.mxu0 %v1111_v21  ;;  %1161 = vmatpush.bf16.msra.mxu3 %v1111_v21 }
  0x2a   : > { %618 = vmatpush.bf16.msra.mxu1 %v1099_v22 }
  0x2b   : > { %743 = vmatpush.bf16.msra.mxu2 %v1123_v23 }
  0x2c   : > { %518 = vmatmul.bf16.vlgmr.msra.gmra.mxu0 %v1107_v24  ;;  %523 = vmatmul.bf16.vlgmr.msra.gmra.mxu3 %v1108_v27 }
  0x2d   : > { %619 = vmatmul.bf16.vlgmr.msra.gmra.mxu1 %v1095_v25 }
  0x2e   : > { %744 = vmatmul.bf16.vlgmr.msra.gmra.mxu2 %v1119_v26 }
  0x3c   : > { %528 = vmatmul.bf16.gmra.mxu3 %v1109_v30 }
  0x3d   : > { %624 = vmatmul.bf16.gmra.mxu1 %v1096_v28 }
  0x3e   : > { %749 = vmatmul.bf16.gmra.mxu2 %v1120_v29 }
  0x4c   : > { %533 = vmatmul.bf16.gmra.mxu3 %v1110_v33 }
  0x4d   : > { %629 = vmatmul.bf16.gmra.mxu1 %v1097_v31 }
  0x4e   : > { %754 = vmatmul.bf16.gmra.mxu2 %v1121_v32 }
  0x5d   : > { %634 = vmatmul.bf16.gmra.mxu1 %v1098_v34 }
  0x5e   : > { %759 = vmatmul.bf16.gmra.mxu2 %v1122_v35 }
  0xa9   : > { %v519_v37 = vpop.f32.mrf.mxu0 }
  0xaa   : > { %v620_v36 = vpop.f32.mrf.mxu1 }
  0xab   : > { %v621_v39 = vadd.f32 %v620_v36, %v519_v37 }
  0xaf   : > { %v524_v42 = vpop.f32.mrf.mxu3 }
  0xb1   : > { %v745_v38 = vpop.f32.mrf.mxu2  ;;  %v521_v41 = vpop.f32.mrf.mxu0 }
  0xb2   : > { %v622_v40 = vpop.f32.mrf.mxu1  ;;  %v765_v43 = vadd.f32 %v745_v38, %v621_v39 }
  0xb3   : > { %v623_v45 = vadd.f32 %v622_v40, %v521_v41 }
  0xb4   : > { %v777_v47 = vadd.f32 %v1186_v44, %v765_v43 }
  0xb6   : > { %v785_v51 = vmax.f32 %v777_v47, 0.0 }
  0xb7   : > { %v526_v53 = vpop.f32.mrf.mxu3 }
  0xb9   : > { %v747_v46 = vpop.f32.mrf.mxu2 }
  0xba   : > { %v766_v48 = vadd.f32 %v747_v46, %v623_v45  ;;  %v625_v49 = vpop.f32.mrf.mxu1 }
  0xbb   : > { %v626_v56 = vadd.f32 %v625_v49, %v524_v42 }
  0xbc   : > { %v778_v50 = vadd.f32 %v1186_v44, %v766_v48 }
  0xbe   : > { %v786_v52 = vmax.f32 %v778_v50, 0.0 }
  0xbf   : > { %v529_v60 = vpop.f32.mrf.mxu3 }
  0xc0   : > { %v1134_v54 = vpack.c.bf16 %v786_v52, %v785_v51 }
  0xc1   : > { %v750_v55 = vpop.f32.mrf.mxu2 }
  0xc2   : > { %1135 = vst [vmem:[%s1366_s10] sm:$0xff] %v1134_v54   ;;  %v627_v57 = vpop.f32.mrf.mxu1  ;;  %v767_v58 = vadd.f32 %v750_v55, %v626_v56 }
  0xc3   : > { %v628_v59 = vadd.f32 %v627_v57, %v526_v53 }
  0xc4   : > { %v779_v62 = vadd.f32 %v1186_v44, %v767_v58 }
  0xc6   : > { %v787_v2 = vmax.f32 %v779_v62, 0.0 }
  0xc7   : > { %v531_v8 = vpop.f32.mrf.mxu3 }
  0xc9   : > { %v752_v61 = vpop.f32.mrf.mxu2 }
  0xca   : > { %v768_v63 = vadd.f32 %v752_v61, %v628_v59  ;;  %v630_v0 = vpop.f32.mrf.mxu1 }
  0xcb   : > { %v631_v6 = vadd.f32 %v630_v0, %v529_v60 }
  0xcc   : > { %v780_v1 = vadd.f32 %v1186_v44, %v768_v63 }
  0xce   : > { %v788_v3 = vmax.f32 %v780_v1, 0.0 }
  0xcf   : > { %v534_v16 = vpop.f32.mrf.mxu3 }
  0xd0   : > { %v1139_v4 = vpack.c.bf16 %v788_v3, %v787_v2 }
  0xd1   : > { %v755_v5 = vpop.f32.mrf.mxu2 }
  0xd2   : > { %1151 = vst [vmem:[%s1366_s10 + $0x8] sm:$0xff] %v1139_v4   ;;  %v632_v7 = vpop.f32.mrf.mxu1  ;;  %v769_v9 = vadd.f32 %v755_v5, %v631_v6 }
  0xd3   : > { %v633_v10 = vadd.f32 %v632_v7, %v531_v8 }
  0xd4   : > { %v781_v12 = vadd.f32 %v1186_v44, %v769_v9 }
  0xd6   : > { %v789_v17 = vmax.f32 %v781_v12, 0.0 }
  0xd7   : > { %v536_v24 = vpop.f32.mrf.mxu3 }
  0xd9   : > { %v757_v11 = vpop.f32.mrf.mxu2 }
  0xda   : > { %v770_v13 = vadd.f32 %v757_v11, %v633_v10  ;;  %v635_v14 = vpop.f32.mrf.mxu1 }
  0xdb   : > { %v636_v21 = vadd.f32 %v635_v14, %v534_v16 }
  0xdc   : > { %v782_v15 = vadd.f32 %v1186_v44, %v770_v13 }
  0xde   : > { %v790_v18 = vmax.f32 %v782_v15, 0.0 }
  0xe0   : > { %v1144_v19 = vpack.c.bf16 %v790_v18, %v789_v17 }
  0xe1   : > { %v760_v20 = vpop.f32.mrf.mxu2 }
  0xe2   : > { %1152 = vst [vmem:[%s1366_s10 + $0x10] sm:$0xff] %v1144_v19   ;;  %v637_v22 = vpop.f32.mrf.mxu1  ;;  %v771_v23 = vadd.f32 %v760_v20, %v636_v21 }
  0xe3   : > { %v638_v25 = vadd.f32 %v637_v22, %v536_v24 }
  0xe4   : > { %v783_v27 = vadd.f32 %v1186_v44, %v771_v23 }
  0xe6   : > { %v791_v30 = vmax.f32 %v783_v27, 0.0 }
  0xe9   : > { %v762_v26 = vpop.f32.mrf.mxu2 }
  0xea   : > { %v772_v28 = vadd.f32 %v762_v26, %v638_v25 }
  0xec   : > { %v784_v29 = vadd.f32 %v1186_v44, %v772_v28 }
  0xee   : > { %v792_v31 = vmax.f32 %v784_v29, 0.0 }
  0xf0   : > { %v1149_v32 = vpack.c.bf16 %v792_v31, %v791_v30 }
  0xf2   : > { %1153 = vst [vmem:[%s1366_s10 + $0x18] sm:$0xff] %v1149_v32  }
  0xf3 PF: > { %s17_s26 = sadd.s32 1, %s1209_s26   ;;  %s1389_s24 = smov %s1205_s25 }
  0xf4   : > { %p14_p5 = scmp.ge.s32.totalorder %s17_s26, 4   ;;  %s1390_s25 = smov %s1392_s27 }
  0xf6   :  { %16 = sbr.rel (!%p14_p5) target bundleno = 2 (0x2), region = 84 }

// kernel: pyramid_detection_forward.13
= control target key start
LH: loop header
LB: loop body
LE: loop exit
PB: predicated region body
PF: predicated region fallthrough
CT: control target
= control target key end

     0   :  { %s1524_s21 = smov 0   ;;  %s1691_s0 = inlined_call_operand.vmem [shape: bf16[2,32,128], index: 0, kind: input, shape index: {}]   ;;  %s1692_s1 = inlined_call_operand.vmem [shape: bf16[2,32,128], index: 1, kind: input, shape index: {}]   ;;  %s1693_s2 = inlined_call_operand.vmem [shape: bf16[2,32,128], index: 2, kind: input, shape index: {}]   ;;  %s1694_s3 = inlined_call_operand.vmem [shape: bf16[2,32,128], index: 3, kind: input, shape index: {}]   ;;  %s1695_s4 = inlined_call_operand.vmem [shape: bf16[128,128], index: 4, kind: input, shape index: {}]   ;;  %s1696_s5 = inlined_call_operand.vmem [shape: bf16[128,128], index: 5, kind: input, shape index: {}]   ;;  %s1697_s6 = inlined_call_operand.vmem [shape: bf16[128,128], index: 6, kind: input, shape index: {}]   ;;  %s1698_s7 = inlined_call_operand.vmem [shape: f32[1,128], index: 7, kind: input, shape index: {}]   ;;  %s1699_s8 = inlined_call_operand.vmem [shape: bf16[128,128], index: 8, kind: input, shape index: {}]   ;;  %s1700_s9 = inlined_call_operand.vmem [shape: bf16[128,128], index: 9, kind: input, shape index: {}]   ;;  %s1701_s10 = inlined_call_operand.vmem [shape: f32[1,128], index: 10, kind: input, shape index: {}]   ;;  %s1702_s11 = inlined_call_operand.vmem [shape: bf16[2,32,128], index: 11, kind: output, shape index: {0}]   ;;  %s1703_s12 = inlined_call_operand.vmem [shape: bf16[2,32,128], index: 12, kind: output, shape index: {1}]  }
   0x1 LB: > { %s1146_s22 = sadd.s32 4294967295, %s1457_s21   ;;  %p1150_p0 = scmp.ge.s32.totalorder %s1457_s21, 1  ;;  %s1457_s21 = sphi %s1524_s21, %s23_s21  }
   0x2   : > { %p395_p1 = scmp.lt.s32.totalorder %s1457_s21, 3 }
   0x4   : > { %p396_p2 = pnand %p1150_p0, %p395_p1 }
   0x5   : > { %p457_p3 = scmp.lt.s32.totalorder (!%p396_p2), %s1146_s22, 1 }
   0x6   : > { %399 = sbr.rel (%p396_p2) target bundleno = 356 (0x164), region = 64 }
   0xb   : > { %v1382_v0 = vld [vmem:[%s1696_s5 + $0x38] sm:$0xff]  ;;  %v1381_v3 = vld [vmem:[%s1696_s5 + $0x30] sm:$0xff]  ;;  %v1380_v6 = vld [vmem:[%s1696_s5 + $0x28] sm:$0xff]  ;;  %s1705_s22 = smov (!%p457_p3, %s1146_s22), 1 }
   0xc   : > { %v1372_v1 = vld [vmem:[%s1695_s4 + $0x38] sm:$0xff]  ;;  %587 = vmatpush.bf16.msra.mxu0 %v1382_v0  ;;  %v1371_v4 = vld [vmem:[%s1695_s4 + $0x30] sm:$0xff]  ;;  %v1370_v7 = vld [vmem:[%s1695_s4 + $0x28] sm:$0xff]  ;;  %s1605_s19 = sshll.u32 %s1705_s22, 4 }
   0xd   : > { %v1392_v2 = vld [vmem:[%s1697_s6 + $0x38] sm:$0xff]  ;;  %666 = vmatpush.bf16.msra.mxu1 %v1372_v1  ;;  %v1391_v5 = vld [vmem:[%s1697_s6 + $0x30] sm:$0xff]  ;;  %v1390_v8 = vld [vmem:[%s1697_s6 + $0x28] sm:$0xff]  ;;  %s466_s29 = scalar_lea.vmem %s1692_s1, %s1605_s19  ;;  %s461_s14 = scalar_lea.vmem %s1691_s0, %s1605_s19 }
   0xe   : > { %765 = vmatpush.bf16.msra.mxu2 %v1392_v2  ;;  %v1379_v9 = vld [vmem:[%s1696_s5 + $0x20] sm:$0xff]  ;;  %v1378_v12 = vld [vmem:[%s1696_s5 + $0x18] sm:$0xff]  ;;  %v1377_v15 = vld [vmem:[%s1696_s5 + $0x10] sm:$0xff]  ;;  %s471_s20 = scalar_lea.vmem %s1693_s2, %s1605_s19  ;;  %s476_s27 = scalar_lea.vmem %s1694_s3, %s1605_s19 }
   0xf   : > { %v1369_v10 = vld [vmem:[%s1695_s4 + $0x20] sm:$0xff]  ;;  %v1368_v13 = vld [vmem:[%s1695_s4 + $0x18] sm:$0xff]  ;;  %v1367_v16 = vld [vmem:[%s1695_s4 + $0x10] sm:$0xff]  ;;  %s481_s24 = scalar_lea.vmem %s1702_s11, %s1605_s19  ;;  %s486_s28 = scalar_lea.vmem %s1703_s12, %s1605_s19 }
  0x10   : > { %588 = vmatpush.bf16.msra.mxu0 %v1381_v3  ;;  %v1389_v11 = vld [vmem:[%s1697_s6 + $0x20] sm:$0xff]  ;;  %v1388_v14 = vld [vmem:[%s1697_s6 + $0x18] sm:$0xff]  ;;  %v1387_v18 = vld [vmem:[%s1697_s6 + $0x10] sm:$0xff] }
  0x11   : > { %667 = vmatpush.bf16.msra.mxu1 %v1371_v4  ;;  %v1410_v17 = vld [vmem:[%s1700_s9 + $0x38] sm:$0xff]  ;;  %v1409_v19 = vld [vmem:[%s1700_s9 + $0x30] sm:$0xff]  ;;  %v1376_v20 = vld [vmem:[%s1696_s5 + $0x8] sm:$0xff] }
  0x12   : > { %766 = vmatpush.bf16.msra.mxu2 %v1391_v5  ;;  %904 = vmatpush.bf16.msra.mxu3 %v1410_v17  ;;  %v1366_v21 = vld [vmem:[%s1695_s4 + $0x8] sm:$0xff]  ;;  %v1375_v24 = vld [vmem:[%s1696_s5] sm:$0xff]  ;;  %v1400_v27 = vld [vmem:[%s1699_s8 + $0x38] sm:$0xff] }
  0x13   : > { %v1386_v22 = vld [vmem:[%s1697_s6 + $0x8] sm:$0xff]  ;;  %v1365_v25 = vld [vmem:[%s1695_s4] sm:$0xff]  ;;  %v1406_v32 = vld [vmem:[%s1700_s9 + $0x18] sm:$0xff] }
  0x14   : > { %589 = vmatpush.bf16.msra.mxu0 %v1380_v6  ;;  %v1408_v23 = vld [vmem:[%s1700_s9 + $0x28] sm:$0xff]  ;;  %v1385_v26 = vld [vmem:[%s1697_s6] sm:$0xff]  ;;  %v1399_v36 = vld [vmem:[%s1699_s8 + $0x30] sm:$0xff] }
  0x15   : > { %668 = vmatpush.bf16.msra.mxu1 %v1370_v7  ;;  %v1407_v28 = vld [vmem:[%s1700_s9 + $0x20] sm:$0xff]  ;;  %v1374_v33 = vld [vmem:[%s466_s29 + $0x8] sm:$0xff]  ;;  %v1405_v37 = vld [vmem:[%s1700_s9 + $0x10] sm:$0xff] }
  0x16   : > { %767 = vmatpush.bf16.msra.mxu2 %v1390_v8  ;;  %905 = vmatpush.bf16.msra.mxu3 %v1409_v19  ;;  %v1373_v29 = vld [vmem:[%s466_s29] sm:$0xff]  ;;  %v1364_v34 = vld [vmem:[%s461_s14 + $0x8] sm:$0xff]  ;;  %v1396_v42 = vld [vmem:[%s1699_s8 + $0x18] sm:$0xff] }
  0x17   : > { %v1363_v30 = vld [vmem:[%s461_s14] sm:$0xff]  ;;  %v1384_v35 = vld [vmem:[%s471_s20 + $0x8] sm:$0xff]  ;;  %v1395_v44 = vld [vmem:[%s1699_s8 + $0x10] sm:$0xff] }
  0x18   : > { %590 = vmatpush.bf16.msra.mxu0 %v1379_v9  ;;  %v1383_v31 = vld [vmem:[%s471_s20] sm:$0xff]  ;;  %v1398_v38 = vld [vmem:[%s1699_s8 + $0x28] sm:$0xff] }
  0x19   : > { %669 = vmatpush.bf16.msra.mxu1 %v1369_v10  ;;  %v1404_v39 = vld [vmem:[%s1700_s9 + $0x8] sm:$0xff]  ;;  %v1397_v40 = vld [vmem:[%s1699_s8 + $0x20] sm:$0xff] }
  0x1a   : > { %768 = vmatpush.bf16.msra.mxu2 %v1389_v11  ;;  %906 = vmatpush.bf16.msra.mxu3 %v1408_v23  ;;  %v1403_v41 = vld [vmem:[%s1700_s9] sm:$0xff]  ;;  %v1394_v45 = vld [vmem:[%s1699_s8 + $0x8] sm:$0xff] }
  0x1b   : > { %v1401_v43 = vld [vmem:[%s476_s27] sm:$0xff]  ;;  %v1402_v47 = vld [vmem:[%s476_s27 + $0x8] sm:$0xff] }
  0x1c   : > { %591 = vmatpush.bf16.msra.mxu0 %v1378_v12  ;;  %v1393_v46 = vld [vmem:[%s1699_s8] sm:$0xff] }
  0x1d   : > { %670 = vmatpush.bf16.msra.mxu1 %v1368_v13  ;;  %v1449_v53 = vld [vmem:[%s1698_s7] ss:$0 sm:$0xff] }
  0x1e   : > { %769 = vmatpush.bf16.msra.mxu2 %v1388_v14  ;;  %907 = vmatpush.bf16.msra.mxu3 %v1407_v28 }
  0x20   : > { %592 = vmatpush.bf16.msra.mxu0 %v1377_v15 }
  0x21   : > { %671 = vmatpush.bf16.msra.mxu1 %v1367_v16 }
  0x22   : > { %770 = vmatpush.bf16.msra.mxu2 %v1387_v18  ;;  %908 = vmatpush.bf16.msra.mxu3 %v1406_v32 }
  0x24   : > { %593 = vmatpush.bf16.msra.mxu0 %v1376_v20 }
  0x25   : > { %672 = vmatpush.bf16.msra.mxu1 %v1366_v21 }
  0x26   : > { %771 = vmatpush.bf16.msra.mxu2 %v1386_v22  ;;  %909 = vmatpush.bf16.msra.mxu3 %v1405_v37 }
  0x28   : > { %594 = vmatpush.bf16.msra.mxu0 %v1375_v24 }
  0x29   : > { %673 = vmatpush.bf16.msra.mxu1 %v1365_v25 }
  0x2a   : > { %772 = vmatpush.bf16.msra.mxu2 %v1385_v26  ;;  %910 = vmatpush.bf16.msra.mxu3 %v1404_v39 }
  0x2b   : > { %595 = vmatmul.bf16.vlgmr.msra.gmra.mxu0 %v1373_v29  ;;  %v1450_v29 = vld [vmem:[%s1701_s10] ss:$0 sm:$0xff] }
  0x2c   : > { %983 = vmatpush.bf16.msrb.mxu0 %v1400_v27  ;;  %674 = vmatmul.bf16.vlgmr.msra.gmra.mxu1 %v1363_v30 }
  0x2d   : > { %1433 = vmatpush.bf16.msrb.mxu1 %v1400_v27  ;;  %773 = vmatmul.bf16.vlgmr.msra.gmra.mxu2 %v1383_v31 }
  0x2e   : > { %911 = vmatpush.bf16.msra.mxu3 %v1403_v41 }
  0x30   : > { %984 = vmatpush.bf16.msrb.mxu0 %v1399_v36 }
  0x31   : > { %1434 = vmatpush.bf16.msrb.mxu1 %v1399_v36  ;;  %912 = vmatmul.bf16.vlgmr.msra.gmra.mxu3 %v1401_v43 }
  0x34   : > { %985 = vmatpush.bf16.msrb.mxu0 %v1398_v38 }
  0x35   : > { %1435 = vmatpush.bf16.msrb.mxu1 %v1398_v38 }
  0x38   : > { %986 = vmatpush.bf16.msrb.mxu0 %v1397_v40 }
  0x39   : > { %1436 = vmatpush.bf16.msrb.mxu1 %v1397_v40 }
  0x3b   : > { %600 = vmatmul.bf16.gmra.mxu0 %v1374_v33 }
  0x3c   : > { %679 = vmatmul.bf16.gmra.mxu1 %v1364_v34  ;;  %987 = vmatpush.bf16.msrb.mxu0 %v1396_v42 }
  0x3d   : > { %778 = vmatmul.bf16.gmra.mxu2 %v1384_v35  ;;  %1437 = vmatpush.bf16.msrb.mxu1 %v1396_v42 }
  0x40   : > { %988 = vmatpush.bf16.msrb.mxu0 %v1395_v44 }
  0x41   : > { %1438 = vmatpush.bf16.msrb.mxu1 %v1395_v44  ;;  %917 = vmatmul.bf16.gmra.mxu3 %v1402_v47 }
  0x44   : > { %989 = vmatpush.bf16.msrb.mxu0 %v1394_v45 }
  0x45   : > { %1439 = vmatpush.bf16.msrb.mxu1 %v1394_v45 }
  0x48   : > { %990 = vmatpush.bf16.msrb.mxu0 %v1393_v46 }
  0x49   : > { %1440 = vmatpush.bf16.msrb.mxu1 %v1393_v46 }
  0xa8   : > { %v596_v48 = vpop.f32.mrf.mxu0 }
  0xa9   : > { %v675_v49 = vpop.f32.mrf.mxu1 }
  0xaa   : > { %v676_v50 = vadd.f32 %v675_v49, %v596_v48 }
  0xb0   : > { %v774_v51 = vpop.f32.mrf.mxu2  ;;  %v598_v54 = vpop.f32.mrf.mxu0 }
  0xb1   : > { %v784_v52 = vadd.f32 %v774_v51, %v676_v50  ;;  %v677_v55 = vpop.f32.mrf.mxu1 }
  0xb2   : > { %v678_v57 = vadd.f32 %v677_v55, %v598_v54 }
  0xb3   : > { %v792_v56 = vadd.f32 %v1449_v53, %v784_v52 }
  0xb4   : > { %v913_v25 = vpop.f32.mrf.mxu3 }
  0xb5   : > { %v796_v59 = vmax.f32 %v792_v56, 0.0 }
  0xb7   : > { %v800_v0 = vpack.c.bf16 %v796_v59, %v796_v59 }
  0xb8   : > { %v776_v58 = vpop.f32.mrf.mxu2  ;;  %v601_v61 = vpop.f32.mrf.mxu0 }
  0xb9   : > { %v785_v60 = vadd.f32 %v776_v58, %v678_v57  ;;  %v680_v62 = vpop.f32.mrf.mxu1  ;;  %v927_v6 = vunpack.c.l.b16 %v800_v0 }
  0xba   : > { %v681_v2 = vadd.f32 %v680_v62, %v601_v61 }
  0xbb   : > { %v793_v63 = vadd.f32 %v1449_v53, %v785_v60 }
  0xbc   : > { %v915_v27 = vpop.f32.mrf.mxu3 }
  0xbd   : > { %v797_v1 = vmax.f32 %v793_v63, 0.0 }
  0xbf   : > { %v801_v3 = vpack.c.bf16 %v797_v1, %v797_v1  ;;  %v1414_v4 = vpack.c.bf16 %v797_v1, %v796_v59 }
  0xc0   : > { %v779_v5 = vpop.f32.mrf.mxu2  ;;  %v603_v10 = vpop.f32.mrf.mxu0 }
  0xc1   : > { %1415 = vst [vmem:[%s481_s24] sm:$0xff] %v1414_v4   ;;  %v928_v7 = vunpack.c.l.b16 %v801_v3  ;;  %v786_v8 = vadd.f32 %v779_v5, %v681_v2  ;;  %v682_v11 = vpop.f32.mrf.mxu1 }
  0xc2   : > { %v683_v13 = vadd.f32 %v682_v11, %v603_v10 }
  0xc3   : > { %v931_v9 = vpack.c.b16 %v928_v7, %v927_v6  ;;  %v794_v12 = vadd.f32 %v1449_v53, %v786_v8 }
  0xc4   : > { %v918_v36 = vpop.f32.mrf.mxu3 }
  0xc5   : > { %991 = vmatmul.bf16.vlgmr.msrb.gmra.mxu0 %v931_v9  ;;  %v798_v15 = vmax.f32 %v794_v12, 0.0 }
  0xc7   : > { %v802_v18 = vpack.c.bf16 %v798_v15, %v798_v15 }
  0xc8   : > { %v781_v14 = vpop.f32.mrf.mxu2 }
  0xc9   : > { %v787_v16 = vadd.f32 %v781_v14, %v683_v13  ;;  %v929_v22 = vunpack.c.l.b16 %v802_v18 }
  0xcb   : > { %v795_v17 = vadd.f32 %v1449_v53, %v787_v16 }
  0xcc   : > { %v920_v40 = vpop.f32.mrf.mxu3 }
  0xcd   : > { %v799_v19 = vmax.f32 %v795_v17, 0.0 }
  0xcf   : > { %v803_v20 = vpack.c.bf16 %v799_v19, %v799_v19  ;;  %v1419_v21 = vpack.c.bf16 %v799_v19, %v798_v15 }
  0xd1   : > { %1431 = vst [vmem:[%s481_s24 + $0x8] sm:$0xff] %v1419_v21   ;;  %v930_v23 = vunpack.c.l.b16 %v803_v20 }
  0xd3   : > { %v932_v24 = vpack.c.b16 %v930_v23, %v929_v22 }
  0xd5   : > { %996 = vmatmul.bf16.vlgmr.msrb.gmra.mxu1 %v932_v24 }
 0x142   : > { %v992_v26 = vpop.f32.mrf.mxu0 }
 0x143   : > { %v993_v28 = vadd.f32 %v992_v26, %v913_v25 }
 0x145   : > { %v1006_v31 = vadd.f32 %v1450_v29, %v993_v28 }
 0x147   : > { %v1010_v34 = vmax.f32 %v1006_v31, 0.0 }
 0x14a   : > { %v994_v30 = vpop.f32.mrf.mxu0 }
 0x14b   : > { %v995_v32 = vadd.f32 %v994_v30, %v915_v27 }
 0x14d   : > { %v1007_v33 = vadd.f32 %v1450_v29, %v995_v32 }
 0x14f   : > { %v1011_v35 = vmax.f32 %v1007_v33, 0.0 }
 0x151   : > { %v1424_v37 = vpack.c.bf16 %v1011_v35, %v1010_v34 }
 0x152   : > { %v997_v38 = vpop.f32.mrf.mxu1 }
 0x153   : > { %1425 = vst [vmem:[%s486_s28] sm:$0xff] %v1424_v37   ;;  %v998_v39 = vadd.f32 %v997_v38, %v918_v36 }
 0x155   : > { %v1008_v42 = vadd.f32 %v1450_v29, %v998_v39 }
 0x157   : > { %v1012_v45 = vmax.f32 %v1008_v42, 0.0 }
 0x15a   : > { %v999_v41 = vpop.f32.mrf.mxu1 }
 0x15b   : > { %v1000_v43 = vadd.f32 %v999_v41, %v920_v40 }
 0x15d   : > { %v1009_v44 = vadd.f32 %v1450_v29, %v1000_v43 }
 0x15f   : > { %v1013_v46 = vmax.f32 %v1009_v44, 0.0 }
 0x161   : > { %v1429_v47 = vpack.c.bf16 %v1013_v46, %v1012_v45 }
 0x163   : > { %1432 = vst [vmem:[%s486_s28 + $0x8] sm:$0xff] %v1429_v47  }
 0x164 PF: > { %s23_s21 = sadd.s32 1, %s1457_s21  }
 0x165   : > { %p20_p4 = scmp.ge.s32.totalorder %s23_s21, 4  }
 0x167   :  { %22 = sbr.rel (!%p20_p4) target bundleno = 1 (0x1), region = 115 }

// kernel: pyramid_detection_forward.14
= control target key start
LH: loop header
LB: loop body
LE: loop exit
PB: predicated region body
PF: predicated region fallthrough
CT: control target
= control target key end

     0   :  { %s1403_s21 = smov 0   ;;  %s1570_s0 = inlined_call_operand.vmem [shape: bf16[2,16,128], index: 0, kind: input, shape index: {}]   ;;  %s1571_s1 = inlined_call_operand.vmem [shape: bf16[2,16,128], index: 1, kind: input, shape index: {}]   ;;  %s1572_s2 = inlined_call_operand.vmem [shape: bf16[2,16,128], index: 2, kind: input, shape index: {}]   ;;  %s1573_s3 = inlined_call_operand.vmem [shape: bf16[2,16,128], index: 3, kind: input, shape index: {}]   ;;  %s1574_s4 = inlined_call_operand.vmem [shape: bf16[128,128], index: 4, kind: input, shape index: {}]   ;;  %s1575_s5 = inlined_call_operand.vmem [shape: bf16[128,128], index: 5, kind: input, shape index: {}]   ;;  %s1576_s6 = inlined_call_operand.vmem [shape: bf16[128,128], index: 6, kind: input, shape index: {}]   ;;  %s1577_s7 = inlined_call_operand.vmem [shape: f32[1,128], index: 7, kind: input, shape index: {}]   ;;  %s1578_s8 = inlined_call_operand.vmem [shape: bf16[128,128], index: 8, kind: input, shape index: {}]   ;;  %s1579_s9 = inlined_call_operand.vmem [shape: bf16[128,128], index: 9, kind: input, shape index: {}]   ;;  %s1580_s10 = inlined_call_operand.vmem [shape: f32[1,128], index: 10, kind: input, shape index: {}]   ;;  %s1581_s11 = inlined_call_operand.vmem [shape: bf16[2,16,128], index: 11, kind: output, shape index: {0}]   ;;  %s1582_s12 = inlined_call_operand.vmem [shape: bf16[2,16,128], index: 12, kind: output, shape index: {1}]  }
   0x1 LB: > { %s1065_s22 = sadd.s32 4294967295, %s1336_s21   ;;  %p1069_p0 = scmp.ge.s32.totalorder %s1336_s21, 1  ;;  %s1336_s21 = sphi %s1403_s21, %s23_s21  }
   0x2   : > { %p395_p1 = scmp.lt.s32.totalorder %s1336_s21, 3 }
   0x4   : > { %p396_p2 = pnand %p1069_p0, %p395_p1 }
   0x5   : > { %p457_p3 = scmp.lt.s32.totalorder (!%p396_p2), %s1065_s22, 1 }
   0x6   : > { %399 = sbr.rel (%p396_p2) target bundleno = 340 (0x154), region = 64 }
   0xb   : > { %v1283_v0 = vld [vmem:[%s1575_s5 + $0x38] sm:$0xff]  ;;  %v1282_v3 = vld [vmem:[%s1575_s5 + $0x30] sm:$0xff]  ;;  %v1281_v6 = vld [vmem:[%s1575_s5 + $0x28] sm:$0xff]  ;;  %s1584_s22 = smov (!%p457_p3, %s1065_s22), 1 }
   0xc   : > { %v1274_v1 = vld [vmem:[%s1574_s4 + $0x38] sm:$0xff]  ;;  %577 = vmatpush.bf16.msra.mxu0 %v1283_v0  ;;  %v1273_v4 = vld [vmem:[%s1574_s4 + $0x30] sm:$0xff]  ;;  %v1272_v7 = vld [vmem:[%s1574_s4 + $0x28] sm:$0xff]  ;;  %s1490_s25 = sshll.u32 %s1584_s22, 3 }
   0xd   : > { %v1292_v2 = vld [vmem:[%s1576_s6 + $0x38] sm:$0xff]  ;;  %645 = vmatpush.bf16.msra.mxu1 %v1274_v1  ;;  %v1291_v5 = vld [vmem:[%s1576_s6 + $0x30] sm:$0xff]  ;;  %v1290_v8 = vld [vmem:[%s1576_s6 + $0x28] sm:$0xff]  ;;  %s466_s15 = scalar_lea.vmem %s1571_s1, %s1490_s25  ;;  %s461_s18 = scalar_lea.vmem %s1570_s0, %s1490_s25 }
   0xe   : > { %731 = vmatpush.bf16.msra.mxu2 %v1292_v2  ;;  %v1309_v9 = vld [vmem:[%s1579_s9 + $0x38] sm:$0xff]  ;;  %v1280_v10 = vld [vmem:[%s1575_s5 + $0x20] sm:$0xff]  ;;  %v1308_v13 = vld [vmem:[%s1579_s9 + $0x30] sm:$0xff]  ;;  %s471_s26 = scalar_lea.vmem %s1572_s2, %s1490_s25  ;;  %s476_s27 = scalar_lea.vmem %s1573_s3, %s1490_s25 }
   0xf   : > { %v1271_v11 = vld [vmem:[%s1574_s4 + $0x20] sm:$0xff]  ;;  %847 = vmatpush.bf16.msra.mxu3 %v1309_v9  ;;  %v1279_v14 = vld [vmem:[%s1575_s5 + $0x18] sm:$0xff]  ;;  %v1307_v17 = vld [vmem:[%s1579_s9 + $0x28] sm:$0xff]  ;;  %s481_s23 = scalar_lea.vmem %s1581_s11, %s1490_s25  ;;  %s486_s29 = scalar_lea.vmem %s1582_s12, %s1490_s25 }
  0x10   : > { %578 = vmatpush.bf16.msra.mxu0 %v1282_v3  ;;  %v1289_v12 = vld [vmem:[%s1576_s6 + $0x20] sm:$0xff]  ;;  %v1270_v15 = vld [vmem:[%s1574_s4 + $0x18] sm:$0xff]  ;;  %v1278_v18 = vld [vmem:[%s1575_s5 + $0x10] sm:$0xff] }
  0x11   : > { %646 = vmatpush.bf16.msra.mxu1 %v1273_v4  ;;  %v1288_v16 = vld [vmem:[%s1576_s6 + $0x18] sm:$0xff]  ;;  %v1269_v19 = vld [vmem:[%s1574_s4 + $0x10] sm:$0xff]  ;;  %v1306_v21 = vld [vmem:[%s1579_s9 + $0x20] sm:$0xff] }
  0x12   : > { %732 = vmatpush.bf16.msra.mxu2 %v1291_v5  ;;  %v1287_v20 = vld [vmem:[%s1576_s6 + $0x10] sm:$0xff]  ;;  %v1277_v22 = vld [vmem:[%s1575_s5 + $0x8] sm:$0xff]  ;;  %v1305_v25 = vld [vmem:[%s1579_s9 + $0x18] sm:$0xff] }
  0x13   : > { %848 = vmatpush.bf16.msra.mxu3 %v1308_v13  ;;  %v1268_v23 = vld [vmem:[%s1574_s4 + $0x8] sm:$0xff]  ;;  %v1276_v26 = vld [vmem:[%s1575_s5] sm:$0xff]  ;;  %v1300_v29 = vld [vmem:[%s1578_s8 + $0x38] sm:$0xff] }
  0x14   : > { %579 = vmatpush.bf16.msra.mxu0 %v1281_v6  ;;  %v1286_v24 = vld [vmem:[%s1576_s6 + $0x8] sm:$0xff]  ;;  %v1267_v27 = vld [vmem:[%s1574_s4] sm:$0xff]  ;;  %v1299_v33 = vld [vmem:[%s1578_s8 + $0x30] sm:$0xff] }
  0x15   : > { %647 = vmatpush.bf16.msra.mxu1 %v1272_v7  ;;  %v1285_v28 = vld [vmem:[%s1576_s6] sm:$0xff]  ;;  %v1304_v34 = vld [vmem:[%s1579_s9 + $0x10] sm:$0xff]  ;;  %v1298_v35 = vld [vmem:[%s1578_s8 + $0x28] sm:$0xff] }
  0x16   : > { %733 = vmatpush.bf16.msra.mxu2 %v1290_v8  ;;  %v1275_v30 = vld [vmem:[%s466_s15] sm:$0xff]  ;;  %v1303_v36 = vld [vmem:[%s1579_s9 + $0x8] sm:$0xff]  ;;  %v1296_v39 = vld [vmem:[%s1578_s8 + $0x18] sm:$0xff] }
  0x17   : > { %849 = vmatpush.bf16.msra.mxu3 %v1307_v17  ;;  %v1266_v31 = vld [vmem:[%s461_s18] sm:$0xff]  ;;  %v1295_v41 = vld [vmem:[%s1578_s8 + $0x10] sm:$0xff]  ;;  %v1294_v42 = vld [vmem:[%s1578_s8 + $0x8] sm:$0xff] }
  0x18   : > { %580 = vmatpush.bf16.msra.mxu0 %v1280_v10  ;;  %v1284_v32 = vld [vmem:[%s471_s26] sm:$0xff] }
  0x19   : > { %648 = vmatpush.bf16.msra.mxu1 %v1271_v11  ;;  %v1297_v37 = vld [vmem:[%s1578_s8 + $0x20] sm:$0xff] }
  0x1a   : > { %734 = vmatpush.bf16.msra.mxu2 %v1289_v12  ;;  %v1302_v38 = vld [vmem:[%s1579_s9] sm:$0xff] }
  0x1b   : > { %850 = vmatpush.bf16.msra.mxu3 %v1306_v21  ;;  %v1301_v40 = vld [vmem:[%s476_s27] sm:$0xff] }
  0x1c   : > { %581 = vmatpush.bf16.msra.mxu0 %v1279_v14  ;;  %v1293_v43 = vld [vmem:[%s1578_s8] sm:$0xff] }
  0x1d   : > { %649 = vmatpush.bf16.msra.mxu1 %v1270_v15  ;;  %v1328_v49 = vld [vmem:[%s1577_s7] ss:$0 sm:$0xff] }
  0x1e   : > { %735 = vmatpush.bf16.msra.mxu2 %v1288_v16  ;;  %v1329_v4 = vld [vmem:[%s1580_s10] ss:$0 sm:$0xff] }
  0x1f   : > { %851 = vmatpush.bf16.msra.mxu3 %v1305_v25 }
  0x20   : > { %582 = vmatpush.bf16.msra.mxu0 %v1278_v18 }
  0x21   : > { %650 = vmatpush.bf16.msra.mxu1 %v1269_v19 }
  0x22   : > { %736 = vmatpush.bf16.msra.mxu2 %v1287_v20 }
  0x23   : > { %852 = vmatpush.bf16.msra.mxu3 %v1304_v34 }
  0x24   : > { %583 = vmatpush.bf16.msra.mxu0 %v1277_v22 }
  0x25   : > { %651 = vmatpush.bf16.msra.mxu1 %v1268_v23 }
  0x26   : > { %737 = vmatpush.bf16.msra.mxu2 %v1286_v24 }
  0x27   : > { %853 = vmatpush.bf16.msra.mxu3 %v1303_v36 }
  0x28   : > { %584 = vmatpush.bf16.msra.mxu0 %v1276_v26 }
  0x29   : > { %652 = vmatpush.bf16.msra.mxu1 %v1267_v27 }
  0x2a   : > { %738 = vmatpush.bf16.msra.mxu2 %v1285_v28 }
  0x2b   : > { %585 = vmatmul.bf16.vlgmr.msra.gmra.mxu0 %v1275_v30  ;;  %854 = vmatpush.bf16.msra.mxu3 %v1302_v38 }
  0x2c   : > { %915 = vmatpush.bf16.msrb.mxu0 %v1300_v29  ;;  %653 = vmatmul.bf16.vlgmr.msra.gmra.mxu1 %v1266_v31 }
  0x2d   : > { %739 = vmatmul.bf16.vlgmr.msra.gmra.mxu2 %v1284_v32 }
  0x2e   : > { %855 = vmatmul.bf16.vlgmr.msra.gmra.mxu3 %v1301_v40 }
  0x30   : > { %916 = vmatpush.bf16.msrb.mxu0 %v1299_v33 }
  0x34   : > { %917 = vmatpush.bf16.msrb.mxu0 %v1298_v35 }
  0x38   : > { %918 = vmatpush.bf16.msrb.mxu0 %v1297_v37 }
  0x3c   : > { %919 = vmatpush.bf16.msrb.mxu0 %v1296_v39 }
  0x40   : > { %920 = vmatpush.bf16.msrb.mxu0 %v1295_v41 }
  0x44   : > { %921 = vmatpush.bf16.msrb.mxu0 %v1294_v42 }
  0x48   : > { %922 = vmatpush.bf16.msrb.mxu0 %v1293_v43 }
  0xa8   : > { %v586_v44 = vpop.f32.mrf.mxu0 }
  0xa9   : > { %v654_v45 = vpop.f32.mrf.mxu1 }
  0xaa   : > { %v655_v46 = vadd.f32 %v654_v45, %v586_v44 }
  0xb0   : > { %v740_v47 = vpop.f32.mrf.mxu2  ;;  %v588_v50 = vpop.f32.mrf.mxu0 }
  0xb1   : > { %v745_v48 = vadd.f32 %v740_v47, %v655_v46  ;;  %v656_v51 = vpop.f32.mrf.mxu1  ;;  %v856_v1 = vpop.f32.mrf.mxu3 }
  0xb2   : > { %v657_v53 = vadd.f32 %v656_v51, %v588_v50 }
  0xb3   : > { %v751_v52 = vadd.f32 %v1328_v49, %v745_v48 }
  0xb5   : > { %v753_v55 = vmax.f32 %v751_v52, 0.0 }
  0xb7   : > { %v755_v58 = vpack.c.bf16 %v753_v55, %v753_v55 }
  0xb8   : > { %v742_v54 = vpop.f32.mrf.mxu2 }
  0xb9   : > { %v746_v56 = vadd.f32 %v742_v54, %v657_v53  ;;  %v863_v62 = vunpack.c.l.b16 %v755_v58  ;;  %v858_v5 = vpop.f32.mrf.mxu3 }
  0xbb   : > { %v752_v57 = vadd.f32 %v1328_v49, %v746_v56 }
  0xbd   : > { %v754_v59 = vmax.f32 %v752_v57, 0.0 }
  0xbf   : > { %v756_v60 = vpack.c.bf16 %v754_v59, %v754_v59  ;;  %v1313_v61 = vpack.c.bf16 %v754_v59, %v753_v55 }
  0xc1   : > { %1314 = vst [vmem:[%s481_s23] sm:$0xff] %v1313_v61   ;;  %v864_v63 = vunpack.c.l.b16 %v756_v60 }
  0xc3   : > { %v865_v0 = vpack.c.b16 %v864_v63, %v863_v62 }
  0xc5   : > { %923 = vmatmul.bf16.vlgmr.msrb.gmra.mxu0 %v865_v0 }
 0x142   : > { %v924_v2 = vpop.f32.mrf.mxu0 }
 0x143   : > { %v925_v3 = vadd.f32 %v924_v2, %v856_v1 }
 0x145   : > { %v933_v7 = vadd.f32 %v1329_v4, %v925_v3 }
 0x147   : > { %v935_v10 = vmax.f32 %v933_v7, 0.0 }
 0x14a   : > { %v926_v6 = vpop.f32.mrf.mxu0 }
 0x14b   : > { %v927_v8 = vadd.f32 %v926_v6, %v858_v5 }
 0x14d   : > { %v934_v9 = vadd.f32 %v1329_v4, %v927_v8 }
 0x14f   : > { %v936_v11 = vmax.f32 %v934_v9, 0.0 }
 0x151   : > { %v1318_v12 = vpack.c.bf16 %v936_v11, %v935_v10 }
 0x153   : > { %1319 = vst [vmem:[%s486_s29] sm:$0xff] %v1318_v12  }
 0x154 PF: > { %s23_s21 = sadd.s32 1, %s1336_s21  }
 0x155   : > { %p20_p4 = scmp.ge.s32.totalorder %s23_s21, 4  }
 0x157   :  { %22 = sbr.rel (!%p20_p4) target bundleno = 1 (0x1), region = 115 }

// kernel: pyramid_detection_forward.15
= control target key start
LH: loop header
LB: loop body
LE: loop exit
PB: predicated region body
PF: predicated region fallthrough
CT: control target
= control target key end

     0   :  { %s1293_s21 = smov 0   ;;  %s1460_s0 = inlined_call_operand.vmem [shape: bf16[2,8,128], index: 0, kind: input, shape index: {}]   ;;  %s1461_s1 = inlined_call_operand.vmem [shape: bf16[2,8,128], index: 1, kind: input, shape index: {}]   ;;  %s1462_s2 = inlined_call_operand.vmem [shape: bf16[2,8,128], index: 2, kind: input, shape index: {}]   ;;  %s1463_s3 = inlined_call_operand.vmem [shape: bf16[2,8,128], index: 3, kind: input, shape index: {}]   ;;  %s1464_s4 = inlined_call_operand.vmem [shape: bf16[128,128], index: 4, kind: input, shape index: {}]   ;;  %s1465_s5 = inlined_call_operand.vmem [shape: bf16[128,128], index: 5, kind: input, shape index: {}]   ;;  %s1466_s6 = inlined_call_operand.vmem [shape: bf16[128,128], index: 6, kind: input, shape index: {}]   ;;  %s1467_s7 = inlined_call_operand.vmem [shape: f32[1,128], index: 7, kind: input, shape index: {}]   ;;  %s1468_s8 = inlined_call_operand.vmem [shape: bf16[128,128], index: 8, kind: input, shape index: {}]   ;;  %s1469_s9 = inlined_call_operand.vmem [shape: bf16[128,128], index: 9, kind: input, shape index: {}]   ;;  %s1470_s10 = inlined_call_operand.vmem [shape: f32[1,128], index: 10, kind: input, shape index: {}]   ;;  %s1471_s11 = inlined_call_operand.vmem [shape: bf16[2,8,128], index: 11, kind: output, shape index: {0}]   ;;  %s1472_s12 = inlined_call_operand.vmem [shape: bf16[2,8,128], index: 12, kind: output, shape index: {1}]  }
   0x1 LB: > { %s997_s22 = sadd.s32 4294967295, %s1226_s21   ;;  %p1001_p0 = scmp.ge.s32.totalorder %s1226_s21, 1  ;;  %s1226_s21 = sphi %s1293_s21, %s23_s21  }
   0x2   : > { %p391_p1 = scmp.lt.s32.totalorder %s1226_s21, 3 }
   0x4   : > { %p392_p2 = pnand %p1001_p0, %p391_p1 }
   0x5   : > { %p447_p3 = scmp.lt.s32.totalorder (!%p392_p2), %s997_s22, 1 }
   0x6   : > { %395 = sbr.rel (%p392_p2) target bundleno = 320 (0x140), region = 64 }
   0xb   : > { %v1185_v0 = vld [vmem:[%s1465_s5 + $0x38] sm:$0xff]  ;;  %v1184_v3 = vld [vmem:[%s1465_s5 + $0x30] sm:$0xff]  ;;  %v1183_v6 = vld [vmem:[%s1465_s5 + $0x28] sm:$0xff]  ;;  %s1474_s22 = smov (!%p447_p3, %s997_s22), 1 }
   0xc   : > { %v1177_v1 = vld [vmem:[%s1464_s4 + $0x38] sm:$0xff]  ;;  %553 = vmatpush.bf16.msra.mxu0 %v1185_v0  ;;  %v1176_v4 = vld [vmem:[%s1464_s4 + $0x30] sm:$0xff]  ;;  %v1175_v7 = vld [vmem:[%s1464_s4 + $0x28] sm:$0xff]  ;;  %s1383_s27 = sshll.u32 %s1474_s22, 2 }
   0xd   : > { %v1193_v2 = vld [vmem:[%s1466_s6 + $0x38] sm:$0xff]  ;;  %614 = vmatpush.bf16.msra.mxu1 %v1177_v1  ;;  %v1192_v5 = vld [vmem:[%s1466_s6 + $0x30] sm:$0xff]  ;;  %v1191_v8 = vld [vmem:[%s1466_s6 + $0x28] sm:$0xff]  ;;  %s454_s17 = scalar_lea.vmem %s1461_s1, %s1383_s27  ;;  %s450_s20 = scalar_lea.vmem %s1460_s0, %s1383_s27 }
   0xe   : > { %692 = vmatpush.bf16.msra.mxu2 %v1193_v2  ;;  %v1209_v9 = vld [vmem:[%s1469_s9 + $0x38] sm:$0xff]  ;;  %v1182_v10 = vld [vmem:[%s1465_s5 + $0x20] sm:$0xff]  ;;  %v1208_v13 = vld [vmem:[%s1469_s9 + $0x30] sm:$0xff]  ;;  %s458_s28 = scalar_lea.vmem %s1462_s2, %s1383_s27  ;;  %s462_s26 = scalar_lea.vmem %s1463_s3, %s1383_s27 }
   0xf   : > { %v1174_v11 = vld [vmem:[%s1464_s4 + $0x20] sm:$0xff]  ;;  %795 = vmatpush.bf16.msra.mxu3 %v1209_v9  ;;  %v1181_v14 = vld [vmem:[%s1465_s5 + $0x18] sm:$0xff]  ;;  %v1207_v17 = vld [vmem:[%s1469_s9 + $0x28] sm:$0xff]  ;;  %s466_s23 = scalar_lea.vmem %s1471_s11, %s1383_s27  ;;  %s470_s29 = scalar_lea.vmem %s1472_s12, %s1383_s27 }
  0x10   : > { %554 = vmatpush.bf16.msra.mxu0 %v1184_v3  ;;  %v1190_v12 = vld [vmem:[%s1466_s6 + $0x20] sm:$0xff]  ;;  %v1173_v15 = vld [vmem:[%s1464_s4 + $0x18] sm:$0xff]  ;;  %v1180_v18 = vld [vmem:[%s1465_s5 + $0x10] sm:$0xff] }
  0x11   : > { %615 = vmatpush.bf16.msra.mxu1 %v1176_v4  ;;  %v1189_v16 = vld [vmem:[%s1466_s6 + $0x18] sm:$0xff]  ;;  %v1172_v19 = vld [vmem:[%s1464_s4 + $0x10] sm:$0xff]  ;;  %v1206_v21 = vld [vmem:[%s1469_s9 + $0x20] sm:$0xff] }
  0x12   : > { %693 = vmatpush.bf16.msra.mxu2 %v1192_v5  ;;  %v1188_v20 = vld [vmem:[%s1466_s6 + $0x10] sm:$0xff]  ;;  %v1179_v22 = vld [vmem:[%s1465_s5 + $0x8] sm:$0xff]  ;;  %v1205_v25 = vld [vmem:[%s1469_s9 + $0x18] sm:$0xff] }
  0x13   : > { %796 = vmatpush.bf16.msra.mxu3 %v1208_v13  ;;  %v1171_v23 = vld [vmem:[%s1464_s4 + $0x8] sm:$0xff]  ;;  %v1178_v26 = vld [vmem:[%s1465_s5] sm:$0xff]  ;;  %v1201_v29 = vld [vmem:[%s1468_s8 + $0x38] sm:$0xff] }
  0x14   : > { %555 = vmatpush.bf16.msra.mxu0 %v1183_v6  ;;  %v1187_v24 = vld [vmem:[%s1466_s6 + $0x8] sm:$0xff]  ;;  %v1170_v27 = vld [vmem:[%s1464_s4] sm:$0xff]  ;;  %v1204_v30 = vld [vmem:[%s1469_s9 + $0x10] sm:$0xff] }
  0x15   : > { %616 = vmatpush.bf16.msra.mxu1 %v1175_v7  ;;  %v1186_v28 = vld [vmem:[%s1466_s6] sm:$0xff]  ;;  %v1200_v34 = vld [vmem:[%s1468_s8 + $0x30] sm:$0xff]  ;;  %v1203_v35 = vld [vmem:[%s1469_s9 + $0x8] sm:$0xff] }
  0x16   : > { %694 = vmatpush.bf16.msra.mxu2 %v1191_v8  ;;  %v488_v31 = vld [vmem:[%s454_s17] sm:$0xf]  ;;  %v1199_v36 = vld [vmem:[%s1468_s8 + $0x28] sm:$0xff]  ;;  %v1197_v39 = vld [vmem:[%s1468_s8 + $0x18] sm:$0xff] }
  0x17   : > { %797 = vmatpush.bf16.msra.mxu3 %v1207_v17  ;;  %v471_v32 = vld [vmem:[%s450_s20] sm:$0xf]  ;;  %v1196_v41 = vld [vmem:[%s1468_s8 + $0x10] sm:$0xff]  ;;  %v1195_v42 = vld [vmem:[%s1468_s8 + $0x8] sm:$0xff] }
  0x18   : > { %556 = vmatpush.bf16.msra.mxu0 %v1182_v10  ;;  %v627_v33 = vld [vmem:[%s458_s28] sm:$0xf] }
  0x19   : > { %617 = vmatpush.bf16.msra.mxu1 %v1174_v11  ;;  %v1202_v37 = vld [vmem:[%s1469_s9] sm:$0xff] }
  0x1a   : > { %695 = vmatpush.bf16.msra.mxu2 %v1190_v12  ;;  %v1198_v38 = vld [vmem:[%s1468_s8 + $0x20] sm:$0xff] }
  0x1b   : > { %798 = vmatpush.bf16.msra.mxu3 %v1206_v21  ;;  %v730_v40 = vld [vmem:[%s462_s26] sm:$0xf] }
  0x1c   : > { %557 = vmatpush.bf16.msra.mxu0 %v1181_v14  ;;  %v1194_v43 = vld [vmem:[%s1468_s8] sm:$0xff] }
  0x1d   : > { %618 = vmatpush.bf16.msra.mxu1 %v1173_v15  ;;  %v1218_v47 = vld [vmem:[%s1467_s7] ss:$0 sm:$0xff] }
  0x1e   : > { %696 = vmatpush.bf16.msra.mxu2 %v1189_v16  ;;  %v1219_v58 = vld [vmem:[%s1470_s10] ss:$0 sm:$0xff] }
  0x1f   : > { %799 = vmatpush.bf16.msra.mxu3 %v1205_v25 }
  0x20   : > { %558 = vmatpush.bf16.msra.mxu0 %v1180_v18 }
  0x21   : > { %619 = vmatpush.bf16.msra.mxu1 %v1172_v19 }
  0x22   : > { %697 = vmatpush.bf16.msra.mxu2 %v1188_v20 }
  0x23   : > { %800 = vmatpush.bf16.msra.mxu3 %v1204_v30 }
  0x24   : > { %559 = vmatpush.bf16.msra.mxu0 %v1179_v22 }
  0x25   : > { %620 = vmatpush.bf16.msra.mxu1 %v1171_v23 }
  0x26   : > { %698 = vmatpush.bf16.msra.mxu2 %v1187_v24 }
  0x27   : > { %801 = vmatpush.bf16.msra.mxu3 %v1203_v35 }
  0x28   : > { %560 = vmatpush.bf16.msra.mxu0 %v1178_v26 }
  0x29   : > { %621 = vmatpush.bf16.msra.mxu1 %v1170_v27 }
  0x2a   : > { %699 = vmatpush.bf16.msra.mxu2 %v1186_v28 }
  0x2b   : > { %561 = vmatmul.bf16.vlgmr.msra.gmra.mxu0 %v488_v31  ;;  %802 = vmatpush.bf16.msra.mxu3 %v1202_v37 }
  0x2c   : > { %856 = vmatpush.bf16.msrb.mxu0 %v1201_v29  ;;  %622 = vmatmul.bf16.vlgmr.msra.gmra.mxu1 %v471_v32 }
  0x2d   : > { %700 = vmatmul.bf16.vlgmr.msra.gmra.mxu2 %v627_v33 }
  0x2e   : > { %803 = vmatmul.bf16.vlgmr.msra.gmra.mxu3 %v730_v40 }
  0x30   : > { %857 = vmatpush.bf16.msrb.mxu0 %v1200_v34 }
  0x34   : > { %858 = vmatpush.bf16.msrb.mxu0 %v1199_v36 }
  0x38   : > { %859 = vmatpush.bf16.msrb.mxu0 %v1198_v38 }
  0x3c   : > { %860 = vmatpush.bf16.msrb.mxu0 %v1197_v39 }
  0x40   : > { %861 = vmatpush.bf16.msrb.mxu0 %v1196_v41 }
  0x44   : > { %862 = vmatpush.bf16.msrb.mxu0 %v1195_v42 }
  0x48   : > { %863 = vmatpush.bf16.msrb.mxu0 %v1194_v43 }
  0xa8   : > { %v562_v44 = vpop.f32.mrf.mxu0 }
  0xa9   : > { %v623_v45 = vpop.f32.mrf.mxu1 }
  0xaa   : > { %v624_v46 = vadd.f32 %v623_v45, %v562_v44 }
  0xb0   : > { %v701_v48 = vpop.f32.mrf.mxu2  ;;  %v564_v50 = vpop.f32.mrf.mxu0 }
  0xb1   : > { %v705_v49 = vadd.f32 %v701_v48, %v624_v46  ;;  %v625_v51 = vpop.f32.mrf.mxu1  ;;  %v804_v56 = vpop.f32.mrf.mxu3 }
  0xb3   : > { %v710_v52 = vadd.f32 %v1218_v47, %v705_v49 }
  0xb5   : > { %v711_v53 = vmax.f32 %v710_v52, 0.0 }
  0xb7   : > { %v712_v54 = vpack.c.bf16 %v711_v53, %v711_v53 }
  0xb8   : > { %v703_v55 = vpop.f32.mrf.mxu2 }
  0xb9   : > { %713 = vst [vmem:[%s466_s23] sm:$0xf] %v712_v54  ;;  %864 = vmatmul.bf16.vlgmr.msrb.gmra.mxu0 %v712_v54  ;;  %v806_v57 = vpop.f32.mrf.mxu3 }
 0x136   : > { %v865_v59 = vpop.f32.mrf.mxu0 }
 0x137   : > { %v866_v60 = vadd.f32 %v865_v59, %v804_v56 }
 0x139   : > { %v873_v61 = vadd.f32 %v1219_v58, %v866_v60 }
 0x13b   : > { %v874_v62 = vmax.f32 %v873_v61, 0.0 }
 0x13d   : > { %v875_v63 = vpack.c.bf16 %v874_v62, %v874_v62 }
 0x13e   : > { %v867_v0 = vpop.f32.mrf.mxu0 }
 0x13f   : > { %876 = vst [vmem:[%s470_s29] sm:$0xf] %v875_v63 }
 0x140 PF: > { %s23_s21 = sadd.s32 1, %s1226_s21  }
 0x141   : > { %p20_p4 = scmp.ge.s32.totalorder %s23_s21, 4  }
 0x143   :  { %22 = sbr.rel (!%p20_p4) target bundleno = 1 (0x1), region = 115 }

// kernel: pyramid_detection_forward.16
= control target key start
LH: loop header
LB: loop body
LE: loop exit
PB: predicated region body
PF: predicated region fallthrough
CT: control target
= control target key end

     0   :  { %s1633_s0 = inlined_call_operand.vmem [shape: bf16[2,4,128], index: 0, kind: input, shape index: {}]   ;;  %s1634_s1 = inlined_call_operand.vmem [shape: bf16[2,4,128], index: 1, kind: input, shape index: {}]   ;;  %s1635_s2 = inlined_call_operand.vmem [shape: bf16[2,4,128], index: 2, kind: input, shape index: {}]   ;;  %s1636_s3 = inlined_call_operand.vmem [shape: bf16[2,4,128], index: 3, kind: input, shape index: {}]   ;;  %s1637_s4 = inlined_call_operand.vmem [shape: bf16[128,128], index: 4, kind: input, shape index: {}]   ;;  %s1638_s5 = inlined_call_operand.vmem [shape: bf16[128,128], index: 5, kind: input, shape index: {}]   ;;  %s1639_s6 = inlined_call_operand.vmem [shape: bf16[128,128], index: 6, kind: input, shape index: {}]   ;;  %s1640_s7 = inlined_call_operand.vmem [shape: f32[1,128], index: 7, kind: input, shape index: {}]   ;;  %s1641_s8 = inlined_call_operand.vmem [shape: bf16[128,128], index: 8, kind: input, shape index: {}]   ;;  %s1642_s9 = inlined_call_operand.vmem [shape: bf16[128,128], index: 9, kind: input, shape index: {}]   ;;  %s1643_s10 = inlined_call_operand.vmem [shape: f32[1,128], index: 10, kind: input, shape index: {}]   ;;  %s1644_s11 = inlined_call_operand.hbm [shape: bf16[2,4,128], index: 11, kind: output, shape index: {0}]   ;;  %s1645_s12 = inlined_call_operand.vmem [shape: bf16[2,4,128], index: 12, kind: output, shape index: {1}]  }
   0x1   :  { %1651 = sst [smem:[#allocation10_spill]] %s1633_s0 }
   0x2   :  { %1652 = sst [smem:[#allocation11_spill]] %s1637_s4 }
   0x3   :  { %18 = vsyncpa [#allocation3], 0 }
   0x4   :  { %20 = vsyncpa [#allocation3 + $0x1], 0  ;;  %s1403_s21 = smov 0   ;;  %s1405_s22 = smov 0  }
   0x5   :  { %s1407_s23 = smov 0   ;;  %s1409_s24 = smov 0  }
   0x6 LB: > { %1653 = sst [smem:[#allocation5_spill]] %s1324_s21  ;;  %s1424_s25 = sadd.s32 4294967295, %s1336_s24   ;;  %s1336_s24 = sphi %s1409_s24, %s1664_s24   ;;  %s1332_s23 = sphi %s1407_s23, %s1666_s23   ;;  %s1328_s22 = sphi %s1405_s22, %s1668_s22   ;;  %s1324_s21 = sphi %s1403_s21, %s1667_s21  }
   0x7   : > { %1654 = sst [smem:[#allocation6_spill]] %s1332_s23  ;;  %s1019_s26 = sadd.s32 4294967294, %s1336_s24  }
   0x8   : > { %s1428_s27 = sadd.s32 1, %s1336_s24   ;;  %s284_s28 = sadd.s32 1, %s1332_s23 }
   0x9   : > { %1655 = sst [smem:[#allocation7_spill]] %s1428_s27  ;;  %s281_s29 = ssub.s32 %s1336_s24, %s1428_s27 }
   0xa   : > { %p294_p0 = scmp.ne.s32.totalorder %s1332_s23, %s1328_s22  ;;  %p282_p1 = scmp.eq.s32.totalorder %s281_s29, 0 }
   0xb   : > { %p295_p2 = scmp.eq.s32.totalorder %s1424_s25, 1  ;;  %p300_p3 = scmp.ne.s32.totalorder %s1328_s22, %s1324_s21 }
   0xc   : > { %p301_p4 = scmp.eq.s32.totalorder %s1019_s26, 1  ;;  %p1022_p7 = scmp.ge.s32.totalorder %s1336_s24, 1 }
   0xd   : > { %s1439_s30 = scalar_select %p282_p1, %s1332_s23, %s284_s28  }
   0xe   : > { %p1441_p5 = por %p295_p2, %p294_p0  ;;  %p1445_p6 = por %p301_p4, %p300_p3 }
   0xf   : > { %1656 = sst [smem:[#allocation8_spill]] %s1439_s30  ;;  %p394_p8 = scmp.lt.s32.totalorder %s1336_s24, 3 }
  0x10   : > { %s1658_s14 = scalar_select %p1445_p6, 1, 0 }
  0x11   : > { %p395_p9 = pnand %p1022_p7, %p394_p8 }
  0x12   : > { %1659 = sst [smem:[#allocation9_spill]] %s1658_s14  ;;  %p451_p10 = scmp.lt.s32.totalorder (!%p395_p9), %s1424_s25, 1 }
  0x13   : > { %398 = sbr.rel (%p395_p9) target bundleno = 333 (0x14d), region = 64  ;;  %s1660_s4 = sld [smem:[#allocation11_spill]] (!%p395_p9) }
  0x14   : > { %s1661_s0 = sld [smem:[#allocation10_spill]] (!%p395_p9)  ;;  %s442_s20 = sand.u32 (!%p395_p9), 1, %s1328_s22  }
  0x15   : > { %s1023_s26 = sshll.u32 (!%p395_p9), %s442_s20, 1 }
  0x16   : > { %s444_s28 = scalar_lea.vmem (!%p395_p9), [#allocation2], %s1023_s26 }
  0x17   : > { %s894_s27 = sshll.u32 (!%p395_p9), %s444_s28, 4  ;;  %s895_s27 = int_to_ptr.vmem [resolvable:$true] %s894_s27 }
  0x18   : > { %v1208_v0 = vld [vmem:[%s1638_s5 + $0x38] sm:$0xff]  ;;  %v1207_v3 = vld [vmem:[%s1638_s5 + $0x30] sm:$0xff]  ;;  %v1206_v6 = vld [vmem:[%s1638_s5 + $0x28] sm:$0xff]  ;;  %s452_s19 = scalar_select %p451_p10, %s1424_s25, 1 }
  0x19   : > { %v1200_v1 = vld [vmem:[%s1660_s4 + $0x38] sm:$0xff]  ;;  %553 = vmatpush.bf16.msra.mxu0 %v1208_v0  ;;  %v1199_v4 = vld [vmem:[%s1660_s4 + $0x30] sm:$0xff]  ;;  %v1198_v7 = vld [vmem:[%s1660_s4 + $0x28] sm:$0xff] }
  0x1a   : > { %v1216_v2 = vld [vmem:[%s1639_s6 + $0x38] sm:$0xff]  ;;  %614 = vmatpush.bf16.msra.mxu1 %v1200_v1  ;;  %v1215_v5 = vld [vmem:[%s1639_s6 + $0x30] sm:$0xff]  ;;  %v1214_v8 = vld [vmem:[%s1639_s6 + $0x28] sm:$0xff]  ;;  %s1531_s18 = sshll.u32 %s452_s19, 1 }
  0x1b   : > { %692 = vmatpush.bf16.msra.mxu2 %v1216_v2  ;;  %v1232_v9 = vld [vmem:[%s1642_s9 + $0x38] sm:$0xff]  ;;  %v1205_v10 = vld [vmem:[%s1638_s5 + $0x20] sm:$0xff]  ;;  %v1231_v13 = vld [vmem:[%s1642_s9 + $0x30] sm:$0xff]  ;;  %s458_s17 = scalar_lea.vmem %s1634_s1, %s1531_s18  ;;  %s454_s14 = scalar_lea.vmem %s1661_s0, %s1531_s18 }
  0x1c   : > { %v1197_v11 = vld [vmem:[%s1660_s4 + $0x20] sm:$0xff]  ;;  %795 = vmatpush.bf16.msra.mxu3 %v1232_v9  ;;  %v1204_v14 = vld [vmem:[%s1638_s5 + $0x18] sm:$0xff]  ;;  %v1230_v17 = vld [vmem:[%s1642_s9 + $0x28] sm:$0xff]  ;;  %s462_s30 = scalar_lea.vmem %s1635_s2, %s1531_s18 }
  0x1d   : > { %554 = vmatpush.bf16.msra.mxu0 %v1207_v3  ;;  %v1213_v12 = vld [vmem:[%s1639_s6 + $0x20] sm:$0xff]  ;;  %v1196_v15 = vld [vmem:[%s1660_s4 + $0x18] sm:$0xff]  ;;  %v1203_v18 = vld [vmem:[%s1638_s5 + $0x10] sm:$0xff] }
  0x1e   : > { %615 = vmatpush.bf16.msra.mxu1 %v1199_v4  ;;  %v1212_v16 = vld [vmem:[%s1639_s6 + $0x18] sm:$0xff]  ;;  %v1195_v19 = vld [vmem:[%s1660_s4 + $0x10] sm:$0xff]  ;;  %v1229_v21 = vld [vmem:[%s1642_s9 + $0x20] sm:$0xff] }
  0x1f   : > { %693 = vmatpush.bf16.msra.mxu2 %v1215_v5  ;;  %v1211_v20 = vld [vmem:[%s1639_s6 + $0x10] sm:$0xff]  ;;  %v1202_v22 = vld [vmem:[%s1638_s5 + $0x8] sm:$0xff]  ;;  %v1228_v25 = vld [vmem:[%s1642_s9 + $0x18] sm:$0xff] }
  0x20   : > { %796 = vmatpush.bf16.msra.mxu3 %v1231_v13  ;;  %v1194_v23 = vld [vmem:[%s1660_s4 + $0x8] sm:$0xff]  ;;  %v1201_v26 = vld [vmem:[%s1638_s5] sm:$0xff]  ;;  %v1224_v29 = vld [vmem:[%s1641_s8 + $0x38] sm:$0xff] }
  0x21   : > { %555 = vmatpush.bf16.msra.mxu0 %v1206_v6  ;;  %v1210_v24 = vld [vmem:[%s1639_s6 + $0x8] sm:$0xff]  ;;  %v1193_v27 = vld [vmem:[%s1660_s4] sm:$0xff]  ;;  %v1227_v30 = vld [vmem:[%s1642_s9 + $0x10] sm:$0xff]  ;;  %s878_s4 = scalar_lea.sflag [#allocation3], %s442_s20 }
  0x22   : > { %616 = vmatpush.bf16.msra.mxu1 %v1198_v7  ;;  %v1209_v28 = vld [vmem:[%s1639_s6] sm:$0xff]  ;;  %v1223_v34 = vld [vmem:[%s1641_s8 + $0x30] sm:$0xff]  ;;  %v1226_v35 = vld [vmem:[%s1642_s9 + $0x8] sm:$0xff] }
  0x23   : > { %694 = vmatpush.bf16.msra.mxu2 %v1214_v8  ;;  %v488_v31 = vld [vmem:[%s458_s17] sm:$0x3]  ;;  %v1222_v36 = vld [vmem:[%s1641_s8 + $0x28] sm:$0xff]  ;;  %v1220_v39 = vld [vmem:[%s1641_s8 + $0x18] sm:$0xff] }
  0x24   : > { %797 = vmatpush.bf16.msra.mxu3 %v1230_v17  ;;  %v471_v32 = vld [vmem:[%s454_s14] sm:$0x3]  ;;  %v1219_v41 = vld [vmem:[%s1641_s8 + $0x10] sm:$0xff]  ;;  %v1218_v42 = vld [vmem:[%s1641_s8 + $0x8] sm:$0xff] }
  0x25   : > { %556 = vmatpush.bf16.msra.mxu0 %v1205_v10  ;;  %v627_v33 = vld [vmem:[%s462_s30] sm:$0x3]  ;;  %s466_s30 = scalar_lea.vmem %s1636_s3, %s1531_s18 }
  0x26   : > { %617 = vmatpush.bf16.msra.mxu1 %v1197_v11  ;;  %v1225_v37 = vld [vmem:[%s1642_s9] sm:$0xff] }
  0x27   : > { %695 = vmatpush.bf16.msra.mxu2 %v1213_v12  ;;  %v1221_v38 = vld [vmem:[%s1641_s8 + $0x20] sm:$0xff] }
  0x28   : > { %798 = vmatpush.bf16.msra.mxu3 %v1229_v21  ;;  %v730_v40 = vld [vmem:[%s466_s30] sm:$0x3]  ;;  %s1190_s30 = sshll.u32 %s1424_s25, 1  ;;  %s1294_s25 = scalar_lea.hbm %s1644_s11, 4 }
  0x29   : > { %557 = vmatpush.bf16.msra.mxu0 %v1204_v14  ;;  %v1217_v43 = vld [vmem:[%s1641_s8] sm:$0xff]  ;;  %s892_s21 = scalar_lea.hbm %s1644_s11, %s1190_s30 }
  0x2a   : > { %618 = vmatpush.bf16.msra.mxu1 %v1196_v15  ;;  %v1272_v47 = vld [vmem:[%s1640_s7] ss:$0 sm:$0xff]  ;;  %s896_s15 = sshll.u32 %s892_s21, 4  ;;  %s897_s15 = int_to_ptr.hbm [resolvable:$true] %s896_s15 }
  0x2b   : > { %696 = vmatpush.bf16.msra.mxu2 %v1212_v16  ;;  %s1288_s19 = sshra.s32 %s897_s15, 4  ;;  %s1289_s19 = int_to_ptr.hbm [resolvable:$true] %s1288_s19 }
  0x2c   : > { %799 = vmatpush.bf16.msra.mxu3 %v1228_v25  ;;  %s1290_s14 = scalar_lea.hbm %s1289_s19, 2  ;;  %p1295_p0 = scmp.lt.s32.totalorder %s1289_s19, %s1644_s11 }
  0x2d   : > { %558 = vmatpush.bf16.msra.mxu0 %v1203_v18  ;;  %p1291_p11 = scmp.ne.s32.totalorder %s1289_s19, %s1290_s14  ;;  %p1296_p1 = scmp.lt.s32.totalorder %s1294_s25, %s1290_s14 }
  0x2e   : > { %619 = vmatpush.bf16.msra.mxu1 %v1195_v19 }
  0x2f   : > { %697 = vmatpush.bf16.msra.mxu2 %v1211_v20  ;;  %p1292_p12 = pnand %p1291_p11, %p1441_p5  ;;  %p1297_p2 = por %p1296_p1, %p1295_p0 }
  0x30   : > { %800 = vmatpush.bf16.msra.mxu3 %v1227_v30 }
  0x31   : > { %559 = vmatpush.bf16.msra.mxu0 %v1202_v22  ;;  %p1293_p13 = pneg %p1292_p12 }
  0x32   : > { %620 = vmatpush.bf16.msra.mxu1 %v1194_v23 }
  0x33   : > { %698 = vmatpush.bf16.msra.mxu2 %v1210_v24  ;;  %p1298_p3 = pnand %p1297_p2, %p1293_p13 }
  0x34   : > { %801 = vmatpush.bf16.msra.mxu3 %v1226_v35 }
  0x35   : > { %560 = vmatpush.bf16.msra.mxu0 %v1201_v26 }
  0x36   : > { %621 = vmatpush.bf16.msra.mxu1 %v1193_v27 }
  0x37   : > { %699 = vmatpush.bf16.msra.mxu2 %v1209_v28 }
  0x38   : > { %561 = vmatmul.bf16.vlgmr.msra.gmra.mxu0 %v488_v31  ;;  %802 = vmatpush.bf16.msra.mxu3 %v1225_v37 }
  0x39   : > { %856 = vmatpush.bf16.msrb.mxu0 %v1224_v29  ;;  %622 = vmatmul.bf16.vlgmr.msra.gmra.mxu1 %v471_v32 }
  0x3a   : > { %700 = vmatmul.bf16.vlgmr.msra.gmra.mxu2 %v627_v33 }
  0x3b   : > { %803 = vmatmul.bf16.vlgmr.msra.gmra.mxu3 %v730_v40 }
  0x3d   : > { %857 = vmatpush.bf16.msrb.mxu0 %v1223_v34 }
  0x41   : > { %858 = vmatpush.bf16.msrb.mxu0 %v1222_v36 }
  0x45   : > { %859 = vmatpush.bf16.msrb.mxu0 %v1221_v38 }
  0x49   : > { %860 = vmatpush.bf16.msrb.mxu0 %v1220_v39 }
  0x4d   : > { %861 = vmatpush.bf16.msrb.mxu0 %v1219_v41 }
  0x51   : > { %862 = vmatpush.bf16.msrb.mxu0 %v1218_v42 }
  0x55   : > { %863 = vmatpush.bf16.msrb.mxu0 %v1217_v43 }
  0xb5   : > { %v562_v44 = vpop.f32.mrf.mxu0 }
  0xb6   : > { %v623_v45 = vpop.f32.mrf.mxu1 }
  0xb7   : > { %v624_v46 = vadd.f32 %v623_v45, %v562_v44 }
  0xbd   : > { %v701_v48 = vpop.f32.mrf.mxu2  ;;  %v564_v50 = vpop.f32.mrf.mxu0 }
  0xbe   : > { %v705_v49 = vadd.f32 %v701_v48, %v624_v46  ;;  %v625_v51 = vpop.f32.mrf.mxu1 }
  0xc0   : > { %v710_v52 = vadd.f32 %v1272_v47, %v705_v49 }
  0xc2   : > { %v711_v53 = vmax.f32 %v710_v52, 0.0 }
  0xc4   : > { %v712_v54 = vpack.c.bf16 %v711_v53, %v711_v53 }
  0xc5   : > { %v703_v55 = vpop.f32.mrf.mxu2 }
  0xc6   : > { %864 = vmatmul.bf16.vlgmr.msrb.gmra.mxu0 %v712_v54  ;;  %713 = vst [vmem:[%s444_s28] sm:$0x3] %v712_v54 }
  0xc7   : > { %1301 = shalt.err (!%p1298_p3)
}
  0xc8   : > { %1233 = dma.vmem_to_hbm [thread:$0]  (%p1441_p5), %s895_s27, 32, %s897_s15, %s878_s4   ;;  %v804_v56 = vpop.f32.mrf.mxu3  ;;  %v1273_v58 = vld [vmem:[%s1643_s10] ss:$0 sm:$0xff] }
  0xc9   : > { %s470_s29 = scalar_lea.vmem %s1645_s12, %s1531_s18 }
  0xd0   : > { %v806_v57 = vpop.f32.mrf.mxu3 }
 0x143   : > { %v865_v59 = vpop.f32.mrf.mxu0 }
 0x144   : > { %v866_v60 = vadd.f32 %v865_v59, %v804_v56 }
 0x146   : > { %v873_v61 = vadd.f32 %v1273_v58, %v866_v60 }
 0x148   : > { %v874_v62 = vmax.f32 %v873_v61, 0.0 }
 0x14a   : > { %v875_v63 = vpack.c.bf16 %v874_v62, %v874_v62 }
 0x14b   : > { %v867_v0 = vpop.f32.mrf.mxu0 }
 0x14c   : > { %876 = vst [vmem:[%s470_s29] sm:$0x3] %v875_v63 }
 0x14d PF: > { %s1662_s13 = sld [smem:[#allocation5_spill]]  ;;  %p1239_p4 = scmp.ge.s32.totalorder %s1336_s24, 2 }
 0x14f   : > { %p1236_p5 = pnand %p1239_p4, %p1445_p6 }
 0x151   : > { %p1237_p7 = pneg %p1236_p5 }
 0x153   : > { %s911_s21 = sand.u32 1, %s1662_s13  }
 0x154   : > { %s912_s27 = scalar_lea.sflag [#allocation3], %s911_s21 }
 0x155   : > { %1319 = dma.done.wait (%p1237_p7), %s912_s27, 32  }
 0x156   : > { %1321 = vsyncadd (%p1237_p7), %s912_s27, 4294967264  ;;  %s1664_s24 = sld [smem:[#allocation7_spill]]  ;;  %s1667_s21 = smov %s1328_s22 }
 0x157   : > { %s1665_s15 = sld [smem:[#allocation6_spill]] }
 0x158   : > { %s1666_s23 = sld [smem:[#allocation8_spill]] }
 0x15c   : > { %p23_p8 = scmp.ge.s32.totalorder %s1664_s24, 4  }
 0x15d   : > { %s1668_s22 = smov %s1665_s15 }
 0x15e   :  { %25 = sbr.rel (!%p23_p8) target bundleno = 6 (0x6), region = 120 }
 0x163   :  { %925 = vsyncpa [#allocation3], 1 }
 0x164   :  { %927 = vsyncpa [#allocation3 + $0x1], 1 }

// kernel: mul.20
= control target key start
LH: loop header
LB: loop body
LE: loop exit
PB: predicated region body
PF: predicated region fallthrough
CT: control target
= control target key end

     0   :  { %s20_s0 = inlined_call_operand.<no memory space> [shape: f32[], index: 0, kind: input, shape index: {}]   ;;  %s21_s1 = inlined_call_operand.vmem [shape: f32[32], index: 1, kind: output, shape index: {}]  }
   0x1   :  { %v2_v0 = vstv %s20_s0 }
   0x2   :  { %3 = vst [vmem:[%s21_s1] sm:$0x1] %v2_v0 }

// kernel: mul.21
= control target key start
LH: loop header
LB: loop body
LE: loop exit
PB: predicated region body
PF: predicated region fallthrough
CT: control target
= control target key end

     0   :  { %s20_s0 = inlined_call_operand.<no memory space> [shape: f32[], index: 0, kind: input, shape index: {}]   ;;  %s21_s1 = inlined_call_operand.vmem [shape: f32[16], index: 1, kind: output, shape index: {}]  }
   0x1   :  { %v2_v0 = vstv %s20_s0 }
   0x2   :  { %3 = vst [vmem:[%s21_s1] sm:$0x1] %v2_v0 }

// kernel: mul.22
= control target key start
LH: loop header
LB: loop body
LE: loop exit
PB: predicated region body
PF: predicated region fallthrough
CT: control target
= control target key end

     0   :  { %s20_s0 = inlined_call_operand.<no memory space> [shape: f32[], index: 0, kind: input, shape index: {}]   ;;  %s21_s1 = inlined_call_operand.vmem [shape: f32[8], index: 1, kind: output, shape index: {}]  }
   0x1   :  { %v2_v0 = vstv %s20_s0 }
   0x2   :  { %3 = vst [vmem:[%s21_s1] sm:$0x1] %v2_v0 }

// kernel: mul.23
= control target key start
LH: loop header
LB: loop body
LE: loop exit
PB: predicated region body
PF: predicated region fallthrough
CT: control target
= control target key end

     0   :  { %s20_s0 = inlined_call_operand.<no memory space> [shape: f32[], index: 0, kind: input, shape index: {}]   ;;  %s21_s1 = inlined_call_operand.vmem [shape: f32[4], index: 1, kind: output, shape index: {}]  }
   0x1   :  { %v2_v0 = vstv %s20_s0 }
   0x2   :  { %3 = vst [vmem:[%s21_s1] sm:$0x1] %v2_v0 }

// kernel: pyramid_detection_forward.17
= control target key start
LH: loop header
LB: loop body
LE: loop exit
PB: predicated region body
PF: predicated region fallthrough
CT: control target
= control target key end

     0   :  { %s2621_s24 = smov 0   ;;  %s4844_s0 = inlined_call_operand.vmem [shape: bf16[2,72,128], index: 0, kind: input, shape index: {}]   ;;  %s4845_s1 = inlined_call_operand.vmem [shape: f32[3,128,256], index: 1, kind: input, shape index: {}]   ;;  %s4846_s2 = inlined_call_operand.vmem [shape: f32[1,256], index: 2, kind: input, shape index: {}]   ;;  %s4847_s3 = inlined_call_operand.vmem [shape: f32[3,256,256], index: 3, kind: input, shape index: {}]   ;;  %s4848_s4 = inlined_call_operand.vmem [shape: f32[1,256], index: 4, kind: input, shape index: {}]   ;;  %s4849_s5 = inlined_call_operand.vmem [shape: f32[3,256,128], index: 5, kind: input, shape index: {}]   ;;  %s4850_s6 = inlined_call_operand.vmem [shape: f32[1,128], index: 6, kind: input, shape index: {}]   ;;  %s4851_s7 = inlined_call_operand.vmem [shape: f32[2,72,128], index: 7, kind: output, shape index: {}]  }
   0x1 LB: > { %s2276_s25 = sadd.s32 4294967295, %s2578_s24   ;;  %p2280_p0 = scmp.ge.s32.totalorder %s2578_s24, 1  ;;  %s2578_s24 = sphi %s2621_s24, %s17_s24  }
   0x2   : > { %p237_p1 = scmp.lt.s32.totalorder %s2578_s24, 3 }
   0x4   : > { %p238_p2 = pnand %p2280_p0, %p237_p1 }
   0x6   : > { %241 = sbr.rel (%p238_p2) target bundleno = 813 (0x32d), region = 48 }
   0xb   : > { %v2313_v0 = vld [vmem:[%s4845_s1 + $0x1f0] sm:$0xff]  ;;  %v2314_v1 = vld [vmem:[%s4845_s1 + $0x1f8] sm:$0xff]  ;;  %v2311_v4 = vld [vmem:[%s4845_s1 + $0x1e0] sm:$0xff]  ;;  %p2685_p3 = scmp.lt.s32.totalorder %s2276_s25, 1  ;;  %v279_v47 = vlaneseq }
   0xc   : > { %v465_v2 = vld [vmem:[%s4845_s1 + $0xf0] sm:$0xff]  ;;  %500 = vmatpush.msra.mxu0 %v2313_v0  ;;  %544 = vmatpush.msra.mxu1 %v2314_v1  ;;  %v466_v3 = vld [vmem:[%s4845_s1 + $0xf8] sm:$0xff]  ;;  %v2312_v5 = vld [vmem:[%s4845_s1 + $0x1e8] sm:$0xff] }
   0xd   : > { %588 = vmatpush.msra.mxu2 %v465_v2  ;;  %632 = vmatpush.msra.mxu3 %v466_v3  ;;  %v463_v6 = vld [vmem:[%s4845_s1 + $0xe0] sm:$0xff]  ;;  %v464_v7 = vld [vmem:[%s4845_s1 + $0xe8] sm:$0xff]  ;;  %v2309_v8 = vld [vmem:[%s4845_s1 + $0x1d0] sm:$0xff]  ;;  %s4868_s25 = smov (!%p2685_p3, %s2276_s25), 1  ;;  %v2815_v59 = vshrl.u32 %v279_v47, 7 }
   0xe   : > { %501 = vmatpush.msra.mxu0 %v2311_v4  ;;  %545 = vmatpush.msra.mxu1 %v2312_v5  ;;  %v2310_v9 = vld [vmem:[%s4845_s1 + $0x1d8] sm:$0xff]  ;;  %v461_v10 = vld [vmem:[%s4845_s1 + $0xd0] sm:$0xff]  ;;  %v2307_v12 = vld [vmem:[%s4845_s1 + $0x1c0] sm:$0xff]  ;;  %s2560_s9 = smul.u32 36, %s4868_s25 }
   0xf   : > { %v462_v11 = vld [vmem:[%s4845_s1 + $0xd8] sm:$0xff]  ;;  %589 = vmatpush.msra.mxu2 %v463_v6  ;;  %633 = vmatpush.msra.mxu3 %v464_v7  ;;  %v2308_v13 = vld [vmem:[%s4845_s1 + $0x1c8] sm:$0xff]  ;;  %v459_v14 = vld [vmem:[%s4845_s1 + $0xc0] sm:$0xff]  ;;  %vm406_vm0 = vcmp.lt.s32.totalorder %v2815_v59, 1  ;;  %vm425_vm1 = vcmp.lt.s32.totalorder %v2815_v59, 7  ;;  %vm298_vm2 = vcmp.eq.s32.totalorder %v2815_v59, 0 }
  0x10   : > { %502 = vmatpush.msra.mxu0 %v2309_v8  ;;  %546 = vmatpush.msra.mxu1 %v2310_v9  ;;  %v460_v15 = vld [vmem:[%s4845_s1 + $0xc8] sm:$0xff]  ;;  %v2305_v16 = vld [vmem:[%s4845_s1 + $0x1b0] sm:$0xff]  ;;  %v2306_v17 = vld [vmem:[%s4845_s1 + $0x1b8] sm:$0xff]  ;;  %s2771_s30 = scalar_lea.vmem %s4844_s0, %s2560_s9  ;;  %s2561_s11 = smul.u32 72, %s4868_s25 }
  0x11   : > { %590 = vmatpush.msra.mxu2 %v461_v10  ;;  %634 = vmatpush.msra.mxu3 %v462_v11  ;;  %v457_v18 = vld [vmem:[%s4845_s1 + $0xb0] sm:$0xff]  ;;  %v458_v19 = vld [vmem:[%s4845_s1 + $0xb8] sm:$0xff]  ;;  %v2303_v20 = vld [vmem:[%s4845_s1 + $0x1a0] sm:$0xff] }
  0x12   : > { %503 = vmatpush.msra.mxu0 %v2307_v12  ;;  %547 = vmatpush.msra.mxu1 %v2308_v13  ;;  %v2304_v21 = vld [vmem:[%s4845_s1 + $0x1a8] sm:$0xff]  ;;  %v455_v22 = vld [vmem:[%s4845_s1 + $0xa0] sm:$0xff]  ;;  %v2301_v24 = vld [vmem:[%s4845_s1 + $0x190] sm:$0xff]  ;;  %s4814_s13 = scalar_lea.vmem %s4851_s7, %s2561_s11 }
  0x13   : > { %591 = vmatpush.msra.mxu2 %v459_v14  ;;  %635 = vmatpush.msra.mxu3 %v460_v15  ;;  %v456_v23 = vld [vmem:[%s4845_s1 + $0xa8] sm:$0xff]  ;;  %v2302_v25 = vld [vmem:[%s4845_s1 + $0x198] sm:$0xff]  ;;  %v453_v26 = vld [vmem:[%s4845_s1 + $0x90] sm:$0xff] }
  0x14   : > { %504 = vmatpush.msra.mxu0 %v2305_v16  ;;  %548 = vmatpush.msra.mxu1 %v2306_v17  ;;  %v454_v27 = vld [vmem:[%s4845_s1 + $0x98] sm:$0xff]  ;;  %v2299_v28 = vld [vmem:[%s4845_s1 + $0x180] sm:$0xff]  ;;  %v2300_v29 = vld [vmem:[%s4845_s1 + $0x188] sm:$0xff] }
  0x15   : > { %592 = vmatpush.msra.mxu2 %v457_v18  ;;  %636 = vmatpush.msra.mxu3 %v458_v19  ;;  %v451_v30 = vld [vmem:[%s4845_s1 + $0x80] sm:$0xff]  ;;  %v452_v31 = vld [vmem:[%s4845_s1 + $0x88] sm:$0xff]  ;;  %v2297_v32 = vld [vmem:[%s4845_s1 + $0x170] sm:$0xff] }
  0x16   : > { %505 = vmatpush.msra.mxu0 %v2303_v20  ;;  %549 = vmatpush.msra.mxu1 %v2304_v21  ;;  %v2298_v33 = vld [vmem:[%s4845_s1 + $0x178] sm:$0xff]  ;;  %v449_v34 = vld [vmem:[%s4845_s1 + $0x70] sm:$0xff]  ;;  %v2295_v36 = vld [vmem:[%s4845_s1 + $0x160] sm:$0xff] }
  0x17   : > { %593 = vmatpush.msra.mxu2 %v455_v22  ;;  %637 = vmatpush.msra.mxu3 %v456_v23  ;;  %v450_v35 = vld [vmem:[%s4845_s1 + $0x78] sm:$0xff]  ;;  %v2296_v37 = vld [vmem:[%s4845_s1 + $0x168] sm:$0xff]  ;;  %v447_v38 = vld [vmem:[%s4845_s1 + $0x60] sm:$0xff] }
  0x18   : > { %506 = vmatpush.msra.mxu0 %v2301_v24  ;;  %550 = vmatpush.msra.mxu1 %v2302_v25  ;;  %v448_v39 = vld [vmem:[%s4845_s1 + $0x68] sm:$0xff]  ;;  %v2293_v40 = vld [vmem:[%s4845_s1 + $0x150] sm:$0xff]  ;;  %v2294_v41 = vld [vmem:[%s4845_s1 + $0x158] sm:$0xff] }
  0x19   : > { %594 = vmatpush.msra.mxu2 %v453_v26  ;;  %638 = vmatpush.msra.mxu3 %v454_v27  ;;  %v445_v42 = vld [vmem:[%s4845_s1 + $0x50] sm:$0xff]  ;;  %v446_v43 = vld [vmem:[%s4845_s1 + $0x58] sm:$0xff]  ;;  %v2291_v44 = vld [vmem:[%s4845_s1 + $0x140] sm:$0xff] }
  0x1a   : > { %507 = vmatpush.msra.mxu0 %v2299_v28  ;;  %551 = vmatpush.msra.mxu1 %v2300_v29  ;;  %v2292_v45 = vld [vmem:[%s4845_s1 + $0x148] sm:$0xff]  ;;  %v443_v46 = vld [vmem:[%s4845_s1 + $0x40] sm:$0xff]  ;;  %v2289_v51 = vld [vmem:[%s4845_s1 + $0x130] sm:$0xff] }
  0x1b   : > { %595 = vmatpush.msra.mxu2 %v451_v30  ;;  %639 = vmatpush.msra.mxu3 %v452_v31  ;;  %v444_v48 = vld [vmem:[%s4845_s1 + $0x48] sm:$0xff]  ;;  %v2542_v49 = vld [vmem:[%s2771_s30] sm:$0xff]   ;;  %v2290_v52 = vld [vmem:[%s4845_s1 + $0x138] sm:$0xff] }
  0x1c   : > { %508 = vmatpush.msra.mxu0 %v2297_v32  ;;  %552 = vmatpush.msra.mxu1 %v2298_v33  ;;  %v387_v50 = vld [vmem:[%s2771_s30 + $0x20] sm:$0xf]  ;;  %v441_v53 = vld [vmem:[%s4845_s1 + $0x30] sm:$0xff]  ;;  %v442_v54 = vld [vmem:[%s4845_s1 + $0x38] sm:$0xff]  ;;  %v2805_v55 = vunpack.c.l.bf16 %v2542_v49  ;;  %v2854_v9 = vunpack.c.h.bf16 %v2542_v49 }
  0x1d   : > { %596 = vmatpush.msra.mxu2 %v449_v34  ;;  %640 = vmatpush.msra.mxu3 %v450_v35  ;;  %v2807_v56 = vunpack.c.l.bf16 %v387_v50  ;;  %v2287_v57 = vld [vmem:[%s4845_s1 + $0x120] sm:$0xff]  ;;  %v2288_v58 = vld [vmem:[%s4845_s1 + $0x128] sm:$0xff]  ;;  %v2285_v62 = vld [vmem:[%s4845_s1 + $0x110] sm:$0xff] }
  0x1e   : > { %509 = vmatpush.msra.mxu0 %v2295_v36  ;;  %553 = vmatpush.msra.mxu1 %v2296_v37  ;;  %v439_v60 = vld [vmem:[%s4845_s1 + $0x20] sm:$0xff]  ;;  %v440_v61 = vld [vmem:[%s4845_s1 + $0x28] sm:$0xff]  ;;  %v2286_v63 = vld [vmem:[%s4845_s1 + $0x118] sm:$0xff]  ;;  %v397_v2 = vrot.slane %v2805_v55, 7  ;;  %v398_v14 = vrot.slane %v2854_v9, 7 }
  0x1f   : > { %597 = vmatpush.msra.mxu2 %v447_v38  ;;  %641 = vmatpush.msra.mxu3 %v448_v39  ;;  %v437_v0 = vld [vmem:[%s4845_s1 + $0x10] sm:$0xff]  ;;  %v438_v1 = vld [vmem:[%s4845_s1 + $0x18] sm:$0xff]  ;;  %v405_v3 = vrot.slane %v2807_v56, 7  ;;  %v2283_v4 = vld [vmem:[%s4845_s1 + $0x100] sm:$0xff] }
  0x20   : > { %510 = vmatpush.msra.mxu0 %v2293_v40  ;;  %554 = vmatpush.msra.mxu1 %v2294_v41  ;;  %v2284_v5 = vld [vmem:[%s4845_s1 + $0x108] sm:$0xff]  ;;  %v435_v6 = vld [vmem:[%s4845_s1] sm:$0xff]  ;;  %v2345_v10 = vld [vmem:[%s4845_s1 + $0x2f0] sm:$0xff]  ;;  %v414_v18 = vsel %vm406_vm0, %v397_v2, %v398_v14 }
  0x21   : > { %598 = vmatpush.msra.mxu2 %v445_v42  ;;  %642 = vmatpush.msra.mxu3 %v446_v43  ;;  %v436_v7 = vld [vmem:[%s4845_s1 + $0x8] sm:$0xff]  ;;  %v415_v8 = vsel %vm406_vm0, %v405_v3, %v397_v2  ;;  %v2346_v11 = vld [vmem:[%s4845_s1 + $0x2f8] sm:$0xff]  ;;  %v2343_v12 = vld [vmem:[%s4845_s1 + $0x2e0] sm:$0xff] }
  0x22   : > { %511 = vmatpush.msra.mxu0 %v2291_v44  ;;  %555 = vmatpush.msra.mxu1 %v2292_v45  ;;  %v2344_v13 = vld [vmem:[%s4845_s1 + $0x2e8] sm:$0xff]  ;;  %v2341_v15 = vld [vmem:[%s4845_s1 + $0x2d0] sm:$0xff]  ;;  %v2342_v16 = vld [vmem:[%s4845_s1 + $0x2d8] sm:$0xff] }
  0x23   : > { %599 = vmatpush.msra.mxu2 %v443_v46  ;;  %643 = vmatpush.msra.mxu3 %v444_v48  ;;  %v2557_v17 = vld [vmem:[%s2771_s30 + $0x8] sm:$0xff]   ;;  %v2339_v20 = vld [vmem:[%s4845_s1 + $0x2c0] sm:$0xff]  ;;  %v2337_v22 = vld [vmem:[%s4845_s1 + $0x2b0] sm:$0xff] }
  0x24   : > { %512 = vmatpush.msra.mxu0 %v2289_v51  ;;  %556 = vmatpush.msra.mxu1 %v2290_v52  ;;  %v2880_v19 = vunpack.c.l.bf16 %v2557_v17  ;;  %v2340_v21 = vld [vmem:[%s4845_s1 + $0x2c8] sm:$0xff]  ;;  %v2338_v23 = vld [vmem:[%s4845_s1 + $0x2b8] sm:$0xff]  ;;  %v2335_v25 = vld [vmem:[%s4845_s1 + $0x2a0] sm:$0xff]  ;;  %v2905_v28 = vunpack.c.h.bf16 %v2557_v17  ;;  %v416_v52 = vrot.slane %v2805_v55, 1 }
  0x25   : > { %600 = vmatpush.msra.mxu2 %v441_v53  ;;  %644 = vmatpush.msra.mxu3 %v442_v54  ;;  %v2336_v26 = vld [vmem:[%s4845_s1 + $0x2a8] sm:$0xff]  ;;  %v2333_v29 = vld [vmem:[%s4845_s1 + $0x290] sm:$0xff]  ;;  %v2334_v30 = vld [vmem:[%s4845_s1 + $0x298] sm:$0xff]  ;;  %v417_v53 = vrot.slane %v2854_v9, 1 }
  0x26   : > { %513 = vmatpush.msra.mxu0 %v2287_v57  ;;  %557 = vmatpush.msra.mxu1 %v2288_v58  ;;  %v399_v24 = vrot.slane %v2880_v19, 7  ;;  %v2331_v31 = vld [vmem:[%s4845_s1 + $0x280] sm:$0xff]  ;;  %v2332_v32 = vld [vmem:[%s4845_s1 + $0x288] sm:$0xff]  ;;  %v400_v33 = vrot.slane %v2905_v28, 7  ;;  %v2558_v34 = vld [vmem:[%s2771_s30 + $0x10] sm:$0xff]   ;;  %v418_v2 = vrot.slane %v2880_v19, 1 }
  0x27   : > { %601 = vmatpush.msra.mxu2 %v439_v60  ;;  %645 = vmatpush.msra.mxu3 %v440_v61  ;;  %v2329_v35 = vld [vmem:[%s4845_s1 + $0x270] sm:$0xff]  ;;  %v2330_v36 = vld [vmem:[%s4845_s1 + $0x278] sm:$0xff]  ;;  %v2931_v38 = vunpack.c.l.bf16 %v2558_v34  ;;  %v2327_v39 = vld [vmem:[%s4845_s1 + $0x260] sm:$0xff]  ;;  %v2956_v47 = vunpack.c.h.bf16 %v2558_v34  ;;  %v433_v61 = vsel %vm425_vm1, %v416_v52, %v417_v53 }
  0x28   : > { %514 = vmatpush.msra.mxu0 %v2285_v62  ;;  %558 = vmatpush.msra.mxu1 %v2286_v63  ;;  %v413_v27 = vsel %vm406_vm0, %v398_v14, %v399_v24  ;;  %v412_v37 = vsel %vm406_vm0, %v399_v24, %v400_v33  ;;  %v2328_v40 = vld [vmem:[%s4845_s1 + $0x268] sm:$0xff]  ;;  %v2325_v41 = vld [vmem:[%s4845_s1 + $0x250] sm:$0xff]  ;;  %v2326_v42 = vld [vmem:[%s4845_s1 + $0x258] sm:$0xff] }
  0x29   : > { %602 = vmatpush.msra.mxu2 %v437_v0  ;;  %646 = vmatpush.msra.mxu3 %v438_v1  ;;  %v401_v43 = vrot.slane %v2931_v38, 7  ;;  %v2323_v44 = vld [vmem:[%s4845_s1 + $0x240] sm:$0xff]  ;;  %v2324_v45 = vld [vmem:[%s4845_s1 + $0x248] sm:$0xff]  ;;  %v2321_v48 = vld [vmem:[%s4845_s1 + $0x230] sm:$0xff]  ;;  %v402_v54 = vrot.slane %v2956_v47, 7 }
  0x2a   : > { %515 = vmatpush.msra.mxu0 %v2283_v4  ;;  %559 = vmatpush.msra.mxu1 %v2284_v5  ;;  %v2322_v49 = vld [vmem:[%s4845_s1 + $0x238] sm:$0xff]  ;;  %v2319_v50 = vld [vmem:[%s4845_s1 + $0x220] sm:$0xff]  ;;  %v2320_v51 = vld [vmem:[%s4845_s1 + $0x228] sm:$0xff]  ;;  %v432_v5 = vsel %vm425_vm1, %v417_v53, %v418_v2 }
  0x2b   : > { %603 = vmatpush.msra.mxu2 %v435_v6  ;;  %647 = vmatpush.msra.mxu3 %v436_v7  ;;  %v411_v46 = vsel %vm406_vm0, %v400_v33, %v401_v43  ;;  %v2559_v57 = vld [vmem:[%s2771_s30 + $0x18] sm:$0xff]   ;;  %v2317_v58 = vld [vmem:[%s4845_s1 + $0x210] sm:$0xff]  ;;  %v410_v62 = vsel %vm406_vm0, %v401_v43, %v402_v54  ;;  %v2315_v0 = vld [vmem:[%s4845_s1 + $0x200] sm:$0xff] }
  0x2c   : > { %516 = vmatmul.f32.vlgmr.msra.gmra.mxu0 %v2805_v55  ;;  %560 = vmatmul.f32.vlgmr.msra.gmra.mxu1 %v2805_v55  ;;  %v2318_v60 = vld [vmem:[%s4845_s1 + $0x218] sm:$0xff]  ;;  %v2555_v63 = vunpack.c.l.bf16 %v2559_v57  ;;  %v2316_v1 = vld [vmem:[%s4845_s1 + $0x208] sm:$0xff]  ;;  %v3002_v7 = vunpack.c.h.bf16 %v2559_v57  ;;  %v2369_v34 = vld [vmem:[%s4847_s3 + $0x2b0] sm:$0xff] }
  0x2d   : > { %604 = vmatmul.f32.vlgmr.msra.gmra.mxu2 %v415_v8  ;;  %648 = vmatmul.f32.vlgmr.msra.gmra.mxu3 %v415_v8  ;;  %v419_v8 = vrot.slane %v2905_v28, 1  ;;  %v2378_v24 = vld [vmem:[%s4847_s3 + $0x2f8] sm:$0xff]  ;;  %v2399_v43 = vld [vmem:[%s4847_s3 + $0x3a0] sm:$0xff]  ;;  %v2361_v57 = vld [vmem:[%s4847_s3 + $0x270] sm:$0xff] }
  0x2e   : > { %709 = vmatpush.msrb.mxu0 %v2345_v10  ;;  %753 = vmatpush.msrb.mxu1 %v2346_v11  ;;  %v403_v4 = vrot.slane %v2555_v63, 7  ;;  %v422_v17 = vrot.slane %v2555_v63, 1  ;;  %v2406_v33 = vld [vmem:[%s4847_s3 + $0x3d8] sm:$0xff]  ;;  %v2363_v53 = vld [vmem:[%s4847_s3 + $0x280] sm:$0xff] }
  0x2f   : > { %v431_v10 = vsel %vm425_vm1, %v418_v2, %v419_v8  ;;  %v2395_v55 = vld [vmem:[%s4847_s3 + $0x380] sm:$0xff]  ;;  %v2362_v2 = vld [vmem:[%s4847_s3 + $0x278] sm:$0xff] }
  0x30   : > { %710 = vmatpush.msrb.mxu0 %v2343_v12  ;;  %754 = vmatpush.msrb.mxu1 %v2344_v13  ;;  %v409_v6 = vsel %vm406_vm0, %v402_v54, %v403_v4  ;;  %v420_v12 = vrot.slane %v2931_v38, 1  ;;  %v2398_v54 = vld [vmem:[%s4847_s3 + $0x398] sm:$0xff] }
  0x32   : > { %711 = vmatpush.msrb.mxu0 %v2341_v15  ;;  %755 = vmatpush.msrb.mxu1 %v2342_v16  ;;  %v430_v13 = vsel %vm425_vm1, %v419_v8, %v420_v12  ;;  %v421_v15 = vrot.slane %v2956_v47, 1  ;;  %v2389_v8 = vld [vmem:[%s4847_s3 + $0x350] sm:$0xff] }
  0x34   : > { %519 = vmatmul.f32.gmra.mxu0 %v2854_v9  ;;  %563 = vmatmul.f32.gmra.mxu1 %v2854_v9  ;;  %v404_v9 = vrot.slane %v3002_v7, 7  ;;  %v429_v16 = vsel %vm425_vm1, %v420_v12, %v421_v15  ;;  %v2387_v12 = vld [vmem:[%s4847_s3 + $0x340] sm:$0xff] }
  0x35   : > { %607 = vmatmul.f32.gmra.mxu2 %v414_v18  ;;  %651 = vmatmul.f32.gmra.mxu3 %v414_v18  ;;  %v428_v18 = vsel %vm425_vm1, %v421_v15, %v422_v17 }
  0x36   : > { %712 = vmatpush.msrb.mxu0 %v2339_v20  ;;  %756 = vmatpush.msrb.mxu1 %v2340_v21  ;;  %v408_v11 = vsel %vm406_vm0, %v403_v4, %v404_v9  ;;  %v407_v14 = vsel %vm406_vm0, %v404_v9, %v405_v3  ;;  %v423_v3 = vrot.slane %v3002_v7, 1  ;;  %v2377_v20 = vld [vmem:[%s4847_s3 + $0x2f0] sm:$0xff]  ;;  %v2394_v4 = vld [vmem:[%s4847_s3 + $0x378] sm:$0xff]  ;;  %v2360_v9 = vld [vmem:[%s4847_s3 + $0x268] sm:$0xff] }
  0x37   : > { %v2409_v21 = vld [vmem:[%s4847_s3 + $0x3f0] sm:$0xff]  ;;  %1076 = vmatpush.msrb.mxu2 %v2377_v20  ;;  %v2351_v20 = vld [vmem:[%s4847_s3 + $0x220] sm:$0xff] }
  0x38   : > { %713 = vmatpush.msrb.mxu0 %v2337_v22  ;;  %757 = vmatpush.msrb.mxu1 %v2338_v23  ;;  %v2375_v22 = vld [vmem:[%s4847_s3 + $0x2e0] sm:$0xff] }
  0x39   : > { %1120 = vmatpush.msrb.mxu3 %v2409_v21  ;;  %v2407_v23 = vld [vmem:[%s4847_s3 + $0x3e0] sm:$0xff]  ;;  %1077 = vmatpush.msrb.mxu2 %v2375_v22  ;;  %v2354_v22 = vld [vmem:[%s4847_s3 + $0x238] sm:$0xff] }
  0x3a   : > { %714 = vmatpush.msrb.mxu0 %v2335_v25  ;;  %758 = vmatpush.msrb.mxu1 %v2336_v26  ;;  %v2410_v25 = vld [vmem:[%s4847_s3 + $0x3f8] sm:$0xff]  ;;  %v2373_v26 = vld [vmem:[%s4847_s3 + $0x2d0] sm:$0xff]  ;;  %v2383_v21 = vld [vmem:[%s4847_s3 + $0x320] sm:$0xff] }
  0x3b   : > { %1121 = vmatpush.msrb.mxu3 %v2407_v23  ;;  %1078 = vmatpush.msrb.mxu2 %v2373_v26  ;;  %v2386_v23 = vld [vmem:[%s4847_s3 + $0x338] sm:$0xff]  ;;  %v2352_v26 = vld [vmem:[%s4847_s3 + $0x228] sm:$0xff] }
  0x3c   : > { %522 = vmatmul.f32.gmra.mxu0 %v2880_v19  ;;  %566 = vmatmul.f32.gmra.mxu1 %v2880_v19  ;;  %v427_v19 = vsel %vm425_vm1, %v422_v17, %v423_v3  ;;  %v2353_v17 = vld [vmem:[%s4847_s3 + $0x230] sm:$0xff] }
  0x3d   : > { %610 = vmatmul.f32.gmra.mxu2 %v413_v27  ;;  %654 = vmatmul.f32.gmra.mxu3 %v413_v27  ;;  %v2405_v27 = vld [vmem:[%s4847_s3 + $0x3d0] sm:$0xff] }
  0x3e   : > { %715 = vmatpush.msrb.mxu0 %v2333_v29  ;;  %759 = vmatpush.msrb.mxu1 %v2334_v30  ;;  %v2408_v29 = vld [vmem:[%s4847_s3 + $0x3e8] sm:$0xff]  ;;  %v2371_v30 = vld [vmem:[%s4847_s3 + $0x2c0] sm:$0xff] }
  0x3f   : > { %1122 = vmatpush.msrb.mxu3 %v2405_v27  ;;  %1079 = vmatpush.msrb.mxu2 %v2371_v30  ;;  %v2384_v27 = vld [vmem:[%s4847_s3 + $0x328] sm:$0xff]  ;;  %v2350_v30 = vld [vmem:[%s4847_s3 + $0x218] sm:$0xff] }
  0x40   : > { %716 = vmatpush.msrb.mxu0 %v2331_v31  ;;  %760 = vmatpush.msrb.mxu1 %v2332_v32  ;;  %v2403_v31 = vld [vmem:[%s4847_s3 + $0x3c0] sm:$0xff]  ;;  %v2374_v32 = vld [vmem:[%s4847_s3 + $0x2d8] sm:$0xff] }
  0x41   : > { %1123 = vmatpush.msrb.mxu3 %v2403_v31  ;;  %1080 = vmatpush.msrb.mxu2 %v2369_v34  ;;  %v2347_v31 = vld [vmem:[%s4847_s3 + $0x200] sm:$0xff] }
  0x42   : > { %717 = vmatpush.msrb.mxu0 %v2329_v35  ;;  %761 = vmatpush.msrb.mxu1 %v2330_v36  ;;  %v2401_v35 = vld [vmem:[%s4847_s3 + $0x3b0] sm:$0xff]  ;;  %v2372_v36 = vld [vmem:[%s4847_s3 + $0x2c8] sm:$0xff] }
  0x43   : > { %1124 = vmatpush.msrb.mxu3 %v2401_v35 }
  0x44   : > { %525 = vmatmul.f32.gmra.mxu0 %v2905_v28  ;;  %569 = vmatmul.f32.gmra.mxu1 %v2905_v28  ;;  %v2376_v28 = vld [vmem:[%s4847_s3 + $0x2e8] sm:$0xff] }
  0x45   : > { %613 = vmatmul.f32.gmra.mxu2 %v412_v37  ;;  %657 = vmatmul.f32.gmra.mxu3 %v412_v37  ;;  %v2404_v37 = vld [vmem:[%s4847_s3 + $0x3c8] sm:$0xff] }
  0x46   : > { %718 = vmatpush.msrb.mxu0 %v2327_v39  ;;  %762 = vmatpush.msrb.mxu1 %v2328_v40 }
  0x47   : > { %1125 = vmatpush.msrb.mxu3 %v2399_v43  ;;  %v1009_v43 = vld [vmem:[%s4847_s3 + $0x1f0] sm:$0xff] }
  0x48   : > { %719 = vmatpush.msrb.mxu0 %v2325_v41  ;;  %763 = vmatpush.msrb.mxu1 %v2326_v42  ;;  %v2367_v42 = vld [vmem:[%s4847_s3 + $0x2a0] sm:$0xff] }
  0x49   : > { %1081 = vmatpush.msrb.mxu2 %v2367_v42  ;;  %v977_v42 = vld [vmem:[%s4847_s3 + $0xf0] sm:$0xff] }
  0x4a   : > { %720 = vmatpush.msrb.mxu0 %v2323_v44  ;;  %764 = vmatpush.msrb.mxu1 %v2324_v45  ;;  %v2402_v44 = vld [vmem:[%s4847_s3 + $0x3b8] sm:$0xff]  ;;  %v2365_v45 = vld [vmem:[%s4847_s3 + $0x290] sm:$0xff] }
  0x4b   : > { %1082 = vmatpush.msrb.mxu2 %v2365_v45  ;;  %v978_v45 = vld [vmem:[%s4847_s3 + $0xf8] sm:$0xff] }
  0x4c   : > { %528 = vmatmul.f32.gmra.mxu0 %v2931_v38  ;;  %572 = vmatmul.f32.gmra.mxu1 %v2931_v38  ;;  %v424_v38 = vrot.slane %v2807_v56, 1 }
  0x4d   : > { %616 = vmatmul.f32.gmra.mxu2 %v411_v46  ;;  %660 = vmatmul.f32.gmra.mxu3 %v411_v46  ;;  %v2397_v46 = vld [vmem:[%s4847_s3 + $0x390] sm:$0xff] }
  0x4e   : > { %721 = vmatpush.msrb.mxu0 %v2321_v48  ;;  %765 = vmatpush.msrb.mxu1 %v2322_v49  ;;  %v426_v41 = vsel %vm425_vm1, %v423_v3, %v424_v38  ;;  %v434_v49 = vsel %vm425_vm1, %v424_v38, %v416_v52  ;;  %v2366_v52 = vld [vmem:[%s4847_s3 + $0x298] sm:$0xff]  ;;  %v2356_v3 = vld [vmem:[%s4847_s3 + $0x248] sm:$0xff] }
  0x4f   : > { %1126 = vmatpush.msrb.mxu3 %v2397_v46  ;;  %1083 = vmatpush.msrb.mxu2 %v2363_v53  ;;  %v1010_v46 = vld [vmem:[%s4847_s3 + $0x1f8] sm:$0xff] }
  0x50   : > { %722 = vmatpush.msrb.mxu0 %v2319_v50  ;;  %766 = vmatpush.msrb.mxu1 %v2320_v51  ;;  %v2368_v50 = vld [vmem:[%s4847_s3 + $0x2a8] sm:$0xff] }
  0x51   : > { %v2400_v51 = vld [vmem:[%s4847_s3 + $0x3a8] sm:$0xff]  ;;  %1127 = vmatpush.msrb.mxu3 %v2395_v55  ;;  %1084 = vmatpush.msrb.mxu2 %v2361_v57  ;;  %v973_v55 = vld [vmem:[%s4847_s3 + $0xd0] sm:$0xff] }
  0x52   : > { %723 = vmatpush.msrb.mxu0 %v2317_v58  ;;  %767 = vmatpush.msrb.mxu1 %v2318_v60  ;;  %v2393_v58 = vld [vmem:[%s4847_s3 + $0x370] sm:$0xff]  ;;  %v1008_v57 = vld [vmem:[%s4847_s3 + $0x1e8] sm:$0xff] }
  0x53   : > { %1128 = vmatpush.msrb.mxu3 %v2393_v58  ;;  %v971_v58 = vld [vmem:[%s4847_s3 + $0xc0] sm:$0xff] }
  0x54   : > { %531 = vmatmul.f32.gmra.mxu0 %v2956_v47  ;;  %575 = vmatmul.f32.gmra.mxu1 %v2956_v47 }
  0x55   : > { %619 = vmatmul.f32.gmra.mxu2 %v410_v62  ;;  %663 = vmatmul.f32.gmra.mxu3 %v410_v62  ;;  %v2364_v62 = vld [vmem:[%s4847_s3 + $0x288] sm:$0xff] }
  0x56   : > { %724 = vmatpush.msrb.mxu0 %v2315_v0  ;;  %768 = vmatpush.msrb.mxu1 %v2316_v1  ;;  %v2359_v0 = vld [vmem:[%s4847_s3 + $0x260] sm:$0xff] }
  0x57   : > { %v2391_v1 = vld [vmem:[%s4847_s3 + $0x360] sm:$0xff]  ;;  %1085 = vmatpush.msrb.mxu2 %v2359_v0 }
  0x58   : > { %1164 = vmatpush.msra.mxu0 %v2378_v24  ;;  %1208 = vmatpush.msra.mxu1 %v2410_v25 }
  0x59   : > { %1129 = vmatpush.msrb.mxu3 %v2391_v1  ;;  %v815_v1 = vld [vmem:[%s4846_s2] sm:$0x3] }
  0x5a   : > { %1165 = vmatpush.msra.mxu0 %v2376_v28  ;;  %1209 = vmatpush.msra.mxu1 %v2408_v29  ;;  %v2349_v28 = vld [vmem:[%s4847_s3 + $0x210] sm:$0xff] }
  0x5b   : > { %1130 = vmatpush.msrb.mxu3 %v2389_v8  ;;  %v2381_v29 = vld [vmem:[%s4847_s3 + $0x310] sm:$0xff] }
  0x5c   : > { %534 = vmatmul.f32.gmra.mxu0 %v2555_v63  ;;  %578 = vmatmul.f32.gmra.mxu1 %v2555_v63  ;;  %v2396_v63 = vld [vmem:[%s4847_s3 + $0x388] sm:$0xff]  ;;  %v1001_v8 = vld [vmem:[%s4847_s3 + $0x1b0] sm:$0xff] }
  0x5d   : > { %622 = vmatmul.f32.gmra.mxu2 %v409_v6  ;;  %666 = vmatmul.f32.gmra.mxu3 %v409_v6 }
  0x5e   : > { %1166 = vmatpush.msra.mxu0 %v2374_v32  ;;  %1210 = vmatpush.msra.mxu1 %v2406_v33  ;;  %v2379_v32 = vld [vmem:[%s4847_s3 + $0x300] sm:$0xff]  ;;  %v2382_v33 = vld [vmem:[%s4847_s3 + $0x318] sm:$0xff] }
  0x5f   : > { %1131 = vmatpush.msrb.mxu3 %v2387_v12 }
  0x60   : > { %1167 = vmatpush.msra.mxu0 %v2372_v36  ;;  %1211 = vmatpush.msra.mxu1 %v2404_v37  ;;  %v2348_v36 = vld [vmem:[%s4847_s3 + $0x208] sm:$0xff] }
  0x61   : > { %v2380_v37 = vld [vmem:[%s4847_s3 + $0x308] sm:$0xff] }
  0x62   : > { %1212 = vmatpush.msra.mxu1 %v2402_v44  ;;  %v1007_v44 = vld [vmem:[%s4847_s3 + $0x1e0] sm:$0xff] }
  0x64   : > { %537 = vmatmul.f32.gmra.mxu0 %v3002_v7  ;;  %581 = vmatmul.f32.gmra.mxu1 %v3002_v7  ;;  %v2357_v7 = vld [vmem:[%s4847_s3 + $0x250] sm:$0xff] }
  0x65   : > { %625 = vmatmul.f32.gmra.mxu2 %v408_v11  ;;  %669 = vmatmul.f32.gmra.mxu3 %v408_v11  ;;  %v2355_v11 = vld [vmem:[%s4847_s3 + $0x240] sm:$0xff] }
  0x66   : > { %1213 = vmatpush.msra.mxu1 %v2400_v51  ;;  %1086 = vmatpush.msrb.mxu2 %v2357_v7  ;;  %v969_v7 = vld [vmem:[%s4847_s3 + $0xb0] sm:$0xff] }
  0x68   : > { %1214 = vmatpush.msra.mxu1 %v2398_v54  ;;  %1087 = vmatpush.msrb.mxu2 %v2355_v11  ;;  %v976_v54 = vld [vmem:[%s4847_s3 + $0xe8] sm:$0xff] }
  0x6a   : > { %1215 = vmatpush.msra.mxu1 %v2396_v63  ;;  %1088 = vmatpush.msrb.mxu2 %v2353_v17  ;;  %v3323_v17 = vperm.slane %v815_v1, 0 }
  0x6c   : > { %540 = vmatmul.f32.gmra.mxu0 %v2807_v56  ;;  %584 = vmatmul.f32.gmra.mxu1 %v2807_v56  ;;  %v2370_v56 = vld [vmem:[%s4847_s3 + $0x2b8] sm:$0xff] }
  0x6d   : > { %628 = vmatmul.f32.gmra.mxu2 %v407_v14  ;;  %672 = vmatmul.f32.gmra.mxu3 %v407_v14  ;;  %v2390_v14 = vld [vmem:[%s4847_s3 + $0x358] sm:$0xff] }
  0x6e   : > { %1168 = vmatpush.msra.mxu0 %v2370_v56  ;;  %1216 = vmatpush.msra.mxu1 %v2394_v4  ;;  %v975_v56 = vld [vmem:[%s4847_s3 + $0xe0] sm:$0xff]  ;;  %v1006_v4 = vld [vmem:[%s4847_s3 + $0x1d8] sm:$0xff] }
  0x6f   : > { %1089 = vmatpush.msrb.mxu2 %v2351_v20 }
  0x70   : > { %1169 = vmatpush.msra.mxu0 %v2368_v50 }
  0x71   : > { %1090 = vmatpush.msrb.mxu2 %v2349_v28 }
  0x72   : > { %1170 = vmatpush.msra.mxu0 %v2366_v52  ;;  %v1005_v52 = vld [vmem:[%s4847_s3 + $0x1d0] sm:$0xff] }
  0x73   : > { %1091 = vmatpush.msrb.mxu2 %v2347_v31 }
  0x74   : > { %725 = vmatmul.f32.vlgmr.msrb.gmra.mxu0 %v433_v61  ;;  %769 = vmatmul.f32.vlgmr.msrb.gmra.mxu1 %v433_v61 }
  0x75   : > { %1171 = vmatpush.msra.mxu0 %v2364_v62  ;;  %1252 = vmatpush.msra.mxu2 %v977_v42  ;;  %v1003_v62 = vld [vmem:[%s4847_s3 + $0x1c0] sm:$0xff] }
  0x77   : > { %1172 = vmatpush.msra.mxu0 %v2362_v2  ;;  %1253 = vmatpush.msra.mxu2 %v975_v56  ;;  %v974_v2 = vld [vmem:[%s4847_s3 + $0xd8] sm:$0xff]  ;;  %v965_v56 = vld [vmem:[%s4847_s3 + $0x90] sm:$0xff] }
  0x79   : > { %1173 = vmatpush.msra.mxu0 %v2360_v9  ;;  %1254 = vmatpush.msra.mxu2 %v973_v55  ;;  %v972_v9 = vld [vmem:[%s4847_s3 + $0xc8] sm:$0xff] }
  0x7b   : > { %1255 = vmatpush.msra.mxu2 %v971_v58  ;;  %v966_v58 = vld [vmem:[%s4847_s3 + $0x98] sm:$0xff] }
  0x7c   : > { %728 = vmatmul.f32.gmra.mxu0 %v432_v5  ;;  %772 = vmatmul.f32.gmra.mxu1 %v432_v5 }
  0x7d   : > { %1256 = vmatpush.msra.mxu2 %v969_v7  ;;  %v993_v7 = vld [vmem:[%s4847_s3 + $0x170] sm:$0xff] }
  0x84   : > { %731 = vmatmul.f32.gmra.mxu0 %v431_v10  ;;  %775 = vmatmul.f32.gmra.mxu1 %v431_v10  ;;  %v2392_v10 = vld [vmem:[%s4847_s3 + $0x368] sm:$0xff] }
  0x85   : > { %1217 = vmatpush.msra.mxu1 %v2392_v10  ;;  %v1004_v10 = vld [vmem:[%s4847_s3 + $0x1c8] sm:$0xff] }
  0x87   : > { %1218 = vmatpush.msra.mxu1 %v2390_v14 }
  0x8c   : > { %734 = vmatmul.f32.gmra.mxu0 %v430_v13  ;;  %778 = vmatmul.f32.gmra.mxu1 %v430_v13  ;;  %v2358_v13 = vld [vmem:[%s4847_s3 + $0x258] sm:$0xff] }
  0x8d   : > { %1174 = vmatpush.msra.mxu0 %v2358_v13 }
  0x8f   : > { %1175 = vmatpush.msra.mxu0 %v2356_v3 }
  0x91   : > { %1176 = vmatpush.msra.mxu0 %v2354_v22  ;;  %v2580_v22 = vmov 1.0  }
  0x93   : > { %1177 = vmatpush.msra.mxu0 %v2352_v26 }
  0x94   : > { %737 = vmatmul.f32.gmra.mxu0 %v429_v16  ;;  %781 = vmatmul.f32.gmra.mxu1 %v429_v16 }
  0x95   : > { %1178 = vmatpush.msra.mxu0 %v2350_v30 }
  0x97   : > { %1179 = vmatpush.msra.mxu0 %v2348_v36 }
  0x99   : > { %1340 = vmatpush.msrb.mxu0 %v978_v45  ;;  %v968_v45 = vld [vmem:[%s4847_s3 + $0xa8] sm:$0xff] }
  0x9b   : > { %1341 = vmatpush.msrb.mxu0 %v976_v54  ;;  %v963_v54 = vld [vmem:[%s4847_s3 + $0x80] sm:$0xff] }
  0x9c   : > { %740 = vmatmul.f32.gmra.mxu0 %v428_v18  ;;  %784 = vmatmul.f32.gmra.mxu1 %v428_v18  ;;  %v2385_v18 = vld [vmem:[%s4847_s3 + $0x330] sm:$0xff] }
  0x9d   : > { %1132 = vmatpush.msrb.mxu3 %v2385_v18  ;;  %1342 = vmatpush.msrb.mxu0 %v974_v2  ;;  %v3325_v18 = vperm.slane %v815_v1, 1  ;;  %v998_v2 = vld [vmem:[%s4847_s3 + $0x198] sm:$0xff] }
  0x9f   : > { %1133 = vmatpush.msrb.mxu3 %v2383_v21  ;;  %1343 = vmatpush.msrb.mxu0 %v972_v9 }
  0xa1   : > { %1134 = vmatpush.msrb.mxu3 %v2381_v29 }
  0xa3   : > { %1135 = vmatpush.msrb.mxu3 %v2379_v32  ;;  %v967_v32 = vld [vmem:[%s4847_s3 + $0xa0] sm:$0xff] }
  0xa4   : > { %743 = vmatmul.f32.gmra.mxu0 %v427_v19  ;;  %787 = vmatmul.f32.gmra.mxu1 %v427_v19  ;;  %v2388_v19 = vld [vmem:[%s4847_s3 + $0x348] sm:$0xff] }
  0xa5   : > { %1219 = vmatpush.msra.mxu1 %v2388_v19  ;;  %1296 = vmatpush.msra.mxu3 %v1009_v43 }
  0xa6   : > { %1257 = vmatpush.msra.mxu2 %v967_v32 }
  0xa7   : > { %1220 = vmatpush.msra.mxu1 %v2386_v23  ;;  %1297 = vmatpush.msra.mxu3 %v1007_v44  ;;  %v3331_v23 = vsel %vm298_vm2, 0.0, %v2580_v22  ;;  %v997_v44 = vld [vmem:[%s4847_s3 + $0x190] sm:$0xff] }
  0xa8   : > { %1258 = vmatpush.msra.mxu2 %v965_v56  ;;  %v991_v56 = vld [vmem:[%s4847_s3 + $0x160] sm:$0xff] }
  0xa9   : > { %v3084_v39 = vpop.f32.mrf.mxu0  ;;  %v3086_v40 = vpop.f32.mrf.mxu1  ;;  %1221 = vmatpush.msra.mxu1 %v2384_v27  ;;  %1298 = vmatpush.msra.mxu3 %v1005_v52 }
  0xaa   : > { %1259 = vmatpush.msra.mxu2 %v963_v54  ;;  %v989_v54 = vld [vmem:[%s4847_s3 + $0x150] sm:$0xff] }
  0xab   : > { %1222 = vmatpush.msra.mxu1 %v2382_v33  ;;  %1299 = vmatpush.msra.mxu3 %v1003_v62  ;;  %v999_v33 = vld [vmem:[%s4847_s3 + $0x1a0] sm:$0xff] }
  0xac   : > { %746 = vmatmul.f32.gmra.mxu0 %v426_v41  ;;  %790 = vmatmul.f32.gmra.mxu1 %v426_v41 }
  0xad   : > { %1223 = vmatpush.msra.mxu1 %v2380_v37  ;;  %1300 = vmatpush.msra.mxu3 %v1001_v8 }
  0xaf   : > { %1384 = vmatpush.msrb.mxu1 %v1010_v46  ;;  %1301 = vmatpush.msra.mxu3 %v999_v33  ;;  %v1000_v46 = vld [vmem:[%s4847_s3 + $0x1a8] sm:$0xff] }
  0xb0   : > { %v605_v38 = vpop.f32.mrf.mxu2  ;;  %v649_v41 = vpop.f32.mrf.mxu3 }
  0xb1   : > { %v3108_v47 = vpop.f32.mrf.mxu0  ;;  %v3110_v48 = vpop.f32.mrf.mxu1  ;;  %1385 = vmatpush.msrb.mxu1 %v1008_v57  ;;  %v606_v11 = vadd.f32 %v605_v38, %v3084_v39  ;;  %v650_v12 = vadd.f32 %v649_v41, %v3086_v40  ;;  %1302 = vmatpush.msra.mxu3 %v997_v44  ;;  %v995_v57 = vld [vmem:[%s4847_s3 + $0x180] sm:$0xff] }
  0xb3   : > { %1386 = vmatpush.msrb.mxu1 %v1006_v4  ;;  %1303 = vmatpush.msra.mxu3 %v995_v57  ;;  %v961_v4 = vld [vmem:[%s4847_s3 + $0x70] sm:$0xff] }
  0xb4   : > { %749 = vmatmul.f32.gmra.mxu0 %v434_v49  ;;  %793 = vmatmul.f32.gmra.mxu1 %v434_v49 }
  0xb5   : > { %1387 = vmatpush.msrb.mxu1 %v1004_v10  ;;  %1260 = vmatpush.msra.mxu2 %v961_v4 }
  0xb6   : > { %1304 = vmatpush.msra.mxu3 %v993_v7 }
  0xb8   : > { %v608_v51 = vpop.f32.mrf.mxu2  ;;  %v652_v53 = vpop.f32.mrf.mxu3  ;;  %1305 = vmatpush.msra.mxu3 %v991_v56  ;;  %v953_v56 = vld [vmem:[%s4847_s3 + $0x30] sm:$0xff] }
  0xb9   : > { %v3140_v60 = vpop.f32.mrf.mxu0  ;;  %v3142_v61 = vpop.f32.mrf.mxu1  ;;  %v609_v28 = vadd.f32 %v608_v51, %v3108_v47  ;;  %v653_v29 = vadd.f32 %v652_v53, %v3110_v48  ;;  %v970_v47 = vld [vmem:[%s4847_s3 + $0xb8] sm:$0xff] }
  0xba   : > { %v1002_v48 = vld [vmem:[%s4847_s3 + $0x1b8] sm:$0xff]  ;;  %1344 = vmatpush.msrb.mxu0 %v970_v47  ;;  %1306 = vmatpush.msra.mxu3 %v989_v54 }
  0xbb   : > { %1388 = vmatpush.msrb.mxu1 %v1002_v48 }
  0xbc   : > { %1345 = vmatpush.msrb.mxu0 %v968_v45 }
  0xbd   : > { %1389 = vmatpush.msrb.mxu1 %v1000_v46 }
  0xbe   : > { %1346 = vmatpush.msrb.mxu0 %v966_v58 }
  0xbf   : > { %1390 = vmatpush.msrb.mxu1 %v998_v2 }
  0xc0   : > { %v611_v13 = vpop.f32.mrf.mxu2  ;;  %v655_v14 = vpop.f32.mrf.mxu3 }
  0xc1   : > { %v3162_v5 = vpop.f32.mrf.mxu0  ;;  %v3164_v6 = vpop.f32.mrf.mxu1  ;;  %v612_v62 = vadd.f32 %v611_v13, %v3140_v60  ;;  %v656_v1 = vadd.f32 %v655_v14, %v3142_v61  ;;  %v996_v13 = vld [vmem:[%s4847_s3 + $0x188] sm:$0xff] }
  0xc2   : > { %1391 = vmatpush.msrb.mxu1 %v996_v13  ;;  %v960_v13 = vld [vmem:[%s4847_s3 + $0x68] sm:$0xff] }
  0xc8   : > { %v3353_v38 = vpop.f32.mrf.mxu2  ;;  %v3355_v41 = vpop.f32.mrf.mxu3 }
  0xc9   : > { %v3190_v15 = vpop.f32.mrf.mxu0  ;;  %v3192_v16 = vpop.f32.mrf.mxu1  ;;  %v615_v48 = vadd.f32 %v3353_v38, %v3162_v5  ;;  %v962_v5 = vld [vmem:[%s4847_s3 + $0x78] sm:$0xff] }
  0xd0   : > { %v661_v32 = vpop.f32.mrf.mxu3 }
  0xd1   : > { %v3218_v24 = vpop.f32.mrf.mxu0  ;;  %v3220_v25 = vpop.f32.mrf.mxu1 }
  0xd9   : > { %v3246_v34 = vpop.f32.mrf.mxu0  ;;  %v3248_v35 = vpop.f32.mrf.mxu1 }
  0xe1   : > { %v3274_v49 = vpop.f32.mrf.mxu0  ;;  %v3276_v50 = vpop.f32.mrf.mxu1 }
  0xe9   : > { %v3296_v63 = vpop.f32.mrf.mxu0  ;;  %v3298_v0 = vpop.f32.mrf.mxu1 }
  0xf1   : > { %v726_v3 = vpop.f32.mrf.mxu0  ;;  %v770_v19 = vpop.f32.mrf.mxu1 }
  0xf2   : > { %v797_v20 = vadd.f32 %v726_v3, %v606_v11  ;;  %v798_v21 = vadd.f32 %v770_v19, %v650_v12  ;;  %v964_v12 = vld [vmem:[%s4847_s3 + $0x88] sm:$0xff] }
  0xf3   : > { %1347 = vmatpush.msrb.mxu0 %v964_v12  ;;  %v662_v12 = vadd.f32 %v661_v32, %v3192_v16  ;;  %v987_v16 = vld [vmem:[%s4847_s3 + $0x140] sm:$0xff] }
  0xf4   : > { %v821_v39 = vadd.f32 %v3323_v17, %v797_v20  ;;  %v822_v40 = vadd.f32 %v3325_v18, %v798_v21  ;;  %1307 = vmatpush.msra.mxu3 %v987_v16 }
  0xf5   : > { %1348 = vmatpush.msrb.mxu0 %v962_v5 }
  0xf6   : > { %v839_v26 = vmax.f32 %v821_v39, 0.0  ;;  %v840_v27 = vmax.f32 %v822_v40, 0.0 }
  0xf7   : > { %1349 = vmatpush.msrb.mxu0 %v960_v13 }
  0xf8   : > { %v3336_v30 = vmul.f32 %v839_v26, %v3331_v23  ;;  %v3339_v31 = vmul.f32 %v840_v27, %v3331_v23 }
  0xf9   : > { %v729_v36 = vpop.f32.mrf.mxu0  ;;  %v773_v37 = vpop.f32.mrf.mxu1 }
  0xfa   : > { %v799_v42 = vadd.f32 %v729_v36, %v609_v28  ;;  %v800_v43 = vadd.f32 %v773_v37, %v653_v29  ;;  %1092 = vmatmul.f32.vlgmr.msrb.gmra.mxu2 %v3336_v30  ;;  %1136 = vmatmul.f32.vlgmr.msrb.gmra.mxu3 %v3339_v31  ;;  %v875_v60 = vrot.slane %v3336_v30, 7  ;;  %v876_v14 = vrot.slane %v3339_v31, 7  ;;  %v617_v29 = vpop.f32.mrf.mxu2 }
  0xfb   : > { %1180 = vmatmul.f32.vlgmr.msra.gmra.mxu0 %v3336_v30  ;;  %1224 = vmatmul.f32.vlgmr.msra.gmra.mxu1 %v3339_v31  ;;  %v911_v3 = vrot.slane %v3336_v30, 1  ;;  %v912_v19 = vrot.slane %v3339_v31, 1  ;;  %v2459_v30 = vld [vmem:[%s4847_s3 + $0x580] sm:$0xff]  ;;  %v2430_v31 = vld [vmem:[%s4847_s3 + $0x498] sm:$0xff] }
  0xfc   : > { %v823_v51 = vadd.f32 %v3323_v17, %v799_v42  ;;  %v824_v53 = vadd.f32 %v3325_v18, %v800_v43  ;;  %v659_v42 = vadd.f32 %v3355_v41, %v3164_v6  ;;  %v959_v43 = vld [vmem:[%s4847_s3 + $0x60] sm:$0xff]  ;;  %v994_v6 = vld [vmem:[%s4847_s3 + $0x178] sm:$0xff] }
  0xfd   : > { %1261 = vmatpush.msra.mxu2 %v959_v43  ;;  %1392 = vmatpush.msrb.mxu1 %v994_v6 }
  0xfe   : > { %v3375_v55 = vmax.f32 %v823_v51, 0.0  ;;  %v3377_v52 = vmax.f32 %v824_v53, 0.0 }
 0x100   : > { %v877_v61 = vrot.slane %v3375_v55, 7  ;;  %v878_v8 = vrot.slane %v3377_v52, 7  ;;  %v913_v9 = vrot.slane %v3375_v55, 1  ;;  %v914_v20 = vrot.slane %v3377_v52, 1 }
 0x101   : > { %v732_v10 = vpop.f32.mrf.mxu0  ;;  %v776_v11 = vpop.f32.mrf.mxu1 }
 0x102   : > { %v801_v21 = vadd.f32 %v732_v10, %v612_v62  ;;  %v802_v39 = vadd.f32 %v776_v11, %v656_v1  ;;  %1095 = vmatmul.f32.gmra.mxu2 %v3375_v55  ;;  %1139 = vmatmul.f32.gmra.mxu3 %v3377_v52  ;;  %v3419_v40 = vsel %vm406_vm0, %v875_v60, %v877_v61  ;;  %v620_v7 = vpop.f32.mrf.mxu2 }
 0x103   : > { %1183 = vmatmul.f32.gmra.mxu0 %v3375_v55  ;;  %1227 = vmatmul.f32.gmra.mxu1 %v3377_v52  ;;  %v3427_v26 = vsel %vm406_vm0, %v876_v14, %v878_v8  ;;  %v3433_v27 = vsel %vm425_vm1, %v911_v3, %v913_v9  ;;  %v3439_v28 = vsel %vm425_vm1, %v912_v19, %v914_v20  ;;  %v957_v52 = vld [vmem:[%s4847_s3 + $0x50] sm:$0xff] }
 0x104   : > { %v825_v33 = vadd.f32 %v3323_v17, %v801_v21  ;;  %v826_v36 = vadd.f32 %v3325_v18, %v802_v39  ;;  %1262 = vmatpush.msra.mxu2 %v957_v52  ;;  %v618_v11 = vadd.f32 %v617_v29, %v3190_v15  ;;  %v955_v15 = vld [vmem:[%s4847_s3 + $0x40] sm:$0xff]  ;;  %v621_v52 = vadd.f32 %v620_v7, %v3218_v24 }
 0x105   : > { %v983_v7 = vld [vmem:[%s4847_s3 + $0x120] sm:$0xff] }
 0x106   : > { %v3443_v37 = vmax.f32 %v825_v33, 0.0  ;;  %v3445_v47 = vmax.f32 %v826_v36, 0.0  ;;  %1263 = vmatpush.msra.mxu2 %v955_v15 }
 0x108   : > { %v879_v44 = vrot.slane %v3443_v37, 7  ;;  %v880_v45 = vrot.slane %v3445_v47, 7  ;;  %v915_v38 = vrot.slane %v3443_v37, 1  ;;  %v916_v41 = vrot.slane %v3445_v47, 1  ;;  %1264 = vmatpush.msra.mxu2 %v953_v56 }
 0x109   : > { %v735_v46 = vpop.f32.mrf.mxu0  ;;  %v779_v51 = vpop.f32.mrf.mxu1 }
 0x10a   : > { %v803_v53 = vadd.f32 %v735_v46, %v615_v48  ;;  %v804_v55 = vadd.f32 %v779_v51, %v659_v42  ;;  %1098 = vmatmul.f32.gmra.mxu2 %v3443_v37  ;;  %1142 = vmatmul.f32.gmra.mxu3 %v3445_v47  ;;  %v3477_v57 = vsel %vm406_vm0, %v877_v61, %v879_v44  ;;  %v664_v61 = vpop.f32.mrf.mxu3  ;;  %v958_v48 = vld [vmem:[%s4847_s3 + $0x58] sm:$0xff]  ;;  %v985_v46 = vld [vmem:[%s4847_s3 + $0x130] sm:$0xff]  ;;  %v623_v54 = vpop.f32.mrf.mxu2 }
 0x10b   : > { %1186 = vmatmul.f32.gmra.mxu0 %v3443_v37  ;;  %1230 = vmatmul.f32.gmra.mxu1 %v3445_v47  ;;  %v3483_v58 = vsel %vm406_vm0, %v878_v8, %v880_v45  ;;  %v3487_v62 = vsel %vm425_vm1, %v913_v9, %v915_v38  ;;  %v3491_v1 = vsel %vm425_vm1, %v914_v20, %v916_v41  ;;  %v284_v9 = vadd.s32 32, %v2815_v59  ;;  %v992_v20 = vld [vmem:[%s4847_s3 + $0x168] sm:$0xff]  ;;  %v990_v42 = vld [vmem:[%s4847_s3 + $0x158] sm:$0xff] }
 0x10c   : > { %v827_v2 = vadd.f32 %v3323_v17, %v803_v53  ;;  %v828_v4 = vadd.f32 %v3325_v18, %v804_v55  ;;  %1393 = vmatpush.msrb.mxu1 %v992_v20  ;;  %1350 = vmatpush.msrb.mxu0 %v958_v48 }
 0x10d   : > { %vm320_vm3 = vcmp.eq.s32.totalorder %v284_v9, 33  ;;  %1308 = vmatpush.msra.mxu3 %v985_v46  ;;  %v956_v9 = vld [vmem:[%s4847_s3 + $0x48] sm:$0xff] }
 0x10e   : > { %v3495_v8 = vmax.f32 %v827_v2, 0.0  ;;  %v3497_v10 = vmax.f32 %v828_v4, 0.0  ;;  %1394 = vmatpush.msrb.mxu1 %v990_v42  ;;  %1351 = vmatpush.msrb.mxu0 %v956_v9 }
 0x10f   : > { %1309 = vmatpush.msra.mxu3 %v983_v7 }
 0x110   : > { %v881_v21 = vrot.slane %v3495_v8, 7  ;;  %v882_v39 = vrot.slane %v3497_v10, 7  ;;  %v917_v33 = vrot.slane %v3495_v8, 1  ;;  %v918_v29 = vrot.slane %v3497_v10, 1 }
 0x111   : > { %v738_v36 = vpop.f32.mrf.mxu0  ;;  %v782_v37 = vpop.f32.mrf.mxu1 }
 0x112   : > { %v805_v32 = vadd.f32 %v738_v36, %v618_v11  ;;  %v806_v47 = vadd.f32 %v782_v37, %v662_v12  ;;  %1101 = vmatmul.f32.gmra.mxu2 %v3495_v8  ;;  %1145 = vmatmul.f32.gmra.mxu3 %v3497_v10  ;;  %v3530_v43 = vsel %vm406_vm0, %v879_v44, %v881_v21  ;;  %v667_v2 = vpop.f32.mrf.mxu3  ;;  %v988_v12 = vld [vmem:[%s4847_s3 + $0x148] sm:$0xff]  ;;  %v954_v36 = vld [vmem:[%s4847_s3 + $0x38] sm:$0xff] }
 0x113   : > { %1189 = vmatmul.f32.gmra.mxu0 %v3495_v8  ;;  %1233 = vmatmul.f32.gmra.mxu1 %v3497_v10  ;;  %v3544_v51 = vsel %vm406_vm0, %v880_v45, %v882_v39  ;;  %v3550_v44 = vsel %vm425_vm1, %v915_v38, %v917_v33  ;;  %v3556_v5 = vsel %vm425_vm1, %v916_v41, %v918_v29  ;;  %v3562_v45 = vsel %vm320_vm3, 0.0, %v2580_v22  ;;  %v986_v37 = vld [vmem:[%s4847_s3 + $0x138] sm:$0xff] }
 0x114   : > { %v829_v6 = vadd.f32 %v3323_v17, %v805_v32  ;;  %v830_v53 = vadd.f32 %v3325_v18, %v806_v47  ;;  %v665_v41 = vadd.f32 %v664_v61, %v3220_v25  ;;  %1395 = vmatpush.msrb.mxu1 %v988_v12  ;;  %v951_v25 = vld [vmem:[%s4847_s3 + $0x20] sm:$0xff]  ;;  %v949_v32 = vld [vmem:[%s4847_s3 + $0x10] sm:$0xff]  ;;  %1352 = vmatpush.msrb.mxu0 %v954_v36  ;;  %v286_v12 = vadd.s32 48, %v2815_v59  ;;  %v950_v8 = vld [vmem:[%s4847_s3 + $0x18] sm:$0xff]  ;;  %v626_v36 = vpop.f32.mrf.mxu2 }
 0x115   : > { %v981_v47 = vld [vmem:[%s4847_s3 + $0x110] sm:$0xff]  ;;  %1265 = vmatpush.msra.mxu2 %v951_v25  ;;  %v982_v10 = vld [vmem:[%s4847_s3 + $0x118] sm:$0xff] }
 0x116   : > { %v847_v38 = vmax.f32 %v829_v6, 0.0  ;;  %v848_v55 = vmax.f32 %v830_v53, 0.0  ;;  %v952_v6 = vld [vmem:[%s4847_s3 + $0x28] sm:$0xff]  ;;  %1396 = vmatpush.msrb.mxu1 %v986_v37  ;;  %1310 = vmatpush.msra.mxu3 %v981_v47  ;;  %vm340_vm4 = vcmp.eq.s32.totalorder %v286_v12, 50  ;;  %v2473_v47 = vld [vmem:[%s4847_s3 + $0x5f0] sm:$0xff] }
 0x117   : > { %v984_v53 = vld [vmem:[%s4847_s3 + $0x128] sm:$0xff]  ;;  %1266 = vmatpush.msra.mxu2 %v949_v32  ;;  %1353 = vmatpush.msrb.mxu0 %v952_v6  ;;  %v2441_v32 = vld [vmem:[%s4847_s3 + $0x4f0] sm:$0xff] }
 0x118   : > { %v3567_v4 = vmul.f32 %v847_v38, %v3562_v45  ;;  %v3570_v11 = vmul.f32 %v848_v55, %v3562_v45  ;;  %v947_v55 = vld [vmem:[%s4847_s3] sm:$0xff]  ;;  %1397 = vmatpush.msrb.mxu1 %v984_v53 }
 0x119   : > { %v741_v13 = vpop.f32.mrf.mxu0  ;;  %v785_v24 = vpop.f32.mrf.mxu1  ;;  %1267 = vmatpush.msra.mxu2 %v947_v55  ;;  %1354 = vmatpush.msrb.mxu0 %v950_v8  ;;  %v287_v8 = vadd.s32 56, %v2815_v59 }
 0x11a   : > { %v807_v61 = vadd.f32 %v741_v13, %v621_v52  ;;  %v808_v20 = vadd.f32 %v785_v24, %v665_v41  ;;  %1104 = vmatmul.f32.gmra.mxu2 %v3567_v4  ;;  %1148 = vmatmul.f32.gmra.mxu3 %v3570_v11  ;;  %v883_v15 = vrot.slane %v3567_v4, 7  ;;  %v884_v16 = vrot.slane %v3570_v11, 7  ;;  %v979_v52 = vld [vmem:[%s4847_s3 + $0x100] sm:$0xff]  ;;  %v670_v37 = vpop.f32.mrf.mxu3 }
 0x11b   : > { %1192 = vmatmul.f32.gmra.mxu0 %v3567_v4  ;;  %1236 = vmatmul.f32.gmra.mxu1 %v3570_v11  ;;  %v919_v48 = vrot.slane %v3567_v4, 1  ;;  %v920_v42 = vrot.slane %v3570_v11, 1  ;;  %vm359_vm5 = vcmp.eq.s32.totalorder %v287_v8, 59 }
 0x11c   : > { %v831_v56 = vadd.f32 %v3323_v17, %v807_v61  ;;  %v832_v46 = vadd.f32 %v3325_v18, %v808_v20  ;;  %v3616_v38 = vsel %vm406_vm0, %v881_v21, %v883_v15  ;;  %v3628_v41 = vsel %vm406_vm0, %v882_v39, %v884_v16  ;;  %1311 = vmatpush.msra.mxu3 %v979_v52  ;;  %v2474_v52 = vld [vmem:[%s4847_s3 + $0x5f8] sm:$0xff] }
 0x11d   : > { %v3634_v21 = vsel %vm425_vm1, %v917_v33, %v919_v48  ;;  %v3640_v4 = vsel %vm425_vm1, %v918_v29, %v920_v42  ;;  %v624_v39 = vadd.f32 %v623_v54, %v3246_v34  ;;  %v668_v33 = vadd.f32 %v667_v2, %v3248_v35  ;;  %1398 = vmatpush.msrb.mxu1 %v982_v10  ;;  %v948_v34 = vld [vmem:[%s4847_s3 + $0x8] sm:$0xff] }
 0x11e   : > { %v3642_v11 = vmax.f32 %v831_v56, 0.0  ;;  %v3644_v9 = vmax.f32 %v832_v46, 0.0  ;;  %v980_v35 = vld [vmem:[%s4847_s3 + $0x108] sm:$0xff]  ;;  %v2439_v56 = vld [vmem:[%s4847_s3 + $0x4e0] sm:$0xff]  ;;  %1355 = vmatpush.msrb.mxu0 %v948_v34  ;;  %1493 = vmatpush.msrb.mxu2 %v2441_v32 }
 0x11f   : > { %1399 = vmatpush.msrb.mxu1 %v980_v35  ;;  %1537 = vmatpush.msrb.mxu3 %v2473_v47 }
 0x120   : > { %v885_v29 = vrot.slane %v3642_v11, 7  ;;  %v886_v13 = vrot.slane %v3644_v9, 7  ;;  %v921_v24 = vrot.slane %v3642_v11, 1  ;;  %v922_v25 = vrot.slane %v3644_v9, 1  ;;  %1494 = vmatpush.msrb.mxu2 %v2439_v56 }
 0x121   : > { %v744_v7 = vpop.f32.mrf.mxu0  ;;  %v788_v61 = vpop.f32.mrf.mxu1  ;;  %1625 = vmatpush.msra.mxu1 %v2474_v52  ;;  %v2467_v52 = vld [vmem:[%s4847_s3 + $0x5c0] sm:$0xff] }
 0x122   : > { %v809_v54 = vadd.f32 %v744_v7, %v624_v39  ;;  %v810_v2 = vadd.f32 %v788_v61, %v668_v33  ;;  %1107 = vmatmul.f32.gmra.mxu2 %v3642_v11  ;;  %1151 = vmatmul.f32.gmra.mxu3 %v3644_v9  ;;  %v3671_v20 = vsel %vm406_vm0, %v883_v15, %v885_v29 }
 0x123   : > { %1195 = vmatmul.f32.gmra.mxu0 %v3642_v11  ;;  %1239 = vmatmul.f32.gmra.mxu1 %v3644_v9  ;;  %v3688_v15 = vsel %vm406_vm0, %v884_v16, %v886_v13  ;;  %v3694_v46 = vsel %vm425_vm1, %v919_v48, %v921_v24  ;;  %v3700_v6 = vsel %vm425_vm1, %v920_v42, %v922_v25  ;;  %v2471_v16 = vld [vmem:[%s4847_s3 + $0x5e0] sm:$0xff]  ;;  %v2442_v48 = vld [vmem:[%s4847_s3 + $0x4f8] sm:$0xff]  ;;  %v3715_v42 = vsel %vm340_vm4, 0.0, %v2580_v22 }
 0x124   : > { %v833_v53 = vadd.f32 %v3323_v17, %v809_v54  ;;  %v834_v55 = vadd.f32 %v3325_v18, %v810_v2  ;;  %1581 = vmatpush.msra.mxu0 %v2442_v48  ;;  %1538 = vmatpush.msrb.mxu3 %v2471_v16  ;;  %v627_v33 = vadd.f32 %v626_v36, %v3274_v49  ;;  %v2469_v36 = vld [vmem:[%s4847_s3 + $0x5d0] sm:$0xff]  ;;  %v2472_v16 = vld [vmem:[%s4847_s3 + $0x5e8] sm:$0xff]  ;;  %v2435_v48 = vld [vmem:[%s4847_s3 + $0x4c0] sm:$0xff] }
 0x125   : > { %v671_v7 = vadd.f32 %v670_v37, %v3276_v50  ;;  %v2437_v50 = vld [vmem:[%s4847_s3 + $0x4d0] sm:$0xff]  ;;  %v2440_v37 = vld [vmem:[%s4847_s3 + $0x4e8] sm:$0xff]  ;;  %1626 = vmatpush.msra.mxu1 %v2472_v16 }
 0x126   : > { %v851_v10 = vmax.f32 %v833_v53, 0.0  ;;  %v852_v39 = vmax.f32 %v834_v55, 0.0  ;;  %1495 = vmatpush.msrb.mxu2 %v2437_v50  ;;  %1539 = vmatpush.msrb.mxu3 %v2469_v36 }
 0x127   : > { %1582 = vmatpush.msra.mxu0 %v2440_v37 }
 0x128   : > { %v3721_v61 = vmul.f32 %v851_v10, %v3715_v42  ;;  %v3724_v12 = vmul.f32 %v852_v39, %v3715_v42  ;;  %v629_v39 = vpop.f32.mrf.mxu2  ;;  %1496 = vmatpush.msrb.mxu2 %v2435_v48  ;;  %1540 = vmatpush.msrb.mxu3 %v2467_v52 }
 0x129   : > { %v747_v34 = vpop.f32.mrf.mxu0  ;;  %v791_v35 = vpop.f32.mrf.mxu1 }
 0x12a   : > { %v811_v54 = vadd.f32 %v747_v34, %v627_v33  ;;  %v812_v2 = vadd.f32 %v791_v35, %v671_v7  ;;  %1110 = vmatmul.f32.gmra.mxu2 %v3721_v61  ;;  %1154 = vmatmul.f32.gmra.mxu3 %v3724_v12  ;;  %v887_v32 = vrot.slane %v3721_v61, 7  ;;  %v888_v49 = vrot.slane %v3724_v12, 7  ;;  %v673_v33 = vpop.f32.mrf.mxu3 }
 0x12b   : > { %1198 = vmatmul.f32.gmra.mxu0 %v3721_v61  ;;  %1242 = vmatmul.f32.gmra.mxu1 %v3724_v12  ;;  %v923_v47 = vrot.slane %v3721_v61, 1  ;;  %v924_v56 = vrot.slane %v3724_v12, 1  ;;  %v3762_v7 = vsel %vm359_vm5, 0.0, %v2580_v22  ;;  %v2438_v61 = vld [vmem:[%s4847_s3 + $0x4d8] sm:$0xff]  ;;  %v674_v11 = vadd.f32 %v673_v33, %v3298_v0  ;;  %v2465_v0 = vld [vmem:[%s4847_s3 + $0x5b0] sm:$0xff]  ;;  %v2431_v33 = vld [vmem:[%s4847_s3 + $0x4a0] sm:$0xff] }
 0x12c   : > { %v835_v53 = vadd.f32 %v3323_v17, %v811_v54  ;;  %v836_v55 = vadd.f32 %v3325_v18, %v812_v2  ;;  %v3758_v10 = vsel %vm406_vm0, %v885_v29, %v887_v32  ;;  %4855 = vst [vmem:[#allocation2_spill] sm:$0xff] %v3762_v7  ;;  %v2470_v12 = vld [vmem:[%s4847_s3 + $0x5d8] sm:$0xff]  ;;  %v3774_v29 = vsel %vm406_vm0, %v886_v13, %v888_v49 }
 0x12d   : > { %v3780_v22 = vsel %vm425_vm1, %v921_v24, %v923_v47  ;;  %v3786_v8 = vsel %vm425_vm1, %v922_v25, %v924_v56  ;;  %1583 = vmatpush.msra.mxu0 %v2438_v61  ;;  %1627 = vmatpush.msra.mxu1 %v2470_v12  ;;  %v630_v13 = vadd.f32 %v629_v39, %v3296_v63  ;;  %v2433_v63 = vld [vmem:[%s4847_s3 + $0x4b0] sm:$0xff]  ;;  %v2468_v39 = vld [vmem:[%s4847_s3 + $0x5c8] sm:$0xff]  ;;  %v2463_v61 = vld [vmem:[%s4847_s3 + $0x5a0] sm:$0xff] }
 0x12e   : > { %v853_v34 = vmax.f32 %v835_v53, 0.0  ;;  %v854_v35 = vmax.f32 %v836_v55, 0.0  ;;  %v2436_v53 = vld [vmem:[%s4847_s3 + $0x4c8] sm:$0xff]  ;;  %1497 = vmatpush.msrb.mxu2 %v2433_v63  ;;  %1541 = vmatpush.msrb.mxu3 %v2465_v0  ;;  %v2461_v63 = vld [vmem:[%s4847_s3 + $0x590] sm:$0xff] }
 0x12f   : > { %1584 = vmatpush.msra.mxu0 %v2436_v53  ;;  %1628 = vmatpush.msra.mxu1 %v2468_v39  ;;  %v2432_v0 = vld [vmem:[%s4847_s3 + $0x4a8] sm:$0xff] }
 0x130   : > { %v871_v54 = vmul.f32 %v853_v34, %v3762_v7  ;;  %v872_v24 = vmul.f32 %v854_v35, %v3762_v7  ;;  %1498 = vmatpush.msrb.mxu2 %v2431_v33  ;;  %1542 = vmatpush.msrb.mxu3 %v2463_v61  ;;  %v2464_v53 = vld [vmem:[%s4847_s3 + $0x5a8] sm:$0xff]  ;;  %v2423_v61 = vld [vmem:[%s4847_s3 + $0x460] sm:$0xff] }
 0x131   : > { %v750_v2 = vpop.f32.mrf.mxu0  ;;  %v794_v9 = vpop.f32.mrf.mxu1  ;;  %v2428_v39 = vld [vmem:[%s4847_s3 + $0x488] sm:$0xff] }
 0x132   : > { %v813_v50 = vadd.f32 %v750_v2, %v630_v13  ;;  %v814_v36 = vadd.f32 %v794_v9, %v674_v11  ;;  %1113 = vmatmul.f32.gmra.mxu2 %v871_v54  ;;  %1157 = vmatmul.f32.gmra.mxu3 %v872_v24  ;;  %v889_v25 = vrot.slane %v871_v54, 7  ;;  %v890_v37 = vrot.slane %v872_v24, 7  ;;  %v2429_v9 = vld [vmem:[%s4847_s3 + $0x490] sm:$0xff]  ;;  %v2460_v33 = vld [vmem:[%s4847_s3 + $0x588] sm:$0xff] }
 0x133   : > { %1201 = vmatmul.f32.gmra.mxu0 %v871_v54  ;;  %1245 = vmatmul.f32.gmra.mxu1 %v872_v24  ;;  %v925_v55 = vrot.slane %v871_v54, 1  ;;  %v926_v16 = vrot.slane %v872_v24, 1 }
 0x134   : > { %v837_v48 = vadd.f32 %v3323_v17, %v813_v50  ;;  %v838_v52 = vadd.f32 %v3325_v18, %v814_v36  ;;  %v3814_v12 = vsel %vm406_vm0, %v887_v32, %v889_v25  ;;  %v3818_v17 = vsel %vm406_vm0, %v888_v49, %v890_v37  ;;  %1499 = vmatpush.msrb.mxu2 %v2429_v9  ;;  %v2452_v9 = vld [vmem:[%s4847_s3 + $0x548] sm:$0xff] }
 0x135   : > { %v3822_v18 = vsel %vm425_vm1, %v923_v47, %v925_v55  ;;  %v3826_v34 = vsel %vm425_vm1, %v924_v56, %v926_v16  ;;  %v2434_v47 = vld [vmem:[%s4847_s3 + $0x4b8] sm:$0xff]  ;;  %1543 = vmatpush.msrb.mxu3 %v2461_v63  ;;  %v2413_v63 = vld [vmem:[%s4847_s3 + $0x410] sm:$0xff] }
 0x136   : > { %v855_v35 = vmax.f32 %v837_v48, 0.0  ;;  %v856_v13 = vmax.f32 %v838_v52, 0.0  ;;  %v2466_v56 = vld [vmem:[%s4847_s3 + $0x5b8] sm:$0xff]  ;;  %1585 = vmatpush.msra.mxu0 %v2434_v47  ;;  %v2449_v47 = vld [vmem:[%s4847_s3 + $0x530] sm:$0xff] }
 0x137   : > { %1629 = vmatpush.msra.mxu1 %v2466_v56  ;;  %1544 = vmatpush.msrb.mxu3 %v2459_v30  ;;  %v2420_v56 = vld [vmem:[%s4847_s3 + $0x448] sm:$0xff]  ;;  %v2411_v30 = vld [vmem:[%s4847_s3 + $0x400] sm:$0xff] }
 0x138   : > { %v873_v32 = vmul.f32 0.0, %v855_v35  ;;  %v874_v11 = vmul.f32 0.0, %v856_v13  ;;  %1586 = vmatpush.msra.mxu0 %v2432_v0  ;;  %v2455_v35 = vld [vmem:[%s4847_s3 + $0x560] sm:$0xff]  ;;  %v2426_v13 = vld [vmem:[%s4847_s3 + $0x478] sm:$0xff]  ;;  %v2445_v0 = vld [vmem:[%s4847_s3 + $0x510] sm:$0xff] }
 0x139   : > { %1630 = vmatpush.msra.mxu1 %v2464_v53  ;;  %v2416_v53 = vld [vmem:[%s4847_s3 + $0x428] sm:$0xff] }
 0x13a   : > { %1116 = vmatmul.f32.gmra.mxu2 %v873_v32  ;;  %1160 = vmatmul.f32.gmra.mxu3 %v874_v11  ;;  %v891_v54 = vrot.slane %v873_v32, 7  ;;  %v892_v24 = vrot.slane %v874_v11, 7  ;;  %v927_v49 = vrot.slane %v873_v32, 1  ;;  %v928_v2 = vrot.slane %v874_v11, 1 }
 0x13b   : > { %1204 = vmatmul.f32.gmra.mxu0 %v873_v32  ;;  %1248 = vmatmul.f32.gmra.mxu1 %v874_v11  ;;  %v2453_v32 = vld [vmem:[%s4847_s3 + $0x550] sm:$0xff]  ;;  %v2424_v11 = vld [vmem:[%s4847_s3 + $0x468] sm:$0xff] }
 0x13c   : > { %v909_v50 = vsel %vm406_vm0, %v891_v54, %v875_v60  ;;  %v910_v36 = vsel %vm406_vm0, %v892_v24, %v876_v14  ;;  %v3856_v60 = vsel %vm406_vm0, %v889_v25, %v891_v54  ;;  %v3860_v14 = vsel %vm406_vm0, %v890_v37, %v892_v24  ;;  %1587 = vmatpush.msra.mxu0 %v2430_v31  ;;  %v2456_v54 = vld [vmem:[%s4847_s3 + $0x568] sm:$0xff]  ;;  %v2419_v24 = vld [vmem:[%s4847_s3 + $0x440] sm:$0xff]  ;;  %v2446_v31 = vld [vmem:[%s4847_s3 + $0x518] sm:$0xff] }
 0x13d   : > { %v3864_v48 = vsel %vm425_vm1, %v925_v55, %v927_v49  ;;  %v3868_v52 = vsel %vm425_vm1, %v926_v16, %v928_v2  ;;  %v3874_v25 = vsel %vm425_vm1, %v927_v49, %v911_v3  ;;  %v3880_v37 = vsel %vm425_vm1, %v928_v2, %v912_v19  ;;  %v2427_v55 = vld [vmem:[%s4847_s3 + $0x480] sm:$0xff]  ;;  %v2462_v3 = vld [vmem:[%s4847_s3 + $0x598] sm:$0xff]  ;;  %v2425_v19 = vld [vmem:[%s4847_s3 + $0x470] sm:$0xff] }
 0x13e   : > { %1500 = vmatpush.msrb.mxu2 %v2427_v55  ;;  %v2457_v16 = vld [vmem:[%s4847_s3 + $0x570] sm:$0xff]  ;;  %1631 = vmatpush.msra.mxu1 %v2462_v3  ;;  %v2451_v49 = vld [vmem:[%s4847_s3 + $0x540] sm:$0xff]  ;;  %v2422_v2 = vld [vmem:[%s4847_s3 + $0x458] sm:$0xff] }
 0x13f   : > { %1545 = vmatpush.msrb.mxu3 %v2457_v16  ;;  %1588 = vmatpush.msra.mxu0 %v2428_v39  ;;  %v2448_v55 = vld [vmem:[%s4847_s3 + $0x528] sm:$0xff] }
 0x140   : > { %1501 = vmatpush.msrb.mxu2 %v2425_v19  ;;  %1632 = vmatpush.msra.mxu1 %v2460_v33  ;;  %v2412_v3 = vld [vmem:[%s4847_s3 + $0x408] sm:$0xff] }
 0x141   : > { %1546 = vmatpush.msrb.mxu3 %v2455_v35  ;;  %1589 = vmatpush.msra.mxu0 %v2426_v13  ;;  %v2444_v19 = vld [vmem:[%s4847_s3 + $0x508] sm:$0xff] }
 0x142   : > { %1268 = vmatmul.f32.vlgmr.msra.gmra.mxu2 %v909_v50  ;;  %1312 = vmatmul.f32.vlgmr.msra.gmra.mxu3 %v910_v36 }
 0x143   : > { %1356 = vmatmul.f32.vlgmr.msrb.gmra.mxu0 %v909_v50  ;;  %1400 = vmatmul.f32.vlgmr.msrb.gmra.mxu1 %v910_v36  ;;  %v2415_v50 = vld [vmem:[%s4847_s3 + $0x420] sm:$0xff]  ;;  %v2450_v36 = vld [vmem:[%s4847_s3 + $0x538] sm:$0xff] }
 0x144   : > { %1502 = vmatpush.msrb.mxu2 %v2423_v61  ;;  %1547 = vmatpush.msrb.mxu3 %v2453_v32 }
 0x145   : > { %1590 = vmatpush.msra.mxu0 %v2424_v11 }
 0x146   : > { %1548 = vmatpush.msrb.mxu3 %v2451_v49 }
 0x147   : > { %1591 = vmatpush.msra.mxu0 %v2422_v2 }
 0x148   : > { %1549 = vmatpush.msrb.mxu3 %v2449_v47 }
 0x149   : > { %1592 = vmatpush.msra.mxu0 %v2420_v56 }
 0x14a   : > { %1271 = vmatmul.f32.gmra.mxu2 %v3419_v40  ;;  %1315 = vmatmul.f32.gmra.mxu3 %v3427_v26 }
 0x14b   : > { %1359 = vmatmul.f32.gmra.mxu0 %v3419_v40  ;;  %1403 = vmatmul.f32.gmra.mxu1 %v3427_v26  ;;  %v2458_v40 = vld [vmem:[%s4847_s3 + $0x578] sm:$0xff]  ;;  %v2421_v26 = vld [vmem:[%s4847_s3 + $0x450] sm:$0xff] }
 0x14c   : > { %1633 = vmatpush.msra.mxu1 %v2458_v40  ;;  %1503 = vmatpush.msrb.mxu2 %v2421_v26 }
 0x14e   : > { %1634 = vmatpush.msra.mxu1 %v2456_v54  ;;  %1504 = vmatpush.msrb.mxu2 %v2419_v24 }
 0x152   : > { %1274 = vmatmul.f32.gmra.mxu2 %v3477_v57  ;;  %1318 = vmatmul.f32.gmra.mxu3 %v3483_v58 }
 0x153   : > { %1362 = vmatmul.f32.gmra.mxu0 %v3477_v57  ;;  %1406 = vmatmul.f32.gmra.mxu1 %v3483_v58  ;;  %v2454_v57 = vld [vmem:[%s4847_s3 + $0x558] sm:$0xff]  ;;  %v2417_v58 = vld [vmem:[%s4847_s3 + $0x430] sm:$0xff] }
 0x154   : > { %1635 = vmatpush.msra.mxu1 %v2454_v57  ;;  %1505 = vmatpush.msrb.mxu2 %v2417_v58 }
 0x156   : > { %1636 = vmatpush.msra.mxu1 %v2452_v9  ;;  %1506 = vmatpush.msrb.mxu2 %v2415_v50 }
 0x158   : > { %1637 = vmatpush.msra.mxu1 %v2450_v36  ;;  %1507 = vmatpush.msrb.mxu2 %v2413_v63  ;;  %v2504_v36 = vld [vmem:[%s4849_s5 + $0x1e8] sm:$0xff] }
 0x15a   : > { %1277 = vmatmul.f32.gmra.mxu2 %v3530_v43  ;;  %1321 = vmatmul.f32.gmra.mxu3 %v3544_v51 }
 0x15b   : > { %1365 = vmatmul.f32.gmra.mxu0 %v3530_v43  ;;  %1409 = vmatmul.f32.gmra.mxu1 %v3544_v51  ;;  %v2447_v43 = vld [vmem:[%s4847_s3 + $0x520] sm:$0xff]  ;;  %v2418_v51 = vld [vmem:[%s4847_s3 + $0x438] sm:$0xff] }
 0x15c   : > { %1550 = vmatpush.msrb.mxu3 %v2447_v43  ;;  %1593 = vmatpush.msra.mxu0 %v2418_v51  ;;  %v2488_v51 = vld [vmem:[%s4849_s5 + $0x168] sm:$0xff] }
 0x15d   : > { %1638 = vmatpush.msra.mxu1 %v2448_v55  ;;  %1508 = vmatpush.msrb.mxu2 %v2411_v30  ;;  %v2486_v30 = vld [vmem:[%s4849_s5 + $0x158] sm:$0xff] }
 0x15e   : > { %1551 = vmatpush.msrb.mxu3 %v2445_v0  ;;  %1594 = vmatpush.msra.mxu0 %v2416_v53 }
 0x15f   : > { %1639 = vmatpush.msra.mxu1 %v2446_v31 }
 0x161   : > { %1640 = vmatpush.msra.mxu1 %v2444_v19 }
 0x162   : > { %1280 = vmatmul.f32.gmra.mxu2 %v3616_v38  ;;  %1324 = vmatmul.f32.gmra.mxu3 %v3628_v41 }
 0x163   : > { %1368 = vmatmul.f32.gmra.mxu0 %v3616_v38  ;;  %1412 = vmatmul.f32.gmra.mxu1 %v3628_v41  ;;  %v2443_v38 = vld [vmem:[%s4847_s3 + $0x500] sm:$0xff]  ;;  %v2414_v41 = vld [vmem:[%s4847_s3 + $0x418] sm:$0xff] }
 0x164   : > { %1552 = vmatpush.msrb.mxu3 %v2443_v38  ;;  %1595 = vmatpush.msra.mxu0 %v2414_v41  ;;  %v2502_v38 = vld [vmem:[%s4849_s5 + $0x1d8] sm:$0xff] }
 0x166   : > { %1596 = vmatpush.msra.mxu0 %v2412_v3 }
 0x16a   : > { %1283 = vmatmul.f32.gmra.mxu2 %v3671_v20  ;;  %1327 = vmatmul.f32.gmra.mxu3 %v3688_v15 }
 0x16b   : > { %1371 = vmatmul.f32.gmra.mxu0 %v3671_v20  ;;  %1415 = vmatmul.f32.gmra.mxu1 %v3688_v15 }
 0x172   : > { %1286 = vmatmul.f32.gmra.mxu2 %v3758_v10  ;;  %1330 = vmatmul.f32.gmra.mxu3 %v3774_v29 }
 0x173   : > { %1374 = vmatmul.f32.gmra.mxu0 %v3758_v10  ;;  %1418 = vmatmul.f32.gmra.mxu1 %v3774_v29 }
 0x178   : > { %v4020_v16 = vpop.f32.mrf.mxu0  ;;  %v4022_v39 = vpop.f32.mrf.mxu1 }
 0x17a   : > { %1289 = vmatmul.f32.gmra.mxu2 %v3814_v12  ;;  %1333 = vmatmul.f32.gmra.mxu3 %v3818_v17 }
 0x17b   : > { %1377 = vmatmul.f32.gmra.mxu0 %v3814_v12  ;;  %1421 = vmatmul.f32.gmra.mxu1 %v3818_v17 }
 0x17d   : > { %v1093_v20 = vpop.f32.mrf.mxu2  ;;  %v1137_v15 = vpop.f32.mrf.mxu3 }
 0x17e   : > { %v4028_v33 = vadd.f32 %v1137_v15, %v1093_v20  ;;  %v2484_v20 = vld [vmem:[%s4849_s5 + $0x148] sm:$0xff] }
 0x180   : > { %v4030_v61 = vpop.f32.mrf.mxu0  ;;  %v4032_v10 = vpop.f32.mrf.mxu1 }
 0x182   : > { %1292 = vmatmul.f32.gmra.mxu2 %v3856_v60  ;;  %1336 = vmatmul.f32.gmra.mxu3 %v3860_v14 }
 0x183   : > { %1380 = vmatmul.f32.gmra.mxu0 %v3856_v60  ;;  %1424 = vmatmul.f32.gmra.mxu1 %v3860_v14 }
 0x185   : > { %v1096_v29 = vpop.f32.mrf.mxu2  ;;  %v1140_v12 = vpop.f32.mrf.mxu3 }
 0x186   : > { %v4038_v35 = vadd.f32 %v1140_v12, %v1096_v29 }
 0x188   : > { %v4040_v17 = vpop.f32.mrf.mxu0  ;;  %v4042_v13 = vpop.f32.mrf.mxu1 }
 0x18a   : > { %1509 = vmatmul.f32.vlgmr.msrb.gmra.mxu2 %v3433_v27  ;;  %1553 = vmatmul.f32.vlgmr.msrb.gmra.mxu3 %v3439_v28 }
 0x18b   : > { %1597 = vmatmul.f32.vlgmr.msra.gmra.mxu0 %v3433_v27  ;;  %1641 = vmatmul.f32.vlgmr.msra.gmra.mxu1 %v3439_v28 }
 0x18d   : > { %v1099_v40 = vpop.f32.mrf.mxu2  ;;  %v1143_v60 = vpop.f32.mrf.mxu3 }
 0x18e   : > { %v4048_v26 = vadd.f32 %v1143_v60, %v1099_v40  ;;  %v2483_v40 = vld [vmem:[%s4849_s5 + $0x140] sm:$0xff] }
 0x18f   : > { %v2499_v60 = vld [vmem:[%s4849_s5 + $0x1c0] sm:$0xff] }
 0x190   : > { %v4050_v14 = vpop.f32.mrf.mxu0  ;;  %v4052_v32 = vpop.f32.mrf.mxu1 }
 0x192   : > { %1512 = vmatmul.f32.gmra.mxu2 %v3487_v62  ;;  %1556 = vmatmul.f32.gmra.mxu3 %v3491_v1 }
 0x193   : > { %1600 = vmatmul.f32.gmra.mxu0 %v3487_v62  ;;  %1644 = vmatmul.f32.gmra.mxu1 %v3491_v1 }
 0x195   : > { %v4058_v11 = vpop.f32.mrf.mxu2  ;;  %v4060_v27 = vpop.f32.mrf.mxu3 }
 0x198   : > { %v4062_v28 = vpop.f32.mrf.mxu0  ;;  %v4064_v54 = vpop.f32.mrf.mxu1 }
 0x19a   : > { %1515 = vmatmul.f32.gmra.mxu2 %v3550_v44  ;;  %1559 = vmatmul.f32.gmra.mxu3 %v3556_v5 }
 0x19b   : > { %1603 = vmatmul.f32.gmra.mxu0 %v3550_v44  ;;  %1647 = vmatmul.f32.gmra.mxu1 %v3556_v5 }
 0x19d   : > { %v4070_v24 = vpop.f32.mrf.mxu2  ;;  %v4072_v62 = vpop.f32.mrf.mxu3 }
 0x1a0   : > { %v4074_v1 = vpop.f32.mrf.mxu0  ;;  %v4076_v49 = vpop.f32.mrf.mxu1 }
 0x1a2   : > { %1518 = vmatmul.f32.gmra.mxu2 %v3634_v21  ;;  %1562 = vmatmul.f32.gmra.mxu3 %v3640_v4 }
 0x1a3   : > { %1606 = vmatmul.f32.gmra.mxu0 %v3634_v21  ;;  %1650 = vmatmul.f32.gmra.mxu1 %v3640_v4 }
 0x1a5   : > { %v4082_v2 = vpop.f32.mrf.mxu2  ;;  %v4084_v44 = vpop.f32.mrf.mxu3 }
 0x1a8   : > { %v4086_v5 = vpop.f32.mrf.mxu0  ;;  %v4088_v57 = vpop.f32.mrf.mxu1 }
 0x1aa   : > { %1521 = vmatmul.f32.gmra.mxu2 %v3694_v46  ;;  %1565 = vmatmul.f32.gmra.mxu3 %v3700_v6 }
 0x1ab   : > { %1609 = vmatmul.f32.gmra.mxu0 %v3694_v46  ;;  %1653 = vmatmul.f32.gmra.mxu1 %v3700_v6  ;;  %v2490_v46 = vld [vmem:[%s4849_s5 + $0x178] sm:$0xff] }
 0x1ac   : > { %v2506_v6 = vld [vmem:[%s4849_s5 + $0x1f8] sm:$0xff]  ;;  %1884 = vmatpush.msra.mxu2 %v2490_v46 }
 0x1ad   : > { %v4094_v58 = vpop.f32.mrf.mxu2  ;;  %v4096_v21 = vpop.f32.mrf.mxu3  ;;  %1928 = vmatpush.msra.mxu3 %v2506_v6  ;;  %v2482_v46 = vld [vmem:[%s4849_s5 + $0x138] sm:$0xff] }
 0x1ae   : > { %v2498_v6 = vld [vmem:[%s4849_s5 + $0x1b8] sm:$0xff] }
 0x1b0   : > { %v4098_v4 = vpop.f32.mrf.mxu0  ;;  %v4100_v47 = vpop.f32.mrf.mxu1 }
 0x1b2   : > { %1524 = vmatmul.f32.gmra.mxu2 %v3780_v22  ;;  %1568 = vmatmul.f32.gmra.mxu3 %v3786_v8 }
 0x1b3   : > { %1612 = vmatmul.f32.gmra.mxu0 %v3780_v22  ;;  %1656 = vmatmul.f32.gmra.mxu1 %v3786_v8  ;;  %v2489_v22 = vld [vmem:[%s4849_s5 + $0x170] sm:$0xff] }
 0x1b4   : > { %v2505_v8 = vld [vmem:[%s4849_s5 + $0x1f0] sm:$0xff]  ;;  %1885 = vmatpush.msra.mxu2 %v2489_v22 }
 0x1b5   : > { %v4112_v56 = vpop.f32.mrf.mxu2  ;;  %v4114_v9 = vpop.f32.mrf.mxu3  ;;  %1929 = vmatpush.msra.mxu3 %v2505_v8 }
 0x1b6   : > { %1886 = vmatpush.msra.mxu2 %v2488_v51  ;;  %v1235_v51 = vadd.f32 %v4052_v32, %v4050_v14  ;;  %v1238_v14 = vadd.f32 %v4064_v54, %v4062_v28  ;;  %v2495_v28 = vld [vmem:[%s4849_s5 + $0x1a0] sm:$0xff] }
 0x1b7   : > { %1930 = vmatpush.msra.mxu3 %v2504_v36 }
 0x1b8   : > { %v4116_v50 = vpop.f32.mrf.mxu0  ;;  %v4118_v43 = vpop.f32.mrf.mxu1 }
 0x1ba   : > { %1527 = vmatmul.f32.gmra.mxu2 %v3822_v18  ;;  %1571 = vmatmul.f32.gmra.mxu3 %v3826_v34 }
 0x1bb   : > { %1615 = vmatmul.f32.gmra.mxu0 %v3822_v18  ;;  %1659 = vmatmul.f32.gmra.mxu1 %v3826_v34  ;;  %v2487_v18 = vld [vmem:[%s4849_s5 + $0x160] sm:$0xff] }
 0x1bc   : > { %v2503_v34 = vld [vmem:[%s4849_s5 + $0x1e0] sm:$0xff]  ;;  %1887 = vmatpush.msra.mxu2 %v2487_v18 }
 0x1bd   : > { %v4136_v63 = vpop.f32.mrf.mxu2  ;;  %v4138_v0 = vpop.f32.mrf.mxu3  ;;  %1931 = vmatpush.msra.mxu3 %v2503_v34 }
 0x1be   : > { %4856 = vst [vmem:[#allocation3_spill] sm:$0xff] %v4136_v63  ;;  %1888 = vmatpush.msra.mxu2 %v2486_v30 }
 0x1bf   : > { %4857 = vst [vmem:[#allocation4_spill] sm:$0xff] %v4138_v0  ;;  %1932 = vmatpush.msra.mxu3 %v2502_v38  ;;  %v2481_v38 = vld [vmem:[%s4849_s5 + $0x130] sm:$0xff] }
 0x1c0   : > { %v4140_v53 = vpop.f32.mrf.mxu0  ;;  %v4142_v55 = vpop.f32.mrf.mxu1 }
 0x1c2   : > { %1530 = vmatmul.f32.gmra.mxu2 %v3864_v48  ;;  %1574 = vmatmul.f32.gmra.mxu3 %v3868_v52 }
 0x1c3   : > { %1618 = vmatmul.f32.gmra.mxu0 %v3864_v48  ;;  %1662 = vmatmul.f32.gmra.mxu1 %v3868_v52  ;;  %v2485_v48 = vld [vmem:[%s4849_s5 + $0x150] sm:$0xff] }
 0x1c4   : > { %v2501_v52 = vld [vmem:[%s4849_s5 + $0x1d0] sm:$0xff]  ;;  %1889 = vmatpush.msra.mxu2 %v2485_v48 }
 0x1c5   : > { %v4160_v41 = vpop.f32.mrf.mxu2  ;;  %v4162_v31 = vpop.f32.mrf.mxu3  ;;  %1933 = vmatpush.msra.mxu3 %v2501_v52  ;;  %v2497_v48 = vld [vmem:[%s4849_s5 + $0x1b0] sm:$0xff] }
 0x1c6   : > { %1890 = vmatpush.msra.mxu2 %v2484_v20 }
 0x1c8   : > { %v4164_v3 = vpop.f32.mrf.mxu0  ;;  %v4166_v19 = vpop.f32.mrf.mxu1  ;;  %1891 = vmatpush.msra.mxu2 %v2483_v40  ;;  %v2480_v40 = vld [vmem:[%s4849_s5 + $0x128] sm:$0xff] }
 0x1ca   : > { %1533 = vmatmul.f32.gmra.mxu2 %v3874_v25  ;;  %1577 = vmatmul.f32.gmra.mxu3 %v3880_v37 }
 0x1cb   : > { %1621 = vmatmul.f32.gmra.mxu0 %v3874_v25  ;;  %1665 = vmatmul.f32.gmra.mxu1 %v3880_v37  ;;  %v2500_v25 = vld [vmem:[%s4849_s5 + $0x1c8] sm:$0xff] }
 0x1cc   : > { %1934 = vmatpush.msra.mxu3 %v2500_v25  ;;  %1892 = vmatpush.msra.mxu2 %v2482_v46 }
 0x1cd   : > { %v4184_v15 = vpop.f32.mrf.mxu2  ;;  %v4186_v37 = vpop.f32.mrf.mxu3 }
 0x1ce   : > { %1935 = vmatpush.msra.mxu3 %v2499_v60  ;;  %1893 = vmatpush.msra.mxu2 %v2481_v38  ;;  %v2496_v60 = vld [vmem:[%s4849_s5 + $0x1a8] sm:$0xff] }
 0x1d0   : > { %v4188_v29 = vpop.f32.mrf.mxu0  ;;  %v4190_v12 = vpop.f32.mrf.mxu1  ;;  %1936 = vmatpush.msra.mxu3 %v2498_v6  ;;  %1894 = vmatpush.msra.mxu2 %v2480_v40 }
 0x1d2   : > { %1937 = vmatpush.msra.mxu3 %v2497_v48  ;;  %v2478_v48 = vld [vmem:[%s4849_s5 + $0x118] sm:$0xff] }
 0x1d4   : > { %1938 = vmatpush.msra.mxu3 %v2496_v60 }
 0x1d5   : > { %v4204_v22 = vpop.f32.mrf.mxu2  ;;  %v4206_v8 = vpop.f32.mrf.mxu3 }
 0x1d6   : > { %1939 = vmatpush.msra.mxu3 %v2495_v28  ;;  %v2492_v28 = vld [vmem:[%s4849_s5 + $0x188] sm:$0xff] }
 0x1d8   : > { %v1366_v36 = vpop.f32.mrf.mxu0  ;;  %v1410_v18 = vpop.f32.mrf.mxu1 }
 0x1d9   : > { %v1367_v34 = vadd.f32 %v1366_v36, %v1235_v51  ;;  %v2479_v51 = vld [vmem:[%s4849_s5 + $0x120] sm:$0xff] }
 0x1da   : > { %1895 = vmatpush.msra.mxu2 %v2479_v51 }
 0x1db   : > { %v4210_v30 = vadd.f32 %v1410_v18, %v1367_v34  ;;  %v1241_v18 = vadd.f32 %v4076_v49, %v4074_v1  ;;  %v2493_v1 = vld [vmem:[%s4849_s5 + $0x190] sm:$0xff]  ;;  %v1244_v49 = vadd.f32 %v4088_v57, %v4086_v5 }
 0x1dc   : > { %1896 = vmatpush.msra.mxu2 %v2478_v48 }
 0x1dd   : > { %v4218_v52 = vpop.f32.mrf.mxu2  ;;  %v4220_v20 = vpop.f32.mrf.mxu3 }
 0x1e0   : > { %v1369_v32 = vpop.f32.mrf.mxu0  ;;  %v1413_v25 = vpop.f32.mrf.mxu1 }
 0x1e1   : > { %v1370_v46 = vadd.f32 %v1369_v32, %v1238_v14  ;;  %v2494_v14 = vld [vmem:[%s4849_s5 + $0x198] sm:$0xff] }
 0x1e2   : > { %1940 = vmatpush.msra.mxu3 %v2494_v14  ;;  %v2476_v14 = vld [vmem:[%s4849_s5 + $0x108] sm:$0xff] }
 0x1e3   : > { %v4230_v6 = vadd.f32 %v1413_v25, %v1370_v46 }
 0x1e4   : > { %1941 = vmatpush.msra.mxu3 %v2493_v1  ;;  %v1247_v1 = vadd.f32 %v4100_v47, %v4098_v4 }
 0x1e5   : > { %v4238_v54 = vpop.f32.mrf.mxu2  ;;  %v4240_v36 = vpop.f32.mrf.mxu3 }
 0x1e6   : > { %1942 = vmatpush.msra.mxu3 %v2492_v28 }
 0x1e8   : > { %v1372_v34 = vpop.f32.mrf.mxu0  ;;  %v1416_v38 = vpop.f32.mrf.mxu1 }
 0x1e9   : > { %v1373_v32 = vadd.f32 %v1372_v34, %v1241_v18  ;;  %v2477_v34 = vld [vmem:[%s4849_s5 + $0x110] sm:$0xff] }
 0x1ea   : > { %1897 = vmatpush.msra.mxu2 %v2477_v34  ;;  %v2538_v34 = vld [vmem:[%s4849_s5 + $0x2f8] sm:$0xff] }
 0x1eb   : > { %v4250_v25 = vadd.f32 %v1416_v38, %v1373_v32  ;;  %v2491_v38 = vld [vmem:[%s4849_s5 + $0x180] sm:$0xff] }
 0x1ec   : > { %1943 = vmatpush.msra.mxu3 %v2491_v38  ;;  %v2475_v32 = vld [vmem:[%s4849_s5 + $0x100] sm:$0xff]  ;;  %1898 = vmatpush.msra.mxu2 %v2476_v14  ;;  %v1834_v38 = vld [vmem:[%s4849_s5 + $0x78] sm:$0xff]  ;;  %v1250_v14 = vadd.f32 %v4118_v43, %v4116_v50  ;;  %v1226_v50 = vadd.f32 %v4022_v39, %v4020_v16  ;;  %v1849_v16 = vld [vmem:[%s4849_s5 + $0xf0] sm:$0xff] }
 0x1ed   : > { %v4252_v40 = vpop.f32.mrf.mxu2  ;;  %v4254_v60 = vpop.f32.mrf.mxu3  ;;  %1972 = vmatpush.msrb.mxu0 %v1834_v38  ;;  %v2520_v38 = vld [vmem:[%s4849_s5 + $0x268] sm:$0xff] }
 0x1ee   : > { %1899 = vmatpush.msra.mxu2 %v2475_v32  ;;  %2137 = vmatpush.msrb.mxu3 %v2538_v34  ;;  %v1833_v34 = vld [vmem:[%s4849_s5 + $0x70] sm:$0xff]  ;;  %v1358_v39 = vadd.f32 %v4140_v53, %v1226_v50  ;;  %v2519_v53 = vld [vmem:[%s4849_s5 + $0x260] sm:$0xff] }
 0x1ef   : > { %1973 = vmatpush.msrb.mxu0 %v1833_v34  ;;  %v2535_v50 = vld [vmem:[%s4849_s5 + $0x2e0] sm:$0xff] }
 0x1f0   : > { %v1375_v46 = vpop.f32.mrf.mxu0  ;;  %v1419_v51 = vpop.f32.mrf.mxu1  ;;  %v1402_v34 = vadd.f32 %v4142_v55, %v1358_v39 }
 0x1f1   : > { %v1376_v18 = vadd.f32 %v1375_v46, %v1244_v49 }
 0x1f3   : > { %v4270_v48 = vadd.f32 %v1419_v51, %v1376_v18  ;;  %v2522_v18 = vld [vmem:[%s4849_s5 + $0x278] sm:$0xff] }
 0x1f4   : > { %2093 = vmatpush.msrb.mxu2 %v2522_v18 }
 0x1f5   : > { %v4272_v5 = vpop.f32.mrf.mxu2  ;;  %v4274_v57 = vpop.f32.mrf.mxu3 }
 0x1f8   : > { %v1378_v49 = vpop.f32.mrf.mxu0  ;;  %v1422_v46 = vpop.f32.mrf.mxu1 }
 0x1f9   : > { %v1379_v51 = vadd.f32 %v1378_v49, %v1247_v1  ;;  %v2521_v49 = vld [vmem:[%s4849_s5 + $0x270] sm:$0xff] }
 0x1fa   : > { %2094 = vmatpush.msrb.mxu2 %v2521_v49  ;;  %v1687_v49 = vld [vmem:[%s4848_s4] sm:$0x3] }
 0x1fb   : > { %v4284_v28 = vadd.f32 %v1422_v46, %v1379_v51  ;;  %v2537_v46 = vld [vmem:[%s4849_s5 + $0x2f0] sm:$0xff]  ;;  %v1850_v51 = vld [vmem:[%s4849_s5 + $0xf8] sm:$0xff] }
 0x1fc   : > { %2138 = vmatpush.msrb.mxu3 %v2537_v46  ;;  %2016 = vmatpush.msrb.mxu1 %v1850_v51 }
 0x1fd   : > { %v4295_v4 = vpop.f32.mrf.mxu2  ;;  %v4297_v47 = vpop.f32.mrf.mxu3  ;;  %2095 = vmatpush.msrb.mxu2 %v2520_v38 }
 0x1fe   : > { %2017 = vmatpush.msrb.mxu1 %v1849_v16  ;;  %v1270_v16 = vadd.f32 %v4160_v41, %v4028_v33  ;;  %v1848_v33 = vld [vmem:[%s4849_s5 + $0xe8] sm:$0xff] }
 0x1ff   : > { %2096 = vmatpush.msrb.mxu2 %v2519_v53 }
 0x200   : > { %v1381_v32 = vpop.f32.mrf.mxu0  ;;  %v1425_v1 = vpop.f32.mrf.mxu1  ;;  %v1314_v55 = vadd.f32 %v4162_v31, %v1270_v16  ;;  %2018 = vmatpush.msrb.mxu1 %v1848_v33  ;;  %v1829_v16 = vld [vmem:[%s4849_s5 + $0x50] sm:$0xff] }
 0x201   : > { %v1382_v18 = vadd.f32 %v1381_v32, %v1250_v14  ;;  %v2536_v14 = vld [vmem:[%s4849_s5 + $0x2e8] sm:$0xff] }
 0x202   : > { %2139 = vmatpush.msrb.mxu3 %v2536_v14  ;;  %v4344_v14 = vperm.slane %v1687_v49, 1 }
 0x203   : > { %v4312_v43 = vadd.f32 %v1425_v1, %v1382_v18  ;;  %v1832_v18 = vld [vmem:[%s4849_s5 + $0x68] sm:$0xff] }
 0x204   : > { %1974 = vmatpush.msrb.mxu0 %v1832_v18  ;;  %2140 = vmatpush.msrb.mxu3 %v2535_v50  ;;  %v1273_v18 = vadd.f32 %v4184_v15, %v4038_v35  ;;  %v2533_v35 = vld [vmem:[%s4849_s5 + $0x2d0] sm:$0xff] }
 0x205   : > { %4858 = vst [vmem:[#allocation5_spill] sm:$0xff] %v4312_v43  ;;  %v4327_v32 = vpop.f32.mrf.mxu2  ;;  %v4329_v1 = vpop.f32.mrf.mxu3 }
 0x206   : > { %4859 = vst [vmem:[#allocation6_spill] sm:$0xff] %v4327_v32 }
 0x207   : > { %4860 = vst [vmem:[#allocation7_spill] sm:$0xff] %v4329_v1  ;;  %v1229_v1 = vadd.f32 %v4032_v10, %v4030_v61  ;;  %v1831_v61 = vld [vmem:[%s4849_s5 + $0x60] sm:$0xff]  ;;  %v2518_v10 = vld [vmem:[%s4849_s5 + $0x258] sm:$0xff] }
 0x208   : > { %v1598_v46 = vpop.f32.mrf.mxu0  ;;  %v1642_v51 = vpop.f32.mrf.mxu1  ;;  %1975 = vmatpush.msrb.mxu0 %v1831_v61  ;;  %2097 = vmatpush.msrb.mxu2 %v2518_v10  ;;  %v2532_v61 = vld [vmem:[%s4849_s5 + $0x2c8] sm:$0xff] }
 0x209   : > { %v1643_v38 = vadd.f32 %v1642_v51, %v1598_v46  ;;  %v1361_v32 = vadd.f32 %v4164_v3, %v1229_v1  ;;  %v4353_v46 = vperm.slane %v1687_v49, 0  ;;  %v1232_v49 = vadd.f32 %v4042_v13, %v4040_v17  ;;  %v2517_v17 = vld [vmem:[%s4849_s5 + $0x250] sm:$0xff] }
 0x20a   : > { %2098 = vmatpush.msrb.mxu2 %v2517_v17 }
 0x20b   : > { %v1670_v43 = vadd.f32 %v1643_v38, %v1402_v34  ;;  %v1830_v34 = vld [vmem:[%s4849_s5 + $0x58] sm:$0xff] }
 0x20c   : > { %1976 = vmatpush.msrb.mxu0 %v1830_v34 }
 0x20d   : > { %v1694_v7 = vadd.f32 %v4344_v14, %v1670_v43  ;;  %v1510_v0 = vpop.f32.mrf.mxu2  ;;  %v1554_v63 = vpop.f32.mrf.mxu3 }
 0x20e   : > { %v1555_v39 = vadd.f32 %v1554_v63, %v1510_v0  ;;  %v1847_v63 = vld [vmem:[%s4849_s5 + $0xe0] sm:$0xff]  ;;  %v1405_v0 = vadd.f32 %v4166_v19, %v1361_v32  ;;  %v1364_v19 = vadd.f32 %v4188_v29, %v1232_v49  ;;  %v1846_v29 = vld [vmem:[%s4849_s5 + $0xd8] sm:$0xff]  ;;  %1977 = vmatpush.msrb.mxu0 %v1829_v16 }
 0x20f   : > { %v1712_v51 = vmax.f32 %v1694_v7, 0.0  ;;  %v2534_v7 = vld [vmem:[%s4849_s5 + $0x2d8] sm:$0xff]  ;;  %2019 = vmatpush.msrb.mxu1 %v1847_v63  ;;  %v1276_v63 = vadd.f32 %v4204_v22, %v4048_v26  ;;  %v2515_v16 = vld [vmem:[%s4849_s5 + $0x240] sm:$0xff] }
 0x210   : > { %v1669_v41 = vadd.f32 %v1555_v39, %v1314_v55  ;;  %v1601_v3 = vpop.f32.mrf.mxu0  ;;  %v1645_v43 = vpop.f32.mrf.mxu1  ;;  %2141 = vmatpush.msrb.mxu3 %v2534_v7  ;;  %v2516_v55 = vld [vmem:[%s4849_s5 + $0x248] sm:$0xff]  ;;  %v1317_v39 = vadd.f32 %v4186_v37, %v1273_v18  ;;  %v1845_v37 = vld [vmem:[%s4849_s5 + $0xd0] sm:$0xff] }
 0x211   : > { %v4372_v31 = vmul.f32 %v1712_v51, %v3331_v23  ;;  %v1646_v1 = vadd.f32 %v1645_v43, %v1601_v3  ;;  %2020 = vmatpush.msrb.mxu1 %v1846_v29  ;;  %2099 = vmatpush.msrb.mxu2 %v2516_v55  ;;  %v1320_v26 = vadd.f32 %v4206_v8, %v1276_v63  ;;  %v1828_v8 = vld [vmem:[%s4849_s5 + $0x48] sm:$0xff]  ;;  %v2531_v55 = vld [vmem:[%s4849_s5 + $0x2c0] sm:$0xff] }
 0x212   : > { %v1693_v53 = vadd.f32 %v4353_v46, %v1669_v41  ;;  %2142 = vmatpush.msrb.mxu3 %v2533_v35  ;;  %v1408_v41 = vadd.f32 %v4190_v12, %v1364_v19  ;;  %1978 = vmatpush.msrb.mxu0 %v1828_v8  ;;  %v1150_v8 = vadd.f32 %v4072_v62, %v4070_v24  ;;  %v1842_v24 = vld [vmem:[%s4849_s5 + $0xb8] sm:$0xff] }
 0x213   : > { %v1672_v50 = vadd.f32 %v1646_v1, %v1405_v0  ;;  %1944 = vmatmul.f32.vlgmr.msra.gmra.mxu3 %v4372_v31  ;;  %2021 = vmatpush.msrb.mxu1 %v1845_v37  ;;  %v1748_v1 = vrot.slane %v4372_v31, 7  ;;  %v2530_v37 = vld [vmem:[%s4849_s5 + $0x2b8] sm:$0xff] }
 0x214   : > { %v1711_v32 = vmax.f32 %v1693_v53, 0.0  ;;  %2143 = vmatpush.msrb.mxu3 %v2532_v61  ;;  %2100 = vmatpush.msrb.mxu2 %v2515_v16 }
 0x215   : > { %v1513_v13 = vpop.f32.mrf.mxu2  ;;  %v1557_v15 = vpop.f32.mrf.mxu3  ;;  %v1696_v38 = vadd.f32 %v4344_v14, %v1672_v50 }
 0x216   : > { %v4402_v51 = vmul.f32 %v1711_v32, %v3331_v23  ;;  %v1558_v33 = vadd.f32 %v1557_v15, %v1513_v13  ;;  %2144 = vmatpush.msrb.mxu3 %v2531_v55  ;;  %v1826_v55 = vld [vmem:[%s4849_s5 + $0x38] sm:$0xff] }
 0x217   : > { %v4407_v10 = vmax.f32 %v1696_v38, 0.0  ;;  %v1147_v38 = vadd.f32 %v4060_v27, %v4058_v11  ;;  %v1844_v11 = vld [vmem:[%s4849_s5 + $0xc8] sm:$0xff]  ;;  %v1827_v27 = vld [vmem:[%s4849_s5 + $0x40] sm:$0xff] }
 0x218   : > { %v1671_v3 = vadd.f32 %v1558_v33, %v1317_v39  ;;  %v1604_v43 = vpop.f32.mrf.mxu0  ;;  %v1648_v7 = vpop.f32.mrf.mxu1  ;;  %1900 = vmatmul.f32.vlgmr.msra.gmra.mxu2 %v4402_v51  ;;  %v1747_v34 = vrot.slane %v4402_v51, 7  ;;  %v1783_v13 = vrot.slane %v4402_v51, 1  ;;  %2022 = vmatpush.msrb.mxu1 %v1844_v11 }
 0x219   : > { %v1649_v0 = vadd.f32 %v1648_v7, %v1604_v43  ;;  %v1750_v49 = vrot.slane %v4407_v10, 7  ;;  %1979 = vmatpush.msrb.mxu0 %v1827_v27  ;;  %2145 = vmatpush.msrb.mxu3 %v2530_v37 }
 0x21a   : > { %v1695_v12 = vadd.f32 %v4353_v46, %v1671_v3 }
 0x21b   : > { %v1674_v18 = vadd.f32 %v1649_v0, %v1408_v41  ;;  %1947 = vmatmul.f32.gmra.mxu3 %v4407_v10  ;;  %v4424_v53 = vsel %vm406_vm0, %v1748_v1, %v1750_v49  ;;  %v2514_v41 = vld [vmem:[%s4849_s5 + $0x238] sm:$0xff]  ;;  %v1279_v0 = vadd.f32 %v4218_v52, %v1147_v38  ;;  %v1843_v52 = vld [vmem:[%s4849_s5 + $0xc0] sm:$0xff]  ;;  %1980 = vmatpush.msrb.mxu0 %v1826_v55 }
 0x21c   : > { %v4426_v50 = vmax.f32 %v1695_v12, 0.0  ;;  %2101 = vmatpush.msrb.mxu2 %v2514_v41  ;;  %2023 = vmatpush.msrb.mxu1 %v1843_v52 }
 0x21d   : > { %v1516_v22 = vpop.f32.mrf.mxu2  ;;  %v1560_v19 = vpop.f32.mrf.mxu3  ;;  %v1698_v32 = vadd.f32 %v4344_v14, %v1674_v18 }
 0x21e   : > { %v1561_v17 = vadd.f32 %v1560_v19, %v1516_v22  ;;  %v1785_v35 = vrot.slane %v4426_v50, 1  ;;  %v1749_v15 = vrot.slane %v4426_v50, 7  ;;  %2024 = vmatpush.msrb.mxu1 %v1842_v24 }
 0x21f   : > { %v4436_v29 = vmax.f32 %v1698_v32, 0.0 }
 0x220   : > { %v1673_v39 = vadd.f32 %v1561_v17, %v1320_v26  ;;  %v1607_v33 = vpop.f32.mrf.mxu0  ;;  %v1651_v61 = vpop.f32.mrf.mxu1  ;;  %1903 = vmatmul.f32.gmra.mxu2 %v4426_v50  ;;  %v4461_v3 = vsel %vm425_vm1, %v1783_v13, %v1785_v35  ;;  %v4467_v43 = vsel %vm406_vm0, %v1747_v34, %v1749_v15 }
 0x221   : > { %v1652_v7 = vadd.f32 %v1651_v61, %v1607_v33  ;;  %v1752_v63 = vrot.slane %v4436_v29, 7 }
 0x222   : > { %v1697_v12 = vadd.f32 %v4353_v46, %v1673_v39  ;;  %v2513_v39 = vld [vmem:[%s4849_s5 + $0x230] sm:$0xff] }
 0x223   : > { %v1676_v18 = vadd.f32 %v1652_v7, %v4210_v30  ;;  %1950 = vmatmul.f32.gmra.mxu3 %v4436_v29  ;;  %v4479_v50 = vsel %vm406_vm0, %v1750_v49, %v1752_v63  ;;  %v1323_v30 = vadd.f32 %v4220_v20, %v1279_v0  ;;  %v2529_v20 = vld [vmem:[%s4849_s5 + $0x2b0] sm:$0xff]  ;;  %2102 = vmatpush.msrb.mxu2 %v2513_v39 }
 0x224   : > { %v4481_v26 = vmax.f32 %v1697_v12, 0.0  ;;  %2146 = vmatpush.msrb.mxu3 %v2529_v20  ;;  %v1841_v7 = vld [vmem:[%s4849_s5 + $0xb0] sm:$0xff]  ;;  %v1282_v0 = vadd.f32 %v4238_v54, %v1150_v8  ;;  %v2527_v8 = vld [vmem:[%s4849_s5 + $0x2a0] sm:$0xff] }
 0x225   : > { %v1519_v22 = vpop.f32.mrf.mxu2  ;;  %v1563_v19 = vpop.f32.mrf.mxu3  ;;  %v1700_v32 = vadd.f32 %v4344_v14, %v1676_v18  ;;  %v1825_v54 = vld [vmem:[%s4849_s5 + $0x30] sm:$0xff]  ;;  %2025 = vmatpush.msrb.mxu1 %v1841_v7  ;;  %v1839_v20 = vld [vmem:[%s4849_s5 + $0xa0] sm:$0xff] }
 0x226   : > { %v1564_v17 = vadd.f32 %v1563_v19, %v1519_v22  ;;  %v1787_v38 = vrot.slane %v4481_v26, 1  ;;  %v1751_v49 = vrot.slane %v4481_v26, 7  ;;  %v2528_v22 = vld [vmem:[%s4849_s5 + $0x2a8] sm:$0xff]  ;;  %1981 = vmatpush.msrb.mxu0 %v1825_v54  ;;  %v1326_v55 = vadd.f32 %v4240_v36, %v1282_v0  ;;  %v2526_v54 = vld [vmem:[%s4849_s5 + $0x298] sm:$0xff] }
 0x227   : > { %v4492_v16 = vmax.f32 %v1700_v32, 0.0  ;;  %2147 = vmatpush.msrb.mxu3 %v2528_v22  ;;  %v1822_v22 = vld [vmem:[%s4849_s5 + $0x18] sm:$0xff] }
 0x228   : > { %v1675_v33 = vadd.f32 %v1564_v17, %v1323_v30  ;;  %v1610_v61 = vpop.f32.mrf.mxu0  ;;  %v1654_v11 = vpop.f32.mrf.mxu1  ;;  %1906 = vmatmul.f32.gmra.mxu2 %v4481_v26  ;;  %v4511_v62 = vsel %vm425_vm1, %v1785_v35, %v1787_v38  ;;  %v4515_v27 = vsel %vm406_vm0, %v1749_v15, %v1751_v49  ;;  %v1840_v15 = vld [vmem:[%s4849_s5 + $0xa8] sm:$0xff]  ;;  %v2511_v17 = vld [vmem:[%s4849_s5 + $0x220] sm:$0xff] }
 0x229   : > { %v1655_v41 = vadd.f32 %v1654_v11, %v1610_v61  ;;  %v1754_v37 = vrot.slane %v4492_v16, 7  ;;  %v1824_v30 = vld [vmem:[%s4849_s5 + $0x28] sm:$0xff]  ;;  %2026 = vmatpush.msrb.mxu1 %v1840_v15  ;;  %v1153_v11 = vadd.f32 %v4084_v44, %v4082_v2  ;;  %2148 = vmatpush.msrb.mxu3 %v2527_v8  ;;  %v1838_v2 = vld [vmem:[%s4849_s5 + $0x98] sm:$0xff]  ;;  %v1823_v15 = vld [vmem:[%s4849_s5 + $0x20] sm:$0xff] }
 0x22a   : > { %v1699_v12 = vadd.f32 %v4353_v46, %v1675_v33  ;;  %1982 = vmatpush.msrb.mxu0 %v1824_v30 }
 0x22b   : > { %v1678_v35 = vadd.f32 %v1655_v41, %v4230_v6  ;;  %1953 = vmatmul.f32.gmra.mxu3 %v4492_v16  ;;  %v4532_v18 = vsel %vm406_vm0, %v1752_v63, %v1754_v37  ;;  %v2512_v6 = vld [vmem:[%s4849_s5 + $0x228] sm:$0xff]  ;;  %2027 = vmatpush.msrb.mxu1 %v1839_v20  ;;  %v1285_v44 = vadd.f32 %v4252_v40, %v1153_v11  ;;  %v1837_v40 = vld [vmem:[%s4849_s5 + $0x90] sm:$0xff] }
 0x22c   : > { %v4534_v52 = vmax.f32 %v1699_v12, 0.0  ;;  %2103 = vmatpush.msrb.mxu2 %v2512_v6  ;;  %1983 = vmatpush.msrb.mxu0 %v1823_v15  ;;  %v1836_v20 = vld [vmem:[%s4849_s5 + $0x88] sm:$0xff] }
 0x22d   : > { %v1702_v19 = vadd.f32 %v4344_v14, %v1678_v35  ;;  %v1522_v32 = vpop.f32.mrf.mxu2  ;;  %v1566_v63 = vpop.f32.mrf.mxu3  ;;  %2028 = vmatpush.msrb.mxu1 %v1838_v2  ;;  %2149 = vmatpush.msrb.mxu3 %v2526_v54  ;;  %v1820_v54 = vld [vmem:[%s4849_s5 + $0x8] sm:$0xff] }
 0x22e   : > { %v1567_v39 = vadd.f32 %v1566_v63, %v1522_v32  ;;  %v1753_v33 = vrot.slane %v4534_v52, 7  ;;  %2104 = vmatpush.msrb.mxu2 %v2511_v17  ;;  %v1790_v32 = vrot.slane %v4492_v16, 1  ;;  %v2525_v17 = vld [vmem:[%s4849_s5 + $0x290] sm:$0xff]  ;;  %1984 = vmatpush.msrb.mxu0 %v1822_v22  ;;  %v2523_v22 = vld [vmem:[%s4849_s5 + $0x280] sm:$0xff] }
 0x22f   : > { %v1720_v61 = vmax.f32 %v1702_v19, 0.0  ;;  %v2509_v19 = vld [vmem:[%s4849_s5 + $0x210] sm:$0xff]  ;;  %2029 = vmatpush.msrb.mxu1 %v1837_v40  ;;  %2150 = vmatpush.msrb.mxu3 %v2525_v17 }
 0x230   : > { %v1677_v24 = vadd.f32 %v1567_v39, %v1326_v55  ;;  %v1613_v41 = vpop.f32.mrf.mxu0  ;;  %v1657_v7 = vpop.f32.mrf.mxu1  ;;  %1909 = vmatmul.f32.gmra.mxu2 %v4534_v52  ;;  %v4567_v36 = vsel %vm406_vm0, %v1751_v49, %v1753_v33  ;;  %v2510_v49 = vld [vmem:[%s4849_s5 + $0x218] sm:$0xff] }
 0x231   : > { %v1658_v0 = vadd.f32 %v1657_v7, %v1613_v41  ;;  %v4570_v12 = vmul.f32 %v1720_v61, %v3562_v45  ;;  %2105 = vmatpush.msrb.mxu2 %v2510_v49  ;;  %2030 = vmatpush.msrb.mxu1 %v1836_v20 }
 0x232   : > { %v1701_v35 = vadd.f32 %v4353_v46, %v1677_v24  ;;  %v1329_v24 = vadd.f32 %v4254_v60, %v1285_v44  ;;  %v1835_v60 = vld [vmem:[%s4849_s5 + $0x80] sm:$0xff]  ;;  %v1156_v44 = vadd.f32 %v4096_v21, %v4094_v58 }
 0x233   : > { %v1680_v6 = vadd.f32 %v1658_v0, %v4250_v25  ;;  %1956 = vmatmul.f32.gmra.mxu3 %v4570_v12  ;;  %v1792_v63 = vrot.slane %v4570_v12, 1  ;;  %v1756_v25 = vrot.slane %v4570_v12, 7  ;;  %2106 = vmatpush.msrb.mxu2 %v2509_v19  ;;  %v1821_v0 = vld [vmem:[%s4849_s5 + $0x10] sm:$0xff]  ;;  %v2508_v12 = vld [vmem:[%s4849_s5 + $0x208] sm:$0xff]  ;;  %v1819_v58 = vld [vmem:[%s4849_s5] sm:$0xff] }
 0x234   : > { %v1719_v30 = vmax.f32 %v1701_v35, 0.0  ;;  %1985 = vmatpush.msrb.mxu0 %v1821_v0  ;;  %2031 = vmatpush.msrb.mxu1 %v1835_v60 }
 0x235   : > { %v1525_v8 = vpop.f32.mrf.mxu2  ;;  %v1569_v55 = vpop.f32.mrf.mxu3  ;;  %v1704_v39 = vadd.f32 %v4344_v14, %v1680_v6  ;;  %v4611_v61 = vsel %vm425_vm1, %v1790_v32, %v1792_v63  ;;  %v4617_v11 = vsel %vm406_vm0, %v1754_v37, %v1756_v25  ;;  %v2524_v37 = vld [vmem:[%s4849_s5 + $0x288] sm:$0xff]  ;;  %2107 = vmatpush.msrb.mxu2 %v2508_v12 }
 0x236   : > { %v1570_v41 = vadd.f32 %v1569_v55, %v1525_v8  ;;  %v4621_v7 = vmul.f32 %v1719_v30, %v3562_v45  ;;  %2151 = vmatpush.msrb.mxu3 %v2524_v37  ;;  %v1288_v30 = vadd.f32 %v4272_v5, %v1156_v44  ;;  %1986 = vmatpush.msrb.mxu0 %v1820_v54 }
 0x237   : > { %v1722_v2 = vmax.f32 %v1704_v39, 0.0  ;;  %v2507_v39 = vld [vmem:[%s4849_s5 + $0x200] sm:$0xff] }
 0x238   : > { %v1679_v35 = vadd.f32 %v1570_v41, %v1329_v24  ;;  %v1616_v15 = vpop.f32.mrf.mxu0  ;;  %v1660_v49 = vpop.f32.mrf.mxu1  ;;  %1912 = vmatmul.f32.gmra.mxu2 %v4621_v7  ;;  %v1755_v6 = vrot.slane %v4621_v7, 7  ;;  %2152 = vmatpush.msrb.mxu3 %v2523_v22  ;;  %v1332_v0 = vadd.f32 %v4274_v57, %v1288_v30 }
 0x239   : > { %v1661_v40 = vadd.f32 %v1660_v49, %v1616_v15  ;;  %v1794_v21 = vrot.slane %v1722_v2, 1  ;;  %v1758_v19 = vrot.slane %v1722_v2, 7  ;;  %1987 = vmatpush.msrb.mxu0 %v1819_v58  ;;  %2108 = vmatpush.msrb.mxu2 %v2507_v39 }
 0x23a   : > { %v1703_v17 = vadd.f32 %v4353_v46, %v1679_v35  ;;  %v4654_v8 = vsel %vm406_vm0, %v1753_v33, %v1755_v6 }
 0x23b   : > { %v1682_v55 = vadd.f32 %v1661_v40, %v4270_v48  ;;  %1959 = vmatmul.f32.gmra.mxu3 %v1722_v2  ;;  %v4662_v5 = vsel %vm425_vm1, %v1792_v63, %v1794_v21  ;;  %v4666_v20 = vsel %vm406_vm0, %v1756_v25, %v1758_v19  ;;  %v1159_v2 = vadd.f32 %v4114_v9, %v4112_v56 }
 0x23c   : > { %v4668_v24 = vmax.f32 %v1703_v17, 0.0 }
 0x23d   : > { %v1706_v33 = vadd.f32 %v4344_v14, %v1682_v55  ;;  %v1528_v48 = vpop.f32.mrf.mxu2  ;;  %v1572_v41 = vpop.f32.mrf.mxu3  ;;  %v1291_v57 = vadd.f32 %v4295_v4, %v1159_v2 }
 0x23e   : > { %v1573_v12 = vadd.f32 %v1572_v41, %v1528_v48  ;;  %v1757_v37 = vrot.slane %v4668_v24, 7  ;;  %v4861_v48 = vld [vmem:[#allocation3_spill] sm:$0xff]  ;;  %v4862_v41 = vld [vmem:[#allocation4_spill] sm:$0xff] }
 0x23f   : > { %v1724_v63 = vmax.f32 %v1706_v33, 0.0  ;;  %v1335_v4 = vadd.f32 %v4297_v47, %v1291_v57  ;;  %v4865_v57 = vld [vmem:[#allocation5_spill] sm:$0xff] }
 0x240   : > { %v1681_v25 = vadd.f32 %v1573_v12, %v1332_v0  ;;  %v1619_v60 = vpop.f32.mrf.mxu0  ;;  %v1663_v44 = vpop.f32.mrf.mxu1  ;;  %1915 = vmatmul.f32.gmra.mxu2 %v4668_v24  ;;  %v4678_v35 = vsel %vm406_vm0, %v1755_v6, %v1757_v37  ;;  %v1162_v0 = vadd.f32 %v4862_v41, %v4861_v48 }
 0x241   : > { %v1664_v15 = vadd.f32 %v1663_v44, %v1619_v60  ;;  %v1742_v49 = vmul.f32 %v1724_v63, %v3715_v42  ;;  %v4864_v44 = vld [vmem:[#allocation6_spill] sm:$0xff] }
 0x242   : > { %v1705_v54 = vadd.f32 %v4353_v46, %v1681_v25  ;;  %v1294_v47 = vadd.f32 %v4864_v44, %v1162_v0 }
 0x243   : > { %v1684_v40 = vadd.f32 %v1664_v15, %v4284_v28  ;;  %1962 = vmatmul.f32.gmra.mxu3 %v1742_v49  ;;  %v1796_v56 = vrot.slane %v1742_v49, 1  ;;  %v1760_v9 = vrot.slane %v1742_v49, 7 }
 0x244   : > { %v1723_v22 = vmax.f32 %v1705_v54, 0.0 }
 0x245   : > { %v1708_v58 = vadd.f32 %v4344_v14, %v1684_v40  ;;  %v1531_v30 = vpop.f32.mrf.mxu2  ;;  %v1575_v17 = vpop.f32.mrf.mxu3  ;;  %v4687_v6 = vsel %vm425_vm1, %v1794_v21, %v1796_v56  ;;  %v4691_v55 = vsel %vm406_vm0, %v1758_v19, %v1760_v9  ;;  %v4863_v19 = vld [vmem:[#allocation2_spill] sm:$0xff] }
 0x246   : > { %v1576_v39 = vadd.f32 %v1575_v17, %v1531_v30  ;;  %v4695_v28 = vmul.f32 %v1723_v22, %v3715_v42 }
 0x247   : > { %v1726_v33 = vmax.f32 %v1708_v58, 0.0 }
 0x248   : > { %v1683_v12 = vadd.f32 %v1576_v39, %v1335_v4  ;;  %v1622_v63 = vpop.f32.mrf.mxu0  ;;  %v1666_v2 = vpop.f32.mrf.mxu1  ;;  %1918 = vmatmul.f32.gmra.mxu2 %v4695_v28  ;;  %v1759_v21 = vrot.slane %v4695_v28, 7 }
 0x249   : > { %v1667_v25 = vadd.f32 %v1666_v2, %v1622_v63  ;;  %v1744_v60 = vmul.f32 %v1726_v33, %v4863_v19 }
 0x24a   : > { %v1707_v15 = vadd.f32 %v4353_v46, %v1683_v12  ;;  %v4706_v49 = vsel %vm406_vm0, %v1757_v37, %v1759_v21  ;;  %v4866_v37 = vld [vmem:[#allocation7_spill] sm:$0xff] }
 0x24b   : > { %v1686_v54 = vadd.f32 %v1667_v25, %v4865_v57  ;;  %1965 = vmatmul.f32.gmra.mxu3 %v1744_v60  ;;  %v1798_v40 = vrot.slane %v1744_v60, 1  ;;  %v1762_v22 = vrot.slane %v1744_v60, 7  ;;  %v1338_v48 = vadd.f32 %v4866_v37, %v1294_v47 }
 0x24c   : > { %v1725_v58 = vmax.f32 %v1707_v15, 0.0  ;;  %v1784_v60 = vrot.slane %v4372_v31, 1 }
 0x24d   : > { %v1710_v30 = vadd.f32 %v4344_v14, %v1686_v54  ;;  %v1534_v17 = vpop.f32.mrf.mxu2  ;;  %v1578_v4 = vpop.f32.mrf.mxu3  ;;  %v4712_v39 = vsel %vm425_vm1, %v1796_v56, %v1798_v40  ;;  %v4716_v33 = vsel %vm406_vm0, %v1760_v9, %v1762_v22  ;;  %v1786_v54 = vrot.slane %v4407_v10, 1 }
 0x24e   : > { %v1579_v41 = vadd.f32 %v1578_v4, %v1534_v17  ;;  %v4720_v0 = vmul.f32 %v1725_v58, %v4863_v19 }
 0x24f   : > { %v1728_v12 = vmax.f32 %v1710_v30, 0.0  ;;  %v1816_v31 = vsel %vm425_vm1, %v1784_v60, %v1786_v54 }
 0x250   : > { %v1685_v63 = vadd.f32 %v1579_v41, %v1338_v48  ;;  %1921 = vmatmul.f32.gmra.mxu2 %v4720_v0  ;;  %v1761_v14 = vrot.slane %v4720_v0, 7 }
 0x251   : > { %v1746_v2 = vmul.f32 0.0, %v1728_v12 }
 0x252   : > { %v1709_v56 = vadd.f32 %v4353_v46, %v1685_v63  ;;  %v1767_v25 = vsel %vm406_vm0, %v1759_v21, %v1761_v14 }
 0x253   : > { %v1764_v9 = vrot.slane %v1746_v2, 7  ;;  %1968 = vmatmul.f32.gmra.mxu3 %v1746_v2  ;;  %v1800_v44 = vrot.slane %v1746_v2, 1 }
 0x254   : > { %v1727_v47 = vmax.f32 %v1709_v56, 0.0 }
 0x255   : > { %v1782_v15 = vsel %vm406_vm0, %v1764_v9, %v1748_v1  ;;  %v1802_v57 = vsel %vm425_vm1, %v1798_v40, %v1800_v44  ;;  %v1766_v46 = vsel %vm406_vm0, %v1762_v22, %v1764_v9  ;;  %v1818_v21 = vsel %vm425_vm1, %v1800_v44, %v1784_v60 }
 0x256   : > { %2032 = vmatmul.f32.vlgmr.msrb.gmra.mxu1 %v1782_v15  ;;  %v1745_v58 = vmul.f32 0.0, %v1727_v47  ;;  %v1788_v22 = vrot.slane %v4436_v29, 1 }
 0x258   : > { %v1763_v30 = vrot.slane %v1745_v58, 7  ;;  %1924 = vmatmul.f32.gmra.mxu2 %v1745_v58  ;;  %v1799_v17 = vrot.slane %v1745_v58, 1  ;;  %v1814_v4 = vsel %vm425_vm1, %v1786_v54, %v1788_v22  ;;  %v1812_v51 = vsel %vm425_vm1, %v1788_v22, %v1790_v32 }
 0x25a   : > { %v1781_v1 = vsel %vm406_vm0, %v1763_v30, %v1747_v34  ;;  %v1765_v40 = vsel %vm406_vm0, %v1761_v14, %v1763_v30  ;;  %v1817_v10 = vsel %vm425_vm1, %v1799_v17, %v1783_v13  ;;  %v1791_v13 = vrot.slane %v4621_v7, 1 }
 0x25b   : > { %2153 = vmatmul.f32.vlgmr.msrb.gmra.mxu3 %v1816_v31  ;;  %1988 = vmatmul.f32.vlgmr.msrb.gmra.mxu0 %v1781_v1 }
 0x25e   : > { %2035 = vmatmul.f32.gmra.mxu1 %v4424_v53  ;;  %v1789_v53 = vrot.slane %v4534_v52, 1 }
 0x260   : > { %2109 = vmatmul.f32.vlgmr.msrb.gmra.mxu2 %v4461_v3  ;;  %v1811_v34 = vsel %vm425_vm1, %v1787_v38, %v1789_v53  ;;  %v1809_v29 = vsel %vm425_vm1, %v1789_v53, %v1791_v13  ;;  %v1793_v3 = vrot.slane %v4668_v24, 1  ;;  %v1797_v38 = vrot.slane %v4720_v0, 1 }
 0x263   : > { %2156 = vmatmul.f32.gmra.mxu3 %v1814_v4  ;;  %1991 = vmatmul.f32.gmra.mxu0 %v4467_v43  ;;  %v1807_v43 = vsel %vm425_vm1, %v1791_v13, %v1793_v3 }
 0x266   : > { %2038 = vmatmul.f32.gmra.mxu1 %v4479_v50  ;;  %v1795_v50 = vrot.slane %v4695_v28, 1 }
 0x268   : > { %2112 = vmatmul.f32.gmra.mxu2 %v4511_v62  ;;  %v1805_v26 = vsel %vm425_vm1, %v1793_v3, %v1795_v50  ;;  %v1803_v16 = vsel %vm425_vm1, %v1795_v50, %v1797_v38 }
 0x26b   : > { %2159 = vmatmul.f32.gmra.mxu3 %v1812_v51  ;;  %1994 = vmatmul.f32.gmra.mxu0 %v4515_v27  ;;  %v1801_v27 = vsel %vm425_vm1, %v1797_v38, %v1799_v17 }
 0x26e   : > { %2041 = vmatmul.f32.gmra.mxu1 %v4532_v18 }
 0x270   : > { %2115 = vmatmul.f32.gmra.mxu2 %v1811_v34 }
 0x273   : > { %2162 = vmatmul.f32.gmra.mxu3 %v4611_v61  ;;  %1997 = vmatmul.f32.gmra.mxu0 %v4567_v36 }
 0x276   : > { %2044 = vmatmul.f32.gmra.mxu1 %v4617_v11 }
 0x278   : > { %2118 = vmatmul.f32.gmra.mxu2 %v1809_v29 }
 0x27b   : > { %2165 = vmatmul.f32.gmra.mxu3 %v4662_v5  ;;  %2000 = vmatmul.f32.gmra.mxu0 %v4654_v8 }
 0x27e   : > { %2047 = vmatmul.f32.gmra.mxu1 %v4666_v20 }
 0x280   : > { %2121 = vmatmul.f32.gmra.mxu2 %v1807_v43 }
 0x283   : > { %2168 = vmatmul.f32.gmra.mxu3 %v4687_v6  ;;  %2003 = vmatmul.f32.gmra.mxu0 %v4678_v35 }
 0x286   : > { %2050 = vmatmul.f32.gmra.mxu1 %v4691_v55 }
 0x288   : > { %2124 = vmatmul.f32.gmra.mxu2 %v1805_v26 }
 0x28b   : > { %2171 = vmatmul.f32.gmra.mxu3 %v4712_v39  ;;  %2006 = vmatmul.f32.gmra.mxu0 %v4706_v49 }
 0x28e   : > { %2053 = vmatmul.f32.gmra.mxu1 %v4716_v33 }
 0x290   : > { %2127 = vmatmul.f32.gmra.mxu2 %v1803_v16 }
 0x293   : > { %2174 = vmatmul.f32.gmra.mxu3 %v1802_v57  ;;  %2009 = vmatmul.f32.gmra.mxu0 %v1767_v25 }
 0x296   : > { %v1945_v62 = vpop.f32.mrf.mxu3  ;;  %2056 = vmatmul.f32.gmra.mxu1 %v1766_v46  ;;  %v4807_v46 = vld [vmem:[%s4850_s6] ss:$0 sm:$0xff] }
 0x298   : > { %2130 = vmatmul.f32.gmra.mxu2 %v1801_v27 }
 0x29b   : > { %2177 = vmatmul.f32.gmra.mxu3 %v1818_v21  ;;  %v1901_v18 = vpop.f32.mrf.mxu2  ;;  %2012 = vmatmul.f32.gmra.mxu0 %v1765_v40 }
 0x29c   : > { %v1946_v52 = vadd.f32 %v1945_v62, %v1901_v18 }
 0x29e   : > { %v1948_v36 = vpop.f32.mrf.mxu3 }
 0x2a0   : > { %2133 = vmatmul.f32.gmra.mxu2 %v1817_v10 }
 0x2a3   : > { %v1904_v32 = vpop.f32.mrf.mxu2 }
 0x2a4   : > { %v1949_v61 = vadd.f32 %v1948_v36, %v1904_v32 }
 0x2a6   : > { %v1951_v11 = vpop.f32.mrf.mxu3 }
 0x2ab   : > { %v1907_v7 = vpop.f32.mrf.mxu2 }
 0x2ac   : > { %v1952_v8 = vadd.f32 %v1951_v11, %v1907_v7 }
 0x2ae   : > { %v1954_v5 = vpop.f32.mrf.mxu3 }
 0x2b3   : > { %v1910_v20 = vpop.f32.mrf.mxu2 }
 0x2b4   : > { %v1955_v24 = vadd.f32 %v1954_v5, %v1910_v20 }
 0x2b6   : > { %v1957_v35 = vpop.f32.mrf.mxu3 }
 0x2bb   : > { %v1913_v6 = vpop.f32.mrf.mxu2 }
 0x2bc   : > { %v1958_v55 = vadd.f32 %v1957_v35, %v1913_v6 }
 0x2be   : > { %v1960_v59 = vpop.f32.mrf.mxu3 }
 0x2c3   : > { %v1916_v28 = vpop.f32.mrf.mxu2 }
 0x2c4   : > { %v4796_v49 = vadd.f32 %v1960_v59, %v1916_v28 }
 0x2c6   : > { %v1963_v39 = vpop.f32.mrf.mxu3 }
 0x2cb   : > { %v1919_v33 = vpop.f32.mrf.mxu2 }
 0x2cc   : > { %v4798_v37 = vadd.f32 %v1963_v39, %v1919_v33 }
 0x2ce   : > { %v1966_v48 = vpop.f32.mrf.mxu3 }
 0x2d3   : > { %v2033_v41 = vpop.f32.mrf.mxu1  ;;  %v1922_v0 = vpop.f32.mrf.mxu2 }
 0x2d4   : > { %v4800_v12 = vadd.f32 %v1966_v48, %v1922_v0 }
 0x2d6   : > { %v1969_v63 = vpop.f32.mrf.mxu3 }
 0x2d8   : > { %v1989_v14 = vpop.f32.mrf.mxu0 }
 0x2d9   : > { %v1990_v60 = vadd.f32 %v1989_v14, %v1946_v52 }
 0x2db   : > { %v1925_v2 = vpop.f32.mrf.mxu2  ;;  %v2036_v56 = vpop.f32.mrf.mxu1  ;;  %v2034_v15 = vadd.f32 %v2033_v41, %v1990_v60 }
 0x2dc   : > { %v4802_v25 = vadd.f32 %v1969_v63, %v1925_v2 }
 0x2de   : > { %v2154_v9 = vpop.f32.mrf.mxu3 }
 0x2e0   : > { %v1992_v44 = vpop.f32.mrf.mxu0 }
 0x2e1   : > { %v1993_v30 = vadd.f32 %v1992_v44, %v1949_v61 }
 0x2e3   : > { %v2110_v47 = vpop.f32.mrf.mxu2  ;;  %v2039_v21 = vpop.f32.mrf.mxu1  ;;  %v2037_v10 = vadd.f32 %v2036_v56, %v1993_v30 }
 0x2e4   : > { %v2155_v57 = vadd.f32 %v2154_v9, %v2110_v47 }
 0x2e6   : > { %v2181_v54 = vadd.f32 %v2155_v57, %v2034_v15  ;;  %v2157_v58 = vpop.f32.mrf.mxu3 }
 0x2e8   : > { %v2194_v17 = vadd.f32 %v4807_v46, %v2181_v54  ;;  %v1995_v31 = vpop.f32.mrf.mxu0 }
 0x2e9   : > { %v1996_v53 = vadd.f32 %v1995_v31, %v1952_v8 }
 0x2ea   : > { %v2203_v1 = vmul.f32 %v2194_v17, %v3331_v23 }
 0x2eb   : > { %v2113_v40 = vpop.f32.mrf.mxu2  ;;  %v2042_v34 = vpop.f32.mrf.mxu1  ;;  %v2040_v43 = vadd.f32 %v2039_v21, %v1996_v53 }
 0x2ec   : > { %2212 = vst [vmem:[%s4814_s13] sm:$0xff] %v2203_v1  ;;  %v2158_v22 = vadd.f32 %v2157_v58, %v2113_v40 }
 0x2ee   : > { %v2182_v4 = vadd.f32 %v2158_v22, %v2037_v10  ;;  %v2160_v51 = vpop.f32.mrf.mxu3 }
 0x2f0   : > { %v2195_v13 = vadd.f32 %v4807_v46, %v2182_v4  ;;  %v1998_v29 = vpop.f32.mrf.mxu0 }
 0x2f1   : > { %v1999_v23 = vadd.f32 %v1998_v29, %v1955_v24 }
 0x2f2   : > { %2213 = vst [vmem:[%s4814_s13 + $0x8] sm:$0xff] %v2195_v13 }
 0x2f3   : > { %v2116_v3 = vpop.f32.mrf.mxu2  ;;  %v2045_v27 = vpop.f32.mrf.mxu1  ;;  %v2043_v52 = vadd.f32 %v2042_v34, %v1999_v23 }
 0x2f4   : > { %v2161_v50 = vadd.f32 %v2160_v51, %v2116_v3 }
 0x2f6   : > { %v2183_v26 = vadd.f32 %v2161_v50, %v2040_v43  ;;  %v2163_v38 = vpop.f32.mrf.mxu3 }
 0x2f8   : > { %v2196_v16 = vadd.f32 %v4807_v46, %v2183_v26  ;;  %v2001_v62 = vpop.f32.mrf.mxu0 }
 0x2f9   : > { %v2002_v11 = vadd.f32 %v2001_v62, %v1958_v55 }
 0x2fa   : > { %2214 = vst [vmem:[%s4814_s13 + $0x10] sm:$0xff] %v2196_v16 }
 0x2fb   : > { %v2119_v18 = vpop.f32.mrf.mxu2  ;;  %v2046_v20 = vadd.f32 %v2045_v27, %v2002_v11  ;;  %v2048_v35 = vpop.f32.mrf.mxu1 }
 0x2fc   : > { %v2164_v36 = vadd.f32 %v2163_v38, %v2119_v18 }
 0x2fe   : > { %v2184_v32 = vadd.f32 %v2164_v36, %v2043_v52  ;;  %v2166_v61 = vpop.f32.mrf.mxu3 }
 0x300   : > { %v2197_v7 = vadd.f32 %v4807_v46, %v2184_v32  ;;  %v2004_v8 = vpop.f32.mrf.mxu0 }
 0x301   : > { %v2005_v28 = vadd.f32 %v2004_v8, %v4796_v49 }
 0x302   : > { %2215 = vst [vmem:[%s4814_s13 + $0x18] sm:$0xff] %v2197_v7 }
 0x303   : > { %v2122_v5 = vpop.f32.mrf.mxu2  ;;  %v2049_v41 = vadd.f32 %v2048_v35, %v2005_v28  ;;  %v2051_v63 = vpop.f32.mrf.mxu1 }
 0x304   : > { %v2167_v24 = vadd.f32 %v2166_v61, %v2122_v5 }
 0x306   : > { %v2185_v6 = vadd.f32 %v2167_v24, %v2046_v20  ;;  %v2169_v59 = vpop.f32.mrf.mxu3 }
 0x308   : > { %v2198_v39 = vadd.f32 %v4807_v46, %v2185_v6  ;;  %v2007_v33 = vpop.f32.mrf.mxu0 }
 0x309   : > { %v2008_v56 = vadd.f32 %v2007_v33, %v4798_v37 }
 0x30a   : > { %v2207_v48 = vmul.f32 %v2198_v39, %v3562_v45 }
 0x30b   : > { %v2125_v55 = vpop.f32.mrf.mxu2  ;;  %v2052_v44 = vadd.f32 %v2051_v63, %v2008_v56  ;;  %v2054_v57 = vpop.f32.mrf.mxu1 }
 0x30c   : > { %2216 = vst [vmem:[%s4814_s13 + $0x20] sm:$0xff] %v2207_v48  ;;  %v2170_v0 = vadd.f32 %v2169_v59, %v2125_v55 }
 0x30e   : > { %v2186_v14 = vadd.f32 %v2170_v0, %v2049_v41  ;;  %v2172_v2 = vpop.f32.mrf.mxu3 }
 0x310   : > { %v2199_v9 = vadd.f32 %v4807_v46, %v2186_v14  ;;  %v2010_v60 = vpop.f32.mrf.mxu0 }
 0x311   : > { %v2011_v45 = vadd.f32 %v2010_v60, %v4800_v12 }
 0x312   : > { %2217 = vst [vmem:[%s4814_s13 + $0x28] sm:$0xff] %v2199_v9 }
 0x313   : > { %v2128_v49 = vpop.f32.mrf.mxu2  ;;  %v2055_v17 = vadd.f32 %v2054_v57, %v2011_v45  ;;  %v2057_v22 = vpop.f32.mrf.mxu1 }
 0x314   : > { %v2173_v47 = vadd.f32 %v2172_v2, %v2128_v49 }
 0x316   : > { %v2187_v15 = vadd.f32 %v2173_v47, %v2052_v44  ;;  %v2175_v54 = vpop.f32.mrf.mxu3 }
 0x318   : > { %v2200_v21 = vadd.f32 %v4807_v46, %v2187_v15  ;;  %v2013_v31 = vpop.f32.mrf.mxu0 }
 0x319   : > { %v2014_v40 = vadd.f32 %v2013_v31, %v4802_v25 }
 0x31a   : > { %v2209_v58 = vmul.f32 %v2200_v21, %v3715_v42 }
 0x31b   : > { %v2131_v30 = vpop.f32.mrf.mxu2  ;;  %v2058_v53 = vadd.f32 %v2057_v22, %v2014_v40 }
 0x31c   : > { %2218 = vst [vmem:[%s4814_s13 + $0x30] sm:$0xff] %v2209_v58  ;;  %v2176_v37 = vadd.f32 %v2175_v54, %v2131_v30 }
 0x31e   : > { %v2188_v1 = vadd.f32 %v2176_v37, %v2055_v17  ;;  %v2178_v4 = vpop.f32.mrf.mxu3 }
 0x320   : > { %v2201_v10 = vadd.f32 %v4807_v46, %v2188_v1 }
 0x322   : > { %v2210_v12 = vmul.f32 %v2201_v10, %v4863_v19 }
 0x323   : > { %v2134_v51 = vpop.f32.mrf.mxu2 }
 0x324   : > { %2219 = vst [vmem:[%s4814_s13 + $0x38] sm:$0xff] %v2210_v12  ;;  %v2179_v34 = vadd.f32 %v2178_v4, %v2134_v51 }
 0x326   : > { %v2189_v42 = vadd.f32 %v2179_v34, %v2058_v53 }
 0x328   : > { %v2202_v13 = vadd.f32 %v4807_v46, %v2189_v42 }
 0x32a   : > { %v2211_v29 = vmul.f32 0.0, %v2202_v13 }
 0x32c   : > { %2220 = vst [vmem:[%s4814_s13 + $0x40] sm:$0xff] %v2211_v29 }
 0x32d PF: > { %s17_s24 = sadd.s32 1, %s2578_s24  }
 0x32e   : > { %p14_p4 = scmp.ge.s32.totalorder %s17_s24, 4  }
 0x330   :  { %16 = sbr.rel (!%p14_p4) target bundleno = 1 (0x1), region = 84 }

</bundles_post_ra>
